<compile_context>
chip_gen: v7x
topology: tpu7x:2x2x1
jax: 0.10.0
libtpu: 0.0.40
codegen_flags: <defaults>
</compile_context>

<pallas_src>
import jax
import jax.numpy as jnp
from jax import lax
from jax.experimental import pallas as pl
from jax.experimental.pallas import tpu as pltpu


def make_fused_gat_kernel(num_heads: int, num_layers: int):
    """Fused num_layers-deep GATConv stack (+ mean over heads, ReLU between)."""
    H = num_heads

    def kernel(x_ref, adj_ref, *rest):
        param_refs = rest[:-1]   # num_layers * (w_scaled, w_al_t, w_ar)
        o_ref = rest[-1]

        # adjacency arrives as int8 [dst, src]; build the f32 0/1 mask once.
        adjf = adj_ref[...].astype(jnp.float32)          # (N, N)
        mask = adjf > 0

        h = x_ref[...].astype(jnp.float32)               # (N, Din)

        for li in range(num_layers):                     # static unroll
            w_ref, walt_ref, war_ref = param_refs[3 * li:3 * li + 3]
            F = w_ref.shape[1] // H

            # --- projections (all MXU; computed once per layer) ---
            # wx already carries the 1/H head-mean scale (folded in wrapper).
            wx = jnp.dot(h, w_ref[...],
                         preferred_element_type=jnp.float32)             # (N, H*F)
            # el_rows[h, src]: contract over Din with src staying on lanes
            # (no per-head transposes / lane reductions).
            el_rows = lax.dot_general(
                walt_ref[...], h,
                dimension_numbers=(((1,), (1,)), ((), ())),
                preferred_element_type=jnp.float32)                      # (H, N)
            er = jnp.dot(h, war_ref[...],
                         preferred_element_type=jnp.float32)             # (N, H)

            # --- per-head masked edge softmax + MXU accumulation ---
            out = jnp.zeros((h.shape[0], F), jnp.float32)
            for hd in range(H):                          # static unroll, H small
                s = er[:, hd:hd + 1] + el_rows[hd:hd + 1, :]   # (N_dst, N_src)
                s = jnp.maximum(s, 0.2 * s)                    # LeakyReLU(0.2)
                s = jnp.where(mask, s, jnp.float32(-1e30))
                m = jnp.max(s, axis=-1, keepdims=True)
                p = jnp.exp(s - m) * adjf
                denom = jnp.sum(p, axis=-1, keepdims=True)
                # zero-in-degree rows stay exactly 0 (allow_zero_in_degree=True)
                inv = jnp.where(denom > 0,
                                pl.reciprocal(denom, approx=True), 0.0)
                out = out + jnp.dot(p * inv, wx[:, hd * F:(hd + 1) * F],
                                    preferred_element_type=jnp.float32)

            if li != num_layers - 1:
                out = jnp.maximum(out, 0.0)   # ReLU; dropout = identity (eval)
            h = out

        o_ref[...] = h.astype(o_ref.dtype)

    return kernel


def gat_forward(adj, feats, params, *, num_heads):
    """GAT.forward with default flags (is_res/is_ln/is_bn/is_jk=False,
    pooling=None, in_linear/out_linear=False, eval-mode dropout)."""
    num_layers = len(params)
    n = feats.shape[0]
    out_feats = params[-1][1].shape[-1]

    # One transposed int8 adjacency (N_dst, N_src) shared by all layers; it is
    # only used as a 0/1 mask, never fed to the MXU.
    adj_t = adj.T.astype(jnp.int8)

    flat = []
    for (w, al, ar) in params:
        din = w.shape[0]
        f = al.shape[-1]
        w_resh = w.reshape(din, num_heads, f)
        # Fold attention vectors into the projection so el / er are plain matmuls.
        w_al_t = jnp.einsum('hf,dhf->hd', al, w_resh)          # (H, Din)
        w_ar = jnp.einsum('hf,dhf->dh', ar, w_resh)            # (Din, H)
        # Fold the .mean(1) over heads into the aggregation weight.
        flat += [(w * (1.0 / num_heads)).astype(jnp.float32),
                 w_al_t.astype(jnp.float32),
                 w_ar.astype(jnp.float32)]

    kernel = make_fused_gat_kernel(num_heads, num_layers)
    return pl.pallas_call(
        kernel,
        out_shape=jax.ShapeDtypeStruct((n, out_feats), jnp.float32),
        compiler_params=pltpu.CompilerParams(
            vmem_limit_bytes=32 * 1024 * 1024,
        ),
    )(feats.astype(jnp.float32), adj_t, *flat)


def gat_forward_ref(adj, feats, params, *, num_heads):
    """Pure-JAX reference of the same math, for verification."""
    adj_t = adj.T.astype(jnp.float32)
    h = feats
    for i, (w, al, ar) in enumerate(params):
        f = al.shape[-1]
        wx = h.astype(jnp.float32) @ w.astype(jnp.float32)        # (N, H*F)
        wx = wx.reshape(h.shape[0], num_heads, f)                 # (N, H, F)
        el = jnp.sum(wx * al[None], axis=-1)                      # (N, H)
        er = jnp.sum(wx * ar[None], axis=-1)                      # (N, H)
        s = er[:, None, :] + el[None, :, :]                       # (Nd, Ns, H)
        s = jnp.where(s >= 0, s, 0.2 * s)
        mask = adj_t[..., None] > 0
        s_m = jnp.where(mask, s, -1e30)
        m = jnp.max(s_m, axis=1, keepdims=True)
        p = jnp.exp(s_m - m) * adj_t[..., None]
        denom = jnp.sum(p, axis=1, keepdims=True)
        alpha = p * jnp.where(denom > 0, 1.0 / denom, 0.0)        # (Nd, Ns, H)
        rst = jnp.einsum('jih,ihf->jhf', alpha, wx)               # (N, H, F)
        h = rst.mean(axis=1)                                      # .mean(1)
        if i != len(params) - 1:
            h = jnp.maximum(h, 0.0)                               # ReLU; dropout=id
    return h


if __name__ == "__main__":
    key = jax.random.PRNGKey(0)
    N = 128           # number of graph nodes (multiple of 128 -> lane-dense)
    in_size = 16
    hid_size = 8      # module default
    out_size = 16
    num_heads = 4
    num_layers = 2

    ks = jax.random.split(key, 8)

    # deterministic synthetic graph: sparse random edges + self loops (src->dst)
    adj = jax.random.bernoulli(ks[0], 0.15, (N, N)).astype(jnp.float32)
    adj = jnp.maximum(adj, jnp.eye(N, dtype=jnp.float32))

    feats = jax.random.normal(ks[1], (N, in_size), jnp.float32)

    # GATConv params (bias=False): fc weight + attn_l/attn_r per layer
    scale = 0.1
    w0 = scale * jax.random.normal(ks[2], (in_size, num_heads * hid_size), jnp.float32)
    al0 = scale * jax.random.normal(ks[3], (num_heads, hid_size), jnp.float32)
    ar0 = scale * jax.random.normal(ks[4], (num_heads, hid_size), jnp.float32)
    w1 = scale * jax.random.normal(ks[5], (hid_size, num_heads * out_size), jnp.float32)
    al1 = scale * jax.random.normal(ks[6], (num_heads, out_size), jnp.float32)
    ar1 = scale * jax.random.normal(ks[7], (num_heads, out_size), jnp.float32)

    params = [(w0, al0, ar0), (w1, al1, ar1)]

    out = gat_forward(adj, feats, params, num_heads=num_heads)
    out = jax.block_until_ready(out)

    ref = gat_forward_ref(adj, feats, params, num_heads=num_heads)
    assert out.shape == (N, out_size)
    # tolerance 2e-3: pl.reciprocal(approx=True) in the edge softmax introduces
    # ~1e-3-level deviations vs. the exact-divide reference.
    assert jnp.allclose(out, ref, rtol=2e-3, atol=2e-3), \
        f"max abs diff {jnp.max(jnp.abs(out - ref))}"

    # TODO(synk): dropout / attn_dropout are eval-mode identities here; pooling
    # readouts (mean/max/sum), residual, layer/batch norm and jk are unused
    # under the module's default config.
    print("KERNEL_OK")
</pallas_src>

<mosaic_0001>
module attributes {stable_mosaic.version = 11 : i64} {
  func.func @kernel(%arg0: memref<128x16xf32, #tpu.memory_space<vmem>>, %arg1: memref<128x128xi8, #tpu.memory_space<vmem>>, %arg2: memref<16x32xf32, #tpu.memory_space<vmem>>, %arg3: memref<4x16xf32, #tpu.memory_space<vmem>>, %arg4: memref<16x4xf32, #tpu.memory_space<vmem>>, %arg5: memref<8x64xf32, #tpu.memory_space<vmem>>, %arg6: memref<4x8xf32, #tpu.memory_space<vmem>>, %arg7: memref<8x4xf32, #tpu.memory_space<vmem>>, %arg8: memref<128x16xf32, #tpu.memory_space<vmem>>) attributes {dimension_semantics = [], scalar_prefetch = 0 : i64, scratch_operands = 0 : i64, tpu.core_type = #tpu.core_type<tc>} {
    %c0 = arith.constant 0 : index
    %c0_0 = arith.constant 0 : index
    %0 = vector.load %arg1[%c0, %c0_0] : memref<128x128xi8, #tpu.memory_space<vmem>>, vector<128x128xi8>
    %1 = arith.sitofp %0 : vector<128x128xi8> to vector<128x128xf32>
    %cst = arith.constant 0.000000e+00 : f32
    %2 = vector.broadcast %cst : f32 to vector<128x128xf32>
    %3 = arith.cmpf ogt, %1, %2 : vector<128x128xf32>
    %c0_1 = arith.constant 0 : index
    %c0_2 = arith.constant 0 : index
    %4 = vector.load %arg0[%c0_1, %c0_2] : memref<128x16xf32, #tpu.memory_space<vmem>>, vector<128x16xf32>
    %c0_3 = arith.constant 0 : index
    %c0_4 = arith.constant 0 : index
    %5 = vector.load %arg2[%c0_3, %c0_4] : memref<16x32xf32, #tpu.memory_space<vmem>>, vector<16x32xf32>
    %cst_5 = arith.constant dense<0.000000e+00> : vector<128x32xf32>
    %6 = tpu.matmul %4, %5, %cst_5 {dimension_numbers = #tpu.dot_dimension_numbers<[1], [0], [0], [1], [0, 0, 1, 1], [], []>} : vector<128x16xf32>, vector<16x32xf32>, vector<128x32xf32> -> vector<128x32xf32>
    %c0_6 = arith.constant 0 : index
    %c0_7 = arith.constant 0 : index
    %7 = vector.load %arg3[%c0_6, %c0_7] : memref<4x16xf32, #tpu.memory_space<vmem>>, vector<4x16xf32>
    %cst_8 = arith.constant dense<0.000000e+00> : vector<4x128xf32>
    %8 = tpu.matmul %7, %4, %cst_8 {dimension_numbers = #tpu.dot_dimension_numbers<[1], [1], [0], [0], [0, 0, 1, 0], [], []>} : vector<4x16xf32>, vector<128x16xf32>, vector<4x128xf32> -> vector<4x128xf32>
    %c0_9 = arith.constant 0 : index
    %c0_10 = arith.constant 0 : index
    %9 = vector.load %arg4[%c0_9, %c0_10] : memref<16x4xf32, #tpu.memory_space<vmem>>, vector<16x4xf32>
    %cst_11 = arith.constant dense<0.000000e+00> : vector<128x4xf32>
    %10 = tpu.matmul %4, %9, %cst_11 {dimension_numbers = #tpu.dot_dimension_numbers<[1], [0], [0], [1], [0, 0, 1, 1], [], []>} : vector<128x16xf32>, vector<16x4xf32>, vector<128x4xf32> -> vector<128x4xf32>
    %cst_12 = arith.constant 0.000000e+00 : f32
    %11 = vector.broadcast %cst_12 : f32 to vector<128x8xf32>
    %12 = vector.extract_strided_slice %10 {offsets = [0, 0], sizes = [128, 1], strides = [1, 1]} : vector<128x4xf32> to vector<128x1xf32>
    %13 = vector.extract_strided_slice %8 {offsets = [0, 0], sizes = [1, 128], strides = [1, 1]} : vector<4x128xf32> to vector<1x128xf32>
    %14 = vector.broadcast %12 : vector<128x1xf32> to vector<128x128xf32>
    %15 = vector.broadcast %13 : vector<1x128xf32> to vector<128x128xf32>
    %16 = arith.addf %14, %15 : vector<128x128xf32>
    %cst_13 = arith.constant 2.000000e-01 : f32
    %17 = vector.broadcast %cst_13 : f32 to vector<128x128xf32>
    %18 = arith.mulf %17, %16 : vector<128x128xf32>
    %19 = arith.maximumf %16, %18 : vector<128x128xf32>
    %cst_14 = arith.constant -1.000000e+30 : f32
    %20 = vector.broadcast %cst_14 : f32 to vector<128x128xf32>
    %21 = arith.select %3, %19, %20 : vector<128x128xi1>, vector<128x128xf32>
    %cst_15 = arith.constant dense<0xFF800000> : vector<128xf32>
    %22 = vector.multi_reduction <maximumf>, %21, %cst_15 [1] : vector<128x128xf32> to vector<128xf32>
    %23 = vector.shape_cast %22 : vector<128xf32> to vector<128x1xf32>
    %24 = vector.broadcast %23 : vector<128x1xf32> to vector<128x128xf32>
    %25 = arith.subf %21, %24 : vector<128x128xf32>
    %26 = math.exp %25 : vector<128x128xf32>
    %27 = arith.mulf %26, %1 : vector<128x128xf32>
    %cst_16 = arith.constant dense<0.000000e+00> : vector<128xf32>
    %28 = vector.multi_reduction <add>, %27, %cst_16 [1] : vector<128x128xf32> to vector<128xf32>
    %29 = vector.shape_cast %28 : vector<128xf32> to vector<128x1xf32>
    %cst_17 = arith.constant 0.000000e+00 : f32
    %30 = vector.broadcast %cst_17 : f32 to vector<128x1xf32>
    %31 = arith.cmpf ogt, %29, %30 : vector<128x1xf32>
    %32 = tpu.reciprocal %29 {approx = true} : vector<128x1xf32> -> vector<128x1xf32>
    %cst_18 = arith.constant 0.000000e+00 : f32
    %33 = vector.broadcast %cst_18 : f32 to vector<128x1xf32>
    %34 = arith.select %31, %32, %33 : vector<128x1xi1>, vector<128x1xf32>
    %35 = vector.broadcast %34 : vector<128x1xf32> to vector<128x128xf32>
    %36 = arith.mulf %27, %35 : vector<128x128xf32>
    %37 = vector.extract_strided_slice %6 {offsets = [0, 0], sizes = [128, 8], strides = [1, 1]} : vector<128x32xf32> to vector<128x8xf32>
    %cst_19 = arith.constant dense<0.000000e+00> : vector<128x8xf32>
    %38 = tpu.matmul %36, %37, %cst_19 {dimension_numbers = #tpu.dot_dimension_numbers<[1], [0], [0], [1], [0, 0, 1, 1], [], []>} : vector<128x128xf32>, vector<128x8xf32>, vector<128x8xf32> -> vector<128x8xf32>
    %39 = arith.addf %11, %38 : vector<128x8xf32>
    %40 = vector.extract_strided_slice %10 {offsets = [0, 1], sizes = [128, 1], strides = [1, 1]} : vector<128x4xf32> to vector<128x1xf32>
    %41 = vector.extract_strided_slice %8 {offsets = [1, 0], sizes = [1, 128], strides = [1, 1]} : vector<4x128xf32> to vector<1x128xf32>
    %42 = vector.broadcast %40 : vector<128x1xf32> to vector<128x128xf32>
    %43 = vector.broadcast %41 : vector<1x128xf32> to vector<128x128xf32>
    %44 = arith.addf %42, %43 : vector<128x128xf32>
    %cst_20 = arith.constant 2.000000e-01 : f32
    %45 = vector.broadcast %cst_20 : f32 to vector<128x128xf32>
    %46 = arith.mulf %45, %44 : vector<128x128xf32>
    %47 = arith.maximumf %44, %46 : vector<128x128xf32>
    %cst_21 = arith.constant -1.000000e+30 : f32
    %48 = vector.broadcast %cst_21 : f32 to vector<128x128xf32>
    %49 = arith.select %3, %47, %48 : vector<128x128xi1>, vector<128x128xf32>
    %cst_22 = arith.constant dense<0xFF800000> : vector<128xf32>
    %50 = vector.multi_reduction <maximumf>, %49, %cst_22 [1] : vector<128x128xf32> to vector<128xf32>
    %51 = vector.shape_cast %50 : vector<128xf32> to vector<128x1xf32>
    %52 = vector.broadcast %51 : vector<128x1xf32> to vector<128x128xf32>
    %53 = arith.subf %49, %52 : vector<128x128xf32>
    %54 = math.exp %53 : vector<128x128xf32>
    %55 = arith.mulf %54, %1 : vector<128x128xf32>
    %cst_23 = arith.constant dense<0.000000e+00> : vector<128xf32>
    %56 = vector.multi_reduction <add>, %55, %cst_23 [1] : vector<128x128xf32> to vector<128xf32>
    %57 = vector.shape_cast %56 : vector<128xf32> to vector<128x1xf32>
    %cst_24 = arith.constant 0.000000e+00 : f32
    %58 = vector.broadcast %cst_24 : f32 to vector<128x1xf32>
    %59 = arith.cmpf ogt, %57, %58 : vector<128x1xf32>
    %60 = tpu.reciprocal %57 {approx = true} : vector<128x1xf32> -> vector<128x1xf32>
    %cst_25 = arith.constant 0.000000e+00 : f32
    %61 = vector.broadcast %cst_25 : f32 to vector<128x1xf32>
    %62 = arith.select %59, %60, %61 : vector<128x1xi1>, vector<128x1xf32>
    %63 = vector.broadcast %62 : vector<128x1xf32> to vector<128x128xf32>
    %64 = arith.mulf %55, %63 : vector<128x128xf32>
    %65 = vector.extract_strided_slice %6 {offsets = [0, 8], sizes = [128, 8], strides = [1, 1]} : vector<128x32xf32> to vector<128x8xf32>
    %cst_26 = arith.constant dense<0.000000e+00> : vector<128x8xf32>
    %66 = tpu.matmul %64, %65, %cst_26 {dimension_numbers = #tpu.dot_dimension_numbers<[1], [0], [0], [1], [0, 0, 1, 1], [], []>} : vector<128x128xf32>, vector<128x8xf32>, vector<128x8xf32> -> vector<128x8xf32>
    %67 = arith.addf %39, %66 : vector<128x8xf32>
    %68 = vector.extract_strided_slice %10 {offsets = [0, 2], sizes = [128, 1], strides = [1, 1]} : vector<128x4xf32> to vector<128x1xf32>
    %69 = vector.extract_strided_slice %8 {offsets = [2, 0], sizes = [1, 128], strides = [1, 1]} : vector<4x128xf32> to vector<1x128xf32>
    %70 = vector.broadcast %68 : vector<128x1xf32> to vector<128x128xf32>
    %71 = vector.broadcast %69 : vector<1x128xf32> to vector<128x128xf32>
    %72 = arith.addf %70, %71 : vector<128x128xf32>
    %cst_27 = arith.constant 2.000000e-01 : f32
    %73 = vector.broadcast %cst_27 : f32 to vector<128x128xf32>
    %74 = arith.mulf %73, %72 : vector<128x128xf32>
    %75 = arith.maximumf %72, %74 : vector<128x128xf32>
    %cst_28 = arith.constant -1.000000e+30 : f32
    %76 = vector.broadcast %cst_28 : f32 to vector<128x128xf32>
    %77 = arith.select %3, %75, %76 : vector<128x128xi1>, vector<128x128xf32>
    %cst_29 = arith.constant dense<0xFF800000> : vector<128xf32>
    %78 = vector.multi_reduction <maximumf>, %77, %cst_29 [1] : vector<128x128xf32> to vector<128xf32>
    %79 = vector.shape_cast %78 : vector<128xf32> to vector<128x1xf32>
    %80 = vector.broadcast %79 : vector<128x1xf32> to vector<128x128xf32>
    %81 = arith.subf %77, %80 : vector<128x128xf32>
    %82 = math.exp %81 : vector<128x128xf32>
    %83 = arith.mulf %82, %1 : vector<128x128xf32>
    %cst_30 = arith.constant dense<0.000000e+00> : vector<128xf32>
    %84 = vector.multi_reduction <add>, %83, %cst_30 [1] : vector<128x128xf32> to vector<128xf32>
    %85 = vector.shape_cast %84 : vector<128xf32> to vector<128x1xf32>
    %cst_31 = arith.constant 0.000000e+00 : f32
    %86 = vector.broadcast %cst_31 : f32 to vector<128x1xf32>
    %87 = arith.cmpf ogt, %85, %86 : vector<128x1xf32>
    %88 = tpu.reciprocal %85 {approx = true} : vector<128x1xf32> -> vector<128x1xf32>
    %cst_32 = arith.constant 0.000000e+00 : f32
    %89 = vector.broadcast %cst_32 : f32 to vector<128x1xf32>
    %90 = arith.select %87, %88, %89 : vector<128x1xi1>, vector<128x1xf32>
    %91 = vector.broadcast %90 : vector<128x1xf32> to vector<128x128xf32>
    %92 = arith.mulf %83, %91 : vector<128x128xf32>
    %93 = vector.extract_strided_slice %6 {offsets = [0, 16], sizes = [128, 8], strides = [1, 1]} : vector<128x32xf32> to vector<128x8xf32>
    %cst_33 = arith.constant dense<0.000000e+00> : vector<128x8xf32>
    %94 = tpu.matmul %92, %93, %cst_33 {dimension_numbers = #tpu.dot_dimension_numbers<[1], [0], [0], [1], [0, 0, 1, 1], [], []>} : vector<128x128xf32>, vector<128x8xf32>, vector<128x8xf32> -> vector<128x8xf32>
    %95 = arith.addf %67, %94 : vector<128x8xf32>
    %96 = vector.extract_strided_slice %10 {offsets = [0, 3], sizes = [128, 1], strides = [1, 1]} : vector<128x4xf32> to vector<128x1xf32>
    %97 = vector.extract_strided_slice %8 {offsets = [3, 0], sizes = [1, 128], strides = [1, 1]} : vector<4x128xf32> to vector<1x128xf32>
    %98 = vector.broadcast %96 : vector<128x1xf32> to vector<128x128xf32>
    %99 = vector.broadcast %97 : vector<1x128xf32> to vector<128x128xf32>
    %100 = arith.addf %98, %99 : vector<128x128xf32>
    %cst_34 = arith.constant 2.000000e-01 : f32
    %101 = vector.broadcast %cst_34 : f32 to vector<128x128xf32>
    %102 = arith.mulf %101, %100 : vector<128x128xf32>
    %103 = arith.maximumf %100, %102 : vector<128x128xf32>
    %cst_35 = arith.constant -1.000000e+30 : f32
    %104 = vector.broadcast %cst_35 : f32 to vector<128x128xf32>
    %105 = arith.select %3, %103, %104 : vector<128x128xi1>, vector<128x128xf32>
    %cst_36 = arith.constant dense<0xFF800000> : vector<128xf32>
    %106 = vector.multi_reduction <maximumf>, %105, %cst_36 [1] : vector<128x128xf32> to vector<128xf32>
    %107 = vector.shape_cast %106 : vector<128xf32> to vector<128x1xf32>
    %108 = vector.broadcast %107 : vector<128x1xf32> to vector<128x128xf32>
    %109 = arith.subf %105, %108 : vector<128x128xf32>
    %110 = math.exp %109 : vector<128x128xf32>
    %111 = arith.mulf %110, %1 : vector<128x128xf32>
    %cst_37 = arith.constant dense<0.000000e+00> : vector<128xf32>
    %112 = vector.multi_reduction <add>, %111, %cst_37 [1] : vector<128x128xf32> to vector<128xf32>
    %113 = vector.shape_cast %112 : vector<128xf32> to vector<128x1xf32>
    %cst_38 = arith.constant 0.000000e+00 : f32
    %114 = vector.broadcast %cst_38 : f32 to vector<128x1xf32>
    %115 = arith.cmpf ogt, %113, %114 : vector<128x1xf32>
    %116 = tpu.reciprocal %113 {approx = true} : vector<128x1xf32> -> vector<128x1xf32>
    %cst_39 = arith.constant 0.000000e+00 : f32
    %117 = vector.broadcast %cst_39 : f32 to vector<128x1xf32>
    %118 = arith.select %115, %116, %117 : vector<128x1xi1>, vector<128x1xf32>
    %119 = vector.broadcast %118 : vector<128x1xf32> to vector<128x128xf32>
    %120 = arith.mulf %111, %119 : vector<128x128xf32>
    %121 = vector.extract_strided_slice %6 {offsets = [0, 24], sizes = [128, 8], strides = [1, 1]} : vector<128x32xf32> to vector<128x8xf32>
    %cst_40 = arith.constant dense<0.000000e+00> : vector<128x8xf32>
    %122 = tpu.matmul %120, %121, %cst_40 {dimension_numbers = #tpu.dot_dimension_numbers<[1], [0], [0], [1], [0, 0, 1, 1], [], []>} : vector<128x128xf32>, vector<128x8xf32>, vector<128x8xf32> -> vector<128x8xf32>
    %123 = arith.addf %95, %122 : vector<128x8xf32>
    %cst_41 = arith.constant 0.000000e+00 : f32
    %124 = vector.broadcast %cst_41 : f32 to vector<128x8xf32>
    %125 = arith.maximumf %123, %124 : vector<128x8xf32>
    %c0_42 = arith.constant 0 : index
    %c0_43 = arith.constant 0 : index
    %126 = vector.load %arg5[%c0_42, %c0_43] : memref<8x64xf32, #tpu.memory_space<vmem>>, vector<8x64xf32>
    %cst_44 = arith.constant dense<0.000000e+00> : vector<128x64xf32>
    %127 = tpu.matmul %125, %126, %cst_44 {dimension_numbers = #tpu.dot_dimension_numbers<[1], [0], [0], [1], [0, 0, 1, 1], [], []>} : vector<128x8xf32>, vector<8x64xf32>, vector<128x64xf32> -> vector<128x64xf32>
    %c0_45 = arith.constant 0 : index
    %c0_46 = arith.constant 0 : index
    %128 = vector.load %arg6[%c0_45, %c0_46] : memref<4x8xf32, #tpu.memory_space<vmem>>, vector<4x8xf32>
    %cst_47 = arith.constant dense<0.000000e+00> : vector<4x128xf32>
    %129 = tpu.matmul %128, %125, %cst_47 {dimension_numbers = #tpu.dot_dimension_numbers<[1], [1], [0], [0], [0, 0, 1, 0], [], []>} : vector<4x8xf32>, vector<128x8xf32>, vector<4x128xf32> -> vector<4x128xf32>
    %c0_48 = arith.constant 0 : index
    %c0_49 = arith.constant 0 : index
    %130 = vector.load %arg7[%c0_48, %c0_49] : memref<8x4xf32, #tpu.memory_space<vmem>>, vector<8x4xf32>
    %cst_50 = arith.constant dense<0.000000e+00> : vector<128x4xf32>
    %131 = tpu.matmul %125, %130, %cst_50 {dimension_numbers = #tpu.dot_dimension_numbers<[1], [0], [0], [1], [0, 0, 1, 1], [], []>} : vector<128x8xf32>, vector<8x4xf32>, vector<128x4xf32> -> vector<128x4xf32>
    %cst_51 = arith.constant 0.000000e+00 : f32
    %132 = vector.broadcast %cst_51 : f32 to vector<128x16xf32>
    %133 = vector.extract_strided_slice %131 {offsets = [0, 0], sizes = [128, 1], strides = [1, 1]} : vector<128x4xf32> to vector<128x1xf32>
    %134 = vector.extract_strided_slice %129 {offsets = [0, 0], sizes = [1, 128], strides = [1, 1]} : vector<4x128xf32> to vector<1x128xf32>
    %135 = vector.broadcast %133 : vector<128x1xf32> to vector<128x128xf32>
    %136 = vector.broadcast %134 : vector<1x128xf32> to vector<128x128xf32>
    %137 = arith.addf %135, %136 : vector<128x128xf32>
    %cst_52 = arith.constant 2.000000e-01 : f32
    %138 = vector.broadcast %cst_52 : f32 to vector<128x128xf32>
    %139 = arith.mulf %138, %137 : vector<128x128xf32>
    %140 = arith.maximumf %137, %139 : vector<128x128xf32>
    %cst_53 = arith.constant -1.000000e+30 : f32
    %141 = vector.broadcast %cst_53 : f32 to vector<128x128xf32>
    %142 = arith.select %3, %140, %141 : vector<128x128xi1>, vector<128x128xf32>
    %cst_54 = arith.constant dense<0xFF800000> : vector<128xf32>
    %143 = vector.multi_reduction <maximumf>, %142, %cst_54 [1] : vector<128x128xf32> to vector<128xf32>
    %144 = vector.shape_cast %143 : vector<128xf32> to vector<128x1xf32>
    %145 = vector.broadcast %144 : vector<128x1xf32> to vector<128x128xf32>
    %146 = arith.subf %142, %145 : vector<128x128xf32>
    %147 = math.exp %146 : vector<128x128xf32>
    %148 = arith.mulf %147, %1 : vector<128x128xf32>
    %cst_55 = arith.constant dense<0.000000e+00> : vector<128xf32>
    %149 = vector.multi_reduction <add>, %148, %cst_55 [1] : vector<128x128xf32> to vector<128xf32>
    %150 = vector.shape_cast %149 : vector<128xf32> to vector<128x1xf32>
    %cst_56 = arith.constant 0.000000e+00 : f32
    %151 = vector.broadcast %cst_56 : f32 to vector<128x1xf32>
    %152 = arith.cmpf ogt, %150, %151 : vector<128x1xf32>
    %153 = tpu.reciprocal %150 {approx = true} : vector<128x1xf32> -> vector<128x1xf32>
    %cst_57 = arith.constant 0.000000e+00 : f32
    %154 = vector.broadcast %cst_57 : f32 to vector<128x1xf32>
    %155 = arith.select %152, %153, %154 : vector<128x1xi1>, vector<128x1xf32>
    %156 = vector.broadcast %155 : vector<128x1xf32> to vector<128x128xf32>
    %157 = arith.mulf %148, %156 : vector<128x128xf32>
    %158 = vector.extract_strided_slice %127 {offsets = [0, 0], sizes = [128, 16], strides = [1, 1]} : vector<128x64xf32> to vector<128x16xf32>
    %cst_58 = arith.constant dense<0.000000e+00> : vector<128x16xf32>
    %159 = tpu.matmul %157, %158, %cst_58 {dimension_numbers = #tpu.dot_dimension_numbers<[1], [0], [0], [1], [0, 0, 1, 1], [], []>} : vector<128x128xf32>, vector<128x16xf32>, vector<128x16xf32> -> vector<128x16xf32>
    %160 = arith.addf %132, %159 : vector<128x16xf32>
    %161 = vector.extract_strided_slice %131 {offsets = [0, 1], sizes = [128, 1], strides = [1, 1]} : vector<128x4xf32> to vector<128x1xf32>
    %162 = vector.extract_strided_slice %129 {offsets = [1, 0], sizes = [1, 128], strides = [1, 1]} : vector<4x128xf32> to vector<1x128xf32>
    %163 = vector.broadcast %161 : vector<128x1xf32> to vector<128x128xf32>
    %164 = vector.broadcast %162 : vector<1x128xf32> to vector<128x128xf32>
    %165 = arith.addf %163, %164 : vector<128x128xf32>
    %cst_59 = arith.constant 2.000000e-01 : f32
    %166 = vector.broadcast %cst_59 : f32 to vector<128x128xf32>
    %167 = arith.mulf %166, %165 : vector<128x128xf32>
    %168 = arith.maximumf %165, %167 : vector<128x128xf32>
    %cst_60 = arith.constant -1.000000e+30 : f32
    %169 = vector.broadcast %cst_60 : f32 to vector<128x128xf32>
    %170 = arith.select %3, %168, %169 : vector<128x128xi1>, vector<128x128xf32>
    %cst_61 = arith.constant dense<0xFF800000> : vector<128xf32>
    %171 = vector.multi_reduction <maximumf>, %170, %cst_61 [1] : vector<128x128xf32> to vector<128xf32>
    %172 = vector.shape_cast %171 : vector<128xf32> to vector<128x1xf32>
    %173 = vector.broadcast %172 : vector<128x1xf32> to vector<128x128xf32>
    %174 = arith.subf %170, %173 : vector<128x128xf32>
    %175 = math.exp %174 : vector<128x128xf32>
    %176 = arith.mulf %175, %1 : vector<128x128xf32>
    %cst_62 = arith.constant dense<0.000000e+00> : vector<128xf32>
    %177 = vector.multi_reduction <add>, %176, %cst_62 [1] : vector<128x128xf32> to vector<128xf32>
    %178 = vector.shape_cast %177 : vector<128xf32> to vector<128x1xf32>
    %cst_63 = arith.constant 0.000000e+00 : f32
    %179 = vector.broadcast %cst_63 : f32 to vector<128x1xf32>
    %180 = arith.cmpf ogt, %178, %179 : vector<128x1xf32>
    %181 = tpu.reciprocal %178 {approx = true} : vector<128x1xf32> -> vector<128x1xf32>
    %cst_64 = arith.constant 0.000000e+00 : f32
    %182 = vector.broadcast %cst_64 : f32 to vector<128x1xf32>
    %183 = arith.select %180, %181, %182 : vector<128x1xi1>, vector<128x1xf32>
    %184 = vector.broadcast %183 : vector<128x1xf32> to vector<128x128xf32>
    %185 = arith.mulf %176, %184 : vector<128x128xf32>
    %186 = vector.extract_strided_slice %127 {offsets = [0, 16], sizes = [128, 16], strides = [1, 1]} : vector<128x64xf32> to vector<128x16xf32>
    %cst_65 = arith.constant dense<0.000000e+00> : vector<128x16xf32>
    %187 = tpu.matmul %185, %186, %cst_65 {dimension_numbers = #tpu.dot_dimension_numbers<[1], [0], [0], [1], [0, 0, 1, 1], [], []>} : vector<128x128xf32>, vector<128x16xf32>, vector<128x16xf32> -> vector<128x16xf32>
    %188 = arith.addf %160, %187 : vector<128x16xf32>
    %189 = vector.extract_strided_slice %131 {offsets = [0, 2], sizes = [128, 1], strides = [1, 1]} : vector<128x4xf32> to vector<128x1xf32>
    %190 = vector.extract_strided_slice %129 {offsets = [2, 0], sizes = [1, 128], strides = [1, 1]} : vector<4x128xf32> to vector<1x128xf32>
    %191 = vector.broadcast %189 : vector<128x1xf32> to vector<128x128xf32>
    %192 = vector.broadcast %190 : vector<1x128xf32> to vector<128x128xf32>
    %193 = arith.addf %191, %192 : vector<128x128xf32>
    %cst_66 = arith.constant 2.000000e-01 : f32
    %194 = vector.broadcast %cst_66 : f32 to vector<128x128xf32>
    %195 = arith.mulf %194, %193 : vector<128x128xf32>
    %196 = arith.maximumf %193, %195 : vector<128x128xf32>
    %cst_67 = arith.constant -1.000000e+30 : f32
    %197 = vector.broadcast %cst_67 : f32 to vector<128x128xf32>
    %198 = arith.select %3, %196, %197 : vector<128x128xi1>, vector<128x128xf32>
    %cst_68 = arith.constant dense<0xFF800000> : vector<128xf32>
    %199 = vector.multi_reduction <maximumf>, %198, %cst_68 [1] : vector<128x128xf32> to vector<128xf32>
    %200 = vector.shape_cast %199 : vector<128xf32> to vector<128x1xf32>
    %201 = vector.broadcast %200 : vector<128x1xf32> to vector<128x128xf32>
    %202 = arith.subf %198, %201 : vector<128x128xf32>
    %203 = math.exp %202 : vector<128x128xf32>
    %204 = arith.mulf %203, %1 : vector<128x128xf32>
    %cst_69 = arith.constant dense<0.000000e+00> : vector<128xf32>
    %205 = vector.multi_reduction <add>, %204, %cst_69 [1] : vector<128x128xf32> to vector<128xf32>
    %206 = vector.shape_cast %205 : vector<128xf32> to vector<128x1xf32>
    %cst_70 = arith.constant 0.000000e+00 : f32
    %207 = vector.broadcast %cst_70 : f32 to vector<128x1xf32>
    %208 = arith.cmpf ogt, %206, %207 : vector<128x1xf32>
    %209 = tpu.reciprocal %206 {approx = true} : vector<128x1xf32> -> vector<128x1xf32>
    %cst_71 = arith.constant 0.000000e+00 : f32
    %210 = vector.broadcast %cst_71 : f32 to vector<128x1xf32>
    %211 = arith.select %208, %209, %210 : vector<128x1xi1>, vector<128x1xf32>
    %212 = vector.broadcast %211 : vector<128x1xf32> to vector<128x128xf32>
    %213 = arith.mulf %204, %212 : vector<128x128xf32>
    %214 = vector.extract_strided_slice %127 {offsets = [0, 32], sizes = [128, 16], strides = [1, 1]} : vector<128x64xf32> to vector<128x16xf32>
    %cst_72 = arith.constant dense<0.000000e+00> : vector<128x16xf32>
    %215 = tpu.matmul %213, %214, %cst_72 {dimension_numbers = #tpu.dot_dimension_numbers<[1], [0], [0], [1], [0, 0, 1, 1], [], []>} : vector<128x128xf32>, vector<128x16xf32>, vector<128x16xf32> -> vector<128x16xf32>
    %216 = arith.addf %188, %215 : vector<128x16xf32>
    %217 = vector.extract_strided_slice %131 {offsets = [0, 3], sizes = [128, 1], strides = [1, 1]} : vector<128x4xf32> to vector<128x1xf32>
    %218 = vector.extract_strided_slice %129 {offsets = [3, 0], sizes = [1, 128], strides = [1, 1]} : vector<4x128xf32> to vector<1x128xf32>
    %219 = vector.broadcast %217 : vector<128x1xf32> to vector<128x128xf32>
    %220 = vector.broadcast %218 : vector<1x128xf32> to vector<128x128xf32>
    %221 = arith.addf %219, %220 : vector<128x128xf32>
    %cst_73 = arith.constant 2.000000e-01 : f32
    %222 = vector.broadcast %cst_73 : f32 to vector<128x128xf32>
    %223 = arith.mulf %222, %221 : vector<128x128xf32>
    %224 = arith.maximumf %221, %223 : vector<128x128xf32>
    %cst_74 = arith.constant -1.000000e+30 : f32
    %225 = vector.broadcast %cst_74 : f32 to vector<128x128xf32>
    %226 = arith.select %3, %224, %225 : vector<128x128xi1>, vector<128x128xf32>
    %cst_75 = arith.constant dense<0xFF800000> : vector<128xf32>
    %227 = vector.multi_reduction <maximumf>, %226, %cst_75 [1] : vector<128x128xf32> to vector<128xf32>
    %228 = vector.shape_cast %227 : vector<128xf32> to vector<128x1xf32>
    %229 = vector.broadcast %228 : vector<128x1xf32> to vector<128x128xf32>
    %230 = arith.subf %226, %229 : vector<128x128xf32>
    %231 = math.exp %230 : vector<128x128xf32>
    %232 = arith.mulf %231, %1 : vector<128x128xf32>
    %cst_76 = arith.constant dense<0.000000e+00> : vector<128xf32>
    %233 = vector.multi_reduction <add>, %232, %cst_76 [1] : vector<128x128xf32> to vector<128xf32>
    %234 = vector.shape_cast %233 : vector<128xf32> to vector<128x1xf32>
    %cst_77 = arith.constant 0.000000e+00 : f32
    %235 = vector.broadcast %cst_77 : f32 to vector<128x1xf32>
    %236 = arith.cmpf ogt, %234, %235 : vector<128x1xf32>
    %237 = tpu.reciprocal %234 {approx = true} : vector<128x1xf32> -> vector<128x1xf32>
    %cst_78 = arith.constant 0.000000e+00 : f32
    %238 = vector.broadcast %cst_78 : f32 to vector<128x1xf32>
    %239 = arith.select %236, %237, %238 : vector<128x1xi1>, vector<128x1xf32>
    %240 = vector.broadcast %239 : vector<128x1xf32> to vector<128x128xf32>
    %241 = arith.mulf %232, %240 : vector<128x128xf32>
    %242 = vector.extract_strided_slice %127 {offsets = [0, 48], sizes = [128, 16], strides = [1, 1]} : vector<128x64xf32> to vector<128x16xf32>
    %cst_79 = arith.constant dense<0.000000e+00> : vector<128x16xf32>
    %243 = tpu.matmul %241, %242, %cst_79 {dimension_numbers = #tpu.dot_dimension_numbers<[1], [0], [0], [1], [0, 0, 1, 1], [], []>} : vector<128x128xf32>, vector<128x16xf32>, vector<128x16xf32> -> vector<128x16xf32>
    %244 = arith.addf %216, %243 : vector<128x16xf32>
    %c0_80 = arith.constant 0 : index
    %c0_81 = arith.constant 0 : index
    %245 = vector.load %arg8[%c0_80, %c0_81] : memref<128x16xf32, #tpu.memory_space<vmem>>, vector<128x16xf32>
    tpu.vector_store %arg8[%c0_80, %c0_81], %244 {strides = array<i32>} : memref<128x16xf32, #tpu.memory_space<vmem>>, vector<128x16xf32>,
    return
  }
}

</mosaic_0001>

<bundles_post_ra>
// kernel: tpu_custom_call.1
= control target key start
LH: loop header
LB: loop body
LE: loop exit
PB: predicated region body
PF: predicated region fallthrough
CT: control target
= control target key end

     0   :  { %vm10754_vm0 = vcmask 130048   ;;  %v10705_v5 = vmov 0.0|0.0   ;;  %vm10757_vm2 = vmmov 0   ;;  %v10704_v25 = vmov 0.0   ;;  %s7469_s28 = smov 112   ;;  %s7470_s29 = smov 104   ;;  %s10689_s2 = inlined_call_operand.vmem [shape: f32[16,32], index: 2, kind: input, shape index: {}]   ;;  %s10690_s0 = inlined_call_operand.vmem [shape: f32[128,16], index: 0, kind: input, shape index: {}]   ;;  %s10691_s4 = inlined_call_operand.vmem [shape: f32[16,4], index: 4, kind: input, shape index: {}]   ;;  %s10692_s3 = inlined_call_operand.vmem [shape: f32[4,16], index: 3, kind: input, shape index: {}]   ;;  %s10693_s1 = inlined_call_operand.vmem [shape: s8[128,128], index: 1, kind: input, shape index: {}]   ;;  %s10694_s5 = inlined_call_operand.vmem [shape: f32[8,64], index: 5, kind: input, shape index: {}]   ;;  %s10695_s7 = inlined_call_operand.vmem [shape: f32[8,4], index: 7, kind: input, shape index: {}]   ;;  %s10696_s6 = inlined_call_operand.vmem [shape: f32[4,8], index: 6, kind: input, shape index: {}]   ;;  %s10697_s8 = inlined_call_operand.vmem [shape: f32[128,16], index: 8, kind: output, shape index: {}]  }
   0x1   :  { %v97_v0 = vld [vmem:[%s10689_s2] sm:$0xff]  ;;  %v98_v1 = vld [vmem:[%s10689_s2 + $0x8] sm:$0xff]  ;;  %v7542_v6 = vld [vmem:[%s10690_s0 + $0x10] sm:$0xff]  ;;  %v10707_v34 = vmov 1   ;;  %v10702_v35 = vmov 0  }
   0x2   :  { %v7527_v2 = vld [vmem:[%s10690_s0] sm:$0xff]  ;;  %v6217_v3 = vpack.c.bf16 %v98_v1, %v97_v0  ;;  %v7534_v4 = vld [vmem:[%s10690_s0 + $0x8] sm:$0xff]  ;;  %vm7550_vm1 = vmpackc.low %vm10754_vm0, %vm10754_vm0  ;;  %6653 = vset.pattern.permute.xlu0 %v10707_v34  ;;  %6654 = vset.pattern.permute.xlu1 %v10702_v35 }
   0x3   :  { %5595 = vmatprep.mubr.msk.f32.mxu0 %vm10754_vm0, %v7527_v2  ;;  %v6222_v7 = vpack.c.bf16 %v7534_v4, %v7527_v2  ;;  %v7557_v9 = vld [vmem:[%s10690_s0 + $0x18] sm:$0xff]  ;;  %v7562_v10 = vld [vmem:[%s10690_s0 + $0x20] sm:$0xff]  ;;  %v86_v11 = vld [vmem:[%s10690_s0 + $0x28] sm:$0xff] }
   0x4   :  { %6218 = vmatprep.subr.bf16.mxu0 %v6217_v3  ;;  %v87_v12 = vld [vmem:[%s10690_s0 + $0x30] sm:$0xff]  ;;  %v6226_v13 = vpack.c.bf16 %v7557_v9, %v7542_v6  ;;  %v88_v14 = vld [vmem:[%s10690_s0 + $0x38] sm:$0xff]  ;;  %v89_v15 = vld [vmem:[%s10690_s0 + $0x40] sm:$0xff]  ;;  %v6230_v18 = vpack.c.bf16 %v86_v11, %v7562_v10 }
   0x5   :  { %6220 = vmatpush3.bf16.msra.mxu0 %v6217_v3  ;;  %v90_v16 = vld [vmem:[%s10690_s0 + $0x48] sm:$0xff]  ;;  %v91_v17 = vld [vmem:[%s10690_s0 + $0x50] sm:$0xff]  ;;  %v92_v19 = vld [vmem:[%s10690_s0 + $0x58] sm:$0xff]  ;;  %v6234_v23 = vpack.c.bf16 %v88_v14, %v87_v12 }
   0x6   :  { %6221 = vmatprep.subr.bf16.mxu0 %v10705_v5  ;;  %v93_v20 = vld [vmem:[%s10690_s0 + $0x60] sm:$0xff]  ;;  %v94_v21 = vld [vmem:[%s10690_s0 + $0x68] sm:$0xff]  ;;  %v95_v22 = vld [vmem:[%s10690_s0 + $0x70] sm:$0xff]  ;;  %v6238_v26 = vpack.c.bf16 %v90_v16, %v89_v15  ;;  %v6242_v27 = vpack.c.bf16 %v92_v19, %v91_v17 }
   0x7   :  { %v96_v24 = vld [vmem:[%s10690_s0 + $0x78] sm:$0xff]  ;;  %v6246_v28 = vpack.c.bf16 %v94_v21, %v93_v20  ;;  %v367_v29 = vld [vmem:[%s10691_s4] sm:$0xff]  ;;  %v368_v30 = vld [vmem:[%s10691_s4 + $0x8] sm:$0xff] }
   0x8   :  { %5596 = vmatmul.mubr.msk.f32.vlgmr.msra.gmra.mrb[0].mxu0 %vm10754_vm0, %v7534_v4  ;;  %v6250_v31 = vpack.c.bf16 %v96_v24, %v95_v22  ;;  %v6253_v32 = vpack.c.bf16 %v368_v30, %v367_v29  ;;  %v293_v33 = vld [vmem:[%s10692_s3] sm:$0xf] }
   0x9   :  { %5598 = vmatprep.mubr.msk.f32.mxu0 %vm10754_vm0, %v7542_v6 }
   0xc   :  { %5599 = vmatmul.mubr.msk.f32.gmra.mrb[2].mxu0 %vm10754_vm0, %v7557_v9 }
   0xd   :  { %5601 = vmatprep.mubr.msk.f32.mxu0 %vm10754_vm0, %v7562_v10 }
   0xe   :  { %6224 = vmatpush3.bf16.xpose.msk.msra.mxu0 %vm7550_vm1, %v6222_v7 }
   0xf   :  { %6225 = vmatprep.subr.bf16.mxu0 %v10705_v5 }
  0x10   :  { %5602 = vmatmul.mubr.msk.f32.gmra.mrb[4].mxu0 %vm10754_vm0, %v86_v11 }
  0x11   :  { %5604 = vmatprep.mubr.msk.f32.mxu0 %vm10754_vm0, %v87_v12 }
  0x14   :  { %5605 = vmatmul.mubr.msk.f32.gmra.mrb[6].mxu0 %vm10754_vm0, %v88_v14 }
  0x15   :  { %5607 = vmatprep.mubr.msk.f32.mxu0 %vm10754_vm0, %v89_v15 }
  0x16   :  { %6228 = vmatpush3.bf16.xpose.msk.msra.mxu0 %vm7550_vm1, %v6226_v13 }
  0x17   :  { %6229 = vmatprep.subr.bf16.mxu0 %v10705_v5 }
  0x18   :  { %5608 = vmatmul.mubr.msk.f32.gmra.mrb[8].mxu0 %vm10754_vm0, %v90_v16 }
  0x19   :  { %5610 = vmatprep.mubr.msk.f32.mxu0 %vm10754_vm0, %v91_v17 }
  0x1c   :  { %5611 = vmatmul.mubr.msk.f32.gmra.mrb[10].mxu0 %vm10754_vm0, %v92_v19 }
  0x1d   :  { %5613 = vmatprep.mubr.msk.f32.mxu0 %vm10754_vm0, %v93_v20 }
  0x1e   :  { %6232 = vmatpush3.bf16.xpose.msk.msra.mxu0 %vm7550_vm1, %v6230_v18 }
  0x1f   :  { %6233 = vmatprep.subr.bf16.mxu0 %v10705_v5 }
  0x20   :  { %5614 = vmatmul.mubr.msk.f32.gmra.mrb[12].mxu0 %vm10754_vm0, %v94_v21 }
  0x21   :  { %5616 = vmatprep.mubr.msk.f32.mxu0 %vm10754_vm0, %v95_v22 }
  0x24   :  { %5617 = vmatmul.mubr.msk.f32.gmra.mrb[14].mxu0 %vm10754_vm0, %v96_v24 }
  0x25   :  { %5651 = vmatprep.mubr.msk.f32.mxu0 %vm10757_vm2, %v10704_v25 }
  0x26   :  { %6236 = vmatpush3.bf16.xpose.msk.msra.mxu0 %vm7550_vm1, %v6234_v23 }
  0x27   :  { %6237 = vmatprep.subr.bf16.mxu0 %v10705_v5 }
  0x2e   :  { %6240 = vmatpush3.bf16.xpose.msk.msra.mxu0 %vm7550_vm1, %v6238_v26 }
  0x2f   :  { %6241 = vmatprep.subr.bf16.mxu0 %v10705_v5 }
  0x36   :  { %6244 = vmatpush3.bf16.xpose.msk.msra.mxu0 %vm7550_vm1, %v6242_v27  ;;  %v7834_v27 = vld [vmem:[%s10693_s1] sm:$0xff] }
  0x37   :  { %6245 = vmatprep.subr.bf16.mxu0 %v10705_v5  ;;  %v34_v29 = vunpack.c.1.s8 %v7834_v27 }
  0x3e   :  { %6248 = vmatpush3.bf16.xpose.msk.msra.mxu0 %vm7550_vm1, %v6246_v28 }
  0x3f   :  { %6249 = vmatprep.subr.bf16.mxu0 %v10705_v5 }
  0x46   :  { %6252 = vmatpush3.bf16.xpose.msk.msra.mxu0 %vm7550_vm1, %v6250_v31 }
  0x47   :  { %6254 = vmatprep.subr.bf16.mxu0 %v6253_v32 }
  0x4d   :  { %5652 = vmatmul.mubr.msk.f32.vlgmr.msra.gmra.mrb[16].mxu0 %vm10754_vm0, %v293_v33  ;;  %v7845_v33 = vcvt.s32.f32 %v34_v29 }
  0x4e   :  { %6256 = vmatpush3.bf16.msra.mxu0 %v6253_v32  ;;  %5658 = vmatprep.mubr.msk.f32.mxu0 %vm10754_vm0, %v7527_v2 }
  0x4f   :  { %10942 = vst [vmem:[#allocation20_spill] sm:$0xff] %v7845_v33  ;;  %vm66_vm3 = vcmp.gt.f32.partialorder %v7845_v33, 0.0 }
  0x51   :  { %5659 = vmatmul.mubr.msk.f32.vlgmr.msra.gmra.mrb[18].mxu0 %vm10754_vm0, %v7534_v4 }
  0x52   :  { %5661 = vmatprep.mubr.msk.f32.mxu0 %vm10754_vm0, %v7542_v6 }
  0x55   :  { %5662 = vmatmul.mubr.msk.f32.gmra.mrb[20].mxu0 %vm10754_vm0, %v7557_v9 }
  0x56   :  { %5664 = vmatprep.mubr.msk.f32.mxu0 %vm10754_vm0, %v7562_v10  ;;  %v10700_v10 = vmov 2  }
  0x59   :  { %5665 = vmatmul.mubr.msk.f32.gmra.mrb[22].mxu0 %vm10754_vm0, %v86_v11 }
  0x5a   :  { %5667 = vmatprep.mubr.msk.f32.mxu0 %vm10754_vm0, %v87_v12 }
  0x5d   :  { %5668 = vmatmul.mubr.msk.f32.gmra.mrb[24].mxu0 %vm10754_vm0, %v88_v14 }
  0x5e   :  { %5670 = vmatprep.mubr.msk.f32.mxu0 %vm10754_vm0, %v89_v15 }
  0x61   :  { %5671 = vmatmul.mubr.msk.f32.gmra.mrb[26].mxu0 %vm10754_vm0, %v90_v16 }
  0x62   :  { %5673 = vmatprep.mubr.msk.f32.mxu0 %vm10754_vm0, %v91_v17 }
  0x65   :  { %5674 = vmatmul.mubr.msk.f32.gmra.mrb[28].mxu0 %vm10754_vm0, %v92_v19 }
  0x66   :  { %5676 = vmatprep.mubr.msk.f32.mxu0 %vm10754_vm0, %v93_v20 }
  0x69   :  { %5677 = vmatmul.mubr.msk.f32.gmra.mrb[30].mxu0 %vm10754_vm0, %v94_v21 }
  0x6a   :  { %5679 = vmatprep.mubr.msk.f32.mxu0 %vm10754_vm0, %v95_v22 }
  0x6d   :  { %5680 = vmatmul.mubr.msk.f32.gmra.mrb[32].mxu0 %vm10754_vm0, %v96_v24  ;;  %v594_v24 = vlaneseq }
  0x6f   :  { %v7827_v26 = vshrl.u32 %v594_v24, 7 }
  0x71   :  { %10941 = vst [vmem:[#allocation19_spill] sm:$0xff] %v7827_v26  ;;  %v10698_v28 = vsub.s32 0, %v7827_v26 }
  0xdb   :  { %v5597_v36 = vpop.f32.mrb[0].mxu0 }
  0xdc   :  { %v214_v37 = vpop.f32.mrb[1].mxu0 }
  0xdd   :  { %v7673_v38 = vpack.i.bf16 %v5597_v36, %v214_v37  ;;  %v7675_v39 = vpack.c.bf16 %v5597_v36, %v214_v37 }
  0xdf   :  { %10924 = vst [vmem:[#allocation2_spill] sm:$0xff] %v7673_v38  ;;  %10925 = vst [vmem:[#allocation3_spill] sm:$0xff] %v7675_v39  ;;  %v5600_v40 = vpop.f32.mrb[2].mxu0 }
  0xe0   :  { %v224_v41 = vpop.f32.mrb[3].mxu0 }
  0xe1   :  { %v7677_v42 = vpack.i.bf16 %v5600_v40, %v224_v41  ;;  %v7679_v43 = vpack.c.bf16 %v5600_v40, %v224_v41  ;;  %v10699_v40 = vsub.s32 1, %v7827_v26 }
  0xe3   :  { %10926 = vst [vmem:[#allocation4_spill] sm:$0xff] %v7677_v42  ;;  %10927 = vst [vmem:[#allocation5_spill] sm:$0xff] %v7679_v43  ;;  %v5603_v44 = vpop.f32.mrb[4].mxu0 }
  0xe4   :  { %v234_v45 = vpop.f32.mrb[5].mxu0 }
  0xe5   :  { %v7681_v46 = vpack.i.bf16 %v5603_v44, %v234_v45  ;;  %v7683_v47 = vpack.c.bf16 %v5603_v44, %v234_v45 }
  0xe7   :  { %10928 = vst [vmem:[#allocation6_spill] sm:$0xff] %v7681_v46  ;;  %10929 = vst [vmem:[#allocation7_spill] sm:$0xff] %v7683_v47  ;;  %v5606_v48 = vpop.f32.mrb[6].mxu0 }
  0xe8   :  { %v244_v49 = vpop.f32.mrb[7].mxu0 }
  0xe9   :  { %v7685_v50 = vpack.i.bf16 %v5606_v48, %v244_v49  ;;  %v7687_v51 = vpack.c.bf16 %v5606_v48, %v244_v49  ;;  %v33_v49 = vunpack.c.0.s8 %v7834_v27 }
  0xeb   :  { %10930 = vst [vmem:[#allocation8_spill] sm:$0xff] %v7685_v50  ;;  %10931 = vst [vmem:[#allocation9_spill] sm:$0xff] %v7687_v51  ;;  %v5609_v52 = vpop.f32.mrb[8].mxu0  ;;  %v10719_v51 = vmov 3  }
  0xec   :  { %v254_v53 = vpop.f32.mrb[9].mxu0 }
  0xed   :  { %v7689_v54 = vpack.i.bf16 %v5609_v52, %v254_v53  ;;  %v7691_v55 = vpack.c.bf16 %v5609_v52, %v254_v53 }
  0xef   :  { %10932 = vst [vmem:[#allocation10_spill] sm:$0xff] %v7689_v54  ;;  %10933 = vst [vmem:[#allocation11_spill] sm:$0xff] %v7691_v55  ;;  %v5612_v56 = vpop.f32.mrb[10].mxu0 }
  0xf0   :  { %v264_v57 = vpop.f32.mrb[11].mxu0 }
  0xf1   :  { %v7693_v58 = vpack.i.bf16 %v5612_v56, %v264_v57  ;;  %v7695_v59 = vpack.c.bf16 %v5612_v56, %v264_v57  ;;  %v36_v57 = vunpack.c.3.s8 %v7834_v27 }
  0xf3   :  { %10934 = vst [vmem:[#allocation12_spill] sm:$0xff] %v7693_v58  ;;  %10935 = vst [vmem:[#allocation13_spill] sm:$0xff] %v7695_v59  ;;  %v5615_v60 = vpop.f32.mrb[12].mxu0  ;;  %v7870_v24 = vcvt.s32.f32 %v36_v57 }
  0xf4   :  { %v274_v61 = vpop.f32.mrb[13].mxu0 }
  0xf5   :  { %v7697_v62 = vpack.i.bf16 %v5615_v60, %v274_v61  ;;  %v7699_v63 = vpack.c.bf16 %v5615_v60, %v274_v61  ;;  %10945 = vst [vmem:[#allocation23_spill] sm:$0xff] %v7870_v24  ;;  %vm10792_vm5 = vcmp.gt.f32.partialorder %v7870_v24, 0.0 }
  0xf7   :  { %10936 = vst [vmem:[#allocation14_spill] sm:$0xff] %v7697_v62  ;;  %10937 = vst [vmem:[#allocation15_spill] sm:$0xff] %v7699_v63  ;;  %v5618_v0 = vpop.f32.mrb[14].mxu0 }
  0xf8   :  { %v284_v1 = vpop.f32.mrb[15].mxu0 }
  0xf9   :  { %v7701_v2 = vpack.i.bf16 %v5618_v0, %v284_v1  ;;  %v7703_v3 = vpack.c.bf16 %v5618_v0, %v284_v1  ;;  %v7868_v0 = vcvt.s32.f32 %v33_v49 }
  0xfb   :  { %10938 = vst [vmem:[#allocation16_spill] sm:$0xff] %v7701_v2  ;;  %10939 = vst [vmem:[#allocation17_spill] sm:$0xff] %v7703_v3  ;;  %vm65_vm4 = vcmp.gt.f32.partialorder %v7868_v0, 0.0 }
  0xfc   :  { %10944 = vst [vmem:[#allocation22_spill] sm:$0xff] %v7868_v0 }
 0x120   :  { %v7705_v4 = vpop.f32.mrb[16].mxu0 }
 0x121   :  { %10940 = vst [vmem:[#allocation18_spill] sm:$0xff] %v7705_v4  ;;  %v5653_v6 = vpop.f32.mrb[17].mxu0  ;;  %v7843_v30 = vrot.slane %v7705_v4, %v10698_v28  ;;  %v7863_v52 = vrot.slane %v7705_v4, %v10699_v40 }
 0x124   :  { %v7707_v7 = vpop.f32.mrb[18].mxu0 }
 0x125   :  { %521 = vperm.xlu1 %6654, %v7707_v7   ;;  %859 = vperm.xlu0 %6653, %v7707_v7   ;;  %v7711_v8 = vpop.f32.mrb[19].mxu0 }
 0x128   :  { %v7713_v9 = vpop.f32.mrb[20].mxu0 }
 0x129   :  { %6658 = vset.pattern.permute.xlu1 %v10700_v10  ;;  %6655 = vset.pattern.permute.xlu0 %v10700_v10  ;;  %v7717_v11 = vpop.f32.mrb[21].mxu0 }
 0x12a   :  { %1537 = vperm.xlu0 %6655, %v7707_v7   ;;  %1533 = vperm.xlu1 %6658, %v7711_v8  }
 0x12c   :  { %v7721_v12 = vpop.f32.mrb[22].mxu0 }
 0x12d   :  { %v7723_v13 = vpop.f32.mrb[23].mxu0 }
 0x12e   :  { %6656 = vset.pattern.permute.xlu0 %v10707_v34  ;;  %6659 = vset.pattern.permute.xlu1 %v10707_v34 }
 0x12f   :  { %855 = vperm.xlu0 %6656, %v7711_v8   ;;  %867 = vperm.xlu1 %6659, %v7713_v9  }
 0x130   :  { %v7729_v14 = vpop.f32.mrb[24].mxu0 }
 0x131   :  { %v7731_v15 = vpop.f32.mrb[25].mxu0 }
 0x133   :  { %6657 = vset.pattern.permute.xlu0 %v10702_v35  ;;  %6660 = vset.pattern.permute.xlu1 %v10700_v10 }
 0x134   :  { %516 = vperm.xlu0 %6657, %v7711_v8   ;;  %1545 = vperm.xlu1 %6660, %v7713_v9   ;;  %v7737_v16 = vpop.f32.mrb[26].mxu0 }
 0x135   :  { %v7739_v17 = vpop.f32.mrb[27].mxu0 }
 0x138   :  { %531 = vperm.xlu0 %6657, %v7713_v9   ;;  %6661 = vset.pattern.permute.xlu1 %v10707_v34  ;;  %v7743_v18 = vpop.f32.mrb[28].mxu0 }
 0x139   :  { %863 = vperm.xlu1 %6661, %v7717_v11   ;;  %v7746_v19 = vpop.f32.mrb[29].mxu0 }
 0x13c   :  { %541 = vperm.xlu0 %6657, %v7721_v12   ;;  %v7749_v20 = vpop.f32.mrb[30].mxu0 }
 0x13d   :  { %6662 = vset.pattern.permute.xlu1 %v10702_v35  ;;  %v7752_v21 = vpop.f32.mrb[31].mxu0 }
 0x13e   :  { %526 = vperm.xlu1 %6662, %v7717_v11  }
 0x140   :  { %6665 = vset.pattern.permute.xlu0 %v10700_v10  ;;  %v7756_v22 = vpop.f32.mrb[32].mxu0 }
 0x141   :  { %1553 = vperm.xlu0 %6665, %v7721_v12   ;;  %v7759_v23 = vpop.f32.mrb[33].mxu0 }
 0x142   :  { %6663 = vset.pattern.permute.xlu1 %v10700_v10 }
 0x143   :  { %1541 = vperm.xlu1 %6663, %v7717_v11  }
 0x145   :  { %6666 = vset.pattern.permute.xlu0 %v10707_v34 }
 0x146   :  { %871 = vperm.xlu0 %6666, %v7723_v13  }
 0x147   :  { %6664 = vset.pattern.permute.xlu1 %v10707_v34 }
 0x148   :  { %875 = vperm.xlu1 %6664, %v7721_v12  }
 0x14a   :  { %6670 = vset.pattern.permute.xlu0 %v10702_v35 }
 0x14b   :  { %551 = vperm.xlu0 %6670, %v7729_v14  }
 0x14c   :  { %6667 = vset.pattern.permute.xlu1 %v10702_v35 }
 0x14d   :  { %536 = vperm.xlu1 %6667, %v7723_v13  }
 0x14f   :  { %6672 = vset.pattern.permute.xlu0 %v10707_v34 }
 0x150   :  { %879 = vperm.xlu0 %6672, %v7731_v15  }
 0x151   :  { %6668 = vset.pattern.permute.xlu1 %v10700_v10 }
 0x152   :  { %1549 = vperm.xlu1 %6668, %v7723_v13  }
 0x154   :  { %6676 = vset.pattern.permute.xlu0 %v10702_v35 }
 0x155   :  { %561 = vperm.xlu0 %6676, %v7737_v16  }
 0x156   :  { %6669 = vset.pattern.permute.xlu1 %v10707_v34 }
 0x157   :  { %883 = vperm.xlu1 %6669, %v7729_v14  }
 0x159   :  { %6678 = vset.pattern.permute.xlu0 %v10707_v34 }
 0x15a   :  { %887 = vperm.xlu0 %6678, %v7739_v17  }
 0x15b   :  { %6671 = vset.pattern.permute.xlu1 %v10700_v10 }
 0x15c   :  { %1561 = vperm.xlu1 %6671, %v7729_v14  }
 0x15e   :  { %6680 = vset.pattern.permute.xlu0 %v10700_v10 }
 0x15f   :  { %1565 = vperm.xlu0 %6680, %v7739_v17  }
 0x160   :  { %6673 = vset.pattern.permute.xlu1 %v10702_v35 }
 0x161   :  { %546 = vperm.xlu1 %6673, %v7731_v15  }
 0x163   :  { %6682 = vset.pattern.permute.xlu0 %v10702_v35 }
 0x164   :  { %571 = vperm.xlu0 %6682, %v7743_v18  }
 0x165   :  { %6674 = vset.pattern.permute.xlu1 %v10700_v10 }
 0x166   :  { %1557 = vperm.xlu1 %6674, %v7731_v15  }
 0x168   :  { %6683 = vset.pattern.permute.xlu0 %v10700_v10 }
 0x169   :  { %1577 = vperm.xlu0 %6683, %v7743_v18  }
 0x16a   :  { %6675 = vset.pattern.permute.xlu1 %v10707_v34 }
 0x16b   :  { %891 = vperm.xlu1 %6675, %v7737_v16  }
 0x16d   :  { %6684 = vset.pattern.permute.xlu0 %v10707_v34 }
 0x16e   :  { %895 = vperm.xlu0 %6684, %v7746_v19  }
 0x16f   :  { %6677 = vset.pattern.permute.xlu1 %v10700_v10 }
 0x170   :  { %1569 = vperm.xlu1 %6677, %v7737_v16  }
 0x172   :  { %6688 = vset.pattern.permute.xlu0 %v10702_v35 }
 0x173   :  { %581 = vperm.xlu0 %6688, %v7749_v20  }
 0x174   :  { %6679 = vset.pattern.permute.xlu1 %v10702_v35 }
 0x175   :  { %556 = vperm.xlu1 %6679, %v7739_v17  }
 0x177   :  { %6689 = vset.pattern.permute.xlu0 %v10700_v10 }
 0x178   :  { %1585 = vperm.xlu0 %6689, %v7749_v20  }
 0x179   :  { %6681 = vset.pattern.permute.xlu1 %v10707_v34 }
 0x17a   :  { %899 = vperm.xlu1 %6681, %v7743_v18  }
 0x17c   :  { %6690 = vset.pattern.permute.xlu0 %v10707_v34 }
 0x17d   :  { %903 = vperm.xlu0 %6690, %v7752_v21  }
 0x17e   :  { %6685 = vset.pattern.permute.xlu1 %v10702_v35 }
 0x17f   :  { %566 = vperm.xlu1 %6685, %v7746_v19  }
 0x181   :  { %6694 = vset.pattern.permute.xlu0 %v10702_v35 }
 0x182   :  { %591 = vperm.xlu0 %6694, %v7756_v22  }
 0x183   :  { %6686 = vset.pattern.permute.xlu1 %v10700_v10 }
 0x184   :  { %1573 = vperm.xlu1 %6686, %v7746_v19  }
 0x186   :  { %6695 = vset.pattern.permute.xlu0 %v10700_v10 }
 0x187   :  { %1593 = vperm.xlu0 %6695, %v7756_v22  }
 0x188   :  { %6687 = vset.pattern.permute.xlu1 %v10707_v34 }
 0x189   :  { %907 = vperm.xlu1 %6687, %v7749_v20  }
 0x18b   :  { %6696 = vset.pattern.permute.xlu0 %v10707_v34 }
 0x18c   :  { %911 = vperm.xlu0 %6696, %v7759_v23  }
 0x18d   :  { %6691 = vset.pattern.permute.xlu1 %v10702_v35 }
 0x18e   :  { %576 = vperm.xlu1 %6691, %v7752_v21  }
 0x190   :  { %6699 = vset.pattern.permute.xlu0 %v10719_v51 }
 0x192   :  { %6692 = vset.pattern.permute.xlu1 %v10700_v10 }
 0x193   :  { %1581 = vperm.xlu1 %6692, %v7752_v21  }
 0x197   :  { %6693 = vset.pattern.permute.xlu1 %v10707_v34 }
 0x198   :  { %915 = vperm.xlu1 %6693, %v7756_v22  }
 0x19c   :  { %6697 = vset.pattern.permute.xlu1 %v10702_v35 }
 0x19d   :  { %586 = vperm.xlu1 %6697, %v7759_v23  }
 0x1a1   :  { %6698 = vset.pattern.permute.xlu1 %v10700_v10 }
 0x1a2   :  { %1589 = vperm.xlu1 %6698, %v7759_v23  }
 0x1a4   :  { %v522_v31 = vpop.permute.xlu1 %521  ;;  %v860_v32 = vpop.permute.xlu0 %859 }
 0x1a5   :  { %v599_v36 = vadd.f32 %v7843_v30, %v522_v31  ;;  %v923_v57 = vadd.f32 %v7863_v52, %v860_v32 }
 0x1a6   :  { %6700 = vset.pattern.permute.xlu1 %v10719_v51 }
 0x1a7   :  { %v615_v37 = vmul.f32 0.2, %v599_v36 }
 0x1a9   :  { %v7850_v41 = vpop.permute.xlu0 %1537  ;;  %v7852_v44 = vpop.permute.xlu1 %1533  ;;  %v631_v45 = vmax.f32 %v599_v36, %v615_v37 }
 0x1ab   :  { %v7856_v48 = vsel %vm66_vm3, %v631_v45, -1e+30 }
 0x1ac   :  { %10943 = vst [vmem:[#allocation21_spill] sm:$0xff] %v7856_v48  ;;  %664 = vmax.xlane.f32.xlu0 %v7856_v48 }
 0x1ae   :  { %v856_v53 = vpop.permute.xlu0 %855  ;;  %v868_v56 = vpop.permute.xlu1 %867 }
 0x1af   :  { %v922_v60 = vadd.f32 %v7863_v52, %v856_v53  ;;  %v925_v61 = vadd.f32 %v7863_v52, %v868_v56 }
 0x1b1   :  { %v938_v1 = vmul.f32 0.2, %v922_v60  ;;  %v941_v6 = vmul.f32 0.2, %v925_v61 }
 0x1b3   :  { %v517_v29 = vpop.permute.xlu0 %516  ;;  %v7872_v31 = vpop.permute.xlu1 %1545  ;;  %v954_v36 = vmax.f32 %v922_v60, %v938_v1  ;;  %v957_v45 = vmax.f32 %v925_v61, %v941_v6  ;;  %v939_v61 = vmul.f32 0.2, %v923_v57 }
 0x1b4   :  { %v598_v6 = vadd.f32 %v7843_v30, %v517_v29 }
 0x1b5   :  { %v7877_v37 = vsel %vm65_vm4, %v954_v36, -1e+30  ;;  %v7885_v60 = vsel %vm10792_vm5, %v957_v45, -1e+30  ;;  %v955_v35 = vmax.f32 %v923_v57, %v939_v61 }
 0x1b6   :  { %10946 = vst [vmem:[#allocation24_spill] sm:$0xff] %v7877_v37  ;;  %986 = vmax.xlane.f32.xlu0 %v7877_v37  ;;  %10947 = vst [vmem:[#allocation25_spill] sm:$0xff] %v7885_v60 }
 0x1b7   :  { %v532_v49 = vpop.permute.xlu0 %531 }
 0x1b8   :  { %v601_v53 = vadd.f32 %v7843_v30, %v532_v49  ;;  %v864_v56 = vpop.permute.xlu1 %863  ;;  %v614_v49 = vmul.f32 0.2, %v598_v6 }
 0x1b9   :  { %v924_v45 = vadd.f32 %v7863_v52, %v864_v56 }
 0x1ba   :  { %v617_v1 = vmul.f32 0.2, %v601_v53  ;;  %992 = vmax.xlane.f32.xlu0 %v7885_v60  ;;  %v630_v34 = vmax.f32 %v598_v6, %v614_v49 }
 0x1bb   :  { %v542_v36 = vpop.permute.xlu0 %541 }
 0x1bc   :  { %v633_v28 = vmax.f32 %v601_v53, %v617_v1  ;;  %v35_v53 = vunpack.c.2.s8 %v7834_v27  ;;  %v940_v1 = vmul.f32 0.2, %v924_v45  ;;  %v7911_v27 = vsel %vm65_vm4, %v630_v34, -1e+30 }
 0x1bd   :  { %v527_v40 = vpop.permute.xlu1 %526  ;;  %10951 = vst [vmem:[#allocation29_spill] sm:$0xff] %v7911_v27 }
 0x1be   :  { %v7891_v10 = vsel %vm10792_vm5, %v633_v28, -1e+30  ;;  %v600_v29 = vadd.f32 %v7843_v30, %v527_v40  ;;  %v7903_v28 = vsel %vm66_vm3, %v955_v35, -1e+30  ;;  %v7906_v3 = vcvt.s32.f32 %v35_v53  ;;  %v30_v40 = vld [vmem:[%s10693_s1 + $0x8] sm:$0xff] }
 0x1bf   :  { %10948 = vst [vmem:[#allocation26_spill] sm:$0xff] %v7891_v10  ;;  %668 = vmax.xlane.f32.xlu0 %v7891_v10  ;;  %10949 = vst [vmem:[#allocation27_spill] sm:$0xff] %v7903_v28  ;;  %v956_v61 = vmax.f32 %v924_v45, %v940_v1  ;;  %v37_v6 = vunpack.c.0.s8 %v30_v40  ;;  %v39_v49 = vunpack.c.2.s8 %v30_v40  ;;  %v603_v53 = vadd.f32 %v7843_v30, %v542_v36 }
 0x1c0   :  { %v7894_v32 = vpop.permute.xlu0 %1553  ;;  %10950 = vst [vmem:[#allocation28_spill] sm:$0xff] %v7906_v3  ;;  %v616_v56 = vmul.f32 0.2, %v600_v29  ;;  %vm67_vm6 = vcmp.gt.f32.partialorder %v7906_v3, 0.0  ;;  %v38_v59 = vunpack.c.1.s8 %v30_v40 }
 0x1c1   :  { %v7924_v45 = vsel %vm67_vm6, %v956_v61, -1e+30  ;;  %v7929_v47 = vcvt.s32.f32 %v37_v6  ;;  %v7931_v39 = vcvt.s32.f32 %v39_v49  ;;  %v619_v10 = vmul.f32 0.2, %v603_v53 }
 0x1c2   :  { %v7897_v25 = vpop.permute.xlu1 %1541  ;;  %10952 = vst [vmem:[#allocation30_spill] sm:$0xff] %v7924_v45  ;;  %v632_v1 = vmax.f32 %v600_v29, %v616_v56  ;;  %v7934_v48 = vcvt.s32.f32 %v38_v59 }
 0x1c3   :  { %vm69_vm7 = vcmp.gt.f32.partialorder %v7929_v47, 0.0  ;;  %vm71_vm8 = vcmp.gt.f32.partialorder %v7931_v39, 0.0 }
 0x1c4   :  { %v7941_v61 = vsel %vm67_vm6, %v632_v1, -1e+30  ;;  %vm70_vm9 = vcmp.gt.f32.partialorder %v7934_v48, 0.0 }
 0x1c5   :  { %v872_v5 = vpop.permute.xlu0 %871  ;;  %10953 = vst [vmem:[#allocation31_spill] sm:$0xff] %v7941_v61 }
 0x1c6   :  { %988 = vmax.xlane.f32.xlu1 %v7903_v28  ;;  %v926_v29 = vadd.f32 %v7863_v52, %v872_v5 }
 0x1c7   :  { %v876_v63 = vpop.permute.xlu1 %875 }
 0x1c8   :  { %v927_v57 = vadd.f32 %v7863_v52, %v876_v63  ;;  %v942_v49 = vmul.f32 0.2, %v926_v29 }
 0x1ca   :  { %v7916_v35 = vpop.permute.xlu0 %551  ;;  %662 = vmax.xlane.f32.xlu1 %v7911_v27  ;;  %v943_v55 = vmul.f32 0.2, %v927_v57 }
 0x1cc   :  { %v537_v63 = vpop.permute.xlu1 %536  ;;  %v959_v6 = vmax.f32 %v927_v57, %v943_v55  ;;  %v635_v57 = vmax.f32 %v603_v53, %v619_v10 }
 0x1cd   :  { %v602_v34 = vadd.f32 %v7843_v30, %v537_v63 }
 0x1ce   :  { %990 = vmax.xlane.f32.xlu1 %v7924_v45  ;;  %v7956_v55 = vsel %vm70_vm9, %v959_v6, -1e+30  ;;  %v958_v6 = vmax.f32 %v926_v29, %v942_v49  ;;  %v31_v29 = vld [vmem:[%s10693_s1 + $0x10] sm:$0xff] }
 0x1cf   :  { %v618_v36 = vmul.f32 0.2, %v602_v34  ;;  %v880_v43 = vpop.permute.xlu0 %879  ;;  %10955 = vst [vmem:[#allocation33_spill] sm:$0xff] %v7956_v55  ;;  %v43_v54 = vunpack.c.2.s8 %v31_v29 }
 0x1d0   :  { %v928_v63 = vadd.f32 %v7863_v52, %v880_v43 }
 0x1d1   :  { %v7937_v56 = vpop.permute.xlu1 %1549  ;;  %v634_v51 = vmax.f32 %v602_v34, %v618_v36  ;;  %v40_v36 = vunpack.c.3.s8 %v30_v40 }
 0x1d2   :  { %v944_v27 = vmul.f32 0.2, %v928_v63  ;;  %666 = vmax.xlane.f32.xlu1 %v7941_v61 }
 0x1d3   :  { %v7947_v43 = vsel %vm69_vm7, %v634_v51, -1e+30  ;;  %v7972_v53 = vcvt.s32.f32 %v40_v36 }
 0x1d4   :  { %10954 = vst [vmem:[#allocation32_spill] sm:$0xff] %v7947_v43  ;;  %v7950_v5 = vpop.permute.xlu0 %561  ;;  %670 = vmax.xlane.f32.xlu0 %v7947_v43  ;;  %v960_v59 = vmax.f32 %v928_v63, %v944_v27  ;;  %v7967_v63 = vsel %vm70_vm9, %v635_v57, -1e+30  ;;  %v41_v57 = vunpack.c.0.s8 %v31_v29 }
 0x1d5   :  { %10957 = vst [vmem:[#allocation35_spill] sm:$0xff] %v7967_v63  ;;  %10958 = vst [vmem:[#allocation36_spill] sm:$0xff] %v7972_v53  ;;  %vm72_vm10 = vcmp.gt.f32.partialorder %v7972_v53, 0.0 }
 0x1d6   :  { %v884_v34 = vpop.permute.xlu1 %883  ;;  %996 = vmax.xlane.f32.xlu1 %v7956_v55  ;;  %v7961_v51 = vsel %vm71_vm8, %v960_v59, -1e+30  ;;  %v7976_v59 = vsel %vm69_vm7, %v958_v6, -1e+30 }
 0x1d7   :  { %10956 = vst [vmem:[#allocation34_spill] sm:$0xff] %v7961_v51  ;;  %v929_v1 = vadd.f32 %v7863_v52, %v884_v34  ;;  %10959 = vst [vmem:[#allocation37_spill] sm:$0xff] %v7976_v59 }
 0x1d8   :  { %998 = vmax.xlane.f32.xlu0 %v7961_v51 }
 0x1d9   :  { %v945_v43 = vmul.f32 0.2, %v929_v1  ;;  %v888_v27 = vpop.permute.xlu0 %887 }
 0x1da   :  { %672 = vmax.xlane.f32.xlu1 %v7967_v63  ;;  %v930_v40 = vadd.f32 %v7863_v52, %v888_v27  ;;  %v7994_v27 = vcvt.s32.f32 %v41_v57 }
 0x1db   :  { %v7970_v10 = vpop.permute.xlu1 %1561  ;;  %v961_v34 = vmax.f32 %v929_v1, %v945_v43 }
 0x1dc   :  { %v946_v43 = vmul.f32 0.2, %v930_v40  ;;  %vm73_vm11 = vcmp.gt.f32.partialorder %v7994_v27, 0.0 }
 0x1dd   :  { %v7989_v6 = vsel %vm72_vm10, %v961_v34, -1e+30  ;;  %v42_v34 = vunpack.c.1.s8 %v31_v29 }
 0x1de   :  { %v7978_v61 = vpop.permute.xlu0 %1565  ;;  %994 = vmax.xlane.f32.xlu1 %v7976_v59  ;;  %10960 = vst [vmem:[#allocation38_spill] sm:$0xff] %v7989_v6 }
 0x1e0   :  { %v547_v49 = vpop.permute.xlu1 %546 }
 0x1e1   :  { %v604_v36 = vadd.f32 %v7843_v30, %v547_v49  ;;  %v962_v49 = vmax.f32 %v930_v40, %v946_v43  ;;  %v8014_v43 = vcvt.s32.f32 %v43_v54 }
 0x1e2   :  { %1000 = vmax.xlane.f32.xlu1 %v7989_v6 }
 0x1e3   :  { %v620_v1 = vmul.f32 0.2, %v604_v36  ;;  %v7992_v63 = vpop.permute.xlu0 %571  ;;  %v8009_v55 = vsel %vm73_vm11, %v962_v49, -1e+30  ;;  %10964 = vst [vmem:[#allocation42_spill] sm:$0xff] %v8014_v43  ;;  %vm75_vm13 = vcmp.gt.f32.partialorder %v8014_v43, 0.0 }
 0x1e4   :  { %10963 = vst [vmem:[#allocation41_spill] sm:$0xff] %v8009_v55 }
 0x1e5   :  { %v7996_v2 = vpop.permute.xlu1 %1557  ;;  %v636_v62 = vmax.f32 %v604_v36, %v620_v1 }
 0x1e7   :  { %v8000_v58 = vsel %vm71_vm8, %v636_v62, -1e+30  ;;  %v8012_v62 = vcvt.s32.f32 %v42_v34 }
 0x1e8   :  { %10961 = vst [vmem:[#allocation39_spill] sm:$0xff] %v8000_v58  ;;  %v8002_v51 = vpop.permute.xlu0 %1577  ;;  %674 = vmax.xlane.f32.xlu0 %v8000_v58 }
 0x1e9   :  { %10962 = vst [vmem:[#allocation40_spill] sm:$0xff] %v8002_v51  ;;  %vm74_vm12 = vcmp.gt.f32.partialorder %v8012_v62, 0.0 }
 0x1ea   :  { %v892_v6 = vpop.permute.xlu1 %891 }
 0x1eb   :  { %v931_v57 = vadd.f32 %v7863_v52, %v892_v6 }
 0x1ec   :  { %1002 = vmax.xlane.f32.xlu0 %v8009_v55 }
 0x1ed   :  { %v947_v40 = vmul.f32 0.2, %v931_v57  ;;  %v896_v36 = vpop.permute.xlu0 %895 }
 0x1ee   :  { %v932_v1 = vadd.f32 %v7863_v52, %v896_v36 }
 0x1ef   :  { %v8017_v58 = vpop.permute.xlu1 %1569  ;;  %v963_v50 = vmax.f32 %v931_v57, %v947_v40  ;;  %v44_v40 = vunpack.c.3.s8 %v31_v29 }
 0x1f0   :  { %v948_v59 = vmul.f32 0.2, %v932_v1 }
 0x1f1   :  { %v8022_v6 = vsel %vm74_vm12, %v963_v50, -1e+30  ;;  %v32_v50 = vld [vmem:[%s10693_s1 + $0x18] sm:$0xff]  ;;  %s7468_s1 = smov 120  }
 0x1f2   :  { %10965 = vst [vmem:[#allocation43_spill] sm:$0xff] %v8022_v6  ;;  %v8025_v49 = vpop.permute.xlu0 %581  ;;  %1004 = vmax.xlane.f32.xlu1 %v8022_v6  ;;  %v964_v54 = vmax.f32 %v932_v1, %v948_v59  ;;  %v45_v55 = vunpack.c.0.s8 %v32_v50  ;;  %v8040_v1 = vcvt.s32.f32 %v44_v40 }
 0x1f4   :  { %v557_v34 = vpop.permute.xlu1 %556  ;;  %v8030_v36 = vsel %vm75_vm13, %v964_v54, -1e+30  ;;  %10968 = vst [vmem:[#allocation46_spill] sm:$0xff] %v8040_v1  ;;  %v8042_v45 = vcvt.s32.f32 %v45_v55  ;;  %vm76_vm14 = vcmp.gt.f32.partialorder %v8040_v1, 0.0 }
 0x1f5   :  { %10966 = vst [vmem:[#allocation44_spill] sm:$0xff] %v8030_v36  ;;  %1006 = vmax.xlane.f32.xlu0 %v8030_v36  ;;  %v606_v59 = vadd.f32 %v7843_v30, %v557_v34 }
 0x1f6   :  { %10969 = vst [vmem:[#allocation47_spill] sm:$0xff] %v8042_v45  ;;  %vm10828_vm15 = vcmp.gt.f32.partialorder %v8042_v45, 0.0 }
 0x1f7   :  { %v8033_v57 = vpop.permute.xlu0 %1585  ;;  %v622_v42 = vmul.f32 0.2, %v606_v59 }
 0x1f8   :  { %10967 = vst [vmem:[#allocation45_spill] sm:$0xff] %v8033_v57 }
 0x1f9   :  { %v900_v46 = vpop.permute.xlu1 %899 }
 0x1fa   :  { %v933_v60 = vadd.f32 %v7863_v52, %v900_v46 }
 0x1fc   :  { %v949_v6 = vmul.f32 0.2, %v933_v60  ;;  %v904_v54 = vpop.permute.xlu0 %903 }
 0x1fd   :  { %v934_v36 = vadd.f32 %v7863_v52, %v904_v54 }
 0x1fe   :  { %v567_v28 = vpop.permute.xlu1 %566  ;;  %v965_v29 = vmax.f32 %v933_v60, %v949_v6  ;;  %v638_v6 = vmax.f32 %v606_v59, %v622_v42 }
 0x1ff   :  { %v950_v57 = vmul.f32 0.2, %v934_v36  ;;  %v608_v51 = vadd.f32 %v7843_v30, %v567_v28  ;;  %v46_v28 = vunpack.c.1.s8 %v32_v50 }
 0x200   :  { %v8049_v46 = vsel %vm76_vm14, %v965_v29, -1e+30  ;;  %v8064_v29 = vsel %vm73_vm11, %v638_v6, -1e+30 }
 0x201   :  { %10970 = vst [vmem:[#allocation48_spill] sm:$0xff] %v8049_v46  ;;  %1008 = vmax.xlane.f32.xlu1 %v8049_v46  ;;  %v966_v55 = vmax.f32 %v934_v36, %v950_v57  ;;  %v624_v34 = vmul.f32 0.2, %v608_v51  ;;  %v8060_v54 = vpop.permute.xlu0 %591  ;;  %10972 = vst [vmem:[#allocation50_spill] sm:$0xff] %v8064_v29  ;;  %v8068_v57 = vcvt.s32.f32 %v46_v28 }
 0x203   :  { %v8053_v40 = vpop.permute.xlu1 %1573  ;;  %v8057_v60 = vsel %vm10828_vm15, %v966_v55, -1e+30  ;;  %v640_v37 = vmax.f32 %v608_v51, %v624_v34  ;;  %10973 = vst [vmem:[#allocation51_spill] sm:$0xff] %v8068_v57  ;;  %vm10814_vm1 = vcmp.gt.f32.partialorder %v8068_v57, 0.0 }
 0x204   :  { %10971 = vst [vmem:[#allocation49_spill] sm:$0xff] %v8057_v60  ;;  %1010 = vmax.xlane.f32.xlu0 %v8057_v60 }
 0x205   :  { %v8072_v42 = vsel %vm75_vm13, %v640_v37, -1e+30 }
 0x206   :  { %10974 = vst [vmem:[#allocation52_spill] sm:$0xff] %v8072_v42  ;;  %v8075_v59 = vpop.permute.xlu0 %1593 }
 0x207   :  { %10975 = vst [vmem:[#allocation53_spill] sm:$0xff] %v8075_v59  ;;  %v47_v59 = vunpack.c.2.s8 %v32_v50 }
 0x208   :  { %v908_v46 = vpop.permute.xlu1 %907  ;;  %678 = vmax.xlane.f32.xlu0 %v8064_v29 }
 0x209   :  { %v935_v36 = vadd.f32 %v7863_v52, %v908_v46 }
 0x20b   :  { %v951_v55 = vmul.f32 0.2, %v935_v36  ;;  %v912_v29 = vpop.permute.xlu0 %911 }
 0x20c   :  { %682 = vmax.xlane.f32.xlu0 %v8072_v42 }
 0x20d   :  { %v577_v60 = vpop.permute.xlu1 %576  ;;  %v967_v6 = vmax.f32 %v935_v36, %v951_v55  ;;  %v10755_v36 = vsub.s32 2, %v7827_v26  ;;  %v936_v55 = vadd.f32 %v7863_v52, %v912_v29  ;;  %v8105_v29 = vcvt.s32.f32 %v47_v59 }
 0x20e   :  { %v610_v51 = vadd.f32 %v7843_v30, %v577_v60  ;;  %v48_v60 = vunpack.c.3.s8 %v32_v50 }
 0x20f   :  { %v8081_v46 = vsel %vm10814_vm1, %v967_v6, -1e+30  ;;  %10980 = vst [vmem:[#allocation58_spill] sm:$0xff] %v8105_v29  ;;  %vm10813_vm2 = vcmp.gt.f32.partialorder %v8105_v29, 0.0 }
 0x210   :  { %10976 = vst [vmem:[#allocation54_spill] sm:$0xff] %v8081_v46  ;;  %v626_v34 = vmul.f32 0.2, %v610_v51  ;;  %1012 = vmax.xlane.f32.xlu1 %v8081_v46  ;;  %v952_v46 = vmul.f32 0.2, %v936_v55 }
 0x212   :  { %v8084_v28 = vpop.permute.xlu1 %1581  ;;  %v642_v37 = vmax.f32 %v610_v51, %v626_v34  ;;  %v8097_v51 = vrot.slane %v7705_v4, %v10755_v36  ;;  %v8099_v34 = vcvt.s32.f32 %v48_v60  ;;  %v607_v60 = vadd.f32 %v7843_v30, %v7950_v5 }
 0x213   :  { %10977 = vst [vmem:[#allocation55_spill] sm:$0xff] %v8084_v28  ;;  %v968_v36 = vmax.f32 %v936_v55, %v952_v46 }
 0x214   :  { %v8088_v42 = vsel %vm10828_vm15, %v642_v37, -1e+30  ;;  %10979 = vst [vmem:[#allocation57_spill] sm:$0xff] %v8099_v34  ;;  %v605_v37 = vadd.f32 %v7843_v30, %v7916_v35  ;;  %vm10827_vm0 = vcmp.gt.f32.partialorder %v8099_v34, 0.0  ;;  %v1604_v55 = vadd.f32 %v8097_v51, %v7937_v56 }
 0x215   :  { %10978 = vst [vmem:[#allocation56_spill] sm:$0xff] %v8088_v42  ;;  %686 = vmax.xlane.f32.xlu0 %v8088_v42  ;;  %v1600_v42 = vadd.f32 %v8097_v51, %v7852_v44  ;;  %v1602_v44 = vadd.f32 %v8097_v51, %v7897_v25  ;;  %v8123_v5 = vsel %vm10813_vm2, %v968_v36, -1e+30  ;;  %v1606_v56 = vadd.f32 %v8097_v51, %v7996_v2 }
 0x216   :  { %v1608_v2 = vadd.f32 %v8097_v51, %v7978_v61 }
 0x217   :  { %v916_v6 = vpop.permute.xlu1 %915  ;;  %v1616_v4 = vmul.f32 0.2, %v1600_v42  ;;  %v1618_v46 = vmul.f32 0.2, %v1602_v44 }
 0x218   :  { %v937_v43 = vadd.f32 %v7863_v52, %v916_v6  ;;  %v621_v6 = vmul.f32 0.2, %v605_v37  ;;  %v1624_v61 = vmul.f32 0.2, %v1608_v2 }
 0x21a   :  { %v953_v45 = vmul.f32 0.2, %v937_v43 }
 0x21c   :  { %v587_v50 = vpop.permute.xlu1 %586  ;;  %v969_v28 = vmax.f32 %v937_v43, %v953_v45  ;;  %v623_v43 = vmul.f32 0.2, %v607_v60 }
 0x21d   :  { %v612_v52 = vadd.f32 %v7843_v30, %v587_v50  ;;  %v609_v50 = vadd.f32 %v7843_v30, %v7992_v63  ;;  %v611_v63 = vadd.f32 %v7843_v30, %v8025_v49  ;;  %v613_v49 = vadd.f32 %v7843_v30, %v8060_v54 }
 0x21e   :  { %v8113_v35 = vsel %vm10827_vm0, %v969_v28, -1e+30  ;;  %v637_v28 = vmax.f32 %v605_v37, %v621_v6  ;;  %v639_v37 = vmax.f32 %v607_v60, %v623_v43  ;;  %v1620_v6 = vmul.f32 0.2, %v1604_v55 }
 0x21f   :  { %v628_v59 = vmul.f32 0.2, %v612_v52  ;;  %1016 = vmax.xlane.f32.xlu1 %v8113_v35  ;;  %v1601_v30 = vadd.f32 %v8097_v51, %v7850_v41  ;;  %v629_v54 = vmul.f32 0.2, %v613_v49  ;;  %v1603_v41 = vadd.f32 %v8097_v51, %v7872_v31 }
 0x220   :  { %v8137_v36 = vsel %vm72_vm10, %v637_v28, -1e+30  ;;  %v8151_v60 = vsel %vm74_vm12, %v639_v37, -1e+30  ;;  %v1622_v28 = vmul.f32 0.2, %v1606_v56 }
 0x221   :  { %v644_v45 = vmax.f32 %v612_v52, %v628_v59  ;;  %v1632_v52 = vmax.f32 %v1600_v42, %v1616_v4  ;;  %v625_v59 = vmul.f32 0.2, %v609_v50  ;;  %v1634_v42 = vmax.f32 %v1602_v44, %v1618_v46  ;;  %10983 = vst [vmem:[#allocation61_spill] sm:$0xff] %v8151_v60 }
 0x222   :  { %v1636_v46 = vmax.f32 %v1604_v55, %v1620_v6  ;;  %v1638_v37 = vmax.f32 %v1606_v56, %v1622_v28  ;;  %v1617_v55 = vmul.f32 0.2, %v1601_v30  ;;  %v1619_v56 = vmul.f32 0.2, %v1603_v41 }
 0x223   :  { %1014 = vmax.xlane.f32.xlu1 %v8123_v5  ;;  %v8130_v25 = vsel %vm10813_vm2, %v644_v45, -1e+30  ;;  %v8144_v4 = vsel %vm65_vm4, %v1632_v52, -1e+30  ;;  %v627_v45 = vmul.f32 0.2, %v611_v63  ;;  %v641_v43 = vmax.f32 %v609_v50, %v625_v59 }
 0x224   :  { %10981 = vst [vmem:[#allocation59_spill] sm:$0xff] %v8130_v25  ;;  %690 = vmax.xlane.f32.xlu0 %v8130_v25  ;;  %10982 = vst [vmem:[#allocation60_spill] sm:$0xff] %v8144_v4  ;;  %v8158_v44 = vsel %vm67_vm6, %v1634_v42, -1e+30  ;;  %v8170_v59 = vsel %vm69_vm7, %v1636_v46, -1e+30  ;;  %v645_v42 = vmax.f32 %v613_v49, %v629_v54  ;;  %v1633_v28 = vmax.f32 %v1601_v30, %v1617_v55 }
 0x225   :  { %10984 = vst [vmem:[#allocation62_spill] sm:$0xff] %v8158_v44  ;;  %v8165_v50 = vsel %vm76_vm14, %v641_v43, -1e+30  ;;  %v643_v52 = vmax.f32 %v611_v63, %v627_v45  ;;  %10986 = vst [vmem:[#allocation64_spill] sm:$0xff] %v8170_v59  ;;  %v8182_v63 = vsel %vm71_vm8, %v1638_v37, -1e+30  ;;  %v1640_v45 = vmax.f32 %v1608_v2, %v1624_v61 }
 0x226   :  { %10985 = vst [vmem:[#allocation63_spill] sm:$0xff] %v8165_v50  ;;  %10988 = vst [vmem:[#allocation66_spill] sm:$0xff] %v8182_v63  ;;  %v1605_v43 = vadd.f32 %v8097_v51, %v7894_v32  ;;  %v8189_v31 = vsel %vm10827_vm0, %v645_v42, -1e+30  ;;  %v1607_v46 = vadd.f32 %v8097_v51, %v7970_v10  ;;  %v8201_v32 = vsel %vm66_vm3, %v1633_v28, -1e+30 }
 0x227   :  { %676 = vmax.xlane.f32.xlu1 %v8137_v36  ;;  %v8177_v6 = vsel %vm10814_vm1, %v643_v52, -1e+30  ;;  %10989 = vst [vmem:[#allocation67_spill] sm:$0xff] %v8189_v31  ;;  %v8194_v49 = vsel %vm73_vm11, %v1640_v45, -1e+30  ;;  %10991 = vst [vmem:[#allocation69_spill] sm:$0xff] %v8201_v32  ;;  %v1635_v54 = vmax.f32 %v1603_v41, %v1619_v56  ;;  %v1609_v52 = vadd.f32 %v8097_v51, %v8017_v58 }
 0x228   :  { %1664 = vmax.xlane.f32.xlu0 %v8144_v4  ;;  %10987 = vst [vmem:[#allocation65_spill] sm:$0xff] %v8177_v6  ;;  %10990 = vst [vmem:[#allocation68_spill] sm:$0xff] %v8194_v49  ;;  %v1621_v2 = vmul.f32 0.2, %v1605_v43  ;;  %v1623_v30 = vmul.f32 0.2, %v1607_v46 }
 0x229   :  { %v8208_v61 = vsel %vm10792_vm5, %v1635_v54, -1e+30  ;;  %v1625_v55 = vmul.f32 0.2, %v1609_v52  ;;  %v10997_v56 = vld [vmem:[#allocation42_spill] sm:$0xff]  ;;  %v11000_v54 = vld [vmem:[#allocation40_spill] sm:$0xff] }
 0x22a   :  { %10992 = vst [vmem:[#allocation70_spill] sm:$0xff] %v8208_v61  ;;  %v1637_v37 = vmax.f32 %v1605_v43, %v1621_v2  ;;  %v1639_v42 = vmax.f32 %v1607_v46, %v1623_v30  ;;  %v10999_v2 = vld [vmem:[#allocation24_spill] sm:$0xff]  ;;  %v1611_v30 = vadd.f32 %v8097_v51, %v11000_v54 }
 0x22b   :  { %680 = vmax.xlane.f32.xlu1 %v8151_v60  ;;  %v1641_v58 = vmax.f32 %v1609_v52, %v1625_v55  ;;  %v11003_v54 = vld [vmem:[#allocation4_spill] sm:$0xff] }
 0x22c   :  { %1668 = vmax.xlane.f32.xlu0 %v8158_v44  ;;  %v8213_v10 = vsel %vm70_vm9, %v1637_v37, -1e+30  ;;  %v8218_v41 = vsel %vm72_vm10, %v1639_v42, -1e+30  ;;  %v1627_v42 = vmul.f32 0.2, %v1611_v30 }
 0x22d   :  { %10993 = vst [vmem:[#allocation71_spill] sm:$0xff] %v8213_v10  ;;  %10994 = vst [vmem:[#allocation72_spill] sm:$0xff] %v8218_v41  ;;  %v8223_v45 = vsel %vm74_vm12, %v1641_v58, -1e+30  ;;  %v11001_v58 = vld [vmem:[#allocation55_spill] sm:$0xff]  ;;  %v11008_v44 = vld [vmem:[#allocation30_spill] sm:$0xff] }
 0x22e   :  { %10995 = vst [vmem:[#allocation73_spill] sm:$0xff] %v8223_v45 }
 0x22f   :  { %684 = vmax.xlane.f32.xlu1 %v8165_v50 }
 0x230   :  { %1672 = vmax.xlane.f32.xlu0 %v8170_v59 }
 0x233   :  { %688 = vmax.xlane.f32.xlu1 %v8177_v6 }
 0x234   :  { %1676 = vmax.xlane.f32.xlu0 %v8182_v63 }
 0x237   :  { %692 = vmax.xlane.f32.xlu1 %v8189_v31 }
 0x238   :  { %1680 = vmax.xlane.f32.xlu0 %v8194_v49 }
 0x23b   :  { %1666 = vmax.xlane.f32.xlu1 %v8201_v32 }
 0x23f   :  { %1670 = vmax.xlane.f32.xlu1 %v8208_v61 }
 0x243   :  { %1674 = vmax.xlane.f32.xlu1 %v8213_v10 }
 0x247   :  { %1678 = vmax.xlane.f32.xlu1 %v8218_v41  ;;  %v11005_v41 = vld [vmem:[#allocation47_spill] sm:$0xff] }
 0x24b   :  { %1682 = vmax.xlane.f32.xlu1 %v8223_v45 }
 0x24e   :  { %2070 = vperm.xlu0 %6699, %v7707_v7   ;;  %v10996_v7 = vmov 1  }
 0x252   :  { %2082 = vperm.xlu0 %6699, %v7723_v13  }
 0x256   :  { %2090 = vperm.xlu0 %6699, %v7731_v15  }
 0x25a   :  { %2098 = vperm.xlu0 %6699, %v7739_v17   ;;  %v1610_v17 = vadd.f32 %v8097_v51, %v8053_v40 }
 0x25c   :  { %2066 = vperm.xlu1 %6700, %v7711_v8   ;;  %v8241_v8 = vpop.permute.xlu1 %1589 }
 0x25e   :  { %2106 = vperm.xlu0 %6699, %v7746_v19   ;;  %v1626_v19 = vmul.f32 0.2, %v1610_v17 }
 0x260   :  { %2074 = vperm.xlu1 %6700, %v7717_v11   ;;  %v8244_v11 = vpop.xlane.xlu0 %664  ;;  %v989_v13 = vpop.xlane.xlu1 %988 }
 0x262   :  { %2114 = vperm.xlu0 %6699, %v7752_v21  }
 0x264   :  { %2078 = vperm.xlu1 %6700, %v7713_v9   ;;  %v987_v9 = vpop.xlane.xlu0 %986  ;;  %v8247_v15 = vpop.xlane.xlu1 %662 }
 0x265   :  { %v1018_v46 = vsub.f32 %v10999_v2, %v987_v9  ;;  %v11002_v2 = vld [vmem:[#allocation45_spill] sm:$0xff] }
 0x266   :  { %2122 = vperm.xlu0 %6699, %v7759_v23  }
 0x267   :  { %v1034_v52 = vmul.f32 1.442695, %v1018_v46  ;;  %v1613_v46 = vadd.f32 %v8097_v51, %v11002_v2 }
 0x268   :  { %2086 = vperm.xlu1 %6700, %v7721_v12   ;;  %v993_v12 = vpop.xlane.xlu0 %992 }
 0x269   :  { %6949 = vpow2.f32 %v1034_v52 }
 0x26a   :  { %6702 = vrot.lane.b32.xlu0 %v7673_v38, %s7468_s1 }
 0x26b   :  { %6821 = vset.pattern.permute.xlu0 %v10996_v7 }
 0x26c   :  { %2094 = vperm.xlu1 %6700, %v7729_v14   ;;  %v991_v14 = vpop.xlane.xlu1 %990 }
 0x270   :  { %2102 = vperm.xlu1 %6700, %v7737_v16   ;;  %v8254_v16 = vpop.xlane.xlu0 %668  ;;  %v8256_v21 = vpop.xlane.xlu1 %666 }
 0x274   :  { %2110 = vperm.xlu1 %6700, %v7743_v18   ;;  %v1642_v18 = vmax.f32 %v1610_v17, %v1626_v19  ;;  %v8258_v23 = vpop.xlane.xlu0 %670  ;;  %v8265_v40 = vpop.xlane.xlu1 %996 }
 0x278   :  { %2118 = vperm.xlu1 %6700, %v7749_v20   ;;  %v8262_v20 = vsel %vm75_vm13, %v1642_v18, -1e+30  ;;  %v8271_v28 = vpop.xlane.xlu1 %672  ;;  %v1643_v18 = vmax.f32 %v1611_v30, %v1627_v42  ;;  %v6950_v30 = vpop.eup %6949  ;;  %v1629_v42 = vmul.f32 0.2, %v1613_v46 }
 0x279   :  { %10998 = vst [vmem:[#allocation74_spill] sm:$0xff] %v8262_v20 }
 0x27a   :  { %v8294_v45 = vsel %vm76_vm14, %v1643_v18, -1e+30  ;;  %v8309_v18 = vmul.f32 %v6950_v30, %v7868_v0  ;;  %v1645_v10 = vmax.f32 %v1613_v46, %v1629_v42 }
 0x27b   :  { %11004 = vst [vmem:[#allocation24_spill] sm:$0xff] %v8294_v45 }
 0x27c   :  { %2126 = vperm.xlu1 %6700, %v7756_v22   ;;  %v8267_v22 = vpop.xlane.xlu0 %998  ;;  %v8278_v55 = vpop.xlane.xlu1 %994  ;;  %v8320_v4 = vsel %vm10814_vm1, %v1645_v10, -1e+30 }
 0x27d   :  { %11009 = vst [vmem:[#allocation55_spill] sm:$0xff] %v8320_v4 }
 0x280   :  { %6822 = vset.pattern.permute.xlu1 %v10996_v7  ;;  %v8269_v43 = vpop.xlane.xlu0 %674  ;;  %v1612_v7 = vadd.f32 %v8097_v51, %v11001_v58 }
 0x282   :  { %v1628_v19 = vmul.f32 0.2, %v1612_v7 }
 0x284   :  { %v8276_v37 = vpop.xlane.xlu0 %1002  ;;  %v1644_v58 = vmax.f32 %v1612_v7, %v1628_v19  ;;  %v11007_v7 = vld [vmem:[#allocation27_spill] sm:$0xff] }
 0x285   :  { %v1019_v19 = vsub.f32 %v11007_v7, %v989_v13  ;;  %v11012_v7 = vld [vmem:[#allocation25_spill] sm:$0xff] }
 0x286   :  { %v8303_v63 = vsel %vm10828_vm15, %v1644_v58, -1e+30  ;;  %v1020_v58 = vsub.f32 %v11008_v44, %v991_v14 }
 0x287   :  { %11006 = vst [vmem:[#allocation40_spill] sm:$0xff] %v8303_v63  ;;  %v1036_v61 = vmul.f32 1.442695, %v1019_v19  ;;  %v1021_v19 = vsub.f32 %v11012_v7, %v993_v12  ;;  %v11018_v7 = vld [vmem:[#allocation6_spill] sm:$0xff] }
 0x288   :  { %v8282_v17 = vpop.xlane.xlu0 %1006  ;;  %v1038_v13 = vmul.f32 1.442695, %v1020_v58 }
 0x289   :  { %1684 = vmax.xlane.f32.xlu0 %v8262_v20  ;;  %v8284_v20 = vpop.xlane.xlu1 %1000  ;;  %6951 = vpow2.f32 %v1036_v61  ;;  %v1040_v10 = vmul.f32 1.442695, %v1021_v19 }
 0x28a   :  { %6953 = vpow2.f32 %v1038_v13 }
 0x28b   :  { %6955 = vpow2.f32 %v1040_v10 }
 0x28d   :  { %v8296_v52 = vpop.xlane.xlu1 %1004 }
 0x291   :  { %v8286_v9 = vpop.xlane.xlu0 %1010  ;;  %v8305_v2 = vpop.xlane.xlu1 %1008 }
 0x293   :  { %v6952_v32 = vpop.eup %6951 }
 0x294   :  { %v8345_v31 = vmul.f32 %v6952_v32, %v7845_v33  ;;  %v6954_v12 = vpop.eup %6953 }
 0x295   :  { %v8299_v49 = vpop.xlane.xlu0 %678  ;;  %v6956_v25 = vpop.eup %6955 }
 0x296   :  { %11017 = vst [vmem:[#allocation75_spill] sm:$0xff] %v8345_v31 }
 0x29d   :  { %v8312_v59 = vpop.xlane.xlu1 %1012 }
 0x29f   :  { %6707 = vrot.lane.b32.xlu0 %v11003_v54, %s7468_s1 }
 0x2a0   :  { %1686 = vmax.xlane.f32.xlu1 %v8294_v45  ;;  %v8315_v45 = vpop.xlane.xlu0 %682 }
 0x2a4   :  { %1688 = vmax.xlane.f32.xlu1 %v8303_v63  ;;  %v8325_v30 = vpop.xlane.xlu0 %686 }
 0x2a5   :  { %11010 = vst [vmem:[#allocation45_spill] sm:$0xff] %v8325_v30  ;;  %v11034_v30 = vld [vmem:[#allocation8_spill] sm:$0xff] }
 0x2a8   :  { %1082 = vadd.xlane.f32.xlu1 %v8309_v18 }
 0x2ac   :  { %v8322_v63 = vpop.xlane.xlu1 %1016  ;;  %1690 = vmax.xlane.f32.xlu1 %v8320_v4  ;;  %v11014_v4 = vld [vmem:[#allocation53_spill] sm:$0xff] }
 0x2ad   :  { %v1615_v38 = vadd.f32 %v8097_v51, %v11014_v4  ;;  %v8355_v4 = vmul.f32 %v6954_v12, %v7906_v3 }
 0x2af   :  { %v1631_v13 = vmul.f32 0.2, %v1615_v38  ;;  %11021 = vst [vmem:[#allocation78_spill] sm:$0xff] %v8355_v4 }
 0x2b0   :  { %v8327_v46 = vpop.xlane.xlu1 %1014 }
 0x2b1   :  { %v8329_v42 = vpop.xlane.xlu0 %690  ;;  %v1647_v10 = vmax.f32 %v1615_v38, %v1631_v13 }
 0x2b2   :  { %11011 = vst [vmem:[#allocation27_spill] sm:$0xff] %v8329_v42 }
 0x2b4   :  { %v8332_v44 = vpop.xlane.xlu1 %676 }
 0x2b5   :  { %v8334_v14 = vpop.xlane.xlu0 %1664 }
 0x2b6   :  { %11013 = vst [vmem:[#allocation30_spill] sm:$0xff] %v8334_v14 }
 0x2b8   :  { %v8336_v54 = vpop.xlane.xlu1 %680 }
 0x2b9   :  { %v8340_v61 = vpop.xlane.xlu0 %1668 }
 0x2ba   :  { %11015 = vst [vmem:[#allocation25_spill] sm:$0xff] %v8340_v61 }
 0x2bc   :  { %v8342_v58 = vpop.xlane.xlu1 %684 }
 0x2bd   :  { %11016 = vst [vmem:[#allocation53_spill] sm:$0xff] %v8342_v58  ;;  %6712 = vrot.lane.b32.xlu1 %v11018_v7, %s7468_s1  ;;  %v8349_v19 = vpop.xlane.xlu0 %1672  ;;  %v8364_v7 = vsel %vm10827_vm0, %v1647_v10, -1e+30  ;;  %v11030_v10 = vld [vmem:[#allocation37_spill] sm:$0xff] }
 0x2be   :  { %11019 = vst [vmem:[#allocation76_spill] sm:$0xff] %v8349_v19  ;;  %1084 = vadd.xlane.f32.xlu0 %v8345_v31  ;;  %11024 = vst [vmem:[#allocation81_spill] sm:$0xff] %v8364_v7  ;;  %v8370_v31 = vmul.f32 %v6956_v25, %v7870_v24 }
 0x2c0   :  { %v8352_v14 = vpop.xlane.xlu1 %688  ;;  %11026 = vst [vmem:[#allocation83_spill] sm:$0xff] %v8370_v31 }
 0x2c1   :  { %11020 = vst [vmem:[#allocation77_spill] sm:$0xff] %v8352_v14  ;;  %v8358_v61 = vpop.xlane.xlu0 %1676 }
 0x2c2   :  { %1086 = vadd.xlane.f32.xlu0 %v8355_v4  ;;  %11022 = vst [vmem:[#allocation79_spill] sm:$0xff] %v8358_v61 }
 0x2c4   :  { %v8360_v32 = vpop.xlane.xlu1 %692 }
 0x2c5   :  { %11023 = vst [vmem:[#allocation80_spill] sm:$0xff] %v8360_v32  ;;  %v8372_v12 = vpop.xlane.xlu0 %1680  ;;  %v1022_v32 = vsub.f32 %v11030_v10, %v8278_v55 }
 0x2c6   :  { %1694 = vmax.xlane.f32.xlu0 %v8364_v7  ;;  %11027 = vst [vmem:[#allocation84_spill] sm:$0xff] %v8372_v12  ;;  %v1614_v7 = vadd.f32 %v8097_v51, %v8241_v8 }
 0x2c7   :  { %v1042_v12 = vmul.f32 1.442695, %v1022_v32 }
 0x2c8   :  { %v8367_v19 = vpop.xlane.xlu1 %1666  ;;  %v1630_v42 = vmul.f32 0.2, %v1614_v7 }
 0x2c9   :  { %11025 = vst [vmem:[#allocation82_spill] sm:$0xff] %v8367_v19  ;;  %6957 = vpow2.f32 %v1042_v12 }
 0x2ca   :  { %1088 = vadd.xlane.f32.xlu0 %v8370_v31  ;;  %v10781_v31 = vsub.s32 3, %v7827_v26  ;;  %v1646_v51 = vmax.f32 %v1614_v7, %v1630_v42 }
 0x2cc   :  { %v8375_v38 = vpop.xlane.xlu1 %1670  ;;  %v8407_v12 = vsel %vm10813_vm2, %v1646_v51, -1e+30  ;;  %v11040_v51 = vld [vmem:[#allocation33_spill] sm:$0xff] }
 0x2cd   :  { %11028 = vst [vmem:[#allocation85_spill] sm:$0xff] %v8375_v38  ;;  %v2071_v13 = vpop.permute.xlu0 %2070 }
 0x2d0   :  { %v8377_v61 = vpop.xlane.xlu1 %1674 }
 0x2d1   :  { %11029 = vst [vmem:[#allocation86_spill] sm:$0xff] %v8377_v61  ;;  %v8379_v4 = vpop.permute.xlu0 %2082  ;;  %v11033_v61 = vld [vmem:[#allocation18_spill] sm:$0xff] }
 0x2d2   :  { %v8397_v55 = vrot.slane %v11033_v61, %v10781_v31  ;;  %11035 = vst [vmem:[#allocation18_spill] sm:$0xff] %v8407_v12 }
 0x2d3   :  { %v6958_v7 = vpop.eup %6957 }
 0x2d4   :  { %v8385_v19 = vpop.xlane.xlu1 %1678  ;;  %v2134_v14 = vadd.f32 %v8397_v55, %v2071_v13  ;;  %v8420_v26 = vmul.f32 %v6958_v7, %v7929_v47 }
 0x2d5   :  { %11031 = vst [vmem:[#allocation37_spill] sm:$0xff] %v8385_v19  ;;  %v8387_v25 = vpop.permute.xlu0 %2090 }
 0x2d6   :  { %11039 = vst [vmem:[#allocation91_spill] sm:$0xff] %v8420_v26 }
 0x2d8   :  { %v8390_v38 = vpop.xlane.xlu1 %1682 }
 0x2d9   :  { %11032 = vst [vmem:[#allocation87_spill] sm:$0xff] %v8390_v38  ;;  %v8392_v6 = vpop.permute.xlu0 %2098  ;;  %v1023_v38 = vsub.f32 %v11040_v51, %v8265_v40 }
 0x2dc   :  { %v2067_v10 = vpop.permute.xlu1 %2066 }
 0x2dd   :  { %v2133_v8 = vadd.f32 %v8397_v55, %v2067_v10  ;;  %v8400_v19 = vpop.permute.xlu0 %2106  ;;  %v2150_v10 = vmul.f32 0.2, %v2134_v14 }
 0x2df   :  { %v2149_v32 = vmul.f32 0.2, %v2133_v8 }
 0x2e0   :  { %6717 = vrot.lane.b32.xlu0 %v11034_v30, %s7468_s1 }
 0x2e1   :  { %1692 = vmax.xlane.f32.xlu1 %v8407_v12  ;;  %v8410_v61 = vpop.permute.xlu0 %2114  ;;  %v2165_v31 = vmax.f32 %v2133_v8, %v2149_v32  ;;  %v2166_v12 = vmax.f32 %v2134_v14, %v2150_v10  ;;  %v11044_v10 = vld [vmem:[#allocation10_spill] sm:$0xff] }
 0x2e2   :  { %11036 = vst [vmem:[#allocation88_spill] sm:$0xff] %v8410_v61  ;;  %v11041_v61 = vld [vmem:[#allocation38_spill] sm:$0xff] }
 0x2e3   :  { %v8414_v42 = vsel %vm65_vm4, %v2165_v31, -1e+30  ;;  %v1044_v31 = vmul.f32 1.442695, %v1023_v38  ;;  %v1025_v50 = vsub.f32 %v11041_v61, %v8284_v20  ;;  %v2075_v20 = vpop.permute.xlu1 %2074 }
 0x2e4   :  { %11037 = vst [vmem:[#allocation89_spill] sm:$0xff] %v8414_v42 }
 0x2e5   :  { %2197 = vmax.xlane.f32.xlu1 %v8414_v42  ;;  %v8417_v13 = vpop.permute.xlu0 %2122  ;;  %v8429_v42 = vsel %vm66_vm3, %v2166_v12, -1e+30  ;;  %6959 = vpow2.f32 %v1044_v31  ;;  %v1048_v40 = vmul.f32 1.442695, %v1025_v50  ;;  %v11046_v50 = vld [vmem:[#allocation34_spill] sm:$0xff]  ;;  %v11048_v31 = vld [vmem:[#allocation43_spill] sm:$0xff] }
 0x2e6   :  { %11038 = vst [vmem:[#allocation90_spill] sm:$0xff] %v8417_v13  ;;  %11042 = vst [vmem:[#allocation33_spill] sm:$0xff] %v8429_v42  ;;  %v1024_v61 = vsub.f32 %v11046_v50, %v8267_v22 }
 0x2e7   :  { %6961 = vpow2.f32 %v1048_v40  ;;  %v2079_v12 = vpop.permute.xlu1 %2078  ;;  %v1027_v40 = vsub.f32 %v11048_v31, %v8296_v52 }
 0x2e8   :  { %v1046_v51 = vmul.f32 1.442695, %v1024_v61 }
 0x2e9   :  { %1090 = vadd.xlane.f32.xlu1 %v8420_v26  ;;  %v6703_v8 = vpop.permute.xlu0 %6702  ;;  %v1052_v22 = vmul.f32 1.442695, %v1027_v40 }
 0x2ea   :  { %v6705_v32 = vunpack.i.h.bf16 %v6703_v8  ;;  %v6704_v30 = vunpack.i.l.bf16 %v6703_v8  ;;  %6963 = vpow2.f32 %v1046_v51  ;;  %v2136_v51 = vadd.f32 %v8397_v55, %v2079_v12  ;;  %v11051_v12 = vld [vmem:[#allocation48_spill] sm:$0xff] }
 0x2eb   :  { %6965 = vpow2.f32 %v1052_v22  ;;  %v1029_v60 = vsub.f32 %v11051_v12, %v8305_v2 }
 0x2ec   :  { %v6257_v13 = vpack.c.bf16 %v6705_v32, %v6704_v30 }
 0x2ed   :  { %2199 = vmax.xlane.f32.xlu1 %v8429_v42  ;;  %v11049_v42 = vld [vmem:[#allocation12_spill] sm:$0xff] }
 0x2ee   :  { %6258 = vmatprep.subr.bf16.mxu0 %v6257_v13 }
 0x2ef   :  { %6260 = vmatpush3.bf16.msra.mxu0 %v6257_v13  ;;  %v6960_v14 = vpop.eup %6959  ;;  %v8444_v13 = vpop.permute.xlu1 %2086 }
 0x2f0   :  { %v8433_v7 = vmul.f32 %v6960_v14, %v7934_v48 }
 0x2f1   :  { %v6962_v38 = vpop.eup %6961 }
 0x2f2   :  { %11043 = vst [vmem:[#allocation38_spill] sm:$0xff] %v8433_v7  ;;  %v8439_v30 = vmul.f32 %v6962_v38, %v7972_v53  ;;  %v2135_v38 = vadd.f32 %v8397_v55, %v2075_v20  ;;  %v11050_v20 = vld [vmem:[#allocation41_spill] sm:$0xff] }
 0x2f3   :  { %v8446_v8 = vpop.permute.xlu1 %2094  ;;  %v1026_v31 = vsub.f32 %v11050_v20, %v8276_v37  ;;  %v1056_v37 = vmul.f32 1.442695, %v1029_v60 }
 0x2f4   :  { %11045 = vst [vmem:[#allocation92_spill] sm:$0xff] %v8439_v30  ;;  %v6964_v61 = vpop.eup %6963 }
 0x2f5   :  { %v8461_v52 = vmul.f32 %v6964_v61, %v7931_v39  ;;  %v1050_v58 = vmul.f32 1.442695, %v1026_v31  ;;  %v6966_v22 = vpop.eup %6965 }
 0x2f6   :  { %v8483_v2 = vmul.f32 %v6966_v22, %v8012_v62  ;;  %v11058_v22 = vld [vmem:[#allocation14_spill] sm:$0xff] }
 0x2f7   :  { %v8452_v14 = vpop.permute.xlu1 %2102  ;;  %6967 = vpow2.f32 %v1050_v58 }
 0x2f8   :  { %6969 = vpow2.f32 %v1056_v37 }
 0x2fb   :  { %v8458_v26 = vpop.permute.xlu1 %2110 }
 0x2fe   :  { %6722 = vrot.lane.b32.xlu1 %v11044_v10, %s7468_s1 }
 0x2ff   :  { %1092 = vadd.xlane.f32.xlu0 %v8433_v7  ;;  %v2151_v7 = vmul.f32 0.2, %v2135_v38 }
 0x301   :  { %v2167_v40 = vmax.f32 %v2135_v38, %v2151_v7  ;;  %v6968_v58 = vpop.eup %6967 }
 0x302   :  { %v8491_v61 = vmul.f32 %v6968_v58, %v7994_v27 }
 0x303   :  { %1096 = vadd.xlane.f32.xlu0 %v8439_v30 }
 0x316   :  { %v8448_v32 = vpop.xlane.xlu0 %1684 }
 0x317   :  { %11047 = vst [vmem:[#allocation34_spill] sm:$0xff] %v8448_v32 }
 0x319   :  { %6727 = vrot.lane.b32.xlu0 %v11049_v42, %s7468_s1  ;;  %v2152_v42 = vmul.f32 0.2, %v2136_v51 }
 0x31a   :  { %v6708_v10 = vpop.permute.xlu0 %6707 }
 0x31b   :  { %v6710_v50 = vunpack.i.h.bf16 %v6708_v10  ;;  %v6709_v30 = vunpack.i.l.bf16 %v6708_v10  ;;  %v8466_v10 = vpop.permute.xlu1 %2118 }
 0x31d   :  { %v6261_v32 = vpack.c.bf16 %v6710_v50, %v6709_v30  ;;  %v8472_v30 = vsel %vm67_vm6, %v2167_v40, -1e+30 }
 0x31e   :  { %11052 = vst [vmem:[#allocation43_spill] sm:$0xff] %v8472_v30 }
 0x31f   :  { %6262 = vmatprep.subr.bf16.mxu0 %v6261_v32  ;;  %v8475_v50 = vpop.permute.xlu1 %2126 }
 0x320   :  { %6264 = vmatpush3.bf16.msra.mxu0 %v6261_v32  ;;  %v2168_v32 = vmax.f32 %v2136_v51, %v2152_v42  ;;  %v6970_v51 = vpop.eup %6969 }
 0x321   :  { %v8497_v31 = vmul.f32 %v6970_v51, %v8040_v1  ;;  %v11059_v51 = vld [vmem:[#allocation44_spill] sm:$0xff] }
 0x322   :  { %1094 = vadd.xlane.f32.xlu1 %v8461_v52  ;;  %v8479_v7 = vsel %vm10792_vm5, %v2168_v32, -1e+30 }
 0x323   :  { %11053 = vst [vmem:[#allocation41_spill] sm:$0xff] %v8479_v7  ;;  %11057 = vst [vmem:[#allocation95_spill] sm:$0xff] %v8497_v31 }
 0x326   :  { %2201 = vmax.xlane.f32.xlu1 %v8472_v30 }
 0x32a   :  { %2203 = vmax.xlane.f32.xlu1 %v8479_v7 }
 0x32d   :  { %v8485_v38 = vpop.xlane.xlu1 %1686 }
 0x32e   :  { %11054 = vst [vmem:[#allocation48_spill] sm:$0xff] %v8485_v38  ;;  %1100 = vadd.xlane.f32.xlu1 %v8483_v2 }
 0x331   :  { %v8488_v42 = vpop.xlane.xlu1 %1688 }
 0x332   :  { %11055 = vst [vmem:[#allocation93_spill] sm:$0xff] %v8488_v42 }
 0x335   :  { %v1083_v60 = vpop.xlane.xlu1 %1082 }
 0x336   :  { %6971 = vrcp.f32 %v1083_v60  ;;  %vm1114_vm5 = vcmp.gt.f32.partialorder %v1083_v60, 0.0 }
 0x338   :  { %1098 = vadd.xlane.f32.xlu0 %v8491_v61 }
 0x339   :  { %v8494_v20 = vpop.xlane.xlu1 %1690 }
 0x33a   :  { %11056 = vst [vmem:[#allocation94_spill] sm:$0xff] %v8494_v20  ;;  %v1028_v20 = vsub.f32 %v11059_v51, %v8282_v17  ;;  %v2138_v51 = vadd.f32 %v8397_v55, %v8444_v13  ;;  %v2137_v13 = vadd.f32 %v8397_v55, %v8379_v4 }
 0x33c   :  { %1104 = vadd.xlane.f32.xlu0 %v8497_v31  ;;  %v11060_v31 = vld [vmem:[#allocation49_spill] sm:$0xff] }
 0x33d   :  { %v6713_v40 = vpop.permute.xlu1 %6712 }
 0x33e   :  { %v6715_v12 = vunpack.i.h.bf16 %v6713_v40  ;;  %v6714_v32 = vunpack.i.l.bf16 %v6713_v40  ;;  %v1054_v40 = vmul.f32 1.442695, %v1028_v20  ;;  %v1032_v20 = vsub.f32 %v8123_v5, %v8327_v46  ;;  %v11064_v5 = vld [vmem:[#allocation31_spill] sm:$0xff] }
 0x33f   :  { %6732 = vrot.lane.b32.xlu1 %v11058_v22, %s7468_s1  ;;  %v1030_v22 = vsub.f32 %v11060_v31, %v8286_v9  ;;  %v696_v46 = vsub.f32 %v11064_v5, %v8256_v21  ;;  %v2153_v21 = vmul.f32 0.2, %v2137_v13 }
 0x340   :  { %v6265_v37 = vpack.c.bf16 %v6715_v12, %v6714_v32  ;;  %v6972_v58 = vpop.eup %6971  ;;  %v11061_v12 = vld [vmem:[#allocation16_spill] sm:$0xff]  ;;  %6973 = vpow2.f32 %v1054_v40  ;;  %v1062_v40 = vmul.f32 1.442695, %v1032_v20  ;;  %v2140_v20 = vadd.f32 %v8397_v55, %v8446_v8  ;;  %v11068_v8 = vld [vmem:[#allocation39_spill] sm:$0xff] }
 0x341   :  { %v1146_v7 = vsel %vm1114_vm5, %v6972_v58, 0.0  ;;  %v1058_v32 = vmul.f32 1.442695, %v1030_v22  ;;  %v1033_v22 = vsub.f32 %v8113_v35, %v8322_v63  ;;  %v714_v63 = vmul.f32 1.442695, %v696_v46 }
 0x342   :  { %6266 = vmatprep.subr.bf16.mxu0 %v6265_v37  ;;  %v1162_v30 = vmul.f32 %v1146_v7, %v8309_v18  ;;  %v700_v5 = vsub.f32 %v11068_v8, %v8269_v43  ;;  %v2139_v46 = vadd.f32 %v8397_v55, %v8387_v25 }
 0x343   :  { %6268 = vmatpush3.bf16.msra.mxu0 %v6265_v37  ;;  %6975 = vpow2.f32 %v1058_v32 }
 0x344   :  { %5714 = vmatprep.mubr.f32.mxu0 %v1162_v30  ;;  %v11063_v30 = vld [vmem:[#allocation54_spill] sm:$0xff] }
 0x345   :  { %v1031_v7 = vsub.f32 %v11063_v30, %v8312_v59  ;;  %v2154_v30 = vmul.f32 0.2, %v2138_v51 }
 0x347   :  { %v1060_v37 = vmul.f32 1.442695, %v1031_v7  ;;  %v1064_v7 = vmul.f32 1.442695, %v1033_v22  ;;  %v2156_v22 = vmul.f32 0.2, %v2140_v20 }
 0x349   :  { %6977 = vpow2.f32 %v1060_v37  ;;  %v2172_v43 = vmax.f32 %v2140_v20, %v2156_v22  ;;  %v2142_v20 = vadd.f32 %v8397_v55, %v8452_v14 }
 0x34a   :  { %v6974_v31 = vpop.eup %6973  ;;  %6979 = vpow2.f32 %v1062_v40  ;;  %v2169_v40 = vmax.f32 %v2137_v13, %v2153_v21  ;;  %v2141_v13 = vadd.f32 %v8397_v55, %v8392_v6  ;;  %v2155_v21 = vmul.f32 0.2, %v2139_v46 }
 0x34b   :  { %v8503_v42 = vpop.xlane.xlu0 %1084  ;;  %v8526_v59 = vmul.f32 %v6974_v31, %v10997_v56  ;;  %6981 = vpow2.f32 %v1064_v7  ;;  %v8579_v22 = vsel %vm72_vm10, %v2172_v43, -1e+30 }
 0x34c   :  { %6983 = vpow2.f32 %v714_v63  ;;  %vm1115_vm5 = vcmp.gt.f32.partialorder %v8503_v42, 0.0 }
 0x34d   :  { %v6976_v32 = vpop.eup %6975 }
 0x34e   :  { %v8534_v35 = vmul.f32 %v6976_v32, %v11005_v41 }
 0x34f   :  { %v8507_v38 = vpop.xlane.xlu0 %1086 }
 0x352   :  { %6737 = vrot.lane.b32.xlu0 %v11061_v12, %s7468_s1 }
 0x353   :  { %v8513_v60 = vpop.xlane.xlu0 %1694 }
 0x354   :  { %11062 = vst [vmem:[#allocation44_spill] sm:$0xff] %v8513_v60 }
 0x357   :  { %v8515_v18 = vpop.xlane.xlu0 %1088 }
 0x35b   :  { %v6718_v17 = vpop.permute.xlu0 %6717 }
 0x35c   :  { %v6720_v58 = vunpack.i.h.bf16 %v6718_v17  ;;  %v6719_v9 = vunpack.i.l.bf16 %v6718_v17  ;;  %v11065_v17 = vld [vmem:[#allocation29_spill] sm:$0xff] }
 0x35d   :  { %v694_v37 = vsub.f32 %v11065_v17, %v8247_v15 }
 0x35e   :  { %v6269_v60 = vpack.c.bf16 %v6720_v58, %v6719_v9  ;;  %v6978_v58 = vpop.eup %6977  ;;  %v11067_v9 = vld [vmem:[#allocation21_spill] sm:$0xff] }
 0x35f   :  { %v695_v31 = vsub.f32 %v11067_v9, %v8244_v11  ;;  %v8549_v15 = vmul.f32 %v6978_v58, %v8068_v57  ;;  %v6980_v32 = vpop.eup %6979  ;;  %v11070_v11 = vld [vmem:[#allocation26_spill] sm:$0xff]  ;;  %v11073_v58 = vld [vmem:[#allocation32_spill] sm:$0xff]  ;;  %11074 = vst [vmem:[#allocation21_spill] sm:$0xff] %v8579_v22 }
 0x360   :  { %6270 = vmatprep.subr.bf16.mxu0 %v6269_v60  ;;  %v697_v63 = vsub.f32 %v11070_v11, %v8254_v16  ;;  %v8568_v25 = vmul.f32 %v6980_v32, %v8105_v29  ;;  %v6982_v17 = vpop.eup %6981  ;;  %v698_v9 = vsub.f32 %v11073_v58, %v8258_v23  ;;  %v2171_v23 = vmax.f32 %v2139_v46, %v2155_v21 }
 0x361   :  { %6272 = vmatpush3.bf16.msra.mxu0 %v6269_v60  ;;  %v2170_v60 = vmax.f32 %v2138_v51, %v2154_v30  ;;  %v710_v51 = vmul.f32 1.442695, %v694_v37  ;;  %v712_v7 = vmul.f32 1.442695, %v695_v31  ;;  %v722_v37 = vmul.f32 1.442695, %v700_v5  ;;  %v6984_v6 = vpop.eup %6983 }
 0x362   :  { %v716_v31 = vmul.f32 1.442695, %v697_v63  ;;  %v718_v8 = vmul.f32 1.442695, %v698_v9  ;;  %v11075_v5 = vld [vmem:[#allocation35_spill] sm:$0xff]  ;;  %v8591_v14 = vmul.f32 %v6984_v6, %v7906_v3  ;;  %v701_v21 = vsub.f32 %v8137_v36, %v8332_v44 }
 0x363   :  { %1102 = vadd.xlane.f32.xlu1 %v8526_v59  ;;  %v8543_v4 = vsel %vm70_vm9, %v2170_v60, -1e+30  ;;  %6985 = vpow2.f32 %v710_v51  ;;  %v8564_v60 = vsel %vm69_vm7, %v2169_v40, -1e+30  ;;  %v2157_v51 = vmul.f32 0.2, %v2141_v13 }
 0x364   :  { %11066 = vst [vmem:[#allocation49_spill] sm:$0xff] %v8543_v4  ;;  %11071 = vst [vmem:[#allocation31_spill] sm:$0xff] %v8564_v60  ;;  %6987 = vpow2.f32 %v712_v7  ;;  %v8583_v40 = vmul.f32 %v6982_v17, %v8099_v34  ;;  %v699_v7 = vsub.f32 %v11075_v5, %v8271_v28  ;;  %v2158_v11 = vmul.f32 0.2, %v2142_v20  ;;  %v11076_v17 = vld [vmem:[#allocation52_spill] sm:$0xff] }
 0x365   :  { %6989 = vpow2.f32 %v722_v37  ;;  %v2173_v63 = vmax.f32 %v2141_v13, %v2157_v51  ;;  %v704_v37 = vsub.f32 %v11076_v17, %v8315_v45  ;;  %v8600_v46 = vsel %vm71_vm8, %v2171_v23, -1e+30 }
 0x366   :  { %6991 = vpow2.f32 %v716_v31  ;;  %11078 = vst [vmem:[#allocation26_spill] sm:$0xff] %v8600_v46  ;;  %v720_v28 = vmul.f32 1.442695, %v699_v7  ;;  %v2143_v13 = vadd.f32 %v8397_v55, %v8400_v19  ;;  %v2174_v45 = vmax.f32 %v2142_v20, %v2158_v11 }
 0x367   :  { %1106 = vadd.xlane.f32.xlu1 %v8534_v35  ;;  %6993 = vpow2.f32 %v718_v8  ;;  %v8609_v9 = vsel %vm73_vm11, %v2173_v63, -1e+30  ;;  %v730_v51 = vmul.f32 1.442695, %v704_v37  ;;  %v11080_v8 = vld [vmem:[#allocation50_spill] sm:$0xff]  ;;  %v2144_v20 = vadd.f32 %v8397_v55, %v8458_v26 }
 0x368   :  { %11079 = vst [vmem:[#allocation32_spill] sm:$0xff] %v8609_v9  ;;  %6995 = vpow2.f32 %v720_v28  ;;  %v702_v36 = vsub.f32 %v11080_v8, %v8299_v49  ;;  %v724_v7 = vmul.f32 1.442695, %v701_v21  ;;  %v2159_v63 = vmul.f32 0.2, %v2143_v13  ;;  %v11082_v28 = vld [vmem:[#allocation61_spill] sm:$0xff] }
 0x369   :  { %v8622_v11 = vsel %vm74_vm12, %v2174_v45, -1e+30  ;;  %6997 = vpow2.f32 %v730_v51  ;;  %v703_v21 = vsub.f32 %v11082_v28, %v8336_v54  ;;  %v2160_v45 = vmul.f32 0.2, %v2144_v20  ;;  %v11083_v54 = vld [vmem:[#allocation53_spill] sm:$0xff] }
 0x36a   :  { %11081 = vst [vmem:[#allocation35_spill] sm:$0xff] %v8622_v11  ;;  %v726_v37 = vmul.f32 1.442695, %v702_v36  ;;  %6999 = vpow2.f32 %v724_v7  ;;  %v11084_v36 = vld [vmem:[#allocation63_spill] sm:$0xff] }
 0x36b   :  { %2207 = vmax.xlane.f32.xlu1 %v8543_v4  ;;  %v728_v51 = vmul.f32 1.442695, %v703_v21 }
 0x36c   :  { %7001 = vpow2.f32 %v726_v37  ;;  %v11088_v37 = vld [vmem:[#allocation56_spill] sm:$0xff] }
 0x36d   :  { %v6986_v43 = vpop.eup %6985  ;;  %7003 = vpow2.f32 %v728_v51 }
 0x36e   :  { %v8555_v30 = vpop.xlane.xlu1 %1692  ;;  %v6988_v6 = vpop.eup %6987  ;;  %v8613_v31 = vmul.f32 %v6986_v43, %v7868_v0 }
 0x36f   :  { %11069 = vst [vmem:[#allocation54_spill] sm:$0xff] %v8555_v30  ;;  %1108 = vadd.xlane.f32.xlu1 %v8549_v15  ;;  %v6990_v19 = vpop.eup %6989  ;;  %v8626_v43 = vmul.f32 %v6988_v6, %v7845_v33 }
 0x370   :  { %v6992_v17 = vpop.eup %6991  ;;  %v8632_v26 = vmul.f32 %v6990_v19, %v7931_v39 }
 0x371   :  { %2205 = vmax.xlane.f32.xlu0 %v8564_v60  ;;  %v6994_v8 = vpop.eup %6993  ;;  %v8636_v6 = vmul.f32 %v6992_v17, %v7870_v24  ;;  %v11087_v17 = vld [vmem:[#allocation45_spill] sm:$0xff]  ;;  %v11103_v60 = vld [vmem:[#allocation4_spill] sm:$0xff] }
 0x372   :  { %v8570_v16 = vpop.xlane.xlu1 %2197  ;;  %v706_v28 = vsub.f32 %v11088_v37, %v11087_v17  ;;  %v11091_v17 = vld [vmem:[#allocation65_spill] sm:$0xff] }
 0x373   :  { %11072 = vst [vmem:[#allocation29_spill] sm:$0xff] %v8570_v16  ;;  %1110 = vadd.xlane.f32.xlu1 %v8568_v25  ;;  %v11104_v16 = vld [vmem:[#allocation90_spill] sm:$0xff] }
 0x374   :  { %v734_v51 = vmul.f32 1.442695, %v706_v28  ;;  %v11092_v28 = vld [vmem:[#allocation27_spill] sm:$0xff] }
 0x375   :  { %2211 = vmax.xlane.f32.xlu0 %v8579_v22 }
 0x376   :  { %v8585_v32 = vpop.xlane.xlu1 %1090 }
 0x377   :  { %1112 = vadd.xlane.f32.xlu1 %v8583_v40 }
 0x379   :  { %762 = vadd.xlane.f32.xlu0 %v8591_v14 }
 0x37a   :  { %v8596_v58 = vpop.xlane.xlu1 %2199 }
 0x37b   :  { %11077 = vst [vmem:[#allocation39_spill] sm:$0xff] %v8596_v58  ;;  %2209 = vmax.xlane.f32.xlu1 %v8600_v46  ;;  %v2147_v58 = vadd.f32 %v8397_v55, %v11104_v16 }
 0x37d   :  { %2213 = vmax.xlane.f32.xlu0 %v8609_v9 }
 0x37e   :  { %v6723_v23 = vpop.permute.xlu1 %6722 }
 0x37f   :  { %v6725_v44 = vunpack.i.h.bf16 %v6723_v23  ;;  %v6724_v5 = vunpack.i.l.bf16 %v6723_v23  ;;  %758 = vadd.xlane.f32.xlu1 %v8613_v31  ;;  %v2175_v23 = vmax.f32 %v2143_v13, %v2159_v63  ;;  %v2176_v13 = vmax.f32 %v2144_v20, %v2160_v45  ;;  %v6996_v63 = vpop.eup %6995 }
 0x380   :  { %v6998_v21 = vpop.eup %6997  ;;  %v8664_v45 = vmul.f32 %v6996_v63, %v7934_v48 }
 0x381   :  { %2215 = vmax.xlane.f32.xlu0 %v8622_v11  ;;  %v6273_v49 = vpack.c.bf16 %v6725_v44, %v6724_v5  ;;  %v705_v44 = vsub.f32 %v11084_v36, %v11083_v54  ;;  %v11085_v5 = vld [vmem:[#allocation88_spill] sm:$0xff]  ;;  %v8645_v7 = vsel %vm75_vm13, %v2175_v23, -1e+30  ;;  %v2146_v23 = vadd.f32 %v8397_v55, %v8466_v10  ;;  %v11090_v10 = vld [vmem:[#allocation77_spill] sm:$0xff] }
 0x382   :  { %v2145_v19 = vadd.f32 %v8397_v55, %v11085_v5  ;;  %11086 = vst [vmem:[#allocation52_spill] sm:$0xff] %v8645_v7  ;;  %v8660_v20 = vsel %vm76_vm14, %v2176_v13, -1e+30  ;;  %v707_v37 = vsub.f32 %v11091_v17, %v11090_v10 }
 0x383   :  { %760 = vadd.xlane.f32.xlu1 %v8626_v43  ;;  %6274 = vmatprep.subr.bf16.mxu0 %v6273_v49  ;;  %v732_v54 = vmul.f32 1.442695, %v705_v44  ;;  %11089 = vst [vmem:[#allocation50_spill] sm:$0xff] %v8660_v20  ;;  %v8668_v44 = vmul.f32 %v6998_v21, %v10997_v56  ;;  %v2162_v22 = vmul.f32 0.2, %v2146_v23  ;;  %v11093_v21 = vld [vmem:[#allocation59_spill] sm:$0xff] }
 0x384   :  { %6276 = vmatpush3.bf16.msra.mxu0 %v6273_v49  ;;  %v8649_v49 = vmul.f32 %v6994_v8, %v7929_v47  ;;  %v2161_v36 = vmul.f32 0.2, %v2145_v19  ;;  %v7000_v8 = vpop.eup %6999 }
 0x385   :  { %770 = vadd.xlane.f32.xlu0 %v8632_v26  ;;  %7005 = vpow2.f32 %v732_v54  ;;  %v7002_v11 = vpop.eup %7001  ;;  %v8676_v63 = vmul.f32 %v7000_v8, %v7972_v53  ;;  %v736_v54 = vmul.f32 1.442695, %v707_v37  ;;  %v2178_v17 = vmax.f32 %v2146_v23, %v2162_v22  ;;  %v11095_v37 = vld [vmem:[#allocation80_spill] sm:$0xff] }
 0x386   :  { %v2177_v13 = vmax.f32 %v2145_v19, %v2161_v36  ;;  %7007 = vpow2.f32 %v734_v51  ;;  %v7004_v19 = vpop.eup %7003  ;;  %v8687_v8 = vmul.f32 %v7002_v11, %v7994_v27 }
 0x387   :  { %764 = vadd.xlane.f32.xlu1 %v8636_v6  ;;  %7009 = vpow2.f32 %v736_v54  ;;  %v8698_v22 = vmul.f32 %v7004_v19, %v8012_v62 }
 0x388   :  { %v8683_v10 = vsel %vm10828_vm15, %v2177_v13, -1e+30  ;;  %v8694_v13 = vsel %vm10814_vm1, %v2178_v17, -1e+30 }
 0x389   :  { %2217 = vmax.xlane.f32.xlu0 %v8645_v7  ;;  %11094 = vst [vmem:[#allocation61_spill] sm:$0xff] %v8683_v10  ;;  %11097 = vst [vmem:[#allocation53_spill] sm:$0xff] %v8694_v13 }
 0x38b   :  { %766 = vadd.xlane.f32.xlu1 %v8649_v49 }
 0x38c   :  { %v8656_v5 = vpop.xlane.xlu0 %1092 }
 0x38d   :  { %2219 = vmax.xlane.f32.xlu0 %v8660_v20  ;;  %v708_v20 = vsub.f32 %v11093_v21, %v11092_v28  ;;  %v11096_v28 = vld [vmem:[#allocation67_spill] sm:$0xff]  ;;  %vm1119_vm1 = vcmp.gt.f32.partialorder %v8656_v5, 0.0 }
 0x38e   :  { %v709_v21 = vsub.f32 %v11096_v28, %v11095_v37  ;;  %v11098_v28 = vld [vmem:[#allocation2_spill] sm:$0xff] }
 0x38f   :  { %768 = vadd.xlane.f32.xlu1 %v8664_v45  ;;  %v738_v4 = vmul.f32 1.442695, %v708_v20 }
 0x390   :  { %v8672_v7 = vpop.xlane.xlu0 %1096 }
 0x391   :  { %778 = vadd.xlane.f32.xlu0 %v8668_v44  ;;  %7011 = vpow2.f32 %v738_v4 }
 0x393   :  { %772 = vadd.xlane.f32.xlu1 %v8676_v63 }
 0x394   :  { %v6728_v9 = vpop.permute.xlu0 %6727 }
 0x395   :  { %v6730_v36 = vunpack.i.h.bf16 %v6728_v9  ;;  %v6729_v46 = vunpack.i.l.bf16 %v6728_v9  ;;  %2221 = vmax.xlane.f32.xlu0 %v8683_v10  ;;  %v7006_v9 = vpop.eup %7005 }
 0x396   :  { %v7008_v11 = vpop.eup %7007  ;;  %v8702_v23 = vmul.f32 %v7006_v9, %v8040_v1  ;;  %v11108_v1 = vld [vmem:[#allocation62_spill] sm:$0xff] }
 0x397   :  { %774 = vadd.xlane.f32.xlu1 %v8687_v8  ;;  %v6277_v51 = vpack.c.bf16 %v6730_v36, %v6729_v46  ;;  %v740_v46 = vmul.f32 1.442695, %v709_v21  ;;  %v8706_v20 = vmul.f32 %v7008_v11, %v11005_v41  ;;  %v7010_v54 = vpop.eup %7009  ;;  %v11101_v11 = vld [vmem:[#allocation82_spill] sm:$0xff] }
 0x398   :  { %v8710_v17 = vmul.f32 %v7010_v54, %v8068_v57  ;;  %v11102_v54 = vld [vmem:[#allocation69_spill] sm:$0xff] }
 0x399   :  { %2223 = vmax.xlane.f32.xlu0 %v8694_v13  ;;  %6278 = vmatprep.subr.bf16.mxu0 %v6277_v51  ;;  %7013 = vpow2.f32 %v740_v46 }
 0x39a   :  { %6280 = vmatpush3.bf16.msra.mxu0 %v6277_v51  ;;  %7015 = vrcp.f32 %v8503_v42 }
 0x39b   :  { %776 = vadd.xlane.f32.xlu1 %v8698_v22  ;;  %v7012_v19 = vpop.eup %7011  ;;  %7017 = vrcp.f32 %v8507_v38 }
 0x39c   :  { %v8714_v4 = vmul.f32 %v7012_v19, %v8105_v29  ;;  %v1697_v19 = vsub.f32 %v11102_v54, %v11101_v11  ;;  %v11105_v54 = vld [vmem:[#allocation30_spill] sm:$0xff] }
 0x39f   :  { %780 = vadd.xlane.f32.xlu1 %v8702_v23 }
 0x3a3   :  { %782 = vadd.xlane.f32.xlu1 %v8706_v20  ;;  %v7014_v36 = vpop.eup %7013 }
 0x3a4   :  { %v8718_v51 = vmul.f32 %v7014_v36, %v8099_v34 }
 0x3a7   :  { %784 = vadd.xlane.f32.xlu1 %v8710_v17 }
 0x3ab   :  { %786 = vadd.xlane.f32.xlu1 %v8714_v4 }
 0x3af   :  { %v8720_v37 = vpop.xlane.xlu1 %1094  ;;  %788 = vadd.xlane.f32.xlu1 %v8718_v51  ;;  %6742 = vrot.lane.b32.xlu0 %v11098_v28, %s7469_s28  ;;  %v1714_v28 = vmul.f32 1.442695, %v1697_v19  ;;  %v11106_v19 = vld [vmem:[#allocation60_spill] sm:$0xff] }
 0x3b1   :  { %7019 = vpow2.f32 %v1714_v28  ;;  %v7016_v28 = vpop.eup %7015 }
 0x3b2   :  { %7021 = vrcp.f32 %v8515_v18  ;;  %v7018_v57 = vpop.eup %7017  ;;  %v1147_v29 = vsel %vm1115_vm5, %v7016_v28, 0.0  ;;  %vm1117_vm5 = vcmp.gt.f32.partialorder %v8515_v18, 0.0  ;;  %v11116_v18 = vld [vmem:[#allocation83_spill] sm:$0xff] }
 0x3b3   :  { %v8725_v21 = vpop.xlane.xlu1 %2201  ;;  %7023 = vrcp.f32 %v8585_v32 }
 0x3b4   :  { %11099 = vst [vmem:[#allocation63_spill] sm:$0xff] %v8725_v21  ;;  %v2148_v21 = vadd.f32 %v8397_v55, %v8475_v50  ;;  %7025 = vrcp.f32 %v8656_v5  ;;  %v11118_v5 = vld [vmem:[#allocation7_spill] sm:$0xff] }
 0x3b5   :  { %7027 = vrcp.f32 %v8720_v37 }
 0x3b6   :  { %7029 = vrcp.f32 %v8672_v7 }
 0x3b7   :  { %v8727_v9 = vpop.xlane.xlu1 %2203 }
 0x3b8   :  { %11100 = vst [vmem:[#allocation88_spill] sm:$0xff] %v8727_v9  ;;  %v2163_v9 = vmul.f32 0.2, %v2147_v58 }
 0x3bb   :  { %v8729_v46 = vpop.xlane.xlu1 %1100  ;;  %v7020_v12 = vpop.eup %7019 }
 0x3bf   :  { %v6733_v13 = vpop.permute.xlu1 %6732 }
 0x3c0   :  { %v6735_v36 = vunpack.i.h.bf16 %v6733_v13  ;;  %v6734_v10 = vunpack.i.l.bf16 %v6733_v13  ;;  %6747 = vrot.lane.b32.xlu1 %v11103_v60, %s7469_s28  ;;  %v2164_v13 = vmul.f32 0.2, %v2148_v21 }
 0x3c2   :  { %v6281_v41 = vpack.c.bf16 %v6735_v36, %v6734_v10  ;;  %v2179_v10 = vmax.f32 %v2147_v58, %v2163_v9  ;;  %v1696_v36 = vsub.f32 %v11106_v19, %v11105_v54  ;;  %v2180_v50 = vmax.f32 %v2148_v21, %v2164_v13  ;;  %v11107_v9 = vld [vmem:[#allocation25_spill] sm:$0xff]  ;;  %v7022_v13 = vpop.eup %7021 }
 0x3c3   :  { %v1698_v54 = vsub.f32 %v11108_v1, %v11107_v9  ;;  %v7024_v1 = vpop.eup %7023  ;;  %v1149_v28 = vsel %vm1117_vm5, %v7022_v13, 0.0  ;;  %vm1120_vm5 = vcmp.gt.f32.partialorder %v8720_v37, 0.0 }
 0x3c4   :  { %6282 = vmatprep.subr.bf16.mxu0 %v6281_v41  ;;  %v1712_v58 = vmul.f32 1.442695, %v1696_v36  ;;  %v8764_v21 = vsel %vm10827_vm0, %v2180_v50, -1e+30  ;;  %v8772_v36 = vmul.f32 %v7020_v12, %v7845_v33  ;;  %v11115_v12 = vld [vmem:[#allocation5_spill] sm:$0xff]  ;;  %v1165_v13 = vmul.f32 %v1149_v28, %v11116_v18 }
 0x3c5   :  { %v8741_v11 = vpop.xlane.xlu0 %1098  ;;  %6284 = vmatpush3.bf16.msra.mxu0 %v6281_v41  ;;  %v8753_v41 = vsel %vm10813_vm2, %v2179_v10, -1e+30  ;;  %vm1116_vm2 = vcmp.gt.f32.partialorder %v8507_v38, 0.0  ;;  %11109 = vst [vmem:[#allocation45_spill] sm:$0xff] %v8764_v21  ;;  %v1716_v42 = vmul.f32 1.442695, %v1698_v54  ;;  %v7026_v54 = vpop.eup %7025 }
 0x3c6   :  { %7031 = vrcp.f32 %v8741_v11  ;;  %v1148_v10 = vsel %vm1116_vm2, %v7018_v57, 0.0  ;;  %v11111_v38 = vld [vmem:[#allocation3_spill] sm:$0xff]  ;;  %v11113_v57 = vld [vmem:[#allocation70_spill] sm:$0xff]  ;;  %vm1118_vm2 = vcmp.gt.f32.partialorder %v8585_v32, 0.0  ;;  %v1151_v32 = vsel %vm1119_vm1, %v7026_v54, 0.0  ;;  %v11121_v54 = vld [vmem:[#allocation92_spill] sm:$0xff] }
 0x3c7   :  { %7033 = vpow2.f32 %v1712_v58  ;;  %v11114_v58 = vld [vmem:[#allocation78_spill] sm:$0xff]  ;;  %vm1122_vm1 = vcmp.gt.f32.partialorder %v8741_v11, 0.0 }
 0x3c8   :  { %7035 = vrcp.f32 %v8729_v46  ;;  %v1164_v9 = vmul.f32 %v1148_v10, %v11114_v58  ;;  %v11117_v10 = vld [vmem:[#allocation91_spill] sm:$0xff] }
 0x3c9   :  { %v8745_v16 = vpop.xlane.xlu0 %1104  ;;  %7037 = vpow2.f32 %v1716_v42  ;;  %v11119_v42 = vld [vmem:[#allocation38_spill] sm:$0xff] }
 0x3cd   :  { %v6738_v55 = vpop.permute.xlu0 %6737 }
 0x3ce   :  { %v6740_v60 = vunpack.i.h.bf16 %v6738_v55  ;;  %v6739_v30 = vunpack.i.l.bf16 %v6738_v55  ;;  %2225 = vmax.xlane.f32.xlu0 %v8753_v41  ;;  %v11112_v55 = vld [vmem:[#allocation85_spill] sm:$0xff] }
 0x3cf   :  { %v1699_v50 = vsub.f32 %v11113_v57, %v11112_v55 }
 0x3d0   :  { %v6285_v19 = vpack.c.bf16 %v6740_v60, %v6739_v30  ;;  %v11110_v30 = vld [vmem:[#allocation75_spill] sm:$0xff] }
 0x3d1   :  { %v1163_v60 = vmul.f32 %v1147_v29, %v11110_v30  ;;  %v7028_v29 = vpop.eup %7027  ;;  %v1718_v30 = vmul.f32 1.442695, %v1699_v50 }
 0x3d2   :  { %2227 = vmax.xlane.f32.xlu0 %v8764_v21  ;;  %6286 = vmatprep.subr.bf16.mxu0 %v6285_v19  ;;  %v7030_v55 = vpop.eup %7029  ;;  %v1152_v57 = vsel %vm1120_vm5, %v7028_v29, 0.0  ;;  %vm1123_vm5 = vcmp.gt.f32.partialorder %v8729_v46, 0.0  ;;  %v11169_v21 = vld [vmem:[#allocation43_spill] sm:$0xff] }
 0x3d3   :  { %6288 = vmatpush3.bf16.msra.mxu0 %v6285_v19  ;;  %v1150_v19 = vsel %vm1118_vm2, %v7024_v1, 0.0  ;;  %vm1121_vm2 = vcmp.gt.f32.partialorder %v8672_v7, 0.0  ;;  %7039 = vpow2.f32 %v1718_v30  ;;  %v1168_v37 = vmul.f32 %v1152_v57, %v8461_v52  ;;  %v11120_v7 = vld [vmem:[#allocation9_spill] sm:$0xff]  ;;  %v11122_v52 = vld [vmem:[#allocation11_spill] sm:$0xff]  ;;  %v11127_v57 = vld [vmem:[#allocation76_spill] sm:$0xff] }
 0x3d4   :  { %6290 = vmatprep.subr.bf16.mxu0 %v11111_v38  ;;  %v1166_v1 = vmul.f32 %v1150_v19, %v11117_v10  ;;  %v1153_v50 = vsel %vm1121_vm2, %v7030_v55, 0.0  ;;  %v11125_v10 = vld [vmem:[#allocation15_spill] sm:$0xff]  ;;  %7041 = vrcp.f32 %v8745_v16  ;;  %v11126_v55 = vld [vmem:[#allocation17_spill] sm:$0xff]  ;;  %vm1125_vm2 = vcmp.gt.f32.partialorder %v8745_v16, 0.0 }
 0x3d5   :  { %v1169_v19 = vmul.f32 %v1153_v50, %v11121_v54  ;;  %v11129_v54 = vld [vmem:[#allocation8_spill] sm:$0xff] }
 0x3d6   :  { %1762 = vadd.xlane.f32.xlu0 %v8772_v36  ;;  %5715 = vmatmul.mubr.f32.vlgmr.msra.gmra.mrb[34].mxu0 %v1163_v60  ;;  %v7032_v60 = vpop.eup %7031 }
 0x3d7   :  { %5717 = vmatprep.mubr.f32.mxu0 %v1164_v9  ;;  %6292 = vmatpush3.bf16.msra.mxu0 %v11111_v38  ;;  %v1167_v38 = vmul.f32 %v1151_v32, %v11119_v42  ;;  %v7034_v28 = vpop.eup %7033  ;;  %v1154_v9 = vsel %vm1122_vm1, %v7032_v60, 0.0  ;;  %v11128_v60 = vld [vmem:[#allocation64_spill] sm:$0xff] }
 0x3d8   :  { %6294 = vmatprep.subr.bf16.mxu0 %v11115_v12  ;;  %v7036_v58 = vpop.eup %7035  ;;  %v8797_v11 = vmul.f32 %v7034_v28, %v7868_v0 }
 0x3d9   :  { %v1155_v29 = vsel %vm1123_vm5, %v7036_v58, 0.0  ;;  %v7038_v18 = vpop.eup %7037 }
 0x3da   :  { %5718 = vmatmul.mubr.f32.gmra.mrb[36].mxu0 %v1165_v13  ;;  %v1171_v46 = vmul.f32 %v1155_v29, %v8483_v2  ;;  %v8804_v13 = vmul.f32 %v7038_v18, %v7906_v3  ;;  %v11124_v2 = vld [vmem:[#allocation6_spill] sm:$0xff] }
 0x3db   :  { %5720 = vmatprep.mubr.f32.mxu0 %v1166_v1  ;;  %6296 = vmatpush3.bf16.msra.mxu0 %v11115_v12  ;;  %v1170_v12 = vmul.f32 %v1154_v9, %v8491_v61  ;;  %v11123_v61 = vld [vmem:[#allocation13_spill] sm:$0xff] }
 0x3dc   :  { %6298 = vmatprep.subr.bf16.mxu0 %v11118_v5 }
 0x3dd   :  { %v7040_v30 = vpop.eup %7039 }
 0x3de   :  { %5721 = vmatmul.mubr.f32.gmra.mrb[38].mxu0 %v1167_v38  ;;  %v8810_v32 = vmul.f32 %v7040_v30, %v7870_v24  ;;  %v7042_v38 = vpop.eup %7041 }
 0x3df   :  { %5723 = vmatprep.mubr.f32.mxu0 %v1168_v37  ;;  %6300 = vmatpush3.bf16.msra.mxu0 %v11118_v5  ;;  %v1700_v5 = vsub.f32 %v11128_v60, %v11127_v57  ;;  %v1157_v58 = vsel %vm1125_vm2, %v7042_v38, 0.0  ;;  %v11132_v38 = vld [vmem:[#allocation71_spill] sm:$0xff] }
 0x3e0   :  { %6302 = vmatprep.subr.bf16.mxu0 %v11120_v7 }
 0x3e1   :  { %v1720_v28 = vmul.f32 1.442695, %v1700_v5 }
 0x3e2   :  { %5724 = vmatmul.mubr.f32.gmra.mrb[40].mxu0 %v1169_v19 }
 0x3e3   :  { %5726 = vmatprep.mubr.f32.mxu0 %v1170_v12  ;;  %6304 = vmatpush3.bf16.msra.mxu0 %v11120_v7  ;;  %v11130_v12 = vld [vmem:[#allocation95_spill] sm:$0xff] }
 0x3e4   :  { %1760 = vadd.xlane.f32.xlu1 %v8797_v11  ;;  %6306 = vmatprep.subr.bf16.mxu0 %v11122_v52  ;;  %v1173_v18 = vmul.f32 %v1157_v58, %v11130_v12  ;;  %v11133_v12 = vld [vmem:[#allocation79_spill] sm:$0xff] }
 0x3e6   :  { %5727 = vmatmul.mubr.f32.gmra.mrb[42].mxu0 %v1171_v46 }
 0x3e7   :  { %6308 = vmatpush3.bf16.msra.mxu0 %v11122_v52 }
 0x3e8   :  { %1764 = vadd.xlane.f32.xlu1 %v8804_v13  ;;  %6310 = vmatprep.subr.bf16.mxu0 %v11123_v61 }
 0x3eb   :  { %6312 = vmatpush3.bf16.msra.mxu0 %v11123_v61 }
 0x3ec   :  { %1766 = vadd.xlane.f32.xlu1 %v8810_v32  ;;  %6752 = vrot.lane.b32.xlu0 %v11124_v2, %s7469_s28 }
 0x3ed   :  { %6314 = vmatprep.subr.bf16.mxu0 %v11125_v10 }
 0x3ef   :  { %6316 = vmatpush3.bf16.msra.mxu0 %v11125_v10 }
 0x3f0   :  { %v1103_v1 = vpop.xlane.xlu1 %1102  ;;  %6318 = vmatprep.subr.bf16.mxu0 %v11126_v55 }
 0x3f1   :  { %7043 = vrcp.f32 %v1103_v1  ;;  %vm1124_vm1 = vcmp.gt.f32.partialorder %v1103_v1, 0.0 }
 0x3f3   :  { %6320 = vmatpush3.bf16.msra.mxu0 %v11126_v55 }
 0x3f4   :  { %v1107_v42 = vpop.xlane.xlu1 %1106 }
 0x3f5   :  { %7045 = vrcp.f32 %v1107_v42  ;;  %vm1126_vm5 = vcmp.gt.f32.partialorder %v1107_v42, 0.0  ;;  %v11131_v42 = vld [vmem:[#allocation86_spill] sm:$0xff] }
 0x3f6   :  { %7047 = vpow2.f32 %v1720_v28  ;;  %v1701_v28 = vsub.f32 %v11132_v38, %v11131_v42 }
 0x3f8   :  { %v8823_v50 = vpop.xlane.xlu1 %2207 }
 0x3fb   :  { %v7044_v37 = vpop.eup %7043 }
 0x3fc   :  { %v1156_v9 = vsel %vm1124_vm1, %v7044_v37, 0.0  ;;  %v1109_v7 = vpop.xlane.xlu1 %1108 }
 0x3fd   :  { %6757 = vrot.lane.b32.xlu1 %v11129_v54, %s7469_s28  ;;  %v1172_v19 = vmul.f32 %v1156_v9, %v8526_v59  ;;  %7049 = vrcp.f32 %v1109_v7  ;;  %vm1127_vm2 = vcmp.gt.f32.partialorder %v1109_v7, 0.0 }
 0x3fe   :  { %v8829_v29 = vpop.xlane.xlu0 %2205 }
 0x3ff   :  { %v7046_v52 = vpop.eup %7045  ;;  %5729 = vmatprep.mubr.f32.mxu0 %v1172_v19 }
 0x400   :  { %v1158_v16 = vsel %vm1126_vm5, %v7046_v52, 0.0  ;;  %v1111_v46 = vpop.xlane.xlu1 %1110  ;;  %5730 = vmatmul.mubr.f32.gmra.mrb[44].mxu0 %v1173_v18  ;;  %v7048_v59 = vpop.eup %7047  ;;  %v11134_v18 = vld [vmem:[#allocation66_spill] sm:$0xff] }
 0x401   :  { %7051 = vrcp.f32 %v1111_v46  ;;  %v1174_v30 = vmul.f32 %v1158_v16, %v8534_v35  ;;  %v8838_v5 = vmul.f32 %v7048_v59, %v7929_v47  ;;  %vm1128_vm1 = vcmp.gt.f32.partialorder %v1111_v46, 0.0  ;;  %v11136_v46 = vld [vmem:[#allocation72_spill] sm:$0xff] }
 0x402   :  { %v8833_v61 = vpop.xlane.xlu0 %2211  ;;  %v1702_v52 = vsub.f32 %v11134_v18, %v11133_v12  ;;  %v1722_v16 = vmul.f32 1.442695, %v1701_v28 }
 0x403   :  { %5732 = vmatprep.mubr.f32.mxu0 %v1174_v30 }
 0x404   :  { %v1113_v10 = vpop.xlane.xlu1 %1112 }
 0x405   :  { %7053 = vrcp.f32 %v1113_v10  ;;  %vm1129_vm5 = vcmp.gt.f32.partialorder %v1113_v10, 0.0 }
 0x406   :  { %v763_v1 = vpop.xlane.xlu0 %762 }
 0x407   :  { %v7050_v55 = vpop.eup %7049  ;;  %7055 = vrcp.f32 %v763_v1 }
 0x408   :  { %v8835_v57 = vpop.xlane.xlu1 %2209  ;;  %v1159_v60 = vsel %vm1127_vm2, %v7050_v55, 0.0 }
 0x409   :  { %v1175_v35 = vmul.f32 %v1159_v60, %v8549_v15  ;;  %v11135_v15 = vld [vmem:[#allocation37_spill] sm:$0xff] }
 0x40a   :  { %v8842_v37 = vpop.xlane.xlu0 %2213  ;;  %v1703_v55 = vsub.f32 %v11136_v46, %v11135_v15 }
 0x40b   :  { %v7052_v58 = vpop.eup %7051  ;;  %1768 = vadd.xlane.f32.xlu0 %v8838_v5  ;;  %5733 = vmatmul.mubr.f32.gmra.mrb[46].mxu0 %v1175_v35  ;;  %v1724_v35 = vmul.f32 1.442695, %v1702_v52 }
 0x40c   :  { %v1160_v9 = vsel %vm1128_vm1, %v7052_v58, 0.0  ;;  %v759_v7 = vpop.xlane.xlu1 %758  ;;  %v1726_v58 = vmul.f32 1.442695, %v1703_v55  ;;  %vm792_vm1 = vcmp.gt.f32.partialorder %v763_v1, 0.0 }
 0x40d   :  { %v1176_v19 = vmul.f32 %v1160_v9, %v8568_v25  ;;  %7057 = vrcp.f32 %v759_v7  ;;  %vm790_vm2 = vcmp.gt.f32.partialorder %v759_v7, 0.0 }
 0x40e   :  { %v8849_v30 = vpop.xlane.xlu0 %2215 }
 0x40f   :  { %v7054_v59 = vpop.eup %7053  ;;  %5735 = vmatprep.mubr.f32.mxu0 %v1176_v19 }
 0x410   :  { %v1161_v60 = vsel %vm1129_vm5, %v7054_v59, 0.0  ;;  %v761_v42 = vpop.xlane.xlu1 %760 }
 0x411   :  { %7059 = vrcp.f32 %v761_v42  ;;  %v1177_v38 = vmul.f32 %v1161_v60, %v8583_v40  ;;  %v7056_v10 = vpop.eup %7055  ;;  %vm791_vm5 = vcmp.gt.f32.partialorder %v761_v42, 0.0 }
 0x412   :  { %7061 = vpow2.f32 %v1722_v16  ;;  %v771_v25 = vpop.xlane.xlu0 %770  ;;  %v824_v59 = vsel %vm792_vm1, %v7056_v10, 0.0 }
 0x413   :  { %5736 = vmatmul.mubr.f32.gmra.mrb[48].mxu0 %v1177_v38  ;;  %v840_v38 = vmul.f32 %v824_v59, %v8591_v14 }
 0x414   :  { %v765_v28 = vpop.xlane.xlu1 %764 }
 0x415   :  { %7063 = vrcp.f32 %v765_v28 }
 0x416   :  { %7065 = vpow2.f32 %v1724_v35  ;;  %v8854_v9 = vpop.xlane.xlu0 %2217 }
 0x417   :  { %v7058_v19 = vpop.eup %7057  ;;  %7067 = vpow2.f32 %v1726_v58 }
 0x418   :  { %v767_v12 = vpop.xlane.xlu1 %766  ;;  %v822_v18 = vsel %vm790_vm2, %v7058_v19, 0.0  ;;  %vm793_vm2 = vcmp.gt.f32.partialorder %v765_v28, 0.0 }
 0x419   :  { %7069 = vrcp.f32 %v767_v12  ;;  %v838_v52 = vmul.f32 %v822_v18, %v8613_v31  ;;  %vm794_vm1 = vcmp.gt.f32.partialorder %v767_v12, 0.0 }
 0x41a   :  { %7071 = vrcp.f32 %v771_v25  ;;  %v8856_v40 = vpop.xlane.xlu0 %2219 }
 0x41b   :  { %v7060_v16 = vpop.eup %7059  ;;  %5770 = vmatprep.mubr.f32.mxu0 %v838_v52 }
 0x41c   :  { %v7062_v15 = vpop.eup %7061  ;;  %v823_v46 = vsel %vm791_vm5, %v7060_v16, 0.0  ;;  %v769_v55 = vpop.xlane.xlu1 %768  ;;  %vm796_vm5 = vcmp.gt.f32.partialorder %v771_v25, 0.0 }
 0x41d   :  { %v839_v60 = vmul.f32 %v823_v46, %v8626_v43  ;;  %7073 = vrcp.f32 %v769_v55  ;;  %v8864_v35 = vmul.f32 %v7062_v15, %v7934_v48  ;;  %v11137_v43 = vld [vmem:[#allocation10_spill] sm:$0xff] }
 0x41e   :  { %v8860_v7 = vpop.xlane.xlu0 %778 }
 0x41f   :  { %v7064_v1 = vpop.eup %7063  ;;  %5771 = vmatmul.mubr.f32.vlgmr.msra.gmra.mrb[34].mxu0 %v839_v60 }
 0x420   :  { %v7066_v31 = vpop.eup %7065  ;;  %v825_v58 = vsel %vm793_vm2, %v7064_v1, 0.0  ;;  %v773_v42 = vpop.xlane.xlu1 %772  ;;  %5773 = vmatprep.mubr.f32.mxu0 %v840_v38  ;;  %vm795_vm2 = vcmp.gt.f32.partialorder %v769_v55, 0.0  ;;  %v11138_v38 = vld [vmem:[#allocation84_spill] sm:$0xff] }
 0x421   :  { %7075 = vrcp.f32 %v773_v42  ;;  %1770 = vadd.xlane.f32.xlu1 %v8864_v35  ;;  %6762 = vrot.lane.b32.xlu0 %v11137_v43, %s7469_s28  ;;  %v841_v10 = vmul.f32 %v825_v58, %v8636_v6  ;;  %v7068_v19 = vpop.eup %7067  ;;  %v8873_v18 = vmul.f32 %v7066_v31, %v7931_v39  ;;  %v11139_v1 = vld [vmem:[#allocation68_spill] sm:$0xff] }
 0x422   :  { %v8870_v14 = vpop.xlane.xlu0 %2221  ;;  %v8881_v12 = vmul.f32 %v7068_v19, %v7972_v53  ;;  %v1704_v31 = vsub.f32 %v11139_v1, %v11138_v38 }
 0x423   :  { %v7070_v28 = vpop.eup %7069  ;;  %5774 = vmatmul.mubr.f32.gmra.mrb[36].mxu0 %v841_v10 }
 0x424   :  { %v7072_v52 = vpop.eup %7071  ;;  %v826_v16 = vsel %vm794_vm1, %v7070_v28, 0.0  ;;  %v775_v59 = vpop.xlane.xlu1 %774  ;;  %vm797_vm1 = vcmp.gt.f32.partialorder %v773_v42, 0.0  ;;  %v1728_v19 = vmul.f32 1.442695, %v1704_v31 }
 0x425   :  { %7077 = vrcp.f32 %v775_v59  ;;  %1772 = vadd.xlane.f32.xlu1 %v8873_v18  ;;  %v842_v15 = vmul.f32 %v826_v16, %v8649_v49  ;;  %v828_v60 = vsel %vm796_vm5, %v7072_v52, 0.0  ;;  %vm798_vm5 = vcmp.gt.f32.partialorder %v775_v59, 0.0 }
 0x426   :  { %7079 = vrcp.f32 %v8860_v7  ;;  %v8878_v6 = vpop.xlane.xlu0 %2223  ;;  %v844_v28 = vmul.f32 %v828_v60, %v8632_v26 }
 0x427   :  { %v7074_v46 = vpop.eup %7073  ;;  %5776 = vmatprep.mubr.f32.mxu0 %v842_v15 }
 0x428   :  { %v827_v58 = vsel %vm795_vm2, %v7074_v46, 0.0  ;;  %v777_v10 = vpop.xlane.xlu1 %776  ;;  %vm800_vm2 = vcmp.gt.f32.partialorder %v8860_v7, 0.0 }
 0x429   :  { %7081 = vrcp.f32 %v777_v10  ;;  %1774 = vadd.xlane.f32.xlu1 %v8881_v12  ;;  %v843_v49 = vmul.f32 %v827_v58, %v8664_v45 }
 0x42a   :  { %v6743_v25 = vpop.permute.xlu0 %6742 }
 0x42b   :  { %v7076_v16 = vpop.eup %7075  ;;  %v6745_v55 = vunpack.i.h.bf16 %v6743_v25  ;;  %v6744_v52 = vunpack.i.l.bf16 %v6743_v25  ;;  %5777 = vmatmul.mubr.f32.gmra.mrb[38].mxu0 %v843_v49 }
 0x42c   :  { %v829_v15 = vsel %vm797_vm1, %v7076_v16, 0.0  ;;  %v781_v53 = vpop.xlane.xlu1 %780  ;;  %5779 = vmatprep.mubr.f32.mxu0 %v844_v28  ;;  %vm799_vm1 = vcmp.gt.f32.partialorder %v777_v10, 0.0  ;;  %v11140_v10 = vld [vmem:[#allocation12_spill] sm:$0xff] }
 0x42d   :  { %7083 = vrcp.f32 %v781_v53  ;;  %v845_v46 = vmul.f32 %v829_v15, %v8676_v63  ;;  %v6321_v38 = vpack.c.bf16 %v6745_v55, %v6744_v52 }
 0x42e   :  { %7085 = vpow2.f32 %v1728_v19 }
 0x42f   :  { %v7078_v1 = vpop.eup %7077  ;;  %5780 = vmatmul.mubr.f32.gmra.mrb[40].mxu0 %v845_v46  ;;  %6322 = vmatprep.subr.bf16.mxu0 %v6321_v38 }
 0x430   :  { %v7080_v45 = vpop.eup %7079  ;;  %v830_v26 = vsel %vm798_vm5, %v7078_v1, 0.0  ;;  %v783_v60 = vpop.xlane.xlu1 %782  ;;  %6324 = vmatpush3.bf16.msra.mxu0 %v6321_v38  ;;  %vm801_vm5 = vcmp.gt.f32.partialorder %v781_v53, 0.0 }
 0x431   :  { %7087 = vrcp.f32 %v783_v60  ;;  %v846_v42 = vmul.f32 %v830_v26, %v8687_v8  ;;  %v832_v58 = vsel %vm800_vm2, %v7080_v45, 0.0  ;;  %vm802_vm2 = vcmp.gt.f32.partialorder %v783_v60, 0.0 }
 0x432   :  { %v848_v25 = vmul.f32 %v832_v58, %v8668_v44  ;;  %v11141_v58 = vld [vmem:[#allocation87_spill] sm:$0xff] }
 0x433   :  { %v7082_v31 = vpop.eup %7081  ;;  %5782 = vmatprep.mubr.f32.mxu0 %v846_v42 }
 0x434   :  { %v831_v63 = vsel %vm799_vm1, %v7082_v31, 0.0  ;;  %v785_v49 = vpop.xlane.xlu1 %784 }
 0x435   :  { %7089 = vrcp.f32 %v785_v49  ;;  %v847_v59 = vmul.f32 %v831_v63, %v8698_v22  ;;  %vm803_vm1 = vcmp.gt.f32.partialorder %v785_v49, 0.0  ;;  %v11142_v63 = vld [vmem:[#allocation73_spill] sm:$0xff] }
 0x436   :  { %v1705_v49 = vsub.f32 %v11142_v63, %v11141_v58 }
 0x437   :  { %v7084_v28 = vpop.eup %7083  ;;  %5783 = vmatmul.mubr.f32.gmra.mrb[42].mxu0 %v847_v59 }
 0x438   :  { %v833_v16 = vsel %vm801_vm5, %v7084_v28, 0.0  ;;  %v787_v55 = vpop.xlane.xlu1 %786  ;;  %5785 = vmatprep.mubr.f32.mxu0 %v848_v25  ;;  %v7086_v7 = vpop.eup %7085  ;;  %v1730_v28 = vmul.f32 1.442695, %v1705_v49 }
 0x439   :  { %7091 = vrcp.f32 %v787_v55  ;;  %v849_v8 = vmul.f32 %v833_v16, %v8702_v23  ;;  %v8898_v53 = vmul.f32 %v7086_v7, %v7994_v27  ;;  %vm804_vm5 = vcmp.gt.f32.partialorder %v787_v55, 0.0  ;;  %v11144_v16 = vld [vmem:[#allocation74_spill] sm:$0xff] }
 0x43a   :  { %6767 = vrot.lane.b32.xlu1 %v11140_v10, %s7469_s28 }
 0x43b   :  { %v7088_v52 = vpop.eup %7087  ;;  %5786 = vmatmul.mubr.f32.gmra.mrb[44].mxu0 %v849_v8 }
 0x43c   :  { %v834_v19 = vsel %vm802_vm2, %v7088_v52, 0.0  ;;  %v789_v22 = vpop.xlane.xlu1 %788 }
 0x43d   :  { %7093 = vrcp.f32 %v789_v22  ;;  %v850_v44 = vmul.f32 %v834_v19, %v8706_v20  ;;  %vm805_vm2 = vcmp.gt.f32.partialorder %v789_v22, 0.0 }
 0x43e   :  { %7095 = vpow2.f32 %v1730_v28  ;;  %v11151_v28 = vld [vmem:[#allocation46_spill] sm:$0xff] }
 0x43f   :  { %v7090_v15 = vpop.eup %7089  ;;  %5788 = vmatprep.mubr.f32.mxu0 %v850_v44  ;;  %v11146_v44 = vld [vmem:[#allocation48_spill] sm:$0xff] }
 0x440   :  { %v835_v46 = vsel %vm803_vm1, %v7090_v15, 0.0  ;;  %v6748_v23 = vpop.permute.xlu1 %6747  ;;  %1776 = vadd.xlane.f32.xlu0 %v8898_v53 }
 0x441   :  { %v6750_v38 = vunpack.i.h.bf16 %v6748_v23  ;;  %v6749_v1 = vunpack.i.l.bf16 %v6748_v23  ;;  %v851_v45 = vmul.f32 %v835_v46, %v8710_v17  ;;  %v11143_v17 = vld [vmem:[#allocation34_spill] sm:$0xff] }
 0x442   :  { %v1706_v55 = vsub.f32 %v11144_v16, %v11143_v17 }
 0x443   :  { %v7092_v26 = vpop.eup %7091  ;;  %5789 = vmatmul.mubr.f32.gmra.mrb[46].mxu0 %v851_v45  ;;  %v6325_v60 = vpack.c.bf16 %v6750_v38, %v6749_v1  ;;  %v11148_v1 = vld [vmem:[#allocation94_spill] sm:$0xff]  ;;  %v11149_v45 = vld [vmem:[#allocation55_spill] sm:$0xff] }
 0x444   :  { %v836_v42 = vsel %vm804_vm5, %v7092_v26, 0.0  ;;  %v1732_v8 = vmul.f32 1.442695, %v1706_v55  ;;  %v1709_v26 = vsub.f32 %v11149_v45, %v11148_v1 }
 0x445   :  { %6326 = vmatprep.subr.bf16.mxu0 %v6325_v60  ;;  %v852_v20 = vmul.f32 %v836_v42, %v8714_v4  ;;  %v11145_v4 = vld [vmem:[#allocation14_spill] sm:$0xff] }
 0x446   :  { %6328 = vmatpush3.bf16.msra.mxu0 %v6325_v60  ;;  %7097 = vpow2.f32 %v1732_v8  ;;  %v1738_v42 = vmul.f32 1.442695, %v1709_v26  ;;  %v11152_v8 = vld [vmem:[#allocation51_spill] sm:$0xff]  ;;  %v11153_v26 = vld [vmem:[#allocation93_spill] sm:$0xff] }
 0x447   :  { %v7094_v31 = vpop.eup %7093  ;;  %5791 = vmatprep.mubr.f32.mxu0 %v852_v20 }
 0x448   :  { %v837_v59 = vsel %vm805_vm2, %v7094_v31, 0.0  ;;  %v7096_v7 = vpop.eup %7095 }
 0x449   :  { %v853_v25 = vmul.f32 %v837_v59, %v8718_v51  ;;  %v8913_v19 = vmul.f32 %v7096_v7, %v8012_v62  ;;  %v11147_v51 = vld [vmem:[#allocation24_spill] sm:$0xff] }
 0x44a   :  { %v1707_v15 = vsub.f32 %v11147_v51, %v11146_v44 }
 0x44b   :  { %5792 = vmatmul.mubr.f32.gmra.mrb[48].mxu0 %v853_v25  ;;  %v11150_v25 = vld [vmem:[#allocation16_spill] sm:$0xff] }
 0x44c   :  { %v1734_v38 = vmul.f32 1.442695, %v1707_v15 }
 0x44e   :  { %7099 = vpow2.f32 %v1734_v38 }
 0x44f   :  { %7101 = vpow2.f32 %v1738_v42  ;;  %v11154_v42 = vld [vmem:[#allocation40_spill] sm:$0xff] }
 0x450   :  { %v7098_v22 = vpop.eup %7097 }
 0x451   :  { %v8921_v23 = vmul.f32 %v7098_v22, %v10997_v56 }
 0x456   :  { %6772 = vrot.lane.b32.xlu0 %v11145_v4, %s7469_s28 }
 0x458   :  { %v7100_v49 = vpop.eup %7099 }
 0x459   :  { %v8931_v17 = vmul.f32 %v7100_v49, %v11151_v28  ;;  %v7102_v16 = vpop.eup %7101  ;;  %v11156_v49 = vld [vmem:[#allocation18_spill] sm:$0xff] }
 0x45a   :  { %v8937_v7 = vmul.f32 %v7102_v16, %v11152_v8 }
 0x45b   :  { %v8910_v52 = vpop.xlane.xlu0 %2225 }
 0x45e   :  { %1778 = vadd.xlane.f32.xlu1 %v8913_v19 }
 0x45f   :  { %v8918_v46 = vpop.xlane.xlu0 %2227 }
 0x462   :  { %1780 = vadd.xlane.f32.xlu1 %v8921_v23 }
 0x463   :  { %v8926_v60 = vpop.xlane.xlu0 %1762 }
 0x464   :  { %vm1793_vm5 = vcmp.gt.f32.partialorder %v8926_v60, 0.0 }
 0x467   :  { %v6753_v20 = vpop.permute.xlu0 %6752 }
 0x468   :  { %v6755_v31 = vunpack.i.h.bf16 %v6753_v20  ;;  %v6754_v58 = vunpack.i.l.bf16 %v6753_v20  ;;  %v1708_v20 = vsub.f32 %v11154_v42, %v11153_v26  ;;  %v11161_v42 = vld [vmem:[#allocation58_spill] sm:$0xff] }
 0x46a   :  { %v6329_v63 = vpack.c.bf16 %v6755_v31, %v6754_v58  ;;  %v1736_v58 = vmul.f32 1.442695, %v1708_v20 }
 0x46c   :  { %6330 = vmatprep.subr.bf16.mxu0 %v6329_v63 }
 0x46d   :  { %6332 = vmatpush3.bf16.msra.mxu0 %v6329_v63  ;;  %v11155_v63 = vld [vmem:[#allocation54_spill] sm:$0xff] }
 0x46e   :  { %v1710_v16 = vsub.f32 %v11156_v49, %v11155_v63 }
 0x470   :  { %v1740_v8 = vmul.f32 1.442695, %v1710_v16 }
 0x471   :  { %v1761_v59 = vpop.xlane.xlu1 %1760 }
 0x472   :  { %7103 = vrcp.f32 %v1761_v59  ;;  %vm1792_vm1 = vcmp.gt.f32.partialorder %v1761_v59, 0.0  ;;  %v11157_v59 = vld [vmem:[#allocation2_spill] sm:$0xff] }
 0x473   :  { %6777 = vrot.lane.b32.xlu1 %v11150_v25, %s7469_s28  ;;  %7105 = vpow2.f32 %v1736_v58  ;;  %v11163_v58 = vld [vmem:[#allocation33_spill] sm:$0xff] }
 0x474   :  { %7107 = vpow2.f32 %v1740_v8 }
 0x475   :  { %v8933_v55 = vpop.xlane.xlu1 %1764  ;;  %1782 = vadd.xlane.f32.xlu0 %v8931_v17 }
 0x476   :  { %vm1794_vm2 = vcmp.gt.f32.partialorder %v8933_v55, 0.0 }
 0x479   :  { %v8939_v22 = vpop.xlane.xlu1 %1766  ;;  %1786 = vadd.xlane.f32.xlu0 %v8937_v7 }
 0x47c   :  { %v7104_v44 = vpop.eup %7103 }
 0x47d   :  { %v1824_v51 = vsel %vm1792_vm1, %v7104_v44, 0.0  ;;  %v6758_v15 = vpop.permute.xlu1 %6757  ;;  %v7106_v44 = vpop.eup %7105  ;;  %vm1795_vm1 = vcmp.gt.f32.partialorder %v8939_v22, 0.0 }
 0x47e   :  { %v6760_v38 = vunpack.i.h.bf16 %v6758_v15  ;;  %v6759_v1 = vunpack.i.l.bf16 %v6758_v15  ;;  %v1840_v45 = vmul.f32 %v1824_v51, %v8797_v11  ;;  %v11158_v11 = vld [vmem:[#allocation47_spill] sm:$0xff]  ;;  %v7108_v15 = vpop.eup %7107 }
 0x47f   :  { %v8950_v51 = vmul.f32 %v7106_v44, %v11158_v11  ;;  %v8958_v20 = vmul.f32 %v7108_v15, %v11161_v42  ;;  %v11168_v42 = vld [vmem:[#allocation63_spill] sm:$0xff] }
 0x480   :  { %5826 = vmatprep.mubr.f32.mxu0 %v1840_v45  ;;  %v6333_v31 = vpack.c.bf16 %v6760_v38, %v6759_v1  ;;  %v11159_v45 = vld [vmem:[#allocation44_spill] sm:$0xff]  ;;  %v11160_v38 = vld [vmem:[#allocation81_spill] sm:$0xff] }
 0x481   :  { %v1711_v1 = vsub.f32 %v11160_v38, %v11159_v45  ;;  %v11164_v38 = vld [vmem:[#allocation4_spill] sm:$0xff] }
 0x482   :  { %6334 = vmatprep.subr.bf16.mxu0 %v6333_v31 }
 0x483   :  { %6336 = vmatpush3.bf16.msra.mxu0 %v6333_v31  ;;  %v1742_v8 = vmul.f32 1.442695, %v1711_v1  ;;  %v11162_v31 = vld [vmem:[#allocation39_spill] sm:$0xff] }
 0x484   :  { %v2230_v63 = vsub.f32 %v11163_v58, %v11162_v31 }
 0x485   :  { %7109 = vpow2.f32 %v1742_v8 }
 0x486   :  { %v2247_v44 = vmul.f32 1.442695, %v2230_v63  ;;  %v11166_v63 = vld [vmem:[#allocation29_spill] sm:$0xff] }
 0x488   :  { %7111 = vpow2.f32 %v2247_v44 }
 0x48f   :  { %6782 = vrot.lane.b32.xlu0 %v11157_v59, %s7470_s29  ;;  %v7110_v45 = vpop.eup %7109 }
 0x490   :  { %v8966_v15 = vmul.f32 %v7110_v45, %v8099_v34 }
 0x492   :  { %v7112_v1 = vpop.eup %7111 }
 0x493   :  { %v8972_v58 = vmul.f32 %v7112_v1, %v7845_v33 }
 0x495   :  { %11165 = vst [vmem:[#allocation56_spill] sm:$0xff] %v8972_v58 }
 0x497   :  { %1784 = vadd.xlane.f32.xlu1 %v8950_v51 }
 0x498   :  { %v8955_v26 = vpop.xlane.xlu0 %1768 }
 0x499   :  { %vm1796_vm0 = vcmp.gt.f32.partialorder %v8955_v26, 0.0 }
 0x49b   :  { %1788 = vadd.xlane.f32.xlu1 %v8958_v20 }
 0x49c   :  { %v6763_v49 = vpop.permute.xlu0 %6762 }
 0x49d   :  { %v6765_v16 = vunpack.i.h.bf16 %v6763_v49  ;;  %v6764_v59 = vunpack.i.l.bf16 %v6763_v49  ;;  %v11167_v49 = vld [vmem:[#allocation89_spill] sm:$0xff] }
 0x49f   :  { %v6337_v11 = vpack.c.bf16 %v6765_v16, %v6764_v59  ;;  %v2229_v16 = vsub.f32 %v11167_v49, %v11166_v63  ;;  %v2231_v63 = vsub.f32 %v11169_v21, %v11168_v42  ;;  %v11170_v42 = vld [vmem:[#allocation88_spill] sm:$0xff] }
 0x4a1   :  { %6338 = vmatprep.subr.bf16.mxu0 %v6337_v11 }
 0x4a2   :  { %6340 = vmatpush3.bf16.msra.mxu0 %v6337_v11 }
 0x4ac   :  { %6787 = vrot.lane.b32.xlu1 %v11164_v38, %s7470_s29  ;;  %v2245_v38 = vmul.f32 1.442695, %v2229_v16 }
 0x4ae   :  { %v8968_v31 = vpop.xlane.xlu1 %1770  ;;  %1790 = vadd.xlane.f32.xlu0 %v8966_v15  ;;  %7113 = vpow2.f32 %v2245_v38  ;;  %v11171_v38 = vld [vmem:[#allocation41_spill] sm:$0xff] }
 0x4b2   :  { %v8974_v8 = vpop.xlane.xlu1 %1772  ;;  %2295 = vadd.xlane.f32.xlu0 %v8972_v58 }
 0x4b6   :  { %v8977_v11 = vpop.xlane.xlu1 %1774 }
 0x4b8   :  { %v7114_v1 = vpop.eup %7113 }
 0x4b9   :  { %v8986_v58 = vmul.f32 %v7114_v1, %v7868_v0  ;;  %v2232_v1 = vsub.f32 %v11171_v38, %v11170_v42 }
 0x4ba   :  { %v6768_v59 = vpop.permute.xlu1 %6767 }
 0x4bb   :  { %v6770_v44 = vunpack.i.h.bf16 %v6768_v59  ;;  %v6769_v45 = vunpack.i.l.bf16 %v6768_v59 }
 0x4bd   :  { %v6341_v34 = vpack.c.bf16 %v6770_v44, %v6769_v45  ;;  %v2249_v44 = vmul.f32 1.442695, %v2231_v63  ;;  %v2251_v63 = vmul.f32 1.442695, %v2232_v1 }
 0x4bf   :  { %6342 = vmatprep.subr.bf16.mxu0 %v6341_v34  ;;  %7115 = vpow2.f32 %v2249_v44 }
 0x4c0   :  { %6344 = vmatpush3.bf16.msra.mxu0 %v6341_v34  ;;  %7117 = vrcp.f32 %v8926_v60 }
 0x4c1   :  { %7119 = vrcp.f32 %v8933_v55 }
 0x4c2   :  { %7121 = vrcp.f32 %v8939_v22 }
 0x4c3   :  { %7123 = vrcp.f32 %v8955_v26 }
 0x4c4   :  { %7125 = vrcp.f32 %v8968_v31 }
 0x4c5   :  { %7127 = vrcp.f32 %v8974_v8 }
 0x4c6   :  { %7129 = vpow2.f32 %v2251_v63 }
 0x4c7   :  { %7131 = vrcp.f32 %v8977_v11 }
 0x4c8   :  { %6792 = vrot.lane.b32.xlu0 %v11124_v2, %s7470_s29 }
 0x4c9   :  { %v7116_v2 = vpop.eup %7115 }
 0x4ca   :  { %v8994_v45 = vmul.f32 %v7116_v2, %v7906_v3 }
 0x4cd   :  { %v8983_v33 = vpop.xlane.xlu0 %1776 }
 0x4ce   :  { %7133 = vrcp.f32 %v8983_v33 }
 0x4d0   :  { %2293 = vadd.xlane.f32.xlu1 %v8986_v58 }
 0x4d1   :  { %v6773_v49 = vpop.permute.xlu0 %6772 }
 0x4d2   :  { %v6775_v16 = vunpack.i.h.bf16 %v6773_v49  ;;  %v6774_v59 = vunpack.i.l.bf16 %v6773_v49 }
 0x4d4   :  { %v6345_v34 = vpack.c.bf16 %v6775_v16, %v6774_v59  ;;  %v7118_v16 = vpop.eup %7117 }
 0x4d5   :  { %v1825_v42 = vsel %vm1793_vm5, %v7118_v16, 0.0  ;;  %vm1797_vm5 = vcmp.gt.f32.partialorder %v8968_v31, 0.0 }
 0x4d6   :  { %6346 = vmatprep.subr.bf16.mxu0 %v6345_v34  ;;  %v1841_v0 = vmul.f32 %v1825_v42, %v8772_v36  ;;  %v11172_v42 = vld [vmem:[#allocation31_spill] sm:$0xff] }
 0x4d7   :  { %6348 = vmatpush3.bf16.msra.mxu0 %v6345_v34  ;;  %v7120_v34 = vpop.eup %7119 }
 0x4d8   :  { %v7122_v38 = vpop.eup %7121  ;;  %v1826_v1 = vsel %vm1794_vm2, %v7120_v34, 0.0  ;;  %vm1798_vm2 = vcmp.gt.f32.partialorder %v8974_v8, 0.0 }
 0x4d9   :  { %v7124_v3 = vpop.eup %7123  ;;  %v1827_v60 = vsel %vm1795_vm1, %v7122_v38, 0.0  ;;  %v1842_v55 = vmul.f32 %v1826_v1, %v8804_v13  ;;  %vm1800_vm1 = vcmp.gt.f32.partialorder %v8983_v33, 0.0  ;;  %v2233_v38 = vsub.f32 %v11172_v42, %v8829_v29 }
 0x4da   :  { %v7126_v63 = vpop.eup %7125  ;;  %v1843_v36 = vmul.f32 %v1827_v60, %v8810_v32 }
 0x4db   :  { %v7128_v16 = vpop.eup %7127  ;;  %v2253_v60 = vmul.f32 1.442695, %v2233_v38 }
 0x4dc   :  { %v7130_v22 = vpop.eup %7129  ;;  %v1830_v13 = vsel %vm1798_vm2, %v7128_v16, 0.0 }
 0x4dd   :  { %v9028_v31 = vmul.f32 %v7130_v22, %v7870_v24  ;;  %v1846_v8 = vmul.f32 %v1830_v13, %v8873_v18 }
 0x4e1   :  { %6797 = vrot.lane.b32.xlu1 %v11129_v54, %s7470_s29 }
 0x4e7   :  { %2297 = vadd.xlane.f32.xlu0 %v8994_v45 }
 0x4eb   :  { %v8999_v21 = vpop.xlane.xlu1 %1778 }
 0x4ec   :  { %7135 = vrcp.f32 %v8999_v21 }
 0x4ef   :  { %v9005_v54 = vpop.xlane.xlu1 %1780 }
 0x4f0   :  { %7137 = vrcp.f32 %v9005_v54  ;;  %vm1802_vm2 = vcmp.gt.f32.partialorder %v9005_v54, 0.0 }
 0x4f3   :  { %v6778_v49 = vpop.permute.xlu1 %6777 }
 0x4f4   :  { %v6780_v59 = vunpack.i.h.bf16 %v6778_v49  ;;  %v6779_v44 = vunpack.i.l.bf16 %v6778_v49  ;;  %v1828_v49 = vsel %vm1796_vm0, %v7124_v3, 0.0  ;;  %vm1799_vm0 = vcmp.gt.f32.partialorder %v8977_v11, 0.0 }
 0x4f5   :  { %v1844_v26 = vmul.f32 %v1828_v49, %v8838_v5 }
 0x4f6   :  { %v6349_v2 = vpack.c.bf16 %v6780_v59, %v6779_v44  ;;  %v1829_v59 = vsel %vm1797_vm5, %v7126_v63, 0.0  ;;  %v7132_v44 = vpop.eup %7131  ;;  %vm1801_vm5 = vcmp.gt.f32.partialorder %v8999_v21, 0.0 }
 0x4f7   :  { %v7134_v3 = vpop.eup %7133  ;;  %v1831_v32 = vsel %vm1799_vm0, %v7132_v44, 0.0 }
 0x4f8   :  { %6350 = vmatprep.subr.bf16.mxu0 %v6349_v2  ;;  %v7136_v5 = vpop.eup %7135  ;;  %v1832_v34 = vsel %vm1800_vm1, %v7134_v3, 0.0  ;;  %v1847_v11 = vmul.f32 %v1831_v32, %v8881_v12 }
 0x4f9   :  { %6352 = vmatpush3.bf16.msra.mxu0 %v6349_v2  ;;  %v1833_v1 = vsel %vm1801_vm5, %v7136_v5, 0.0  ;;  %v1848_v33 = vmul.f32 %v1832_v34, %v8898_v53 }
 0x4fa   :  { %v7138_v2 = vpop.eup %7137  ;;  %v1849_v29 = vmul.f32 %v1833_v1, %v8913_v19 }
 0x4fb   :  { %v1834_v18 = vsel %vm1802_vm2, %v7138_v2, 0.0 }
 0x4fc   :  { %5827 = vmatmul.mubr.f32.vlgmr.msra.gmra.mrb[34].mxu0 %v1841_v0  ;;  %v1850_v16 = vmul.f32 %v1834_v18, %v8921_v23  ;;  %v11173_v23 = vld [vmem:[#allocation49_spill] sm:$0xff] }
 0x4fd   :  { %6802 = vrot.lane.b32.xlu0 %v11137_v43, %s7470_s29  ;;  %5829 = vmatprep.mubr.f32.mxu0 %v1842_v55  ;;  %v1845_v43 = vmul.f32 %v1829_v59, %v8864_v35  ;;  %v2234_v22 = vsub.f32 %v11173_v23, %v8823_v50 }
 0x500   :  { %5830 = vmatmul.mubr.f32.gmra.mrb[36].mxu0 %v1843_v36 }
 0x501   :  { %5832 = vmatprep.mubr.f32.mxu0 %v1844_v26  ;;  %v2255_v26 = vmul.f32 1.442695, %v2234_v22 }
 0x502   :  { %v1783_v0 = vpop.xlane.xlu0 %1782 }
 0x503   :  { %7139 = vrcp.f32 %v1783_v0  ;;  %vm1803_vm0 = vcmp.gt.f32.partialorder %v1783_v0, 0.0 }
 0x504   :  { %5833 = vmatmul.mubr.f32.gmra.mrb[38].mxu0 %v1845_v43  ;;  %7141 = vpow2.f32 %v2253_v60 }
 0x505   :  { %2299 = vadd.xlane.f32.xlu1 %v9028_v31  ;;  %5835 = vmatprep.mubr.f32.mxu0 %v1846_v8 }
 0x506   :  { %v1787_v35 = vpop.xlane.xlu0 %1786 }
 0x507   :  { %7143 = vrcp.f32 %v1787_v35  ;;  %vm1805_vm1 = vcmp.gt.f32.partialorder %v1787_v35, 0.0 }
 0x508   :  { %5836 = vmatmul.mubr.f32.gmra.mrb[40].mxu0 %v1847_v11 }
 0x509   :  { %5838 = vmatprep.mubr.f32.mxu0 %v1848_v33 }
 0x50a   :  { %v6783_v55 = vpop.permute.xlu0 %6782 }
 0x50b   :  { %v6785_v63 = vunpack.i.h.bf16 %v6783_v55  ;;  %v6784_v49 = vunpack.i.l.bf16 %v6783_v55 }
 0x50c   :  { %5839 = vmatmul.mubr.f32.gmra.mrb[42].mxu0 %v1849_v29 }
 0x50d   :  { %v7140_v21 = vpop.eup %7139  ;;  %5841 = vmatprep.mubr.f32.mxu0 %v1850_v16  ;;  %v6353_v12 = vpack.c.bf16 %v6785_v63, %v6784_v49 }
 0x50e   :  { %v1835_v54 = vsel %vm1803_vm0, %v7140_v21, 0.0  ;;  %v7142_v19 = vpop.eup %7141  ;;  %v11177_v21 = vld [vmem:[#allocation52_spill] sm:$0xff] }
 0x50f   :  { %6354 = vmatprep.subr.bf16.mxu0 %v6353_v12  ;;  %v1851_v53 = vmul.f32 %v1835_v54, %v8931_v17  ;;  %v9045_v36 = vmul.f32 %v7142_v19, %v7929_v47 }
 0x510   :  { %6356 = vmatpush3.bf16.msra.mxu0 %v6353_v12  ;;  %v2239_v12 = vsub.f32 %v11177_v21, %v8854_v9  ;;  %v11179_v9 = vld [vmem:[#allocation61_spill] sm:$0xff] }
 0x511   :  { %5842 = vmatmul.mubr.f32.gmra.mrb[44].mxu0 %v1851_v53  ;;  %v7144_v17 = vpop.eup %7143 }
 0x512   :  { %v1837_v43 = vsel %vm1805_vm1, %v7144_v17, 0.0  ;;  %v2265_v19 = vmul.f32 1.442695, %v2239_v12  ;;  %v11186_v12 = vld [vmem:[#allocation51_spill] sm:$0xff] }
 0x513   :  { %v1853_v50 = vmul.f32 %v1837_v43, %v8937_v7  ;;  %v11175_v7 = vld [vmem:[#allocation32_spill] sm:$0xff] }
 0x514   :  { %v2237_v1 = vsub.f32 %v11175_v7, %v8842_v37  ;;  %v11183_v7 = vld [vmem:[#allocation47_spill] sm:$0xff] }
 0x516   :  { %6807 = vrot.lane.b32.xlu1 %v11140_v10, %s7470_s29  ;;  %v2261_v60 = vmul.f32 1.442695, %v2237_v1 }
 0x51c   :  { %2301 = vadd.xlane.f32.xlu0 %v9045_v36 }
 0x524   :  { %v1785_v59 = vpop.xlane.xlu1 %1784 }
 0x525   :  { %7145 = vrcp.f32 %v1785_v59  ;;  %vm1804_vm5 = vcmp.gt.f32.partialorder %v1785_v59, 0.0 }
 0x528   :  { %v1789_v44 = vpop.xlane.xlu1 %1788 }
 0x529   :  { %7147 = vrcp.f32 %v1789_v44  ;;  %vm1806_vm2 = vcmp.gt.f32.partialorder %v1789_v44, 0.0 }
 0x52a   :  { %7149 = vpow2.f32 %v2255_v26  ;;  %v2241_v26 = vsub.f32 %v11179_v9, %v8870_v14 }
 0x52c   :  { %v6788_v13 = vpop.permute.xlu1 %6787 }
 0x52d   :  { %v6790_v3 = vunpack.i.h.bf16 %v6788_v13  ;;  %v6789_v10 = vunpack.i.l.bf16 %v6788_v13 }
 0x52f   :  { %v7146_v0 = vpop.eup %7145  ;;  %v6357_v32 = vpack.c.bf16 %v6790_v3, %v6789_v10 }
 0x530   :  { %v1836_v8 = vsel %vm1804_vm5, %v7146_v0, 0.0  ;;  %v11180_v0 = vld [vmem:[#allocation21_spill] sm:$0xff] }
 0x531   :  { %6358 = vmatprep.subr.bf16.mxu0 %v6357_v32  ;;  %v1852_v5 = vmul.f32 %v1836_v8, %v8950_v51  ;;  %v11174_v51 = vld [vmem:[#allocation26_spill] sm:$0xff]  ;;  %v2236_v43 = vsub.f32 %v11180_v0, %v8833_v61  ;;  %v11181_v8 = vld [vmem:[#allocation53_spill] sm:$0xff] }
 0x532   :  { %6812 = vrot.lane.b32.xlu0 %v11145_v4, %s7470_s29  ;;  %6360 = vmatpush3.bf16.msra.mxu0 %v6357_v32  ;;  %v2235_v11 = vsub.f32 %v11174_v51, %v8835_v57 }
 0x533   :  { %v7148_v34 = vpop.eup %7147  ;;  %5844 = vmatprep.mubr.f32.mxu0 %v1852_v5  ;;  %v2259_v32 = vmul.f32 1.442695, %v2236_v43  ;;  %v2242_v5 = vsub.f32 %v11181_v8, %v8878_v6 }
 0x534   :  { %v1838_v2 = vsel %vm1806_vm2, %v7148_v34, 0.0  ;;  %5845 = vmatmul.mubr.f32.gmra.mrb[46].mxu0 %v1853_v50  ;;  %v7150_v42 = vpop.eup %7149  ;;  %v2257_v33 = vmul.f32 1.442695, %v2235_v11 }
 0x535   :  { %v1854_v38 = vmul.f32 %v1838_v2, %v8958_v20  ;;  %v9056_v35 = vmul.f32 %v7150_v42, %v7934_v48  ;;  %v11176_v20 = vld [vmem:[#allocation35_spill] sm:$0xff]  ;;  %v2271_v61 = vmul.f32 1.442695, %v2242_v5  ;;  %v11182_v42 = vld [vmem:[#allocation45_spill] sm:$0xff] }
 0x536   :  { %v2238_v55 = vsub.f32 %v11176_v20, %v8849_v30  ;;  %v11178_v30 = vld [vmem:[#allocation50_spill] sm:$0xff] }
 0x537   :  { %5847 = vmatprep.mubr.f32.mxu0 %v1854_v38  ;;  %v2240_v23 = vsub.f32 %v11178_v30, %v8856_v40  ;;  %v2243_v40 = vsub.f32 %v8753_v41, %v8910_v52  ;;  %v2244_v38 = vsub.f32 %v11182_v42, %v8918_v46  ;;  %v11184_v20 = vld [vmem:[#allocation58_spill] sm:$0xff] }
 0x538   :  { %v2263_v16 = vmul.f32 1.442695, %v2238_v55 }
 0x539   :  { %v2267_v59 = vmul.f32 1.442695, %v2240_v23  ;;  %v2273_v3 = vmul.f32 1.442695, %v2243_v40 }
 0x53a   :  { %2303 = vadd.xlane.f32.xlu1 %v9056_v35 }
 0x53b   :  { %v1791_v4 = vpop.xlane.xlu0 %1790 }
 0x53c   :  { %7151 = vrcp.f32 %v1791_v4  ;;  %vm1807_vm0 = vcmp.gt.f32.partialorder %v1791_v4, 0.0 }
 0x53d   :  { %7153 = vpow2.f32 %v2257_v33  ;;  %v2275_v33 = vmul.f32 1.442695, %v2244_v38 }
 0x53e   :  { %7155 = vpow2.f32 %v2261_v60 }
 0x53f   :  { %v9063_v18 = vpop.xlane.xlu0 %2295  ;;  %7157 = vpow2.f32 %v2263_v16 }
 0x540   :  { %7159 = vpow2.f32 %v2265_v19  ;;  %v11187_v19 = vld [vmem:[#allocation57_spill] sm:$0xff]  ;;  %vm2326_vm5 = vcmp.gt.f32.partialorder %v9063_v18, 0.0 }
 0x541   :  { %7161 = vpow2.f32 %v2267_v59 }
 0x543   :  { %v6793_v29 = vpop.permute.xlu0 %6792 }
 0x544   :  { %v6795_v63 = vunpack.i.h.bf16 %v6793_v29  ;;  %v6794_v49 = vunpack.i.l.bf16 %v6793_v29 }
 0x546   :  { %v7152_v57 = vpop.eup %7151  ;;  %v6361_v54 = vpack.c.bf16 %v6795_v63, %v6794_v49 }
 0x547   :  { %v1839_v37 = vsel %vm1807_vm0, %v7152_v57, 0.0  ;;  %v7154_v22 = vpop.eup %7153  ;;  %v11185_v57 = vld [vmem:[#allocation36_spill] sm:$0xff] }
 0x548   :  { %6362 = vmatprep.subr.bf16.mxu0 %v6361_v54  ;;  %v1855_v53 = vmul.f32 %v1839_v37, %v8966_v15  ;;  %v7156_v44 = vpop.eup %7155  ;;  %v9077_v17 = vmul.f32 %v7154_v22, %v7931_v39  ;;  %v2269_v15 = vmul.f32 1.442695, %v2241_v26 }
 0x549   :  { %6364 = vmatpush3.bf16.msra.mxu0 %v6361_v54  ;;  %v9083_v13 = vmul.f32 %v7156_v44, %v7994_v27 }
 0x54a   :  { %5848 = vmatmul.mubr.f32.gmra.mrb[48].mxu0 %v1855_v53  ;;  %7163 = vpow2.f32 %v2269_v15 }
 0x54b   :  { %6817 = vrot.lane.b32.xlu1 %v11150_v25, %s7470_s29  ;;  %v7158_v25 = vpop.eup %7157  ;;  %7165 = vpow2.f32 %v2273_v3  ;;  %v11188_v3 = vmov 0.0|0.0  }
 0x54c   :  { %v9087_v14 = vmul.f32 %v7158_v25, %v8012_v62  ;;  %v7160_v10 = vpop.eup %7159  ;;  %v2614_v25 = vld [vmem:[%s10694_s5] sm:$0xff] }
 0x54d   :  { %v9093_v41 = vmul.f32 %v7160_v10, %v10997_v56  ;;  %v7162_v52 = vpop.eup %7161  ;;  %5906 = vmatprep.subr.mxu1 %v2614_v25 }
 0x54e   :  { %v9099_v34 = vmul.f32 %v7162_v52, %v11151_v28  ;;  %5907 = vmatpush3.msra.mxu1 %v2614_v25 }
 0x54f   :  { %6385 = vmatprep.subr.bf16.mxu1 %v11188_v3 }
 0x551   :  { %2305 = vadd.xlane.f32.xlu0 %v9077_v17 }
 0x554   :  { %v7164_v2 = vpop.eup %7163 }
 0x555   :  { %2309 = vadd.xlane.f32.xlu0 %v9083_v13  ;;  %v9105_v6 = vmul.f32 %v7164_v2, %v11183_v7  ;;  %v7166_v1 = vpop.eup %7165 }
 0x556   :  { %v9109_v55 = vmul.f32 %v7166_v1, %v11184_v20 }
 0x559   :  { %2311 = vadd.xlane.f32.xlu0 %v9087_v14 }
 0x55d   :  { %v2294_v50 = vpop.xlane.xlu1 %2293  ;;  %2313 = vadd.xlane.f32.xlu0 %v9093_v41 }
 0x55e   :  { %7167 = vrcp.f32 %v2294_v50  ;;  %vm2325_vm1 = vcmp.gt.f32.partialorder %v2294_v50, 0.0 }
 0x55f   :  { %7169 = vpow2.f32 %v2259_v32 }
 0x560   :  { %7171 = vpow2.f32 %v2271_v61 }
 0x561   :  { %v6798_v51 = vpop.permute.xlu1 %6797  ;;  %2315 = vadd.xlane.f32.xlu0 %v9099_v34  ;;  %7173 = vpow2.f32 %v2275_v33  ;;  %v11189_v33 = vld [vmem:[#allocation56_spill] sm:$0xff] }
 0x562   :  { %v6800_v11 = vunpack.i.h.bf16 %v6798_v51  ;;  %v6799_v4 = vunpack.i.l.bf16 %v6798_v51  ;;  %7175 = vrcp.f32 %v9063_v18 }
 0x564   :  { %v6365_v60 = vpack.c.bf16 %v6800_v11, %v6799_v4 }
 0x565   :  { %2317 = vadd.xlane.f32.xlu0 %v9105_v6 }
 0x566   :  { %6366 = vmatprep.subr.bf16.mxu0 %v6365_v60 }
 0x567   :  { %6368 = vmatpush3.bf16.msra.mxu0 %v6365_v60 }
 0x568   :  { %v7168_v46 = vpop.eup %7167 }
 0x569   :  { %v2357_v29 = vsel %vm2325_vm1, %v7168_v46, 0.0  ;;  %2321 = vadd.xlane.f32.xlu0 %v9109_v55  ;;  %v7170_v63 = vpop.eup %7169 }
 0x56a   :  { %v2373_v49 = vmul.f32 %v2357_v29, %v8986_v58  ;;  %v9114_v16 = vmul.f32 %v7170_v63, %v11185_v57  ;;  %v7172_v21 = vpop.eup %7171 }
 0x56b   :  { %v9118_v54 = vmul.f32 %v7172_v21, %v11186_v12  ;;  %v7174_v37 = vpop.eup %7173 }
 0x56c   :  { %5882 = vmatprep.mubr.f32.mxu0 %v2373_v49  ;;  %v9122_v30 = vmul.f32 %v7174_v37, %v11187_v19  ;;  %v7176_v50 = vpop.eup %7175 }
 0x56d   :  { %v2358_v51 = vsel %vm2326_vm5, %v7176_v50, 0.0 }
 0x56e   :  { %v2374_v60 = vmul.f32 %v2358_v51, %v11189_v33 }
 0x56f   :  { %2307 = vadd.xlane.f32.xlu1 %v9114_v16 }
 0x573   :  { %2319 = vadd.xlane.f32.xlu1 %v9118_v54 }
 0x574   :  { %v2298_v53 = vpop.xlane.xlu0 %2297 }
 0x575   :  { %7177 = vrcp.f32 %v2298_v53  ;;  %vm2327_vm2 = vcmp.gt.f32.partialorder %v2298_v53, 0.0 }
 0x577   :  { %2323 = vadd.xlane.f32.xlu1 %v9122_v30 }
 0x578   :  { %v6803_v58 = vpop.permute.xlu0 %6802 }
 0x579   :  { %v6805_v23 = vunpack.i.h.bf16 %v6803_v58  ;;  %v6804_v22 = vunpack.i.l.bf16 %v6803_v58 }
 0x57b   :  { %v6369_v59 = vpack.c.bf16 %v6805_v23, %v6804_v22 }
 0x57d   :  { %6370 = vmatprep.subr.bf16.mxu0 %v6369_v59 }
 0x57e   :  { %6372 = vmatpush3.bf16.msra.mxu0 %v6369_v59 }
 0x57f   :  { %v7178_v42 = vpop.eup %7177 }
 0x580   :  { %v2359_v4 = vsel %vm2327_vm2, %v7178_v42, 0.0 }
 0x581   :  { %v2375_v29 = vmul.f32 %v2359_v4, %v8994_v45 }
 0x592   :  { %v2300_v9 = vpop.xlane.xlu1 %2299 }
 0x593   :  { %7179 = vrcp.f32 %v2300_v9  ;;  %vm2328_vm0 = vcmp.gt.f32.partialorder %v2300_v9, 0.0 }
 0x596   :  { %v6808_v26 = vpop.permute.xlu1 %6807 }
 0x597   :  { %v6810_v44 = vunpack.i.h.bf16 %v6808_v26  ;;  %v6809_v15 = vunpack.i.l.bf16 %v6808_v26 }
 0x599   :  { %v6373_v40 = vpack.c.bf16 %v6810_v44, %v6809_v15 }
 0x59b   :  { %6374 = vmatprep.subr.bf16.mxu0 %v6373_v40 }
 0x59c   :  { %6376 = vmatpush3.bf16.msra.mxu0 %v6373_v40 }
 0x59d   :  { %v7180_v11 = vpop.eup %7179 }
 0x59e   :  { %v2360_v46 = vsel %vm2328_vm0, %v7180_v11, 0.0 }
 0x59f   :  { %v2376_v18 = vmul.f32 %v2360_v46, %v9028_v31 }
 0x5a9   :  { %v2302_v10 = vpop.xlane.xlu0 %2301 }
 0x5aa   :  { %7181 = vrcp.f32 %v2302_v10  ;;  %vm2329_vm1 = vcmp.gt.f32.partialorder %v2302_v10, 0.0 }
 0x5ad   :  { %v6813_v0 = vpop.permute.xlu0 %6812 }
 0x5ae   :  { %v6815_v43 = vunpack.i.h.bf16 %v6813_v0  ;;  %v6814_v52 = vunpack.i.l.bf16 %v6813_v0 }
 0x5b0   :  { %v6377_v32 = vpack.c.bf16 %v6815_v43, %v6814_v52 }
 0x5b2   :  { %6378 = vmatprep.subr.bf16.mxu0 %v6377_v32 }
 0x5b3   :  { %6380 = vmatpush3.bf16.msra.mxu0 %v6377_v32 }
 0x5b4   :  { %v7182_v1 = vpop.eup %7181 }
 0x5b5   :  { %v2361_v49 = vsel %vm2329_vm1, %v7182_v1, 0.0 }
 0x5b6   :  { %v2377_v37 = vmul.f32 %v2361_v49, %v9045_v36 }
 0x5c7   :  { %v2304_v8 = vpop.xlane.xlu1 %2303 }
 0x5c8   :  { %7183 = vrcp.f32 %v2304_v8  ;;  %vm2330_vm15 = vcmp.gt.f32.partialorder %v2304_v8, 0.0 }
 0x5cb   :  { %v6818_v5 = vpop.permute.xlu1 %6817 }
 0x5cc   :  { %v6820_v2 = vunpack.i.h.bf16 %v6818_v5  ;;  %v6819_v61 = vunpack.i.l.bf16 %v6818_v5 }
 0x5ce   :  { %v6381_v38 = vpack.c.bf16 %v6820_v2, %v6819_v61 }
 0x5d0   :  { %6382 = vmatprep.subr.bf16.mxu0 %v6381_v38 }
 0x5d1   :  { %6384 = vmatpush3.bf16.msra.mxu0 %v6381_v38 }
 0x5d2   :  { %v7184_v63 = vpop.eup %7183 }
 0x5d3   :  { %v2362_v21 = vsel %vm2330_vm15, %v7184_v63, 0.0 }
 0x5d4   :  { %5883 = vmatmul.mubr.f32.vlgmr.msra.gmra.mrb[34].mxu0 %v2374_v60  ;;  %v2378_v53 = vmul.f32 %v2362_v21, %v9056_v35 }
 0x5d5   :  { %5885 = vmatprep.mubr.f32.mxu0 %v2375_v29 }
 0x5d8   :  { %5886 = vmatmul.mubr.f32.gmra.mrb[36].mxu0 %v2376_v18 }
 0x5d9   :  { %5888 = vmatprep.mubr.f32.mxu0 %v2377_v37 }
 0x5dc   :  { %5889 = vmatmul.mubr.f32.gmra.mrb[38].mxu0 %v2378_v53 }
 0x5de   :  { %v2306_v58 = vpop.xlane.xlu0 %2305 }
 0x5df   :  { %7185 = vrcp.f32 %v2306_v58  ;;  %vm2331_vm5 = vcmp.gt.f32.partialorder %v2306_v58, 0.0 }
 0x5e2   :  { %v2310_v23 = vpop.xlane.xlu0 %2309 }
 0x5e3   :  { %7187 = vrcp.f32 %v2310_v23  ;;  %vm2333_vm15 = vcmp.gt.f32.partialorder %v2310_v23, 0.0 }
 0x5e6   :  { %v2312_v59 = vpop.xlane.xlu0 %2311 }
 0x5e7   :  { %7189 = vrcp.f32 %v2312_v59  ;;  %vm2334_vm0 = vcmp.gt.f32.partialorder %v2312_v59, 0.0 }
 0x5e9   :  { %v7186_v22 = vpop.eup %7185 }
 0x5ea   :  { %v2363_v45 = vsel %vm2331_vm5, %v7186_v22, 0.0  ;;  %v2314_v26 = vpop.xlane.xlu0 %2313 }
 0x5eb   :  { %v2379_v9 = vmul.f32 %v2363_v45, %v9077_v17  ;;  %vm2335_vm1 = vcmp.gt.f32.partialorder %v2314_v26, 0.0 }
 0x5ed   :  { %5891 = vmatprep.mubr.f32.mxu0 %v2379_v9  ;;  %v7188_v40 = vpop.eup %7187 }
 0x5ee   :  { %v2316_v31 = vpop.xlane.xlu0 %2315  ;;  %v2365_v0 = vsel %vm2333_vm15, %v7188_v40, 0.0 }
 0x5ef   :  { %v2381_v5 = vmul.f32 %v2365_v0, %v9083_v13  ;;  %vm2336_vm5 = vcmp.gt.f32.partialorder %v2316_v31, 0.0 }
 0x5f1   :  { %v7190_v25 = vpop.eup %7189 }
 0x5f2   :  { %v2318_v44 = vpop.xlane.xlu0 %2317  ;;  %v2366_v8 = vsel %vm2334_vm0, %v7190_v25, 0.0 }
 0x5f3   :  { %v2382_v42 = vmul.f32 %v2366_v8, %v9087_v14  ;;  %vm2337_vm15 = vcmp.gt.f32.partialorder %v2318_v44, 0.0 }
 0x5f6   :  { %v2322_v15 = vpop.xlane.xlu0 %2321 }
 0x5f7   :  { %vm2339_vm0 = vcmp.gt.f32.partialorder %v2322_v15, 0.0 }
 0x5fc   :  { %v2308_v36 = vpop.xlane.xlu1 %2307 }
 0x5fd   :  { %7191 = vrcp.f32 %v2308_v36  ;;  %vm2332_vm2 = vcmp.gt.f32.partialorder %v2308_v36, 0.0 }
 0x5fe   :  { %7193 = vrcp.f32 %v2314_v26 }
 0x5ff   :  { %7195 = vrcp.f32 %v2316_v31 }
 0x600   :  { %v2320_v35 = vpop.xlane.xlu1 %2319  ;;  %7197 = vrcp.f32 %v2318_v44 }
 0x601   :  { %7199 = vrcp.f32 %v2320_v35 }
 0x602   :  { %7201 = vrcp.f32 %v2322_v15 }
 0x604   :  { %v2324_v10 = vpop.xlane.xlu1 %2323 }
 0x605   :  { %7203 = vrcp.f32 %v2324_v10 }
 0x607   :  { %v7192_v17 = vpop.eup %7191 }
 0x608   :  { %v7194_v43 = vpop.eup %7193  ;;  %v2364_v52 = vsel %vm2332_vm2, %v7192_v17, 0.0  ;;  %vm2338_vm2 = vcmp.gt.f32.partialorder %v2320_v35, 0.0 }
 0x609   :  { %v2380_v32 = vmul.f32 %v2364_v52, %v9114_v16  ;;  %v7196_v50 = vpop.eup %7195  ;;  %v2367_v2 = vsel %vm2335_vm1, %v7194_v43, 0.0  ;;  %vm2340_vm1 = vcmp.gt.f32.partialorder %v2324_v10, 0.0 }
 0x60a   :  { %v7198_v61 = vpop.eup %7197  ;;  %v2368_v38 = vsel %vm2336_vm5, %v7196_v50, 0.0  ;;  %v2383_v51 = vmul.f32 %v2367_v2, %v9093_v41  ;;  %vm2615_vm5 = vcmask 64512  }
 0x60b   :  { %5892 = vmatmul.mubr.f32.gmra.mrb[40].mxu0 %v2380_v32  ;;  %v7200_v11 = vpop.eup %7199  ;;  %v2369_v4 = vsel %vm2337_vm15, %v7198_v61, 0.0  ;;  %v2384_v13 = vmul.f32 %v2368_v38, %v9099_v34  ;;  %vm9152_vm15 = vmpackc.low %vm2615_vm5, %vm2615_vm5 }
 0x60c   :  { %5894 = vmatprep.mubr.f32.mxu0 %v2381_v5  ;;  %v7202_v16 = vpop.eup %7201  ;;  %v2370_v1 = vsel %vm2338_vm2, %v7200_v11, 0.0  ;;  %v2385_v33 = vmul.f32 %v2369_v4, %v9105_v6  ;;  %vm11193_vm2 = vmmov 0  }
 0x60d   :  { %v2371_v46 = vsel %vm2339_vm0, %v7202_v16, 0.0  ;;  %v2386_v14 = vmul.f32 %v2370_v1, %v9118_v54  ;;  %v2883_v1 = vld [vmem:[%s10695_s7] sm:$0xff]  ;;  %vm11219_vm0 = vcmp.gt.f32.partialorder %v7870_v24, 0.0  ;;  %s7472_s7 = smov 80  }
 0x60e   :  { %v2387_v29 = vmul.f32 %v2371_v46, %v9109_v55 }
 0x60f   :  { %5895 = vmatmul.mubr.f32.gmra.mrb[42].mxu0 %v2382_v42  ;;  %v7204_v60 = vpop.eup %7203 }
 0x610   :  { %5897 = vmatprep.mubr.f32.mxu0 %v2383_v51  ;;  %v2372_v41 = vsel %vm2340_vm1, %v7204_v60, 0.0  ;;  %vm11231_vm1 = vcmp.gt.f32.partialorder %v11183_v7, 0.0 }
 0x611   :  { %v2388_v63 = vmul.f32 %v2372_v41, %v9122_v30 }
 0x613   :  { %5898 = vmatmul.mubr.f32.gmra.mrb[44].mxu0 %v2384_v13  ;;  %v11192_v13 = vmov 0.0  }
 0x614   :  { %5900 = vmatprep.mubr.f32.mxu0 %v2385_v33  ;;  %v2809_v33 = vld [vmem:[%s10696_s6] sm:$0xf]  ;;  %s7471_s6 = smov 96  }
 0x617   :  { %5901 = vmatmul.mubr.f32.gmra.mrb[46].mxu0 %v2386_v14 }
 0x618   :  { %5903 = vmatprep.mubr.f32.mxu0 %v2387_v29 }
 0x61b   :  { %5904 = vmatmul.mubr.f32.gmra.mrb[48].mxu0 %v2388_v63 }
 0x6a7   :  { %v5884_v34 = vpop.f32.mrb[34].mxu0 }
 0x6a8   :  { %v9146_v49 = vmax.f32 %v5884_v34, 0.0  ;;  %v2503_v6 = vpop.f32.mrb[35].mxu0 }
 0x6a9   :  { %v9148_v18 = vmax.f32 %v2503_v6, 0.0 }
 0x6ab   :  { %v6386_v55 = vpack.c.bf16 %v9146_v49, %v9148_v18  ;;  %v5887_v54 = vpop.f32.mrb[36].mxu0  ;;  %5908 = vmatprep.mubr.msk.f32.mxu1 %vm2615_vm5, %v9148_v18 }
 0x6ac   :  { %v2513_v30 = vpop.f32.mrb[37].mxu0  ;;  %5909 = vmatmul.mubr.msk.f32.vlgmr.msra.gmra.mrb[0].mxu1 %vm2615_vm5, %v9146_v49  ;;  %v9166_v53 = vmax.f32 %v5887_v54, 0.0 }
 0x6ad   :  { %v9162_v37 = vmax.f32 %v2513_v30, 0.0  ;;  %6388 = vmatpush3.bf16.xpose.msk.msra.mxu1 %vm9152_vm15, %v6386_v55 }
 0x6ae   :  { %6389 = vmatprep.subr.bf16.mxu1 %v11188_v3 }
 0x6af   :  { %v5890_v58 = vpop.f32.mrb[38].mxu0  ;;  %5911 = vmatprep.mubr.msk.f32.mxu1 %vm2615_vm5, %v9162_v37  ;;  %v6390_v59 = vpack.c.bf16 %v9166_v53, %v9162_v37 }
 0x6b0   :  { %v2523_v23 = vpop.f32.mrb[39].mxu0  ;;  %5912 = vmatmul.mubr.msk.f32.gmra.mrb[2].mxu1 %vm2615_vm5, %v9166_v53  ;;  %v9175_v45 = vmax.f32 %v5890_v58, 0.0 }
 0x6b1   :  { %v9173_v22 = vmax.f32 %v2523_v23, 0.0 }
 0x6b3   :  { %5914 = vmatprep.mubr.msk.f32.mxu1 %vm2615_vm5, %v9173_v22  ;;  %v6394_v9 = vpack.c.bf16 %v9175_v45, %v9173_v22 }
 0x6b4   :  { %5915 = vmatmul.mubr.msk.f32.gmra.mrb[4].mxu1 %vm2615_vm5, %v9175_v45 }
 0x6b5   :  { %6392 = vmatpush3.bf16.xpose.msk.msra.mxu1 %vm9152_vm15, %v6390_v59 }
 0x6b6   :  { %6393 = vmatprep.subr.bf16.mxu1 %v11188_v3 }
 0x6bd   :  { %6396 = vmatpush3.bf16.xpose.msk.msra.mxu1 %vm9152_vm15, %v6394_v9 }
 0x6be   :  { %6397 = vmatprep.subr.bf16.mxu1 %v11188_v3 }
 0x6de   :  { %v5893_v26 = vpop.f32.mrb[40].mxu0 }
 0x6df   :  { %v2605_v31 = vmax.f32 %v5893_v26, 0.0  ;;  %v2533_v36 = vpop.f32.mrb[41].mxu0 }
 0x6e0   :  { %v2604_v44 = vmax.f32 %v2533_v36, 0.0 }
 0x6e2   :  { %v6398_v35 = vpack.c.bf16 %v2605_v31, %v2604_v44  ;;  %v5896_v15 = vpop.f32.mrb[42].mxu0  ;;  %5917 = vmatprep.mubr.msk.f32.mxu1 %vm2615_vm5, %v2604_v44 }
 0x6e3   :  { %v2607_v40 = vmax.f32 %v5896_v15, 0.0  ;;  %v2543_v25 = vpop.f32.mrb[43].mxu0  ;;  %5918 = vmatmul.mubr.msk.f32.gmra.mrb[6].mxu1 %vm2615_vm5, %v2605_v31 }
 0x6e4   :  { %v2606_v10 = vmax.f32 %v2543_v25, 0.0  ;;  %6400 = vmatpush3.bf16.xpose.msk.msra.mxu1 %vm9152_vm15, %v6398_v35 }
 0x6e5   :  { %6401 = vmatprep.subr.bf16.mxu1 %v11188_v3 }
 0x6e6   :  { %v6402_v17 = vpack.c.bf16 %v2607_v40, %v2606_v10  ;;  %v5899_v0 = vpop.f32.mrb[44].mxu0  ;;  %5920 = vmatprep.mubr.msk.f32.mxu1 %vm2615_vm5, %v2606_v10 }
 0x6e7   :  { %v2609_v43 = vmax.f32 %v5899_v0, 0.0  ;;  %v2553_v52 = vpop.f32.mrb[45].mxu0  ;;  %5921 = vmatmul.mubr.msk.f32.gmra.mrb[8].mxu1 %vm2615_vm5, %v2607_v40 }
 0x6e8   :  { %v2608_v32 = vmax.f32 %v2553_v52, 0.0 }
 0x6ea   :  { %v6406_v8 = vpack.c.bf16 %v2609_v43, %v2608_v32  ;;  %v5902_v5 = vpop.f32.mrb[46].mxu0  ;;  %5923 = vmatprep.mubr.msk.f32.mxu1 %vm2615_vm5, %v2608_v32 }
 0x6eb   :  { %v2611_v50 = vmax.f32 %v5902_v5, 0.0  ;;  %v2563_v2 = vpop.f32.mrb[47].mxu0  ;;  %5924 = vmatmul.mubr.msk.f32.gmra.mrb[10].mxu1 %vm2615_vm5, %v2609_v43 }
 0x6ec   :  { %v2610_v61 = vmax.f32 %v2563_v2, 0.0  ;;  %6404 = vmatpush3.bf16.xpose.msk.msra.mxu1 %vm9152_vm15, %v6402_v17 }
 0x6ed   :  { %6405 = vmatprep.subr.bf16.mxu1 %v11188_v3 }
 0x6ee   :  { %v6410_v42 = vpack.c.bf16 %v2611_v50, %v2610_v61  ;;  %v5905_v38 = vpop.f32.mrb[48].mxu0  ;;  %5926 = vmatprep.mubr.msk.f32.mxu1 %vm2615_vm5, %v2610_v61 }
 0x6ef   :  { %v2613_v51 = vmax.f32 %v5905_v38, 0.0  ;;  %v2573_v11 = vpop.f32.mrb[49].mxu0  ;;  %5927 = vmatmul.mubr.msk.f32.gmra.mrb[12].mxu1 %vm2615_vm5, %v2611_v50 }
 0x6f0   :  { %v2612_v4 = vmax.f32 %v2573_v11, 0.0 }
 0x6f2   :  { %v6414_v16 = vpack.c.bf16 %v2613_v51, %v2612_v4  ;;  %5929 = vmatprep.mubr.msk.f32.mxu1 %vm2615_vm5, %v2612_v4 }
 0x6f3   :  { %5930 = vmatmul.mubr.msk.f32.gmra.mrb[14].mxu1 %vm2615_vm5, %v2613_v51 }
 0x6f4   :  { %6408 = vmatpush3.bf16.xpose.msk.msra.mxu1 %vm9152_vm15, %v6406_v8  ;;  %5964 = vmatprep.mubr.msk.f32.mxu1 %vm11193_vm2, %v11192_v13  ;;  %vm11238_vm2 = vcmp.gt.f32.partialorder %v11184_v20, 0.0 }
 0x6f5   :  { %6409 = vmatprep.subr.bf16.mxu1 %v11188_v3 }
 0x6fc   :  { %6412 = vmatpush3.bf16.xpose.msk.msra.mxu1 %vm9152_vm15, %v6410_v42 }
 0x6fd   :  { %6413 = vmatprep.subr.bf16.mxu1 %v11188_v3 }
 0x704   :  { %6416 = vmatpush3.bf16.xpose.msk.msra.mxu1 %vm9152_vm15, %v6414_v16  ;;  %vm11235_vm15 = vcmp.gt.f32.partialorder %v11186_v12, 0.0 }
 0x705   :  { %5967 = vmatprep.subr.mxu1 %v2883_v1 }
 0x70b   :  { %5965 = vmatmul.mubr.msk.f32.vlgmr.msra.gmra.mrb[16].mxu1 %vm2615_vm5, %v2809_v33  ;;  %v11210_v33 = vmov 0  }
 0x70c   :  { %5968 = vmatpush3.msra.mxu1 %v2883_v1  ;;  %5969 = vmatprep.mubr.msk.f32.mxu1 %vm2615_vm5, %v9148_v18 }
 0x70f   :  { %5970 = vmatmul.mubr.msk.f32.vlgmr.msra.gmra.mrb[18].mxu1 %vm2615_vm5, %v9146_v49 }
 0x710   :  { %5972 = vmatprep.mubr.msk.f32.mxu1 %vm2615_vm5, %v9162_v37 }
 0x713   :  { %5973 = vmatmul.mubr.msk.f32.gmra.mrb[20].mxu1 %vm2615_vm5, %v9166_v53 }
 0x714   :  { %5975 = vmatprep.mubr.msk.f32.mxu1 %vm2615_vm5, %v9173_v22 }
 0x717   :  { %5976 = vmatmul.mubr.msk.f32.gmra.mrb[22].mxu1 %vm2615_vm5, %v9175_v45 }
 0x718   :  { %5978 = vmatprep.mubr.msk.f32.mxu1 %vm2615_vm5, %v2604_v44 }
 0x71b   :  { %5979 = vmatmul.mubr.msk.f32.gmra.mrb[24].mxu1 %vm2615_vm5, %v2605_v31 }
 0x71c   :  { %5981 = vmatprep.mubr.msk.f32.mxu1 %vm2615_vm5, %v2606_v10 }
 0x71f   :  { %5982 = vmatmul.mubr.msk.f32.gmra.mrb[26].mxu1 %vm2615_vm5, %v2607_v40 }
 0x720   :  { %5984 = vmatprep.mubr.msk.f32.mxu1 %vm2615_vm5, %v2608_v32 }
 0x723   :  { %5985 = vmatmul.mubr.msk.f32.gmra.mrb[28].mxu1 %vm2615_vm5, %v2609_v43 }
 0x724   :  { %5987 = vmatprep.mubr.msk.f32.mxu1 %vm2615_vm5, %v2610_v61 }
 0x727   :  { %5988 = vmatmul.mubr.msk.f32.gmra.mrb[30].mxu1 %vm2615_vm5, %v2611_v50 }
 0x728   :  { %5990 = vmatprep.mubr.msk.f32.mxu1 %vm2615_vm5, %v2612_v4 }
 0x72b   :  { %5991 = vmatmul.mubr.msk.f32.gmra.mrb[32].mxu1 %vm2615_vm5, %v2613_v51  ;;  %vm11233_vm5 = vcmp.gt.f32.partialorder %v11187_v19, 0.0 }
 0x77f   :  { %v5910_v3 = vpop.f32.mrb[0].mxu1 }
 0x780   :  { %v2730_v60 = vpop.f32.mrb[1].mxu1 }
 0x781   :  { %v9246_v46 = vpack.i.bf16 %v5910_v3, %v2730_v60  ;;  %v9248_v14 = vpack.c.bf16 %v5910_v3, %v2730_v60  ;;  %v11211_v3 = vmov 2   ;;  %v11212_v60 = vld [vmem:[#allocation19_spill] sm:$0xff] }
 0x783   :  { %11194 = vst [vmem:[#allocation77_spill] sm:$0xff] %v9246_v46  ;;  %11195 = vst [vmem:[#allocation65_spill] sm:$0xff] %v9248_v14  ;;  %v5913_v41 = vpop.f32.mrb[2].mxu1 }
 0x784   :  { %v2740_v29 = vpop.f32.mrb[3].mxu1 }
 0x785   :  { %v9250_v63 = vpack.i.bf16 %v5913_v41, %v2740_v29  ;;  %v9252_v34 = vpack.c.bf16 %v5913_v41, %v2740_v29  ;;  %v11213_v41 = vsub.s32 1, %v11212_v60 }
 0x787   :  { %11196 = vst [vmem:[#allocation27_spill] sm:$0xff] %v9250_v63  ;;  %11197 = vst [vmem:[#allocation59_spill] sm:$0xff] %v9252_v34  ;;  %v5916_v49 = vpop.f32.mrb[4].mxu1 }
 0x788   :  { %v2750_v6 = vpop.f32.mrb[5].mxu1 }
 0x789   :  { %v9254_v18 = vpack.i.bf16 %v5916_v49, %v2750_v6  ;;  %v9256_v21 = vpack.c.bf16 %v5916_v49, %v2750_v6 }
 0x78b   :  { %11198 = vst [vmem:[#allocation80_spill] sm:$0xff] %v9254_v18  ;;  %11199 = vst [vmem:[#allocation67_spill] sm:$0xff] %v9256_v21 }
 0x7b6   :  { %v5919_v55 = vpop.f32.mrb[6].mxu1 }
 0x7b7   :  { %v2760_v54 = vpop.f32.mrb[7].mxu1 }
 0x7b8   :  { %v9258_v30 = vpack.i.bf16 %v5919_v55, %v2760_v54  ;;  %v9260_v37 = vpack.c.bf16 %v5919_v55, %v2760_v54 }
 0x7ba   :  { %11200 = vst [vmem:[#allocation82_spill] sm:$0xff] %v9258_v30  ;;  %11201 = vst [vmem:[#allocation69_spill] sm:$0xff] %v9260_v37  ;;  %v5922_v53 = vpop.f32.mrb[8].mxu1 }
 0x7bb   :  { %v2770_v58 = vpop.f32.mrb[9].mxu1 }
 0x7bc   :  { %v9262_v23 = vpack.i.bf16 %v5922_v53, %v2770_v58  ;;  %v9264_v22 = vpack.c.bf16 %v5922_v53, %v2770_v58 }
 0x7be   :  { %11202 = vst [vmem:[#allocation90_spill] sm:$0xff] %v9262_v23  ;;  %11203 = vst [vmem:[#allocation30_spill] sm:$0xff] %v9264_v22  ;;  %v5925_v45 = vpop.f32.mrb[10].mxu1 }
 0x7bf   :  { %v2780_v59 = vpop.f32.mrb[11].mxu1 }
 0x7c0   :  { %v9266_v9 = vpack.i.bf16 %v5925_v45, %v2780_v59  ;;  %v9268_v26 = vpack.c.bf16 %v5925_v45, %v2780_v59 }
 0x7c2   :  { %11204 = vst [vmem:[#allocation60_spill] sm:$0xff] %v9266_v9  ;;  %11205 = vst [vmem:[#allocation25_spill] sm:$0xff] %v9268_v26  ;;  %v5928_v31 = vpop.f32.mrb[12].mxu1 }
 0x7c3   :  { %v2790_v36 = vpop.f32.mrb[13].mxu1 }
 0x7c4   :  { %v9270_v44 = vpack.i.bf16 %v5928_v31, %v2790_v36  ;;  %v9272_v35 = vpack.c.bf16 %v5928_v31, %v2790_v36 }
 0x7c6   :  { %11206 = vst [vmem:[#allocation62_spill] sm:$0xff] %v9270_v44  ;;  %11207 = vst [vmem:[#allocation75_spill] sm:$0xff] %v9272_v35  ;;  %v5931_v15 = vpop.f32.mrb[14].mxu1 }
 0x7c7   :  { %v2800_v40 = vpop.f32.mrb[15].mxu1 }
 0x7c8   :  { %v9274_v25 = vpack.i.bf16 %v5931_v15, %v2800_v40  ;;  %v9276_v10 = vpack.c.bf16 %v5931_v15, %v2800_v40  ;;  %v11214_v15 = vld [vmem:[#allocation20_spill] sm:$0xff] }
 0x7ca   :  { %11208 = vst [vmem:[#allocation3_spill] sm:$0xff] %v9274_v25  ;;  %11209 = vst [vmem:[#allocation85_spill] sm:$0xff] %v9276_v10 }
 0x7de   :  { %v9278_v17 = vpop.f32.mrb[16].mxu1 }
 0x7df   :  { %v5966_v0 = vpop.f32.mrb[17].mxu1  ;;  %v9351_v29 = vrot.slane %v9278_v17, %v11213_v41 }
 0x7e2   :  { %v9280_v43 = vpop.f32.mrb[18].mxu1 }
 0x7e3   :  { %3374 = vperm.xlu1 %6822, %v9280_v43   ;;  %v9283_v52 = vpop.f32.mrb[19].mxu1 }
 0x7e4   :  { %3370 = vperm.xlu0 %6821, %v9283_v52  }
 0x7e6   :  { %v9286_v32 = vpop.f32.mrb[20].mxu1 }
 0x7e7   :  { %v9288_v8 = vpop.f32.mrb[21].mxu1 }
 0x7e8   :  { %3378 = vperm.xlu1 %6822, %v9288_v8  }
 0x7ea   :  { %v9291_v5 = vpop.f32.mrb[22].mxu1 }
 0x7eb   :  { %v9293_v50 = vpop.f32.mrb[23].mxu1 }
 0x7ec   :  { %3382 = vperm.xlu1 %6822, %v9286_v32  }
 0x7ee   :  { %v9296_v2 = vpop.f32.mrb[24].mxu1 }
 0x7ef   :  { %v9298_v61 = vpop.f32.mrb[25].mxu1 }
 0x7f0   :  { %3386 = vperm.xlu1 %6822, %v9293_v50  }
 0x7f2   :  { %v9301_v42 = vpop.f32.mrb[26].mxu1 }
 0x7f3   :  { %3406 = vperm.xlu0 %6821, %v9301_v42   ;;  %v9304_v38 = vpop.f32.mrb[27].mxu1 }
 0x7f4   :  { %3390 = vperm.xlu1 %6822, %v9291_v5  }
 0x7f6   :  { %v9307_v51 = vpop.f32.mrb[28].mxu1 }
 0x7f7   :  { %3414 = vperm.xlu0 %6821, %v9307_v51   ;;  %v9310_v11 = vpop.f32.mrb[29].mxu1 }
 0x7f8   :  { %3394 = vperm.xlu1 %6822, %v9298_v61  }
 0x7fa   :  { %v9313_v4 = vpop.f32.mrb[30].mxu1 }
 0x7fb   :  { %3422 = vperm.xlu0 %6821, %v9313_v4   ;;  %v9316_v16 = vpop.f32.mrb[31].mxu1 }
 0x7fc   :  { %3398 = vperm.xlu1 %6822, %v9296_v2  }
 0x7fe   :  { %v9319_v13 = vpop.f32.mrb[32].mxu1 }
 0x7ff   :  { %3430 = vperm.xlu0 %6821, %v9319_v13   ;;  %v9322_v1 = vpop.f32.mrb[33].mxu1 }
 0x800   :  { %3402 = vperm.xlu1 %6822, %v9304_v38  }
 0x803   :  { %6824 = vset.pattern.permute.xlu0 %v11210_v33 }
 0x804   :  { %3410 = vperm.xlu1 %6822, %v9310_v11   ;;  %3036 = vperm.xlu0 %6824, %v9280_v43  }
 0x808   :  { %3418 = vperm.xlu1 %6822, %v9316_v16   ;;  %3051 = vperm.xlu0 %6824, %v9293_v50  }
 0x80c   :  { %3061 = vperm.xlu0 %6824, %v9298_v61   ;;  %3426 = vperm.xlu1 %6822, %v9322_v1  }
 0x810   :  { %3071 = vperm.xlu0 %6824, %v9304_v38   ;;  %6823 = vset.pattern.permute.xlu1 %v11210_v33  ;;  %v11215_v33 = vld [vmem:[#allocation22_spill] sm:$0xff] }
 0x811   :  { %3031 = vperm.xlu1 %6823, %v9283_v52  }
 0x814   :  { %3081 = vperm.xlu0 %6824, %v9310_v11  }
 0x815   :  { %3041 = vperm.xlu1 %6823, %v9288_v8  }
 0x818   :  { %3091 = vperm.xlu0 %6824, %v9316_v16  }
 0x819   :  { %3046 = vperm.xlu1 %6823, %v9286_v32  }
 0x81c   :  { %3101 = vperm.xlu0 %6824, %v9322_v1  }
 0x81d   :  { %3056 = vperm.xlu1 %6823, %v9291_v5  }
 0x820   :  { %6825 = vset.pattern.permute.xlu0 %v11211_v3 }
 0x821   :  { %3066 = vperm.xlu1 %6823, %v9296_v2  }
 0x825   :  { %3076 = vperm.xlu1 %6823, %v9301_v42  }
 0x829   :  { %3086 = vperm.xlu1 %6823, %v9307_v51  }
 0x82d   :  { %3096 = vperm.xlu1 %6823, %v9313_v4  }
 0x831   :  { %3106 = vperm.xlu1 %6823, %v9319_v13  }
 0x835   :  { %6826 = vset.pattern.permute.xlu1 %v11211_v3 }
 0x862   :  { %v3375_v49 = vpop.permute.xlu1 %3374 }
 0x863   :  { %v3438_v6 = vadd.f32 %v9351_v29, %v3375_v49  ;;  %v3371_v55 = vpop.permute.xlu0 %3370 }
 0x864   :  { %v3437_v54 = vadd.f32 %v9351_v29, %v3371_v55 }
 0x865   :  { %v3454_v53 = vmul.f32 0.2, %v3438_v6 }
 0x866   :  { %v3453_v58 = vmul.f32 0.2, %v3437_v54 }
 0x867   :  { %v3379_v45 = vpop.permute.xlu1 %3378  ;;  %v3470_v59 = vmax.f32 %v3438_v6, %v3454_v53  ;;  %v11217_v53 = vld [vmem:[#allocation28_spill] sm:$0xff] }
 0x868   :  { %v3439_v31 = vadd.f32 %v9351_v29, %v3379_v45  ;;  %v3469_v36 = vmax.f32 %v3437_v54, %v3453_v58 }
 0x869   :  { %v9358_v40 = vsel %vm66_vm3, %v3470_v59, -1e+30 }
 0x86a   :  { %v3455_v0 = vmul.f32 0.2, %v3439_v31  ;;  %3503 = vmax.xlane.f32.xlu0 %v9358_v40  ;;  %v9363_v3 = vsel %vm65_vm4, %v3469_v36, -1e+30 }
 0x86b   :  { %11216 = vst [vmem:[#allocation70_spill] sm:$0xff] %v9363_v3  ;;  %v3383_v41 = vpop.permute.xlu1 %3382  ;;  %3501 = vmax.xlane.f32.xlu1 %v9363_v3 }
 0x86c   :  { %v3440_v49 = vadd.f32 %v9351_v29, %v3383_v41  ;;  %v3471_v6 = vmax.f32 %v3439_v31, %v3455_v0 }
 0x86e   :  { %v3456_v55 = vmul.f32 0.2, %v3440_v49  ;;  %v9369_v54 = vsel %vm67_vm6, %v3471_v6, -1e+30 }
 0x86f   :  { %11218 = vst [vmem:[#allocation78_spill] sm:$0xff] %v9369_v54  ;;  %v3387_v58 = vpop.permute.xlu1 %3386  ;;  %3505 = vmax.xlane.f32.xlu1 %v9369_v54 }
 0x870   :  { %v3441_v45 = vadd.f32 %v9351_v29, %v3387_v58  ;;  %v3472_v59 = vmax.f32 %v3440_v49, %v3456_v55 }
 0x872   :  { %v3457_v10 = vmul.f32 0.2, %v3441_v45  ;;  %v9375_v36 = vsel %vm11219_vm0, %v3472_v59, -1e+30  ;;  %v3407_v58 = vpop.permute.xlu0 %3406 }
 0x873   :  { %11220 = vst [vmem:[#allocation5_spill] sm:$0xff] %v9375_v36  ;;  %v3391_v35 = vpop.permute.xlu1 %3390  ;;  %3507 = vmax.xlane.f32.xlu1 %v9375_v36 }
 0x874   :  { %v3442_v31 = vadd.f32 %v9351_v29, %v3391_v35  ;;  %v3473_v0 = vmax.f32 %v3441_v45, %v3457_v10  ;;  %v3446_v45 = vadd.f32 %v9351_v29, %v3407_v58 }
 0x876   :  { %v3458_v41 = vmul.f32 0.2, %v3442_v31  ;;  %v9381_v6 = vsel %vm69_vm7, %v3473_v0, -1e+30  ;;  %v3462_v34 = vmul.f32 0.2, %v3446_v45 }
 0x877   :  { %11221 = vst [vmem:[#allocation83_spill] sm:$0xff] %v9381_v6  ;;  %v3395_v26 = vpop.permute.xlu1 %3394  ;;  %3509 = vmax.xlane.f32.xlu0 %v9381_v6 }
 0x878   :  { %v3443_v49 = vadd.f32 %v9351_v29, %v3395_v26  ;;  %v3474_v55 = vmax.f32 %v3442_v31, %v3458_v41  ;;  %v3415_v26 = vpop.permute.xlu0 %3414 }
 0x879   :  { %v3448_v14 = vadd.f32 %v9351_v29, %v3415_v26 }
 0x87a   :  { %v3459_v59 = vmul.f32 0.2, %v3443_v49  ;;  %v9387_v22 = vsel %vm70_vm9, %v3474_v55, -1e+30 }
 0x87b   :  { %11222 = vst [vmem:[#allocation91_spill] sm:$0xff] %v9387_v22  ;;  %v3399_v37 = vpop.permute.xlu1 %3398  ;;  %3511 = vmax.xlane.f32.xlu1 %v9387_v22 }
 0x87c   :  { %v3444_v35 = vadd.f32 %v9351_v29, %v3399_v37  ;;  %v3475_v10 = vmax.f32 %v3443_v49, %v3459_v59 }
 0x87e   :  { %v3460_v0 = vmul.f32 0.2, %v3444_v35  ;;  %v9394_v21 = vsel %vm71_vm8, %v3475_v10, -1e+30  ;;  %v3464_v10 = vmul.f32 0.2, %v3448_v14 }
 0x87f   :  { %11223 = vst [vmem:[#allocation7_spill] sm:$0xff] %v9394_v21  ;;  %v3403_v31 = vpop.permute.xlu1 %3402  ;;  %3513 = vmax.xlane.f32.xlu1 %v9394_v21 }
 0x880   :  { %v3445_v41 = vadd.f32 %v9351_v29, %v3403_v31  ;;  %v3476_v55 = vmax.f32 %v3444_v35, %v3460_v0  ;;  %v3478_v35 = vmax.f32 %v3446_v45, %v3462_v34 }
 0x882   :  { %v3461_v44 = vmul.f32 0.2, %v3445_v41  ;;  %v9401_v37 = vsel %vm72_vm10, %v3476_v55, -1e+30  ;;  %v9416_v55 = vsel %vm74_vm12, %v3478_v35, -1e+30 }
 0x883   :  { %11224 = vst [vmem:[#allocation38_spill] sm:$0xff] %v9401_v37  ;;  %v3411_v49 = vpop.permute.xlu1 %3410  ;;  %3515 = vmax.xlane.f32.xlu0 %v9401_v37  ;;  %11227 = vst [vmem:[#allocation11_spill] sm:$0xff] %v9416_v55 }
 0x884   :  { %v3447_v58 = vadd.f32 %v9351_v29, %v3411_v49  ;;  %v3477_v59 = vmax.f32 %v3445_v41, %v3461_v44  ;;  %v3480_v49 = vmax.f32 %v3448_v14, %v3464_v10  ;;  %v11229_v14 = vmov 3  }
 0x886   :  { %v3463_v25 = vmul.f32 0.2, %v3447_v58  ;;  %v9407_v31 = vsel %vm73_vm11, %v3477_v59, -1e+30  ;;  %v9422_v44 = vsel %vm76_vm14, %v3480_v49, -1e+30 }
 0x887   :  { %11225 = vst [vmem:[#allocation9_spill] sm:$0xff] %v9407_v31  ;;  %3517 = vmax.xlane.f32.xlu1 %v9407_v31  ;;  %11228 = vst [vmem:[#allocation13_spill] sm:$0xff] %v9422_v44  ;;  %v3419_v34 = vpop.permute.xlu1 %3418 }
 0x888   :  { %v3479_v0 = vmax.f32 %v3447_v58, %v3463_v25  ;;  %v3423_v25 = vpop.permute.xlu0 %3422  ;;  %v3449_v10 = vadd.f32 %v9351_v29, %v3419_v34 }
 0x88a   :  { %v9412_v26 = vsel %vm75_vm13, %v3479_v0, -1e+30 }
 0x88b   :  { %11226 = vst [vmem:[#allocation92_spill] sm:$0xff] %v9412_v26  ;;  %3521 = vmax.xlane.f32.xlu0 %v9412_v26  ;;  %3519 = vmax.xlane.f32.xlu1 %v9416_v55  ;;  %v3427_v45 = vpop.permute.xlu1 %3426  ;;  %v3465_v55 = vmul.f32 0.2, %v3449_v10 }
 0x88c   :  { %v3431_v41 = vpop.permute.xlu0 %3430  ;;  %v3451_v3 = vadd.f32 %v9351_v29, %v3427_v45 }
 0x88d   :  { %v3452_v49 = vadd.f32 %v9351_v29, %v3431_v41  ;;  %v3481_v22 = vmax.f32 %v3449_v10, %v3465_v55 }
 0x88f   :  { %3523 = vmax.xlane.f32.xlu1 %v9422_v44  ;;  %v11230_v44 = vsub.s32 0, %v11212_v60  ;;  %v3468_v31 = vmul.f32 0.2, %v3452_v49  ;;  %v9455_v41 = vsel %vm11231_vm1, %v3481_v22, -1e+30 }
 0x890   :  { %v3032_v58 = vpop.permute.xlu1 %3031  ;;  %v3037_v59 = vpop.permute.xlu0 %3036  ;;  %11232 = vst [vmem:[#allocation6_spill] sm:$0xff] %v9455_v41  ;;  %v3467_v22 = vmul.f32 0.2, %v3451_v3 }
 0x891   :  { %v9448_v23 = vrot.slane %v9278_v17, %v11230_v44  ;;  %v3484_v54 = vmax.f32 %v3452_v49, %v3468_v31 }
 0x893   :  { %v3113_v63 = vadd.f32 %v9448_v23, %v3032_v58 }
 0x894   :  { %v3042_v35 = vpop.permute.xlu1 %3041  ;;  %v3052_v0 = vpop.permute.xlu0 %3051 }
 0x895   :  { %v3115_v9 = vadd.f32 %v9448_v23, %v3042_v35  ;;  %v3117_v34 = vadd.f32 %v9448_v23, %v3052_v0 }
 0x897   :  { %v3131_v37 = vmul.f32 0.2, %v3115_v9  ;;  %v3133_v35 = vmul.f32 0.2, %v3117_v34 }
 0x898   :  { %v3047_v26 = vpop.permute.xlu1 %3046  ;;  %v3062_v36 = vpop.permute.xlu0 %3061 }
 0x899   :  { %v3119_v55 = vadd.f32 %v9448_v23, %v3062_v36  ;;  %v3147_v10 = vmax.f32 %v3115_v9, %v3131_v37  ;;  %v3149_v36 = vmax.f32 %v3117_v34, %v3133_v35  ;;  %v3114_v9 = vadd.f32 %v9448_v23, %v3037_v59 }
 0x89b   :  { %v9480_v58 = vsel %vm69_vm7, %v3149_v36, -1e+30  ;;  %v3130_v59 = vmul.f32 0.2, %v3114_v9 }
 0x89c   :  { %v3057_v21 = vpop.permute.xlu1 %3056  ;;  %v3072_v6 = vpop.permute.xlu0 %3071  ;;  %11237 = vst [vmem:[#allocation76_spill] sm:$0xff] %v9480_v58 }
 0x89d   :  { %v3121_v31 = vadd.f32 %v9448_v23, %v3072_v6  ;;  %v3483_v6 = vmax.f32 %v3451_v3, %v3467_v22  ;;  %v3116_v22 = vadd.f32 %v9448_v23, %v3047_v26 }
 0x89f   :  { %v9486_v35 = vsel %vm11238_vm2, %v3483_v6, -1e+30  ;;  %v3146_v6 = vmax.f32 %v3114_v9, %v3130_v59 }
 0x8a0   :  { %4052 = vperm.xlu1 %6826, %v9280_v43   ;;  %v3067_v0 = vpop.permute.xlu1 %3066  ;;  %v3082_v45 = vpop.permute.xlu0 %3081  ;;  %11239 = vst [vmem:[#allocation64_spill] sm:$0xff] %v9486_v35 }
 0x8a1   :  { %4048 = vperm.xlu0 %6825, %v9283_v52  }
 0x8a4   :  { %4056 = vperm.xlu1 %6826, %v9288_v8   ;;  %v3077_v34 = vpop.permute.xlu1 %3076 }
 0x8a5   :  { %4060 = vperm.xlu0 %6825, %v9286_v32  }
 0x8a8   :  { %4072 = vperm.xlu1 %6826, %v9298_v61  }
 0x8a9   :  { %4064 = vperm.xlu0 %6825, %v9293_v50  }
 0x8ac   :  { %4084 = vperm.xlu1 %6826, %v9301_v42  }
 0x8ad   :  { %4068 = vperm.xlu0 %6825, %v9291_v5  }
 0x8b0   :  { %4096 = vperm.xlu1 %6826, %v9316_v16  }
 0x8b1   :  { %4076 = vperm.xlu0 %6825, %v9296_v2  }
 0x8b4   :  { %4108 = vperm.xlu1 %6826, %v9319_v13  }
 0x8b5   :  { %4080 = vperm.xlu0 %6825, %v9304_v38  }
 0x8b8   :  { %6828 = vset.pattern.permute.xlu1 %v11229_v14 }
 0x8b9   :  { %4088 = vperm.xlu0 %6825, %v9310_v11  }
 0x8bd   :  { %4092 = vperm.xlu0 %6825, %v9307_v51  }
 0x8c1   :  { %4100 = vperm.xlu0 %6825, %v9313_v4  }
 0x8c5   :  { %4104 = vperm.xlu0 %6825, %v9322_v1  }
 0x8c9   :  { %6827 = vset.pattern.permute.xlu0 %v11229_v14  ;;  %v3450_v14 = vadd.f32 %v9351_v29, %v3423_v25  ;;  %v9462_v25 = vsel %vm11233_vm5, %v3484_v54, -1e+30  ;;  %v9469_v29 = vsel %vm67_vm6, %v3147_v10, -1e+30  ;;  %v3137_v54 = vmul.f32 0.2, %v3121_v31  ;;  %vm11251_vm5 = vmmov %vm11235_vm15 }
 0x8ca   :  { %11234 = vst [vmem:[#allocation15_spill] sm:$0xff] %v9462_v25 }
 0x8cb   :  { %v3466_v44 = vmul.f32 0.2, %v3450_v14 }
 0x8cd   :  { %v3482_v49 = vmax.f32 %v3450_v14, %v3466_v44  ;;  %v3129_v14 = vmul.f32 0.2, %v3113_v63  ;;  %v3123_v44 = vadd.f32 %v9448_v23, %v3082_v45 }
 0x8cf   :  { %v9475_v37 = vsel %vm11235_vm15, %v3482_v49, -1e+30  ;;  %v3153_v49 = vmax.f32 %v3121_v31, %v3137_v54  ;;  %v3139_v3 = vmul.f32 0.2, %v3123_v44  ;;  %v3145_v36 = vmax.f32 %v3113_v63, %v3129_v14  ;;  %vm11252_vm15 = vmmov %vm11238_vm2 }
 0x8d0   :  { %11236 = vst [vmem:[#allocation17_spill] sm:$0xff] %v9475_v37  ;;  %v3132_v31 = vmul.f32 0.2, %v3116_v22  ;;  %v3118_v54 = vadd.f32 %v9448_v23, %v3057_v21  ;;  %v9510_v63 = vsel %vm66_vm3, %v3146_v6, -1e+30  ;;  %vm11253_vm2 = vcmp.gt.f32.partialorder %v11187_v19, 0.0 }
 0x8d1   :  { %v9504_v26 = vsel %vm65_vm4, %v3145_v36, -1e+30 }
 0x8d2   :  { %11242 = vst [vmem:[#allocation86_spill] sm:$0xff] %v9504_v26  ;;  %v3134_v14 = vmul.f32 0.2, %v3118_v54  ;;  %v3148_v21 = vmax.f32 %v3116_v22, %v3132_v31 }
 0x8d4   :  { %v9524_v36 = vsel %vm11219_vm0, %v3148_v21, -1e+30  ;;  %v3150_v6 = vmax.f32 %v3118_v54, %v3134_v14 }
 0x8d6   :  { %v9531_v22 = vsel %vm70_vm9, %v3150_v6, -1e+30 }
 0x8d7   :  { %11244 = vst [vmem:[#allocation79_spill] sm:$0xff] %v9531_v22 }
 0x8d8   :  { %3525 = vmax.xlane.f32.xlu1 %v9455_v41  ;;  %v3135_v41 = vmul.f32 0.2, %v3119_v55 }
 0x8da   :  { %v3151_v10 = vmax.f32 %v3119_v55, %v3135_v41  ;;  %v9495_v41 = vpop.permute.xlu1 %3086  ;;  %v9499_v55 = vsel %vm73_vm11, %v3153_v49, -1e+30  ;;  %v3120_v49 = vadd.f32 %v9448_v23, %v3067_v0 }
 0x8db   :  { %11241 = vst [vmem:[#allocation95_spill] sm:$0xff] %v9499_v55 }
 0x8dc   :  { %3531 = vmax.xlane.f32.xlu1 %v9462_v25  ;;  %v9491_v45 = vsel %vm71_vm8, %v3151_v10, -1e+30  ;;  %v3155_v10 = vmax.f32 %v3123_v44, %v3139_v3  ;;  %v3136_v44 = vmul.f32 0.2, %v3120_v49  ;;  %v3122_v3 = vadd.f32 %v9448_v23, %v3077_v34 }
 0x8dd   :  { %11240 = vst [vmem:[#allocation8_spill] sm:$0xff] %v9491_v45  ;;  %v11247_v25 = vsub.s32 2, %v11212_v60 }
 0x8de   :  { %v9515_v9 = vsel %vm75_vm13, %v3155_v10, -1e+30  ;;  %v9517_v59 = vpop.permute.xlu1 %3096  ;;  %v3138_v10 = vmul.f32 0.2, %v3122_v3  ;;  %v3152_v31 = vmax.f32 %v3120_v49, %v3136_v44  ;;  %v3092_v49 = vpop.permute.xlu0 %3091 }
 0x8df   :  { %11243 = vst [vmem:[#allocation71_spill] sm:$0xff] %v9515_v9 }
 0x8e0   :  { %3181 = vmax.xlane.f32.xlu1 %v9469_v29  ;;  %v9538_v34 = vsel %vm72_vm10, %v3152_v31, -1e+30  ;;  %v3154_v21 = vmax.f32 %v3122_v3, %v3138_v10 }
 0x8e1   :  { %11245 = vst [vmem:[#allocation66_spill] sm:$0xff] %v9538_v34 }
 0x8e2   :  { %v9527_v0 = vpop.permute.xlu1 %3106  ;;  %v9543_v54 = vsel %vm74_vm12, %v3154_v21, -1e+30  ;;  %v3102_v6 = vpop.permute.xlu0 %3101 }
 0x8e3   :  { %11246 = vst [vmem:[#allocation37_spill] sm:$0xff] %v9543_v54 }
 0x8e4   :  { %3527 = vmax.xlane.f32.xlu0 %v9475_v37  ;;  %3185 = vmax.xlane.f32.xlu1 %v9480_v58 }
 0x8e8   :  { %3529 = vmax.xlane.f32.xlu0 %v9486_v35  ;;  %3189 = vmax.xlane.f32.xlu1 %v9491_v45 }
 0x8ec   :  { %3177 = vmax.xlane.f32.xlu0 %v9504_v26  ;;  %3193 = vmax.xlane.f32.xlu1 %v9499_v55 }
 0x8f0   :  { %3179 = vmax.xlane.f32.xlu0 %v9510_v63  ;;  %3197 = vmax.xlane.f32.xlu1 %v9515_v9 }
 0x8f4   :  { %3183 = vmax.xlane.f32.xlu0 %v9524_v36 }
 0x8f7   :  { %v9556_v10 = vpop.xlane.xlu0 %3503 }
 0x8f8   :  { %3187 = vmax.xlane.f32.xlu0 %v9531_v22  ;;  %v9534_v9 = vpop.xlane.xlu1 %3501 }
 0x8fc   :  { %3191 = vmax.xlane.f32.xlu0 %v9538_v34  ;;  %v9545_v14 = vpop.xlane.xlu1 %3505 }
 0x900   :  { %3195 = vmax.xlane.f32.xlu0 %v9543_v54  ;;  %v9550_v44 = vpop.xlane.xlu1 %3507 }
 0x901   :  { %4585 = vperm.xlu1 %6828, %v9280_v43  }
 0x904   :  { %v9561_v21 = vpop.xlane.xlu0 %3509 }
 0x905   :  { %4597 = vperm.xlu1 %6828, %v9293_v50  }
 0x908   :  { %v9553_v3 = vpop.xlane.xlu1 %3511 }
 0x909   :  { %4609 = vperm.xlu1 %6828, %v9296_v2  }
 0x90c   :  { %v9558_v31 = vpop.xlane.xlu1 %3513 }
 0x90d   :  { %4617 = vperm.xlu1 %6828, %v9301_v42  }
 0x910   :  { %v9567_v50 = vpop.xlane.xlu0 %3515 }
 0x911   :  { %4625 = vperm.xlu1 %6828, %v9307_v51  }
 0x914   :  { %v9563_v43 = vpop.xlane.xlu1 %3517 }
 0x915   :  { %4633 = vperm.xlu1 %6828, %v9313_v4  }
 0x916   :  { %4581 = vperm.xlu0 %6827, %v9283_v52  }
 0x918   :  { %v9569_v2 = vpop.xlane.xlu1 %3519  ;;  %v9573_v42 = vpop.xlane.xlu0 %3521 }
 0x919   :  { %4641 = vperm.xlu1 %6828, %v9319_v13  }
 0x91a   :  { %4589 = vperm.xlu0 %6827, %v9288_v8   ;;  %v3125_v8 = vadd.f32 %v9448_v23, %v3092_v49 }
 0x91c   :  { %v9576_v51 = vpop.xlane.xlu1 %3523 }
 0x91e   :  { %4593 = vperm.xlu0 %6827, %v9286_v32  }
 0x920   :  { %v4049_v55 = vpop.permute.xlu0 %4048  ;;  %v4053_v45 = vpop.permute.xlu1 %4052 }
 0x922   :  { %4601 = vperm.xlu0 %6827, %v9291_v5   ;;  %v9590_v5 = vrot.slane %v9278_v17, %v11247_v25 }
 0x924   :  { %v4061_v4 = vpop.permute.xlu0 %4060  ;;  %v4057_v58 = vpop.permute.xlu1 %4056 }
 0x926   :  { %4605 = vperm.xlu0 %6827, %v9298_v61   ;;  %v3141_v61 = vmul.f32 0.2, %v3125_v8 }
 0x928   :  { %v4065_v52 = vpop.permute.xlu0 %4064  ;;  %v4073_v26 = vpop.permute.xlu1 %4072  ;;  %v3157_v49 = vmax.f32 %v3125_v8, %v3141_v61  ;;  %v3127_v8 = vadd.f32 %v9448_v23, %v3102_v6 }
 0x92a   :  { %4613 = vperm.xlu0 %6827, %v9304_v38   ;;  %v4121_v38 = vadd.f32 %v9590_v5, %v4073_v26  ;;  %v9598_v34 = vsel %vm11231_vm1, %v3157_v49, -1e+30 }
 0x92b   :  { %11248 = vst [vmem:[#allocation72_spill] sm:$0xff] %v9598_v34 }
 0x92c   :  { %v9581_v13 = vpop.permute.xlu0 %4068  ;;  %v4137_v37 = vmul.f32 0.2, %v4121_v38 }
 0x92e   :  { %4621 = vperm.xlu0 %6827, %v9310_v11   ;;  %v4153_v22 = vmax.f32 %v4121_v38, %v4137_v37  ;;  %v3126_v37 = vadd.f32 %v9448_v23, %v9517_v59  ;;  %v3128_v38 = vadd.f32 %v9448_v23, %v9527_v0  ;;  %v4115_v59 = vadd.f32 %v9590_v5, %v4049_v55 }
 0x92f   :  { %v4116_v0 = vadd.f32 %v9590_v5, %v4053_v45  ;;  %v4117_v55 = vadd.f32 %v9590_v5, %v4057_v58  ;;  %v4118_v45 = vadd.f32 %v9590_v5, %v4061_v4 }
 0x930   :  { %v9585_v32 = vpop.permute.xlu0 %4076 }
 0x931   :  { %v4134_v58 = vmul.f32 0.2, %v4118_v45 }
 0x932   :  { %4629 = vperm.xlu0 %6827, %v9316_v16   ;;  %v9603_v16 = vsel %vm71_vm8, %v4153_v22, -1e+30  ;;  %v3142_v22 = vmul.f32 0.2, %v3126_v37 }
 0x933   :  { %11249 = vst [vmem:[#allocation10_spill] sm:$0xff] %v9603_v16 }
 0x934   :  { %v4081_v35 = vpop.permute.xlu0 %4080  ;;  %v3158_v49 = vmax.f32 %v3126_v37, %v3142_v22  ;;  %v4132_v37 = vmul.f32 0.2, %v4116_v0 }
 0x935   :  { %v4123_v11 = vadd.f32 %v9590_v5, %v4081_v35  ;;  %v3124_v35 = vadd.f32 %v9448_v23, %v9495_v41  ;;  %v3144_v41 = vmul.f32 0.2, %v3128_v38  ;;  %v4131_v23 = vmul.f32 0.2, %v4115_v59 }
 0x936   :  { %4637 = vperm.xlu0 %6827, %v9322_v1   ;;  %v9628_v6 = vsel %vm11251_vm5, %v3158_v49, -1e+30  ;;  %v4085_v49 = vpop.permute.xlu1 %4084 }
 0x937   :  { %v4139_v54 = vmul.f32 0.2, %v4123_v11  ;;  %v3140_v26 = vmul.f32 0.2, %v3124_v35 }
 0x939   :  { %v4155_v25 = vmax.f32 %v4123_v11, %v4139_v54  ;;  %v3156_v61 = vmax.f32 %v3124_v35, %v3140_v26  ;;  %v3143_v54 = vmul.f32 0.2, %v3127_v8  ;;  %v3160_v26 = vmax.f32 %v3128_v38, %v3144_v41 }
 0x93a   :  { %v4148_v41 = vmax.f32 %v4116_v0, %v4132_v37  ;;  %v4097_v4 = vpop.permute.xlu1 %4096  ;;  %v4120_v0 = vadd.f32 %v9590_v5, %v9581_v13 }
 0x93b   :  { %v9608_v1 = vsel %vm73_vm11, %v4155_v25, -1e+30  ;;  %v9620_v11 = vsel %vm76_vm14, %v3156_v61, -1e+30  ;;  %v3159_v25 = vmax.f32 %v3127_v8, %v3143_v54  ;;  %v9640_v22 = vsel %vm11253_vm2, %v3160_v26, -1e+30  ;;  %v4089_v61 = vpop.permute.xlu0 %4088  ;;  %vm11283_vm2 = vmmov %vm11219_vm0 }
 0x93c   :  { %11250 = vst [vmem:[#allocation84_spill] sm:$0xff] %v9608_v1  ;;  %v4147_v8 = vmax.f32 %v4115_v59, %v4131_v23  ;;  %v4133_v54 = vmul.f32 0.2, %v4117_v55  ;;  %v9652_v59 = vsel %vm66_vm3, %v4148_v41, -1e+30 }
 0x93d   :  { %3201 = vmax.xlane.f32.xlu1 %v9598_v34  ;;  %v9634_v35 = vsel %vm11252_vm15, %v3159_v25, -1e+30  ;;  %v4119_v25 = vadd.f32 %v9590_v5, %v4065_v52  ;;  %11255 = vst [vmem:[#allocation12_spill] sm:$0xff] %v9652_v59  ;;  %v4150_v52 = vmax.f32 %v4118_v45, %v4134_v58  ;;  %v4136_v41 = vmul.f32 0.2, %v4120_v0 }
 0x93e   :  { %v9646_v38 = vsel %vm65_vm4, %v4147_v8, -1e+30  ;;  %v4149_v23 = vmax.f32 %v4117_v55, %v4133_v54  ;;  %v4124_v45 = vadd.f32 %v9590_v5, %v4085_v49 }
 0x93f   :  { %11254 = vst [vmem:[#allocation68_spill] sm:$0xff] %v9646_v38  ;;  %v4093_v26 = vpop.permute.xlu0 %4092  ;;  %v4135_v8 = vmul.f32 0.2, %v4119_v25 }
 0x940   :  { %v9661_v37 = vsel %vm67_vm6, %v4149_v23, -1e+30 }
 0x941   :  { %4191 = vmax.xlane.f32.xlu1 %v9603_v16  ;;  %11256 = vst [vmem:[#allocation87_spill] sm:$0xff] %v9661_v37  ;;  %v4127_v16 = vadd.f32 %v9590_v5, %v4097_v4  ;;  %v9674_v4 = vpop.permute.xlu1 %4108 }
 0x943   :  { %v4101_v55 = vpop.permute.xlu0 %4100  ;;  %v4143_v13 = vmul.f32 0.2, %v4127_v16 }
 0x944   :  { %v4128_v23 = vadd.f32 %v9590_v5, %v4101_v55  ;;  %v4125_v55 = vadd.f32 %v9590_v5, %v4089_v61  ;;  %v4126_v61 = vadd.f32 %v9590_v5, %v4093_v26 }
 0x945   :  { %4195 = vmax.xlane.f32.xlu1 %v9608_v1  ;;  %v3534_v1 = vsub.f32 %v9358_v40, %v9556_v10  ;;  %v9669_v40 = vsel %vm11219_vm0, %v4150_v52, -1e+30  ;;  %v4151_v10 = vmax.f32 %v4119_v25, %v4135_v8  ;;  %v4159_v25 = vmax.f32 %v4127_v16, %v4143_v13 }
 0x946   :  { %11257 = vst [vmem:[#allocation73_spill] sm:$0xff] %v9669_v40  ;;  %v4140_v8 = vmul.f32 0.2, %v4124_v45  ;;  %v4141_v16 = vmul.f32 0.2, %v4125_v55  ;;  %vm11289_vm0 = vcmp.gt.f32.partialorder %v11187_v19, 0.0 }
 0x947   :  { %v3551_v54 = vmul.f32 1.442695, %v3534_v1  ;;  %v9678_v1 = vsel %vm69_vm7, %v4151_v10, -1e+30  ;;  %v9680_v52 = vpop.permute.xlu0 %4104 }
 0x948   :  { %11258 = vst [vmem:[#allocation34_spill] sm:$0xff] %v9678_v1  ;;  %v4156_v13 = vmax.f32 %v4124_v45, %v4140_v8  ;;  %v4157_v45 = vmax.f32 %v4125_v55, %v4141_v16 }
 0x949   :  { %7205 = vpow2.f32 %v3551_v54 }
 0x94a   :  { %v9715_v26 = vsel %vm74_vm12, %v4156_v13, -1e+30  ;;  %v9726_v8 = vsel %vm75_vm13, %v4157_v45, -1e+30 }
 0x94b   :  { %11263 = vst [vmem:[#allocation94_spill] sm:$0xff] %v9715_v26  ;;  %11265 = vst [vmem:[#allocation16_spill] sm:$0xff] %v9726_v8 }
 0x955   :  { %3199 = vmax.xlane.f32.xlu0 %v9620_v11 }
 0x956   :  { %6830 = vrot.lane.b32.xlu1 %v9246_v46, %s7469_s28  ;;  %v4144_v46 = vmul.f32 0.2, %v4128_v23 }
 0x959   :  { %3203 = vmax.xlane.f32.xlu0 %v9628_v6 }
 0x95d   :  { %3205 = vmax.xlane.f32.xlu0 %v9634_v35 }
 0x961   :  { %3207 = vmax.xlane.f32.xlu0 %v9640_v22 }
 0x965   :  { %4179 = vmax.xlane.f32.xlu0 %v9646_v38  ;;  %v4122_v38 = vadd.f32 %v9590_v5, %v9585_v32  ;;  %v4152_v32 = vmax.f32 %v4120_v0, %v4136_v41  ;;  %v9684_v54 = vpop.xlane.xlu1 %3525  ;;  %v9695_v0 = vsel %vm11231_vm1, %v4159_v25, -1e+30  ;;  %v4160_v41 = vmax.f32 %v4128_v23, %v4144_v46 }
 0x966   :  { %11260 = vst [vmem:[#allocation14_spill] sm:$0xff] %v9695_v0  ;;  %v4142_v23 = vmul.f32 0.2, %v4126_v61 }
 0x967   :  { %v4138_v58 = vmul.f32 0.2, %v4122_v38  ;;  %v9688_v49 = vsel %vm70_vm9, %v4152_v32, -1e+30 }
 0x968   :  { %11259 = vst [vmem:[#allocation74_spill] sm:$0xff] %v9688_v49 }
 0x969   :  { %4181 = vmax.xlane.f32.xlu0 %v9652_v59  ;;  %v9708_v32 = vpop.xlane.xlu1 %3531 }
 0x96d   :  { %4183 = vmax.xlane.f32.xlu0 %v9661_v37  ;;  %v9722_v25 = vpop.xlane.xlu1 %3181 }
 0x971   :  { %4185 = vmax.xlane.f32.xlu0 %v9669_v40  ;;  %v4154_v40 = vmax.f32 %v4122_v38, %v4138_v58  ;;  %v9690_v37 = vpop.xlane.xlu0 %3527  ;;  %v7206_v38 = vpop.eup %7205  ;;  %v9706_v58 = vsel %vm11251_vm5, %v4160_v41, -1e+30  ;;  %v4158_v41 = vmax.f32 %v4126_v61, %v4142_v23 }
 0x972   :  { %11262 = vst [vmem:[#allocation24_spill] sm:$0xff] %v9706_v58  ;;  %v9736_v55 = vpop.xlane.xlu1 %3185 }
 0x973   :  { %v9701_v10 = vsel %vm72_vm10, %v4154_v40, -1e+30  ;;  %v9718_v40 = vmul.f32 %v7206_v38, %v11214_v15  ;;  %v9733_v13 = vsel %vm76_vm14, %v4158_v41, -1e+30  ;;  %11268 = vst [vmem:[#allocation40_spill] sm:$0xff] %v9736_v55 }
 0x974   :  { %11261 = vst [vmem:[#allocation48_spill] sm:$0xff] %v9701_v10  ;;  %11267 = vst [vmem:[#allocation93_spill] sm:$0xff] %v9733_v13 }
 0x975   :  { %4187 = vmax.xlane.f32.xlu0 %v9678_v1  ;;  %v9711_v46 = vpop.xlane.xlu0 %3529  ;;  %11264 = vst [vmem:[#allocation55_spill] sm:$0xff] %v9718_v40 }
 0x976   :  { %v9740_v38 = vpop.xlane.xlu1 %3189 }
 0x977   :  { %11269 = vst [vmem:[#allocation54_spill] sm:$0xff] %v9740_v38 }
 0x979   :  { %4189 = vmax.xlane.f32.xlu0 %v9688_v49 }
 0x97a   :  { %4203 = vmax.xlane.f32.xlu1 %v9695_v0  ;;  %v9746_v61 = vpop.xlane.xlu1 %3193 }
 0x97b   :  { %11270 = vst [vmem:[#allocation18_spill] sm:$0xff] %v9746_v61 }
 0x97d   :  { %4193 = vmax.xlane.f32.xlu0 %v9701_v10 }
 0x97e   :  { %4205 = vmax.xlane.f32.xlu1 %v9706_v58  ;;  %v9728_v58 = vpop.xlane.xlu0 %3177  ;;  %v9752_v45 = vpop.xlane.xlu1 %3197 }
 0x97f   :  { %11266 = vst [vmem:[#allocation46_spill] sm:$0xff] %v9728_v58  ;;  %11271 = vst [vmem:[#allocation2_spill] sm:$0xff] %v9752_v45 }
 0x981   :  { %4197 = vmax.xlane.f32.xlu0 %v9715_v26 }
 0x982   :  { %3599 = vadd.xlane.f32.xlu1 %v9718_v40  ;;  %v9738_v16 = vpop.xlane.xlu0 %3179  ;;  %v9758_v26 = vpop.permute.xlu1 %4585 }
 0x985   :  { %4199 = vmax.xlane.f32.xlu0 %v9726_v8  ;;  %v11273_v8 = vld [vmem:[#allocation83_spill] sm:$0xff] }
 0x986   :  { %v9742_v0 = vpop.xlane.xlu0 %3183  ;;  %v3537_v1 = vsub.f32 %v11273_v8, %v9561_v21  ;;  %v9768_v45 = vpop.permute.xlu1 %4597  ;;  %v11276_v21 = vld [vmem:[#allocation78_spill] sm:$0xff] }
 0x987   :  { %v3535_v8 = vsub.f32 %v11276_v21, %v9545_v14 }
 0x988   :  { %v3557_v59 = vmul.f32 1.442695, %v3537_v1 }
 0x989   :  { %4201 = vmax.xlane.f32.xlu0 %v9733_v13  ;;  %v11272_v13 = vld [vmem:[#allocation27_spill] sm:$0xff]  ;;  %v3553_v1 = vmul.f32 1.442695, %v3535_v8 }
 0x98a   :  { %v9748_v23 = vpop.xlane.xlu0 %3187  ;;  %7207 = vpow2.f32 %v3557_v59  ;;  %v9772_v55 = vpop.permute.xlu1 %4609 }
 0x98e   :  { %v9754_v41 = vpop.xlane.xlu0 %3191  ;;  %v9783_v59 = vpop.permute.xlu1 %4617 }
 0x992   :  { %v9760_v10 = vpop.xlane.xlu0 %3195 }
 0x993   :  { %6840 = vrot.lane.b32.xlu1 %v9254_v18, %s7469_s28  ;;  %v11274_v18 = vld [vmem:[#allocation70_spill] sm:$0xff] }
 0x994   :  { %v3533_v49 = vsub.f32 %v11274_v18, %v9534_v9  ;;  %v11277_v18 = vld [vmem:[#allocation38_spill] sm:$0xff] }
 0x995   :  { %v3540_v9 = vsub.f32 %v11277_v18, %v9567_v50  ;;  %v9793_v18 = vpop.permute.xlu1 %4625 }
 0x996   :  { %v4582_v40 = vpop.permute.xlu0 %4581  ;;  %v3549_v61 = vmul.f32 1.442695, %v3533_v49  ;;  %v4129_v49 = vadd.f32 %v9590_v5, %v9680_v52 }
 0x997   :  { %6845 = vrot.lane.b32.xlu1 %v9258_v30, %s7469_s28  ;;  %v11275_v30 = vld [vmem:[#allocation7_spill] sm:$0xff] }
 0x998   :  { %v3539_v34 = vsub.f32 %v11275_v30, %v9558_v31  ;;  %7209 = vpow2.f32 %v3549_v61  ;;  %v11278_v30 = vsub.s32 3, %v11212_v60  ;;  %v7208_v61 = vpop.eup %7207  ;;  %v4145_v8 = vmul.f32 0.2, %v4129_v49 }
 0x999   :  { %v9791_v60 = vmul.f32 %v7208_v61, %v7929_v47  ;;  %v9806_v61 = vpop.permute.xlu1 %4633 }
 0x99a   :  { %v9770_v38 = vpop.permute.xlu0 %4589  ;;  %v9781_v31 = vrot.slane %v9278_v17, %v11278_v30 }
 0x99b   :  { %11280 = vst [vmem:[#allocation44_spill] sm:$0xff] %v9791_v60 }
 0x99e   :  { %v4594_v58 = vpop.permute.xlu0 %4593 }
 0x99f   :  { %6835 = vrot.lane.b32.xlu0 %v11272_v13, %s7469_s28  ;;  %v3561_v13 = vmul.f32 1.442695, %v3539_v34  ;;  %v3563_v34 = vmul.f32 1.442695, %v3540_v9  ;;  %v4651_v14 = vadd.f32 %v9781_v31, %v4594_v58  ;;  %v4130_v58 = vadd.f32 %v9590_v5, %v9674_v4 }
 0x9a1   :  { %7211 = vpow2.f32 %v3561_v13  ;;  %v11279_v13 = vld [vmem:[#allocation5_spill] sm:$0xff]  ;;  %v4667_v9 = vmul.f32 0.2, %v4651_v14 }
 0x9a2   :  { %7213 = vpow2.f32 %v3553_v1  ;;  %v3536_v50 = vsub.f32 %v11279_v13, %v9550_v44  ;;  %v7210_v21 = vpop.eup %7209  ;;  %v4161_v1 = vmax.f32 %v4129_v49, %v4145_v8  ;;  %v9808_v13 = vpop.permute.xlu0 %4601  ;;  %v11285_v49 = vld [vmem:[#allocation91_spill] sm:$0xff] }
 0x9a3   :  { %7215 = vpow2.f32 %v3563_v34  ;;  %v9797_v52 = vmul.f32 %v7210_v21, %v11215_v33  ;;  %v4683_v34 = vmax.f32 %v4651_v14, %v4667_v9  ;;  %v4146_v21 = vmul.f32 0.2, %v4130_v58 }
 0x9a4   :  { %v3555_v30 = vmul.f32 1.442695, %v3536_v50  ;;  %v3538_v14 = vsub.f32 %v11285_v49, %v9553_v3 }
 0x9a5   :  { %v9817_v4 = vsel %vm11283_vm2, %v4683_v34, -1e+30 }
 0x9a6   :  { %7217 = vpow2.f32 %v3555_v30  ;;  %11284 = vst [vmem:[#allocation33_spill] sm:$0xff] %v9817_v4  ;;  %v4162_v30 = vmax.f32 %v4130_v58, %v4146_v21  ;;  %v3559_v34 = vmul.f32 1.442695, %v3538_v14 }
 0x9a8   :  { %7219 = vpow2.f32 %v3559_v34 }
 0x9ab   :  { %v7212_v17 = vpop.eup %7211 }
 0x9ac   :  { %v9802_v44 = vmul.f32 %v7212_v17, %v7931_v39  ;;  %v7214_v50 = vpop.eup %7213  ;;  %v4648_v17 = vadd.f32 %v9781_v31, %v4582_v40  ;;  %v9839_v40 = vsel %vm11289_vm0, %v4162_v30, -1e+30 }
 0x9ad   :  { %v7216_v5 = vpop.eup %7215  ;;  %v9823_v8 = vmul.f32 %v7214_v50, %v11217_v53  ;;  %v4649_v50 = vadd.f32 %v9781_v31, %v9758_v26  ;;  %11290 = vst [vmem:[#allocation63_spill] sm:$0xff] %v9839_v40 }
 0x9ae   :  { %11281 = vst [vmem:[#allocation81_spill] sm:$0xff] %v9802_v44  ;;  %v9827_v9 = vmul.f32 %v7216_v5, %v11185_v57  ;;  %v4664_v49 = vmul.f32 0.2, %v4648_v17 }
 0x9af   :  { %11286 = vst [vmem:[#allocation4_spill] sm:$0xff] %v9823_v8  ;;  %v4665_v14 = vmul.f32 0.2, %v4649_v50 }
 0x9b0   :  { %11287 = vst [vmem:[#allocation29_spill] sm:$0xff] %v9827_v9  ;;  %v7218_v3 = vpop.eup %7217 }
 0x9b1   :  { %v9847_v5 = vmul.f32 %v7218_v3, %v7870_v24 }
 0x9b3   :  { %11292 = vst [vmem:[#allocation88_spill] sm:$0xff] %v9847_v5 }
 0x9bb   :  { %3605 = vadd.xlane.f32.xlu1 %v9791_v60  ;;  %v9812_v60 = vsel %vm11252_vm15, %v4161_v1, -1e+30  ;;  %v9829_v1 = vpop.permute.xlu1 %4641 }
 0x9bc   :  { %11282 = vst [vmem:[#allocation39_spill] sm:$0xff] %v9812_v60  ;;  %11288 = vst [vmem:[#allocation89_spill] sm:$0xff] %v9829_v1 }
 0x9be   :  { %3597 = vadd.xlane.f32.xlu0 %v9797_v52 }
 0x9bf   :  { %3609 = vadd.xlane.f32.xlu1 %v9802_v44  ;;  %v7220_v44 = vpop.eup %7219 }
 0x9c2   :  { %4207 = vmax.xlane.f32.xlu0 %v9812_v60  ;;  %v9831_v60 = vpop.permute.xlu0 %4605 }
 0x9c3   :  { %4718 = vmax.xlane.f32.xlu1 %v9817_v4  ;;  %v4680_v4 = vmax.f32 %v4648_v17, %v4664_v49 }
 0x9c5   :  { %v9854_v30 = vsel %vm65_vm4, %v4680_v4, -1e+30  ;;  %v11297_v4 = vld [vmem:[#allocation60_spill] sm:$0xff]  ;;  %vm11342_vm4 = vmmov %vm11231_vm1 }
 0x9c6   :  { %3601 = vadd.xlane.f32.xlu0 %v9823_v8  ;;  %v9844_v21 = vpop.permute.xlu0 %4613  ;;  %11294 = vst [vmem:[#allocation31_spill] sm:$0xff] %v9854_v30 }
 0x9c7   :  { %3611 = vadd.xlane.f32.xlu1 %v9827_v9  ;;  %v4681_v9 = vmax.f32 %v4649_v50, %v4665_v14  ;;  %v9871_v50 = vmul.f32 %v7220_v44, %v7934_v48 }
 0x9c9   :  { %v9863_v3 = vsel %vm66_vm3, %v4681_v9, -1e+30  ;;  %11298 = vst [vmem:[#allocation32_spill] sm:$0xff] %v9871_v50 }
 0x9ca   :  { %4209 = vmax.xlane.f32.xlu0 %v9839_v40  ;;  %v9842_v58 = vpop.xlane.xlu1 %3201  ;;  %v9856_v40 = vpop.permute.xlu0 %4621  ;;  %11296 = vst [vmem:[#allocation26_spill] sm:$0xff] %v9863_v3 }
 0x9cb   :  { %11291 = vst [vmem:[#allocation43_spill] sm:$0xff] %v9842_v58 }
 0x9ce   :  { %3603 = vadd.xlane.f32.xlu0 %v9847_v5  ;;  %v9850_v26 = vpop.xlane.xlu1 %4191  ;;  %v9866_v5 = vpop.permute.xlu0 %4629 }
 0x9cf   :  { %11293 = vst [vmem:[#allocation41_spill] sm:$0xff] %v9850_v26 }
 0x9d2   :  { %4712 = vmax.xlane.f32.xlu0 %v9854_v30  ;;  %v9859_v34 = vpop.xlane.xlu1 %4195  ;;  %v9874_v9 = vpop.permute.xlu0 %4637 }
 0x9d3   :  { %11295 = vst [vmem:[#allocation49_spill] sm:$0xff] %v9859_v34 }
 0x9d6   :  { %4714 = vmax.xlane.f32.xlu0 %v9863_v3  ;;  %v6831_v17 = vpop.permute.xlu1 %6830  ;;  %v11299_v3 = vld [vmem:[#allocation9_spill] sm:$0xff] }
 0x9d7   :  { %v6833_v49 = vunpack.i.h.bf16 %v6831_v17  ;;  %v6832_v26 = vunpack.i.l.bf16 %v6831_v17  ;;  %v3541_v17 = vsub.f32 %v11299_v3, %v9563_v43 }
 0x9d8   :  { %6855 = vrot.lane.b32.xlu1 %v11297_v4, %s7469_s28  ;;  %v11300_v4 = vld [vmem:[#allocation92_spill] sm:$0xff] }
 0x9d9   :  { %v6417_v14 = vpack.c.bf16 %v6833_v49, %v6832_v26  ;;  %v3565_v8 = vmul.f32 1.442695, %v3541_v17  ;;  %v3543_v58 = vsub.f32 %v11300_v4, %v9573_v42  ;;  %v4655_v42 = vadd.f32 %v9781_v31, %v9772_v55 }
 0x9da   :  { %3607 = vadd.xlane.f32.xlu0 %v9871_v50  ;;  %v11302_v50 = vld [vmem:[#allocation13_spill] sm:$0xff]  ;;  %v4650_v55 = vadd.f32 %v9781_v31, %v9770_v38 }
 0x9db   :  { %6418 = vmatprep.subr.bf16.mxu1 %v6417_v14  ;;  %7221 = vpow2.f32 %v3565_v8  ;;  %v3569_v26 = vmul.f32 1.442695, %v3543_v58  ;;  %v3544_v1 = vsub.f32 %v11302_v50, %v9576_v51 }
 0x9dc   :  { %6420 = vmatpush3.bf16.msra.mxu1 %v6417_v14  ;;  %v11301_v14 = vld [vmem:[#allocation90_spill] sm:$0xff] }
 0x9dd   :  { %7223 = vpow2.f32 %v3569_v26  ;;  %v3571_v3 = vmul.f32 1.442695, %v3544_v1  ;;  %v4671_v26 = vmul.f32 0.2, %v4655_v42 }
 0x9df   :  { %7225 = vpow2.f32 %v3571_v3  ;;  %v4687_v50 = vmax.f32 %v4655_v42, %v4671_v26  ;;  %v4652_v42 = vadd.f32 %v9781_v31, %v9768_v45 }
 0x9e2   :  { %v9876_v30 = vpop.xlane.xlu0 %3199 }
 0x9e5   :  { %v7222_v33 = vpop.eup %7221 }
 0x9e6   :  { %v9880_v34 = vpop.xlane.xlu0 %3203  ;;  %v9901_v58 = vmul.f32 %v7222_v33, %v7994_v27  ;;  %v9916_v33 = vsel %vm72_vm10, %v4687_v50, -1e+30  ;;  %v4668_v50 = vmul.f32 0.2, %v4652_v42 }
 0x9e7   :  { %v7224_v4 = vpop.eup %7223  ;;  %11308 = vst [vmem:[#allocation53_spill] sm:$0xff] %v9916_v33 }
 0x9e8   :  { %11304 = vst [vmem:[#allocation52_spill] sm:$0xff] %v9901_v58  ;;  %v9907_v1 = vmul.f32 %v7224_v4, %v10997_v56  ;;  %v4666_v4 = vmul.f32 0.2, %v4650_v55 }
 0x9ea   :  { %v9884_v44 = vpop.xlane.xlu0 %3205  ;;  %11306 = vst [vmem:[#allocation61_spill] sm:$0xff] %v9907_v1 }
 0x9ee   :  { %v9886_v49 = vpop.xlane.xlu0 %3207 }
 0x9f0   :  { %6850 = vrot.lane.b32.xlu0 %v11301_v14, %s7469_s28  ;;  %v7226_v14 = vpop.eup %7225 }
 0x9f1   :  { %v9926_v38 = vmul.f32 %v7226_v14, %v11151_v28 }
 0x9f2   :  { %v9892_v43 = vpop.xlane.xlu0 %4179 }
 0x9f3   :  { %11303 = vst [vmem:[#allocation35_spill] sm:$0xff] %v9892_v43  ;;  %11311 = vst [vmem:[#allocation47_spill] sm:$0xff] %v9926_v38 }
 0x9f6   :  { %v9894_v17 = vpop.xlane.xlu0 %4181 }
 0x9fa   :  { %v9898_v8 = vpop.xlane.xlu0 %4183 }
 0x9fc   :  { %3613 = vadd.xlane.f32.xlu1 %v9901_v58  ;;  %v11309_v58 = vld [vmem:[#allocation11_spill] sm:$0xff] }
 0x9fd   :  { %v3542_v43 = vsub.f32 %v11309_v58, %v9569_v2  ;;  %v4653_v2 = vadd.f32 %v9781_v31, %v9808_v13 }
 0x9fe   :  { %v9904_v51 = vpop.xlane.xlu0 %4185 }
 0x9ff   :  { %11305 = vst [vmem:[#allocation50_spill] sm:$0xff] %v9904_v51  ;;  %v4669_v45 = vmul.f32 0.2, %v4653_v2 }
 0xa00   :  { %3617 = vadd.xlane.f32.xlu1 %v9907_v1  ;;  %v3567_v1 = vmul.f32 1.442695, %v3542_v43  ;;  %v4684_v43 = vmax.f32 %v4652_v42, %v4668_v50  ;;  %v11321_v42 = vld [vmem:[#allocation3_spill] sm:$0xff] }
 0xa02   :  { %v9912_v3 = vpop.xlane.xlu0 %4187  ;;  %7227 = vpow2.f32 %v3567_v1  ;;  %v9950_v13 = vsel %vm69_vm7, %v4684_v43, -1e+30  ;;  %vm11355_vm7 = vmmov %vm11252_vm15 }
 0xa03   :  { %11307 = vst [vmem:[#allocation21_spill] sm:$0xff] %v9912_v3  ;;  %11318 = vst [vmem:[#allocation83_spill] sm:$0xff] %v9950_v13 }
 0xa04   :  { %4726 = vmax.xlane.f32.xlu1 %v9916_v33  ;;  %v4682_v33 = vmax.f32 %v4650_v55, %v4666_v4  ;;  %v4685_v55 = vmax.f32 %v4653_v2, %v4669_v45 }
 0xa06   :  { %v9923_v26 = vpop.xlane.xlu0 %4189  ;;  %v9941_v14 = vsel %vm67_vm6, %v4682_v33, -1e+30  ;;  %v9957_v33 = vsel %vm70_vm9, %v4685_v55, -1e+30  ;;  %vm11351_vm6 = vmmov %vm11251_vm5 }
 0xa07   :  { %11310 = vst [vmem:[#allocation45_spill] sm:$0xff] %v9923_v26  ;;  %v9928_v3 = vpop.xlane.xlu1 %4203  ;;  %11316 = vst [vmem:[#allocation19_spill] sm:$0xff] %v9941_v14 }
 0xa08   :  { %11312 = vst [vmem:[#allocation58_spill] sm:$0xff] %v9928_v3  ;;  %3619 = vadd.xlane.f32.xlu1 %v9926_v38  ;;  %11320 = vst [vmem:[#allocation7_spill] sm:$0xff] %v9957_v33 }
 0xa0a   :  { %v9933_v58 = vpop.xlane.xlu0 %4193 }
 0xa0b   :  { %11313 = vst [vmem:[#allocation36_spill] sm:$0xff] %v9933_v58  ;;  %v9935_v51 = vpop.xlane.xlu1 %4205 }
 0xa0c   :  { %11314 = vst [vmem:[#allocation51_spill] sm:$0xff] %v9935_v51  ;;  %v7228_v1 = vpop.eup %7227 }
 0xa0d   :  { %v9963_v50 = vmul.f32 %v7228_v1, %v8012_v62  ;;  %v11322_v1 = vld [vmem:[#allocation6_spill] sm:$0xff] }
 0xa0e   :  { %v9937_v26 = vpop.xlane.xlu0 %4197 }
 0xa0f   :  { %11315 = vst [vmem:[#allocation56_spill] sm:$0xff] %v9937_v26  ;;  %4716 = vmax.xlane.f32.xlu0 %v9941_v14  ;;  %v9944_v3 = vpop.xlane.xlu1 %3599 }
 0xa10   :  { %vm3630_vm9 = vcmp.gt.f32.partialorder %v9944_v3, 0.0 }
 0xa12   :  { %v9946_v38 = vpop.xlane.xlu0 %4199 }
 0xa13   :  { %11317 = vst [vmem:[#allocation28_spill] sm:$0xff] %v9946_v38  ;;  %4720 = vmax.xlane.f32.xlu0 %v9950_v13  ;;  %v6841_v4 = vpop.permute.xlu1 %6840 }
 0xa14   :  { %v6843_v2 = vunpack.i.h.bf16 %v6841_v4  ;;  %v6842_v45 = vunpack.i.l.bf16 %v6841_v4 }
 0xa16   :  { %v9953_v51 = vpop.xlane.xlu0 %4201  ;;  %v6425_v58 = vpack.c.bf16 %v6843_v2, %v6842_v45 }
 0xa17   :  { %11319 = vst [vmem:[#allocation70_spill] sm:$0xff] %v9953_v51  ;;  %4722 = vmax.xlane.f32.xlu0 %v9957_v33  ;;  %v6846_v51 = vpop.permute.xlu1 %6845 }
 0xa18   :  { %v6848_v55 = vunpack.i.h.bf16 %v6846_v51  ;;  %v6847_v38 = vunpack.i.l.bf16 %v6846_v51  ;;  %v11323_v51 = vld [vmem:[#allocation62_spill] sm:$0xff] }
 0xa19   :  { %6865 = vrot.lane.b32.xlu1 %v11321_v42, %s7469_s28  ;;  %v3545_v42 = vsub.f32 %v11322_v1, %v9684_v54 }
 0xa1a   :  { %v6836_v43 = vpop.permute.xlu0 %6835  ;;  %v6429_v33 = vpack.c.bf16 %v6848_v55, %v6847_v38  ;;  %v3212_v38 = vsub.f32 %v9524_v36, %v9742_v0  ;;  %v11326_v36 = vld [vmem:[#allocation37_spill] sm:$0xff] }
 0xa1b   :  { %v6838_v13 = vunpack.i.h.bf16 %v6836_v43  ;;  %v6837_v14 = vunpack.i.l.bf16 %v6836_v43  ;;  %3615 = vadd.xlane.f32.xlu0 %v9963_v50  ;;  %v3573_v4 = vmul.f32 1.442695, %v3545_v42  ;;  %v3210_v43 = vsub.f32 %v9510_v63, %v9738_v16  ;;  %v11325_v16 = vld [vmem:[#allocation66_spill] sm:$0xff] }
 0xa1c   :  { %v3231_v54 = vmul.f32 1.442695, %v3212_v38  ;;  %v3218_v0 = vsub.f32 %v11326_v36, %v9760_v10  ;;  %v11327_v10 = vld [vmem:[#allocation17_spill] sm:$0xff]  ;;  %v3222_v38 = vsub.f32 %v9628_v6, %v9880_v34 }
 0xa1d   :  { %v6421_v26 = vpack.c.bf16 %v6838_v13, %v6837_v14  ;;  %7229 = vpow2.f32 %v3573_v4  ;;  %v3211_v14 = vsub.f32 %v9469_v29, %v9722_v25  ;;  %v3227_v13 = vmul.f32 1.442695, %v3210_v43 }
 0xa1e   :  { %v3216_v29 = vsub.f32 %v11325_v16, %v9754_v41  ;;  %v3243_v1 = vmul.f32 1.442695, %v3218_v0  ;;  %v3220_v41 = vsub.f32 %v9620_v11, %v9876_v30  ;;  %v4654_v4 = vadd.f32 %v9781_v31, %v9831_v60 }
 0xa1f   :  { %6422 = vmatprep.subr.bf16.mxu1 %v6421_v26  ;;  %7231 = vpow2.f32 %v3227_v13  ;;  %v3546_v13 = vsub.f32 %v11327_v10, %v9690_v37  ;;  %v4656_v11 = vadd.f32 %v9781_v31, %v9844_v21  ;;  %v3251_v37 = vmul.f32 1.442695, %v3222_v38  ;;  %v11331_v38 = vld [vmem:[#allocation15_spill] sm:$0xff] }
 0xa20   :  { %6424 = vmatpush3.bf16.msra.mxu1 %v6421_v26  ;;  %v3229_v26 = vmul.f32 1.442695, %v3211_v14  ;;  %v3239_v45 = vmul.f32 1.442695, %v3216_v29  ;;  %v11328_v29 = vld [vmem:[#allocation64_spill] sm:$0xff] }
 0xa21   :  { %6426 = vmatprep.subr.bf16.mxu1 %v6425_v58  ;;  %v4672_v6 = vmul.f32 0.2, %v4656_v11 }
 0xa22   :  { %7233 = vpow2.f32 %v3229_v26  ;;  %v3247_v26 = vmul.f32 1.442695, %v3220_v41 }
 0xa23   :  { %7235 = vpow2.f32 %v3231_v54  ;;  %v4670_v54 = vmul.f32 0.2, %v4654_v4 }
 0xa24   :  { %6428 = vmatpush3.bf16.msra.mxu1 %v6425_v58  ;;  %v11324_v58 = vld [vmem:[#allocation79_spill] sm:$0xff] }
 0xa25   :  { %6430 = vmatprep.subr.bf16.mxu1 %v6429_v33  ;;  %v4686_v21 = vmax.f32 %v4654_v4, %v4670_v54  ;;  %v3548_v54 = vsub.f32 %v11331_v38, %v9708_v32 }
 0xa27   :  { %v7230_v42 = vpop.eup %7229  ;;  %v10024_v36 = vsel %vm71_vm8, %v4686_v21, -1e+30  ;;  %vm11359_vm8 = vmmov %vm11289_vm0 }
 0xa28   :  { %6432 = vmatpush3.bf16.msra.mxu1 %v6429_v33  ;;  %v3214_v33 = vsub.f32 %v11324_v58, %v9748_v23  ;;  %v9981_v25 = vmul.f32 %v7230_v42, %v11183_v7  ;;  %v3575_v58 = vmul.f32 1.442695, %v3546_v13  ;;  %v4657_v42 = vadd.f32 %v9781_v31, %v9783_v59  ;;  %11329 = vst [vmem:[#allocation78_spill] sm:$0xff] %v10024_v36 }
 0xa29   :  { %v7232_v2 = vpop.eup %7231 }
 0xa2a   :  { %v3235_v63 = vmul.f32 1.442695, %v3214_v33  ;;  %v9987_v55 = vmul.f32 %v7232_v2, %v11214_v15  ;;  %v3223_v33 = vsub.f32 %v9634_v35, %v9884_v44  ;;  %v3547_v2 = vsub.f32 %v11328_v29, %v9711_v46 }
 0xa2b   :  { %v3224_v35 = vsub.f32 %v9640_v22, %v9886_v49  ;;  %v4673_v59 = vmul.f32 0.2, %v4657_v42  ;;  %v4658_v49 = vadd.f32 %v9781_v31, %v9856_v40  ;;  %v4659_v29 = vadd.f32 %v9781_v31, %v9793_v18 }
 0xa2c   :  { %7237 = vpow2.f32 %v3235_v63  ;;  %v7234_v23 = vpop.eup %7233  ;;  %v3577_v46 = vmul.f32 1.442695, %v3547_v2 }
 0xa2d   :  { %7239 = vpow2.f32 %v3239_v45  ;;  %v9995_v43 = vmul.f32 %v7234_v23, %v11217_v53  ;;  %v7236_v14 = vpop.eup %7235  ;;  %v3253_v45 = vmul.f32 1.442695, %v3223_v33  ;;  %v4688_v23 = vmax.f32 %v4656_v11, %v4672_v6 }
 0xa2e   :  { %7241 = vpow2.f32 %v3243_v1  ;;  %v10005_v60 = vmul.f32 %v7236_v14, %v7870_v24  ;;  %v3255_v22 = vmul.f32 1.442695, %v3224_v35  ;;  %v4689_v13 = vmax.f32 %v4657_v42, %v4673_v59 }
 0xa2f   :  { %7243 = vpow2.f32 %v3247_v26  ;;  %v10039_v14 = vsel %vm73_vm11, %v4688_v23, -1e+30  ;;  %v11335_v23 = vld [vmem:[#allocation86_spill] sm:$0xff] }
 0xa30   :  { %11330 = vst [vmem:[#allocation38_spill] sm:$0xff] %v10039_v14  ;;  %v10054_v42 = vsel %vm74_vm12, %v4689_v13, -1e+30  ;;  %v4675_v13 = vmul.f32 0.2, %v4659_v29 }
 0xa31   :  { %6860 = vrot.lane.b32.xlu0 %v11323_v51, %s7469_s28  ;;  %11333 = vst [vmem:[#allocation91_spill] sm:$0xff] %v10054_v42 }
 0xa36   :  { %v7238_v30 = vpop.eup %7237 }
 0xa37   :  { %v10013_v63 = vmul.f32 %v7238_v30, %v7934_v48  ;;  %v7240_v16 = vpop.eup %7239  ;;  %v4674_v30 = vmul.f32 0.2, %v4658_v49 }
 0xa38   :  { %v10027_v0 = vmul.f32 %v7240_v16, %v11185_v57  ;;  %v7242_v1 = vpop.eup %7241 }
 0xa39   :  { %v10042_v10 = vmul.f32 %v7242_v1, %v8012_v62  ;;  %v7244_v26 = vpop.eup %7243  ;;  %v4690_v35 = vmax.f32 %v4658_v49, %v4674_v30 }
 0xa3a   :  { %v10057_v6 = vmul.f32 %v7244_v26, %v11151_v28 }
 0xa3b   :  { %v10082_v26 = vsel %vm75_vm13, %v4690_v35, -1e+30 }
 0xa3c   :  { %11337 = vst [vmem:[#allocation92_spill] sm:$0xff] %v10082_v26 }
 0xa3d   :  { %3621 = vadd.xlane.f32.xlu1 %v9981_v25 }
 0xa41   :  { %3275 = vadd.xlane.f32.xlu1 %v9987_v55 }
 0xa45   :  { %3277 = vadd.xlane.f32.xlu1 %v9995_v43 }
 0xa48   :  { %v10030_v41 = vpop.xlane.xlu1 %3605 }
 0xa49   :  { %3279 = vadd.xlane.f32.xlu1 %v10005_v60  ;;  %vm3633_vm12 = vcmp.gt.f32.partialorder %v10030_v41, 0.0 }
 0xa4b   :  { %v3598_v34 = vpop.xlane.xlu0 %3597 }
 0xa4c   :  { %7245 = vrcp.f32 %v3598_v34  ;;  %vm3629_vm3 = vcmp.gt.f32.partialorder %v3598_v34, 0.0  ;;  %v3579_v34 = vmul.f32 1.442695, %v3548_v54 }
 0xa4d   :  { %7247 = vpow2.f32 %v3575_v58  ;;  %3283 = vadd.xlane.f32.xlu1 %v10013_v63 }
 0xa4e   :  { %7249 = vpow2.f32 %v3251_v37  ;;  %v10048_v37 = vpop.xlane.xlu1 %3609 }
 0xa4f   :  { %v10020_v44 = vpop.xlane.xlu0 %4207  ;;  %7251 = vpow2.f32 %v3253_v45 }
 0xa50   :  { %4724 = vmax.xlane.f32.xlu0 %v10024_v36  ;;  %7253 = vpow2.f32 %v3577_v46 }
 0xa51   :  { %3287 = vadd.xlane.f32.xlu1 %v10027_v0  ;;  %7255 = vpow2.f32 %v3255_v22 }
 0xa52   :  { %7257 = vpow2.f32 %v3579_v34  ;;  %v10075_v46 = vpop.xlane.xlu1 %4718 }
 0xa53   :  { %v10035_v4 = vpop.xlane.xlu0 %3601  ;;  %11336 = vst [vmem:[#allocation9_spill] sm:$0xff] %v10075_v46 }
 0xa54   :  { %4728 = vmax.xlane.f32.xlu0 %v10039_v14  ;;  %vm3631_vm10 = vcmp.gt.f32.partialorder %v10035_v4, 0.0 }
 0xa55   :  { %3291 = vadd.xlane.f32.xlu1 %v10042_v10 }
 0xa56   :  { %v7246_v40 = vpop.eup %7245  ;;  %v10094_v30 = vpop.xlane.xlu1 %3611 }
 0xa57   :  { %v7248_v11 = vpop.eup %7247  ;;  %v3661_v58 = vsel %vm3629_vm3, %v7246_v40, 0.0  ;;  %v10050_v33 = vpop.xlane.xlu0 %4209  ;;  %vm3636_vm1 = vcmp.gt.f32.partialorder %v10094_v30, 0.0 }
 0xa58   :  { %11332 = vst [vmem:[#allocation5_spill] sm:$0xff] %v10050_v33  ;;  %v7250_v32 = vpop.eup %7249  ;;  %4730 = vmax.xlane.f32.xlu0 %v10054_v42  ;;  %v3677_v21 = vmul.f32 %v3661_v58, %v9797_v52  ;;  %v10063_v16 = vmul.f32 %v7248_v11, %v11186_v12  ;;  %v11334_v52 = vld [vmem:[#allocation46_spill] sm:$0xff]  ;;  %v4660_v11 = vadd.f32 %v9781_v31, %v9866_v5 }
 0xa59   :  { %3295 = vadd.xlane.f32.xlu1 %v10057_v6  ;;  %v10070_v45 = vmul.f32 %v7250_v32, %v11186_v12  ;;  %v7252_v59 = vpop.eup %7251  ;;  %v3209_v1 = vsub.f32 %v11335_v23, %v11334_v52 }
 0xa5a   :  { %6025 = vmatprep.mubr.f32.mxu1 %v3677_v21  ;;  %v7254_v22 = vpop.eup %7253  ;;  %v10085_v49 = vmul.f32 %v7252_v59, %v11184_v20  ;;  %v4691_v21 = vmax.f32 %v4659_v29, %v4675_v13  ;;  %v4676_v35 = vmul.f32 0.2, %v4660_v11  ;;  %v6856_v52 = vpop.permute.xlu1 %6855  ;;  %v4661_v29 = vadd.f32 %v9781_v31, %v9806_v61 }
 0xa5b   :  { %v10067_v2 = vpop.xlane.xlu0 %3603  ;;  %v7256_v38 = vpop.eup %7255  ;;  %v3225_v54 = vmul.f32 1.442695, %v3209_v1  ;;  %v10090_v40 = vmul.f32 %v7254_v22, %v11184_v20  ;;  %v6858_v13 = vunpack.i.h.bf16 %v6856_v52 }
 0xa5c   :  { %3623 = vadd.xlane.f32.xlu0 %v10063_v16  ;;  %v10099_v32 = vmul.f32 %v7256_v38, %v11187_v19  ;;  %v7258_v34 = vpop.eup %7257  ;;  %v10107_v5 = vsel %vm76_vm14, %v4691_v21, -1e+30  ;;  %v4692_v22 = vmax.f32 %v4660_v11, %v4676_v35  ;;  %v6857_v38 = vunpack.i.l.bf16 %v6856_v52  ;;  %v11341_v21 = vld [vmem:[#allocation76_spill] sm:$0xff]  ;;  %v11344_v52 = vld [vmem:[#allocation54_spill] sm:$0xff] }
 0xa5d   :  { %3299 = vadd.xlane.f32.xlu1 %v10070_v45  ;;  %7259 = vpow2.f32 %v3225_v54  ;;  %11339 = vst [vmem:[#allocation11_spill] sm:$0xff] %v10107_v5  ;;  %v10111_v23 = vmul.f32 %v7258_v34, %v11187_v19  ;;  %v4677_v36 = vmul.f32 0.2, %v4661_v29  ;;  %v4662_v34 = vadd.f32 %v9781_v31, %v9874_v9 }
 0xa5e   :  { %v10122_v61 = vsel %vm11342_vm4, %v4692_v22, -1e+30  ;;  %v6437_v11 = vpack.c.bf16 %v6858_v13, %v6857_v38  ;;  %v11348_v13 = vld [vmem:[#allocation18_spill] sm:$0xff]  ;;  %v11349_v38 = vld [vmem:[#allocation95_spill] sm:$0xff]  ;;  %vm3632_vm11 = vcmp.gt.f32.partialorder %v10067_v2, 0.0  ;;  %vm3635_vm14 = vcmp.gt.f32.partialorder %v10048_v37, 0.0 }
 0xa5f   :  { %v10078_v18 = vpop.xlane.xlu0 %4712  ;;  %11343 = vst [vmem:[#allocation6_spill] sm:$0xff] %v10122_v61  ;;  %v4693_v33 = vmax.f32 %v4661_v29, %v4677_v36  ;;  %v11353_v29 = vld [vmem:[#allocation2_spill] sm:$0xff] }
 0xa60   :  { %4732 = vmax.xlane.f32.xlu0 %v10082_v26  ;;  %v11340_v26 = vld [vmem:[#allocation40_spill] sm:$0xff] }
 0xa61   :  { %3301 = vadd.xlane.f32.xlu1 %v10085_v49  ;;  %v3213_v14 = vsub.f32 %v11341_v21, %v11340_v26  ;;  %v4678_v21 = vmul.f32 0.2, %v4662_v34 }
 0xa63   :  { %v10096_v58 = vpop.xlane.xlu0 %4714  ;;  %v3233_v35 = vmul.f32 1.442695, %v3213_v14  ;;  %v3217_v14 = vsub.f32 %v11349_v38, %v11348_v13  ;;  %v11357_v13 = vld [vmem:[#allocation43_spill] sm:$0xff] }
 0xa64   :  { %11338 = vst [vmem:[#allocation13_spill] sm:$0xff] %v10096_v58  ;;  %3625 = vadd.xlane.f32.xlu0 %v10090_v40 }
 0xa65   :  { %3303 = vadd.xlane.f32.xlu1 %v10099_v32  ;;  %7261 = vpow2.f32 %v3233_v35  ;;  %v3241_v36 = vmul.f32 1.442695, %v3217_v14 }
 0xa67   :  { %v10103_v59 = vpop.xlane.xlu0 %3607 }
 0xa68   :  { %4734 = vmax.xlane.f32.xlu0 %v10107_v5  ;;  %v7260_v5 = vpop.eup %7259  ;;  %vm3634_vm13 = vcmp.gt.f32.partialorder %v10103_v59, 0.0 }
 0xa6b   :  { %v6851_v1 = vpop.permute.xlu0 %6850 }
 0xa6c   :  { %v6853_v54 = vunpack.i.h.bf16 %v6851_v1  ;;  %v6852_v42 = vunpack.i.l.bf16 %v6851_v1  ;;  %3627 = vadd.xlane.f32.xlu0 %v10111_v23  ;;  %v11345_v1 = vld [vmem:[#allocation8_spill] sm:$0xff] }
 0xa6d   :  { %v3215_v58 = vsub.f32 %v11345_v1, %v11344_v52 }
 0xa6e   :  { %v6433_v46 = vpack.c.bf16 %v6853_v54, %v6852_v42  ;;  %v11346_v42 = vld [vmem:[#allocation22_spill] sm:$0xff]  ;;  %v11347_v54 = vld [vmem:[#allocation89_spill] sm:$0xff] }
 0xa6f   :  { %v10128_v26 = vmul.f32 %v7260_v5, %v11346_v42  ;;  %v4663_v9 = vadd.f32 %v9781_v31, %v11347_v54  ;;  %v3237_v22 = vmul.f32 1.442695, %v3215_v58  ;;  %v10139_v5 = vsel %vm11351_vm6, %v4693_v33, -1e+30  ;;  %v11354_v58 = vld [vmem:[#allocation71_spill] sm:$0xff]  ;;  %v11358_v33 = vld [vmem:[#allocation72_spill] sm:$0xff] }
 0xa70   :  { %4736 = vmax.xlane.f32.xlu0 %v10122_v61  ;;  %6434 = vmatprep.subr.bf16.mxu1 %v6433_v46  ;;  %11352 = vst [vmem:[#allocation62_spill] sm:$0xff] %v10139_v5  ;;  %v4694_v31 = vmax.f32 %v4662_v34, %v4678_v21  ;;  %v3219_v35 = vsub.f32 %v11354_v58, %v11353_v29  ;;  %v7262_v34 = vpop.eup %7261 }
 0xa71   :  { %6436 = vmatpush3.bf16.msra.mxu1 %v6433_v46  ;;  %v11350_v46 = vld [vmem:[#allocation27_spill] sm:$0xff]  ;;  %v4679_v52 = vmul.f32 0.2, %v4663_v9  ;;  %7263 = vpow2.f32 %v3237_v22  ;;  %v3221_v38 = vsub.f32 %v11358_v33, %v11357_v13  ;;  %v10157_v14 = vmul.f32 %v7262_v34, %v7929_v47 }
 0xa72   :  { %6438 = vmatprep.subr.bf16.mxu1 %v6437_v11  ;;  %7265 = vpow2.f32 %v3241_v36  ;;  %v3245_v54 = vmul.f32 1.442695, %v3219_v35  ;;  %v11362_v35 = vld [vmem:[#allocation87_spill] sm:$0xff] }
 0xa73   :  { %v4695_v1 = vmax.f32 %v4663_v9, %v4679_v52  ;;  %v3249_v22 = vmul.f32 1.442695, %v3221_v38  ;;  %v11361_v52 = vld [vmem:[#allocation12_spill] sm:$0xff]  ;;  %v11364_v38 = vld [vmem:[#allocation73_spill] sm:$0xff] }
 0xa74   :  { %3273 = vadd.xlane.f32.xlu0 %v10128_v26  ;;  %7267 = vpow2.f32 %v3245_v54 }
 0xa75   :  { %6440 = vmatpush3.bf16.msra.mxu1 %v6437_v11  ;;  %v10146_v11 = vsel %vm11355_vm7, %v4694_v31, -1e+30  ;;  %v10153_v21 = vsel %vm11359_vm8, %v4695_v1, -1e+30  ;;  %v4212_v31 = vsub.f32 %v11361_v52, %v9894_v17  ;;  %7269 = vpow2.f32 %v3249_v22  ;;  %v11363_v17 = vld [vmem:[#allocation50_spill] sm:$0xff] }
 0xa76   :  { %6875 = vrot.lane.b32.xlu1 %v11350_v46, %s7471_s6  ;;  %11356 = vst [vmem:[#allocation79_spill] sm:$0xff] %v10146_v11  ;;  %11360 = vst [vmem:[#allocation66_spill] sm:$0xff] %v10153_v21  ;;  %v4213_v1 = vsub.f32 %v11362_v35, %v9898_v8  ;;  %v4214_v34 = vsub.f32 %v11364_v38, %v11363_v17 }
 0xa77   :  { %v4229_v58 = vmul.f32 1.442695, %v4212_v31 }
 0xa78   :  { %4738 = vmax.xlane.f32.xlu0 %v10139_v5  ;;  %v4231_v33 = vmul.f32 1.442695, %v4213_v1  ;;  %v4233_v52 = vmul.f32 1.442695, %v4214_v34 }
 0xa79   :  { %7271 = vpow2.f32 %v4229_v58 }
 0xa7a   :  { %7273 = vpow2.f32 %v4231_v33 }
 0xa7b   :  { %v7264_v9 = vpop.eup %7263  ;;  %7275 = vpow2.f32 %v4233_v52 }
 0xa7c   :  { %4740 = vmax.xlane.f32.xlu0 %v10146_v11  ;;  %v10163_v36 = vmul.f32 %v7264_v9, %v7931_v39  ;;  %v7266_v29 = vpop.eup %7265  ;;  %7277 = vrcp.f32 %v9944_v3  ;;  %v11371_v11 = vld [vmem:[#allocation77_spill] sm:$0xff] }
 0xa7d   :  { %v10169_v54 = vmul.f32 %v7266_v29, %v7994_v27  ;;  %7279 = vrcp.f32 %v10035_v4  ;;  %v11376_v3 = vld [vmem:[#allocation65_spill] sm:$0xff]  ;;  %v11377_v4 = vld [vmem:[#allocation4_spill] sm:$0xff] }
 0xa7e   :  { %v7268_v13 = vpop.eup %7267  ;;  %7281 = vrcp.f32 %v10067_v2  ;;  %v11378_v2 = vld [vmem:[#allocation59_spill] sm:$0xff] }
 0xa7f   :  { %v10175_v22 = vmul.f32 %v7268_v13, %v10997_v56  ;;  %v7270_v9 = vpop.eup %7269  ;;  %7283 = vrcp.f32 %v10030_v41  ;;  %v11379_v41 = vld [vmem:[#allocation88_spill] sm:$0xff] }
 0xa80   :  { %4742 = vmax.xlane.f32.xlu0 %v10153_v21  ;;  %v10181_v31 = vmul.f32 %v7270_v9, %v11183_v7  ;;  %7285 = vrcp.f32 %v10103_v59  ;;  %v11381_v59 = vld [vmem:[#allocation32_spill] sm:$0xff] }
 0xa81   :  { %7287 = vrcp.f32 %v10048_v37 }
 0xa82   :  { %7289 = vrcp.f32 %v10094_v30  ;;  %v11386_v30 = vld [vmem:[#allocation41_spill] sm:$0xff] }
 0xa83   :  { %v7272_v29 = vpop.eup %7271 }
 0xa84   :  { %3281 = vadd.xlane.f32.xlu0 %v10157_v14  ;;  %v10187_v35 = vmul.f32 %v7272_v29, %v11214_v15  ;;  %v7274_v1 = vpop.eup %7273  ;;  %v11372_v15 = vld [vmem:[#allocation35_spill] sm:$0xff] }
 0xa85   :  { %v10193_v33 = vmul.f32 %v7274_v1, %v11217_v53  ;;  %v7276_v17 = vpop.eup %7275 }
 0xa86   :  { %11365 = vst [vmem:[#allocation37_spill] sm:$0xff] %v10187_v35  ;;  %v10201_v9 = vmul.f32 %v7276_v17, %v7870_v24 }
 0xa87   :  { %11366 = vst [vmem:[#allocation17_spill] sm:$0xff] %v10193_v33 }
 0xa88   :  { %3285 = vadd.xlane.f32.xlu0 %v10163_v36  ;;  %11369 = vst [vmem:[#allocation46_spill] sm:$0xff] %v10201_v9 }
 0xa89   :  { %v10178_v8 = vpop.xlane.xlu1 %3613 }
 0xa8a   :  { %7291 = vrcp.f32 %v10178_v8  ;;  %vm3637_vm5 = vcmp.gt.f32.partialorder %v10178_v8, 0.0 }
 0xa8c   :  { %3289 = vadd.xlane.f32.xlu0 %v10169_v54 }
 0xa8d   :  { %v10184_v58 = vpop.xlane.xlu1 %3617 }
 0xa8e   :  { %vm3639_vm2 = vcmp.gt.f32.partialorder %v10184_v58, 0.0 }
 0xa90   :  { %3293 = vadd.xlane.f32.xlu0 %v10175_v22 }
 0xa91   :  { %v10195_v38 = vpop.xlane.xlu1 %4726 }
 0xa92   :  { %11367 = vst [vmem:[#allocation64_spill] sm:$0xff] %v10195_v38 }
 0xa94   :  { %3297 = vadd.xlane.f32.xlu0 %v10181_v31 }
 0xa95   :  { %v10204_v52 = vpop.xlane.xlu1 %3619 }
 0xa96   :  { %vm3640_vm0 = vcmp.gt.f32.partialorder %v10204_v52, 0.0 }
 0xa99   :  { %v6866_v21 = vpop.permute.xlu1 %6865 }
 0xa9a   :  { %4277 = vadd.xlane.f32.xlu1 %v10187_v35  ;;  %v6868_v5 = vunpack.i.h.bf16 %v6866_v21  ;;  %v6867_v61 = vunpack.i.l.bf16 %v6866_v21  ;;  %v11374_v21 = vld [vmem:[#allocation82_spill] sm:$0xff] }
 0xa9c   :  { %v10190_v13 = vpop.xlane.xlu0 %4716  ;;  %v6445_v35 = vpack.c.bf16 %v6868_v5, %v6867_v61 }
 0xa9e   :  { %4279 = vadd.xlane.f32.xlu1 %v10193_v33  ;;  %v7278_v33 = vpop.eup %7277 }
 0xaa0   :  { %v10198_v34 = vpop.xlane.xlu0 %4720 }
 0xaa1   :  { %11368 = vst [vmem:[#allocation15_spill] sm:$0xff] %v10198_v34  ;;  %v11373_v34 = vld [vmem:[#allocation68_spill] sm:$0xff] }
 0xaa2   :  { %4281 = vadd.xlane.f32.xlu1 %v10201_v9  ;;  %v4211_v19 = vsub.f32 %v11373_v34, %v11372_v15  ;;  %v11375_v15 = vld [vmem:[#allocation55_spill] sm:$0xff] }
 0xaa4   :  { %v10206_v29 = vpop.xlane.xlu0 %4722 }
 0xaa5   :  { %11370 = vst [vmem:[#allocation86_spill] sm:$0xff] %v10206_v29  ;;  %v7280_v29 = vpop.eup %7279 }
 0xaa6   :  { %v3663_v61 = vsel %vm3631_vm10, %v7280_v29, 0.0 }
 0xaa8   :  { %v10210_v1 = vpop.xlane.xlu0 %3615 }
 0xaa9   :  { %7293 = vrcp.f32 %v10210_v1  ;;  %vm3638_vm15 = vcmp.gt.f32.partialorder %v10210_v1, 0.0  ;;  %v11391_v1 = vld [vmem:[#allocation30_spill] sm:$0xff] }
 0xaaa   :  { %6870 = vrot.lane.b32.xlu0 %v11371_v11, %s7471_s6  ;;  %7295 = vrcp.f32 %v10184_v58 }
 0xaac   :  { %v6861_v17 = vpop.permute.xlu0 %6860 }
 0xaad   :  { %v6863_v38 = vunpack.i.h.bf16 %v6861_v17  ;;  %v6862_v24 = vunpack.i.l.bf16 %v6861_v17  ;;  %v3662_v17 = vsel %vm3630_vm9, %v7278_v33, 0.0 }
 0xaae   :  { %v3678_v34 = vmul.f32 %v3662_v17, %v11375_v15  ;;  %v11380_v17 = vld [vmem:[#allocation44_spill] sm:$0xff] }
 0xaaf   :  { %v6441_v9 = vpack.c.bf16 %v6863_v38, %v6862_v24  ;;  %v7282_v24 = vpop.eup %7281  ;;  %v4227_v38 = vmul.f32 1.442695, %v4211_v19 }
 0xab0   :  { %v7284_v5 = vpop.eup %7283  ;;  %v3664_v33 = vsel %vm3632_vm11, %v7282_v24, 0.0 }
 0xab1   :  { %6442 = vmatprep.subr.bf16.mxu1 %v6441_v9  ;;  %v3665_v29 = vsel %vm3633_vm12, %v7284_v5, 0.0  ;;  %7297 = vpow2.f32 %v4227_v38 }
 0xab2   :  { %6444 = vmatpush3.bf16.msra.mxu1 %v6441_v9  ;;  %v3679_v9 = vmul.f32 %v3663_v61, %v11377_v4  ;;  %7299 = vrcp.f32 %v10204_v52  ;;  %v3681_v24 = vmul.f32 %v3665_v29, %v11380_v17  ;;  %v11383_v4 = vld [vmem:[#allocation45_spill] sm:$0xff]  ;;  %v11393_v52 = vld [vmem:[#allocation47_spill] sm:$0xff] }
 0xab3   :  { %6885 = vrot.lane.b32.xlu1 %v11374_v21, %s7471_s6  ;;  %6446 = vmatprep.subr.bf16.mxu1 %v6445_v35  ;;  %v7286_v21 = vpop.eup %7285  ;;  %v11385_v29 = vld [vmem:[#allocation81_spill] sm:$0xff] }
 0xab4   :  { %v7288_v19 = vpop.eup %7287  ;;  %v3666_v61 = vsel %vm3634_vm13, %v7286_v21, 0.0 }
 0xab5   :  { %v7290_v5 = vpop.eup %7289  ;;  %v3667_v15 = vsel %vm3635_vm14, %v7288_v19, 0.0 }
 0xab6   :  { %6448 = vmatpush3.bf16.msra.mxu1 %v6445_v35  ;;  %v3680_v35 = vmul.f32 %v3664_v33, %v11379_v41  ;;  %v7292_v38 = vpop.eup %7291  ;;  %v11384_v33 = vld [vmem:[#allocation74_spill] sm:$0xff]  ;;  %v3683_v41 = vmul.f32 %v3667_v15, %v11385_v29  ;;  %v3668_v37 = vsel %vm3636_vm1, %v7290_v5, 0.0 }
 0xab7   :  { %6450 = vmatprep.subr.bf16.mxu1 %v11376_v3  ;;  %v7294_v21 = vpop.eup %7293  ;;  %v3669_v19 = vsel %vm3637_vm5, %v7292_v38, 0.0 }
 0xab8   :  { %v3670_v38 = vsel %vm3638_vm15, %v7294_v21, 0.0 }
 0xab9   :  { %6026 = vmatmul.mubr.f32.vlgmr.msra.gmra.mrb[34].mxu1 %v3678_v34  ;;  %v3682_v34 = vmul.f32 %v3666_v61, %v11381_v59  ;;  %v11389_v59 = vld [vmem:[#allocation69_spill] sm:$0xff] }
 0xaba   :  { %6028 = vmatprep.mubr.f32.mxu1 %v3679_v9  ;;  %6452 = vmatpush3.bf16.msra.mxu1 %v11376_v3  ;;  %v11382_v3 = vld [vmem:[#allocation67_spill] sm:$0xff]  ;;  %v4216_v9 = vsub.f32 %v11384_v33, %v11383_v4  ;;  %v11390_v4 = vld [vmem:[#allocation52_spill] sm:$0xff] }
 0xabb   :  { %6454 = vmatprep.subr.bf16.mxu1 %v11378_v2  ;;  %v3685_v8 = vmul.f32 %v3669_v19, %v11390_v4 }
 0xabc   :  { %v4237_v5 = vmul.f32 1.442695, %v4216_v9 }
 0xabd   :  { %6029 = vmatmul.mubr.f32.gmra.mrb[36].mxu1 %v3680_v35  ;;  %v7296_v35 = vpop.eup %7295 }
 0xabe   :  { %6031 = vmatprep.mubr.f32.mxu1 %v3681_v24  ;;  %6456 = vmatpush3.bf16.msra.mxu1 %v11378_v2  ;;  %v11387_v2 = vld [vmem:[#allocation10_spill] sm:$0xff]  ;;  %v11388_v24 = vld [vmem:[#allocation29_spill] sm:$0xff]  ;;  %v7298_v15 = vpop.eup %7297  ;;  %v3671_v33 = vsel %vm3639_vm2, %v7296_v35, 0.0  ;;  %7301 = vpow2.f32 %v4237_v5  ;;  %v11395_v35 = vld [vmem:[#allocation75_spill] sm:$0xff] }
 0xabf   :  { %6458 = vmatprep.subr.bf16.mxu1 %v11382_v3  ;;  %v4217_v17 = vsub.f32 %v11387_v2, %v11386_v30  ;;  %v3684_v61 = vmul.f32 %v3668_v37, %v11388_v24  ;;  %v10261_v29 = vmul.f32 %v7298_v15, %v11346_v42  ;;  %v11396_v2 = vld [vmem:[#allocation85_spill] sm:$0xff] }
 0xac1   :  { %6032 = vmatmul.mubr.f32.gmra.mrb[38].mxu1 %v3682_v34  ;;  %v7300_v34 = vpop.eup %7299  ;;  %v4239_v9 = vmul.f32 1.442695, %v4217_v17 }
 0xac2   :  { %6034 = vmatprep.mubr.f32.mxu1 %v3683_v41  ;;  %6460 = vmatpush3.bf16.msra.mxu1 %v11382_v3  ;;  %v3686_v3 = vmul.f32 %v3670_v38, %v9963_v50  ;;  %v11392_v41 = vld [vmem:[#allocation61_spill] sm:$0xff]  ;;  %v3672_v37 = vsel %vm3640_vm0, %v7300_v34, 0.0 }
 0xac3   :  { %6462 = vmatprep.subr.bf16.mxu1 %v11389_v59  ;;  %v3687_v58 = vmul.f32 %v3671_v33, %v11392_v41  ;;  %v3688_v19 = vmul.f32 %v3672_v37, %v11393_v52  ;;  %v11394_v50 = vld [vmem:[#allocation25_spill] sm:$0xff]  ;;  %v11401_v37 = vld [vmem:[#allocation60_spill] sm:$0xff] }
 0xac5   :  { %6035 = vmatmul.mubr.f32.gmra.mrb[40].mxu1 %v3684_v61 }
 0xac6   :  { %6037 = vmatprep.mubr.f32.mxu1 %v3685_v8  ;;  %6464 = vmatpush3.bf16.msra.mxu1 %v11389_v59  ;;  %v11397_v8 = vld [vmem:[#allocation80_spill] sm:$0xff] }
 0xac7   :  { %6466 = vmatprep.subr.bf16.mxu1 %v11391_v1 }
 0xac8   :  { %v7302_v30 = vpop.eup %7301 }
 0xac9   :  { %4275 = vadd.xlane.f32.xlu0 %v10261_v29  ;;  %6038 = vmatmul.mubr.f32.gmra.mrb[42].mxu1 %v3686_v3  ;;  %v10273_v24 = vmul.f32 %v7302_v30, %v7934_v48  ;;  %v11399_v3 = vld [vmem:[#allocation21_spill] sm:$0xff] }
 0xaca   :  { %v3622_v21 = vpop.xlane.xlu1 %3621  ;;  %6040 = vmatprep.mubr.f32.mxu1 %v3687_v58  ;;  %6468 = vmatpush3.bf16.msra.mxu1 %v11391_v1 }
 0xacb   :  { %7303 = vrcp.f32 %v3622_v21  ;;  %6470 = vmatprep.subr.bf16.mxu1 %v11394_v50  ;;  %vm3641_vm3 = vcmp.gt.f32.partialorder %v3622_v21, 0.0 }
 0xacc   :  { %7305 = vpow2.f32 %v4239_v9 }
 0xacd   :  { %6041 = vmatmul.mubr.f32.gmra.mrb[44].mxu1 %v3688_v19 }
 0xace   :  { %6472 = vmatpush3.bf16.msra.mxu1 %v11394_v50  ;;  %v3276_v33 = vpop.xlane.xlu1 %3275 }
 0xacf   :  { %6474 = vmatprep.subr.bf16.mxu1 %v11395_v35  ;;  %vm3306_vm8 = vcmp.gt.f32.partialorder %v3276_v33, 0.0 }
 0xad2   :  { %6476 = vmatpush3.bf16.msra.mxu1 %v11395_v35  ;;  %v3278_v58 = vpop.xlane.xlu1 %3277 }
 0xad3   :  { %6478 = vmatprep.subr.bf16.mxu1 %v11396_v2  ;;  %vm3307_vm9 = vcmp.gt.f32.partialorder %v3278_v58, 0.0 }
 0xad5   :  { %v7304_v17 = vpop.eup %7303 }
 0xad6   :  { %v7306_v61 = vpop.eup %7305  ;;  %v3673_v59 = vsel %vm3641_vm3, %v7304_v17, 0.0  ;;  %6480 = vmatpush3.bf16.msra.mxu1 %v11396_v2  ;;  %v10296_v19 = vpop.xlane.xlu1 %3279  ;;  %v11404_v2 = vld [vmem:[#allocation49_spill] sm:$0xff]  ;;  %v11405_v17 = vld [vmem:[#allocation84_spill] sm:$0xff] }
 0xad7   :  { %v3689_v15 = vmul.f32 %v3673_v59, %v9981_v25  ;;  %4285 = vadd.xlane.f32.xlu1 %v10273_v24  ;;  %v10279_v5 = vmul.f32 %v7306_v61, %v7931_v39  ;;  %v11400_v25 = vld [vmem:[#allocation34_spill] sm:$0xff]  ;;  %v4219_v61 = vsub.f32 %v11405_v17, %v11404_v2  ;;  %vm3308_vm11 = vcmp.gt.f32.partialorder %v10296_v19, 0.0 }
 0xad8   :  { %v4215_v1 = vsub.f32 %v11400_v25, %v11399_v3 }
 0xad9   :  { %6043 = vmatprep.mubr.f32.mxu1 %v3689_v15 }
 0xada   :  { %v4235_v41 = vmul.f32 1.442695, %v4215_v1  ;;  %v10303_v15 = vpop.xlane.xlu1 %3283  ;;  %v4243_v1 = vmul.f32 1.442695, %v4219_v61 }
 0xadb   :  { %4287 = vadd.xlane.f32.xlu1 %v10279_v5  ;;  %vm3310_vm12 = vcmp.gt.f32.partialorder %v10303_v15, 0.0 }
 0xadd   :  { %v10282_v4 = vpop.xlane.xlu0 %4724 }
 0xade   :  { %v10312_v2 = vpop.xlane.xlu1 %3287 }
 0xadf   :  { %6880 = vrot.lane.b32.xlu0 %v11397_v8, %s7471_s6  ;;  %vm3312_vm14 = vcmp.gt.f32.partialorder %v10312_v2, 0.0 }
 0xae1   :  { %v10286_v38 = vpop.xlane.xlu0 %4728 }
 0xae5   :  { %v10288_v34 = vpop.xlane.xlu0 %4730 }
 0xae6   :  { %11398 = vst [vmem:[#allocation40_spill] sm:$0xff] %v10288_v34 }
 0xae9   :  { %v3624_v9 = vpop.xlane.xlu0 %3623 }
 0xaea   :  { %7307 = vrcp.f32 %v3624_v9  ;;  %vm3642_vm4 = vcmp.gt.f32.partialorder %v3624_v9, 0.0  ;;  %v11406_v9 = vld [vmem:[#allocation28_spill] sm:$0xff] }
 0xaeb   :  { %7309 = vpow2.f32 %v4235_v41 }
 0xaec   :  { %6895 = vrot.lane.b32.xlu1 %v11401_v37, %s7471_s6 }
 0xaed   :  { %v10294_v21 = vpop.xlane.xlu0 %4732 }
 0xaee   :  { %11402 = vst [vmem:[#allocation76_spill] sm:$0xff] %v10294_v21  ;;  %v11407_v21 = vld [vmem:[#allocation16_spill] sm:$0xff] }
 0xaf1   :  { %v3626_v52 = vpop.xlane.xlu0 %3625 }
 0xaf2   :  { %7311 = vrcp.f32 %v3626_v52  ;;  %vm3643_vm6 = vcmp.gt.f32.partialorder %v3626_v52, 0.0 }
 0xaf4   :  { %v7308_v50 = vpop.eup %7307 }
 0xaf5   :  { %v10298_v35 = vpop.xlane.xlu0 %4734  ;;  %v3674_v30 = vsel %vm3642_vm4, %v7308_v50, 0.0  ;;  %v7310_v3 = vpop.eup %7309 }
 0xaf6   :  { %11403 = vst [vmem:[#allocation54_spill] sm:$0xff] %v10298_v35  ;;  %v3690_v59 = vmul.f32 %v3674_v30, %v10063_v16  ;;  %v10306_v41 = vmul.f32 %v7310_v3, %v7929_v47  ;;  %v4221_v35 = vsub.f32 %v11407_v21, %v11406_v9  ;;  %v10317_v21 = vpop.xlane.xlu1 %3291 }
 0xaf7   :  { %vm3314_vm5 = vcmp.gt.f32.partialorder %v10317_v21, 0.0 }
 0xaf8   :  { %6044 = vmatmul.mubr.f32.gmra.mrb[46].mxu1 %v3690_v59  ;;  %v4247_v17 = vmul.f32 1.442695, %v4221_v35 }
 0xaf9   :  { %v3628_v25 = vpop.xlane.xlu0 %3627 }
 0xafa   :  { %7313 = vrcp.f32 %v3628_v25  ;;  %vm3644_vm7 = vcmp.gt.f32.partialorder %v3628_v25, 0.0  ;;  %v10324_v9 = vpop.xlane.xlu1 %3295 }
 0xafb   :  { %7315 = vpow2.f32 %v4243_v1  ;;  %vm3316_vm2 = vcmp.gt.f32.partialorder %v10324_v9, 0.0 }
 0xafc   :  { %v7312_v34 = vpop.eup %7311  ;;  %7317 = vrcp.f32 %v3276_v33 }
 0xafd   :  { %v10310_v50 = vpop.xlane.xlu0 %4736  ;;  %v3675_v16 = vsel %vm3643_vm6, %v7312_v34, 0.0  ;;  %7319 = vrcp.f32 %v3278_v58 }
 0xafe   :  { %11408 = vst [vmem:[#allocation8_spill] sm:$0xff] %v10310_v50  ;;  %4283 = vadd.xlane.f32.xlu0 %v10306_v41  ;;  %v3691_v30 = vmul.f32 %v3675_v16, %v10090_v40  ;;  %v10335_v33 = vpop.xlane.xlu1 %3299 }
 0xaff   :  { %vm3318_vm3 = vcmp.gt.f32.partialorder %v10335_v33, 0.0 }
 0xb00   :  { %6046 = vmatprep.mubr.f32.mxu1 %v3691_v30 }
 0xb01   :  { %v3274_v61 = vpop.xlane.xlu0 %3273 }
 0xb02   :  { %7321 = vrcp.f32 %v3274_v61  ;;  %vm3305_vm10 = vcmp.gt.f32.partialorder %v3274_v61, 0.0 }
 0xb03   :  { %7323 = vrcp.f32 %v10296_v19 }
 0xb04   :  { %v7314_v52 = vpop.eup %7313  ;;  %7325 = vpow2.f32 %v4247_v17 }
 0xb05   :  { %v10319_v59 = vpop.xlane.xlu0 %4738  ;;  %v3676_v34 = vsel %vm3644_vm7, %v7314_v52, 0.0  ;;  %v7316_v1 = vpop.eup %7315  ;;  %7327 = vrcp.f32 %v10303_v15 }
 0xb06   :  { %11409 = vst [vmem:[#allocation22_spill] sm:$0xff] %v10319_v59  ;;  %v3692_v3 = vmul.f32 %v3676_v34, %v10111_v23  ;;  %v7318_v35 = vpop.eup %7317  ;;  %v10329_v23 = vmul.f32 %v7316_v1, %v7994_v27 }
 0xb07   :  { %v7320_v16 = vpop.eup %7319  ;;  %v3338_v50 = vsel %vm3306_vm8, %v7318_v35, 0.0 }
 0xb08   :  { %6047 = vmatmul.mubr.f32.gmra.mrb[48].mxu1 %v3692_v3  ;;  %v3339_v59 = vsel %vm3307_vm9, %v7320_v16, 0.0  ;;  %v11414_v16 = vld [vmem:[#allocation48_spill] sm:$0xff] }
 0xb09   :  { %v10322_v40 = vpop.xlane.xlu0 %4740  ;;  %v3355_v58 = vmul.f32 %v3339_v59, %v9995_v43  ;;  %v10347_v43 = vpop.xlane.xlu1 %3301 }
 0xb0a   :  { %11410 = vst [vmem:[#allocation89_spill] sm:$0xff] %v10322_v40  ;;  %v3354_v40 = vmul.f32 %v3338_v50, %v9987_v55  ;;  %vm3319_vm6 = vcmp.gt.f32.partialorder %v10347_v43, 0.0 }
 0xb0c   :  { %v7322_v30 = vpop.eup %7321 }
 0xb0d   :  { %v10326_v17 = vpop.xlane.xlu0 %4742  ;;  %v7324_v25 = vpop.eup %7323  ;;  %v3337_v52 = vsel %vm3305_vm10, %v7322_v30, 0.0 }
 0xb0e   :  { %11411 = vst [vmem:[#allocation18_spill] sm:$0xff] %v10326_v17  ;;  %v7326_v34 = vpop.eup %7325  ;;  %v3353_v3 = vmul.f32 %v3337_v52, %v10128_v26  ;;  %v3340_v61 = vsel %vm3308_vm11, %v7324_v25, 0.0  ;;  %v11412_v26 = vld [vmem:[#allocation90_spill] sm:$0xff]  ;;  %v10354_v30 = vpop.xlane.xlu1 %3303 }
 0xb0f   :  { %v10340_v1 = vmul.f32 %v7326_v34, %v10997_v56  ;;  %v3356_v55 = vmul.f32 %v3340_v61, %v10005_v60  ;;  %v7328_v59 = vpop.eup %7327  ;;  %v11416_v17 = vld [vmem:[#allocation94_spill] sm:$0xff]  ;;  %vm3320_vm7 = vcmp.gt.f32.partialorder %v10354_v30, 0.0 }
 0xb10   :  { %4291 = vadd.xlane.f32.xlu1 %v10329_v23  ;;  %6081 = vmatprep.mubr.f32.mxu1 %v3353_v3  ;;  %v3342_v52 = vsel %vm3310_vm12, %v7328_v59, 0.0 }
 0xb11   :  { %v3282_v35 = vpop.xlane.xlu0 %3281  ;;  %6082 = vmatmul.mubr.f32.vlgmr.msra.gmra.mrb[34].mxu1 %v3354_v40  ;;  %v11413_v40 = vld [vmem:[#allocation36_spill] sm:$0xff]  ;;  %v3358_v15 = vmul.f32 %v3342_v52, %v10013_v63 }
 0xb12   :  { %7329 = vrcp.f32 %v3282_v35  ;;  %6084 = vmatprep.mubr.f32.mxu1 %v3355_v58  ;;  %v4218_v60 = vsub.f32 %v11414_v16, %v11413_v40  ;;  %vm3309_vm13 = vcmp.gt.f32.partialorder %v3282_v35, 0.0 }
 0xb13   :  { %7331 = vrcp.f32 %v10312_v2 }
 0xb14   :  { %6890 = vrot.lane.b32.xlu0 %v11412_v26, %s7471_s6  ;;  %4295 = vadd.xlane.f32.xlu1 %v10340_v1  ;;  %v4241_v61 = vmul.f32 1.442695, %v4218_v60 }
 0xb15   :  { %v3286_v19 = vpop.xlane.xlu0 %3285  ;;  %6085 = vmatmul.mubr.f32.gmra.mrb[36].mxu1 %v3356_v55  ;;  %v11415_v55 = vld [vmem:[#allocation56_spill] sm:$0xff] }
 0xb16   :  { %7333 = vrcp.f32 %v3286_v19  ;;  %v4220_v26 = vsub.f32 %v11416_v17, %v11415_v55  ;;  %vm3311_vm1 = vcmp.gt.f32.partialorder %v3286_v19, 0.0 }
 0xb17   :  { %7335 = vrcp.f32 %v10317_v21 }
 0xb19   :  { %v3290_v50 = vpop.xlane.xlu0 %3289 }
 0xb1a   :  { %7337 = vrcp.f32 %v3290_v50  ;;  %vm3313_vm15 = vcmp.gt.f32.partialorder %v3290_v50, 0.0 }
 0xb1b   :  { %7339 = vrcp.f32 %v10324_v9 }
 0xb1c   :  { %v7330_v25 = vpop.eup %7329 }
 0xb1d   :  { %v3294_v34 = vpop.xlane.xlu0 %3293  ;;  %v7332_v3 = vpop.eup %7331  ;;  %v3341_v58 = vsel %vm3309_vm13, %v7330_v25, 0.0 }
 0xb1e   :  { %7341 = vrcp.f32 %v3294_v34  ;;  %v3357_v56 = vmul.f32 %v3341_v58, %v10157_v14  ;;  %v3344_v59 = vsel %vm3312_vm14, %v7332_v3, 0.0  ;;  %v6876_v25 = vpop.permute.xlu1 %6875  ;;  %v4245_v14 = vmul.f32 1.442695, %v4220_v26  ;;  %v11417_v58 = vld [vmem:[#allocation3_spill] sm:$0xff] }
 0xb1f   :  { %7343 = vrcp.f32 %v10335_v33  ;;  %v3360_v2 = vmul.f32 %v3344_v59, %v10027_v0  ;;  %v6877_v55 = vunpack.i.l.bf16 %v6876_v25  ;;  %vm3315_vm0 = vcmp.gt.f32.partialorder %v3294_v34, 0.0 }
 0xb20   :  { %v7334_v40 = vpop.eup %7333  ;;  %7345 = vrcp.f32 %v10347_v43  ;;  %6087 = vmatprep.mubr.f32.mxu1 %v3357_v56  ;;  %v6878_v56 = vunpack.i.h.bf16 %v6876_v25  ;;  %v11418_v43 = vld [vmem:[#allocation58_spill] sm:$0xff] }
 0xb21   :  { %v3343_v35 = vsel %vm3311_vm1, %v7334_v40, 0.0  ;;  %v3298_v16 = vpop.xlane.xlu0 %3297  ;;  %v7336_v60 = vpop.eup %7335  ;;  %6088 = vmatmul.mubr.f32.gmra.mrb[38].mxu1 %v3358_v15 }
 0xb22   :  { %v3359_v17 = vmul.f32 %v3343_v35, %v10163_v36  ;;  %7347 = vrcp.f32 %v3298_v16  ;;  %v3346_v19 = vsel %vm3314_vm5, %v7336_v60, 0.0  ;;  %v6485_v60 = vpack.c.bf16 %v6878_v56, %v6877_v55 }
 0xb23   :  { %7349 = vpow2.f32 %v4241_v61  ;;  %v3362_v21 = vmul.f32 %v3346_v19, %v10042_v10  ;;  %vm3317_vm4 = vcmp.gt.f32.partialorder %v3298_v16, 0.0 }
 0xb24   :  { %v7338_v63 = vpop.eup %7337  ;;  %7351 = vrcp.f32 %v10354_v30  ;;  %6090 = vmatprep.mubr.f32.mxu1 %v3359_v17 }
 0xb25   :  { %v3345_v52 = vsel %vm3313_vm15, %v7338_v63, 0.0  ;;  %v6871_v3 = vpop.permute.xlu0 %6870  ;;  %6905 = vrot.lane.b32.xlu1 %v11417_v58, %s7471_s6  ;;  %v7340_v36 = vpop.eup %7339  ;;  %6091 = vmatmul.mubr.f32.gmra.mrb[40].mxu1 %v3360_v2  ;;  %7353 = vpow2.f32 %v4245_v14 }
 0xb26   :  { %v3361_v26 = vmul.f32 %v3345_v52, %v10169_v54  ;;  %v6873_v61 = vunpack.i.h.bf16 %v6871_v3  ;;  %v6872_v40 = vunpack.i.l.bf16 %v6871_v3  ;;  %v3348_v15 = vsel %vm3316_vm2, %v7340_v36, 0.0  ;;  %v11419_v52 = vld [vmem:[#allocation14_spill] sm:$0xff]  ;;  %v11420_v36 = vld [vmem:[#allocation39_spill] sm:$0xff] }
 0xb27   :  { %v3364_v14 = vmul.f32 %v3348_v15, %v10057_v6  ;;  %v4223_v3 = vsub.f32 %v11419_v52, %v11418_v43  ;;  %v11422_v15 = vld [vmem:[#allocation93_spill] sm:$0xff] }
 0xb28   :  { %v7342_v0 = vpop.eup %7341  ;;  %v6481_v50 = vpack.c.bf16 %v6873_v61, %v6872_v40  ;;  %6093 = vmatprep.mubr.f32.mxu1 %v3361_v26  ;;  %v10393_v61 = vpop.xlane.xlu1 %4277 }
 0xb29   :  { %v3347_v59 = vsel %vm3315_vm0, %v7342_v0, 0.0  ;;  %v7344_v35 = vpop.eup %7343  ;;  %6094 = vmatmul.mubr.f32.gmra.mrb[42].mxu1 %v3362_v21  ;;  %v4251_v30 = vmul.f32 1.442695, %v4223_v3  ;;  %vm4308_vm9 = vcmp.gt.f32.partialorder %v10393_v61, 0.0 }
 0xb2a   :  { %v3363_v25 = vmul.f32 %v3347_v59, %v10175_v22  ;;  %6482 = vmatprep.subr.bf16.mxu1 %v6481_v50  ;;  %v7346_v54 = vpop.eup %7345  ;;  %v3350_v9 = vsel %vm3318_vm3, %v7344_v35, 0.0 }
 0xb2b   :  { %6484 = vmatpush3.bf16.msra.mxu1 %v6481_v50  ;;  %v3351_v2 = vsel %vm3319_vm6, %v7346_v54, 0.0  ;;  %v3366_v19 = vmul.f32 %v3350_v9, %v10070_v45  ;;  %7355 = vpow2.f32 %v4251_v30  ;;  %v11421_v50 = vld [vmem:[#allocation70_spill] sm:$0xff]  ;;  %v11424_v54 = vld [vmem:[#allocation24_spill] sm:$0xff]  ;;  %v11425_v30 = vld [vmem:[#allocation31_spill] sm:$0xff] }
 0xb2c   :  { %v7348_v17 = vpop.eup %7347  ;;  %6096 = vmatprep.mubr.f32.mxu1 %v3363_v25  ;;  %6486 = vmatprep.subr.bf16.mxu1 %v6485_v60  ;;  %v3367_v33 = vmul.f32 %v3351_v2, %v10085_v49  ;;  %v4225_v49 = vsub.f32 %v11420_v36, %v10020_v44  ;;  %v10402_v21 = vpop.xlane.xlu1 %4279  ;;  %v4222_v59 = vsub.f32 %v11422_v15, %v11421_v50  ;;  %v11423_v25 = vld [vmem:[#allocation51_spill] sm:$0xff] }
 0xb2d   :  { %v7350_v10 = vpop.eup %7349  ;;  %v3349_v34 = vsel %vm3317_vm4, %v7348_v17, 0.0  ;;  %6097 = vmatmul.mubr.f32.gmra.mrb[44].mxu1 %v3364_v14  ;;  %v4224_v17 = vsub.f32 %v11424_v54, %v11423_v25  ;;  %v11428_v25 = vld [vmem:[#allocation63_spill] sm:$0xff]  ;;  %vm4309_vm10 = vcmp.gt.f32.partialorder %v10402_v21, 0.0 }
 0xb2e   :  { %v7352_v63 = vpop.eup %7351  ;;  %v3365_v22 = vmul.f32 %v3349_v34, %v10181_v31  ;;  %v10381_v56 = vmul.f32 %v7350_v10, %v11185_v57  ;;  %v4255_v55 = vmul.f32 1.442695, %v4225_v49  ;;  %v4249_v14 = vmul.f32 1.442695, %v4222_v59 }
 0xb2f   :  { %6488 = vmatpush3.bf16.msra.mxu1 %v6485_v60  ;;  %v7354_v6 = vpop.eup %7353  ;;  %v3352_v16 = vsel %vm3320_vm7, %v7352_v63, 0.0 }
 0xb30   :  { %6099 = vmatprep.mubr.f32.mxu1 %v3365_v22  ;;  %v3368_v31 = vmul.f32 %v3352_v16, %v10099_v32  ;;  %v10388_v45 = vmul.f32 %v7354_v6, %v8012_v62  ;;  %7357 = vpow2.f32 %v4255_v55  ;;  %v10407_v44 = vpop.xlane.xlu1 %4281  ;;  %v4253_v22 = vmul.f32 1.442695, %v4224_v17  ;;  %v11426_v55 = vld [vmem:[#allocation19_spill] sm:$0xff] }
 0xb31   :  { %6100 = vmatmul.mubr.f32.gmra.mrb[46].mxu1 %v3366_v19  ;;  %vm4310_vm11 = vcmp.gt.f32.partialorder %v10407_v44, 0.0 }
 0xb32   :  { %6102 = vmatprep.mubr.f32.mxu1 %v3367_v33 }
 0xb33   :  { %4289 = vadd.xlane.f32.xlu0 %v10381_v56 }
 0xb34   :  { %v6886_v60 = vpop.permute.xlu1 %6885 }
 0xb35   :  { %6103 = vmatmul.mubr.f32.gmra.mrb[48].mxu1 %v3368_v31  ;;  %v7356_v26 = vpop.eup %7355  ;;  %v6888_v9 = vunpack.i.h.bf16 %v6886_v60  ;;  %v6887_v34 = vunpack.i.l.bf16 %v6886_v60 }
 0xb36   :  { %v10396_v40 = vmul.f32 %v7356_v26, %v11183_v7  ;;  %v4746_v26 = vsub.f32 %v11426_v55, %v10190_v13  ;;  %v11435_v55 = vld [vmem:[#allocation20_spill] sm:$0xff] }
 0xb37   :  { %4293 = vadd.xlane.f32.xlu0 %v10388_v45  ;;  %v6493_v6 = vpack.c.bf16 %v6888_v9, %v6887_v34 }
 0xb3a   :  { %v7358_v32 = vpop.eup %7357 }
 0xb3b   :  { %v10400_v0 = vmul.f32 %v7358_v32, %v11184_v20 }
 0xb49   :  { %4299 = vadd.xlane.f32.xlu1 %v10396_v40 }
 0xb4d   :  { %6900 = vrot.lane.b32.xlu0 %v11323_v51, %s7471_s6  ;;  %4303 = vadd.xlane.f32.xlu1 %v10400_v0 }
 0xb56   :  { %v4276_v35 = vpop.xlane.xlu0 %4275 }
 0xb57   :  { %7359 = vrcp.f32 %v4276_v35  ;;  %vm4307_vm8 = vcmp.gt.f32.partialorder %v4276_v35, 0.0 }
 0xb58   :  { %7361 = vpow2.f32 %v4249_v14 }
 0xb59   :  { %7363 = vpow2.f32 %v4253_v22 }
 0xb5a   :  { %v6881_v10 = vpop.permute.xlu0 %6880 }
 0xb5b   :  { %v6883_v63 = vunpack.i.h.bf16 %v6881_v10  ;;  %v6882_v2 = vunpack.i.l.bf16 %v6881_v10 }
 0xb5d   :  { %v6489_v19 = vpack.c.bf16 %v6883_v63, %v6882_v2  ;;  %v11429_v63 = vld [vmem:[#allocation13_spill] sm:$0xff]  ;;  %v11430_v2 = vld [vmem:[#allocation26_spill] sm:$0xff] }
 0xb5e   :  { %6915 = vrot.lane.b32.xlu1 %v11350_v46, %s7472_s7  ;;  %v4744_v46 = vsub.f32 %v11425_v30, %v10078_v18  ;;  %v4745_v22 = vsub.f32 %v11430_v2, %v11429_v63  ;;  %v11433_v30 = vld [vmem:[#allocation15_spill] sm:$0xff] }
 0xb5f   :  { %6490 = vmatprep.subr.bf16.mxu1 %v6489_v19 }
 0xb60   :  { %6492 = vmatpush3.bf16.msra.mxu1 %v6489_v19  ;;  %v4760_v49 = vmul.f32 1.442695, %v4744_v46  ;;  %v11434_v46 = vld [vmem:[#allocation83_spill] sm:$0xff] }
 0xb61   :  { %v7360_v33 = vpop.eup %7359  ;;  %6494 = vmatprep.subr.bf16.mxu1 %v6493_v6 }
 0xb62   :  { %v4339_v16 = vsel %vm4307_vm8, %v7360_v33, 0.0  ;;  %v7362_v52 = vpop.eup %7361  ;;  %7365 = vpow2.f32 %v4760_v49  ;;  %v11431_v33 = vld [vmem:[#allocation82_spill] sm:$0xff]  ;;  %v4748_v49 = vsub.f32 %v11434_v46, %v11433_v30 }
 0xb63   :  { %v4355_v43 = vmul.f32 %v4339_v16, %v10261_v29  ;;  %v10417_v3 = vmul.f32 %v7362_v52, %v11151_v28  ;;  %v7364_v31 = vpop.eup %7363  ;;  %v4764_v29 = vmul.f32 1.442695, %v4746_v26 }
 0xb64   :  { %6496 = vmatpush3.bf16.msra.mxu1 %v6493_v6  ;;  %v10423_v36 = vmul.f32 %v7364_v31, %v11186_v12  ;;  %v10431_v18 = vpop.xlane.xlu1 %4285 }
 0xb65   :  { %6137 = vmatprep.mubr.f32.mxu1 %v4355_v43  ;;  %7367 = vpow2.f32 %v4764_v29  ;;  %v11432_v43 = vld [vmem:[#allocation57_spill] sm:$0xff]  ;;  %v4768_v29 = vmul.f32 1.442695, %v4748_v49  ;;  %vm4312_vm13 = vcmp.gt.f32.partialorder %v10431_v18, 0.0 }
 0xb68   :  { %v10440_v13 = vpop.xlane.xlu1 %4287 }
 0xb69   :  { %vm4313_vm14 = vcmp.gt.f32.partialorder %v10440_v13, 0.0 }
 0xb6c   :  { %4297 = vadd.xlane.f32.xlu0 %v10417_v3  ;;  %v7366_v32 = vpop.eup %7365  ;;  %v6896_v60 = vpop.permute.xlu1 %6895 }
 0xb6d   :  { %v10429_v50 = vmul.f32 %v7366_v32, %v11346_v42  ;;  %v11427_v42 = vld [vmem:[#allocation5_spill] sm:$0xff]  ;;  %v6898_v14 = vunpack.i.h.bf16 %v6896_v60  ;;  %v6897_v10 = vunpack.i.l.bf16 %v6896_v60  ;;  %v11436_v32 = vld [vmem:[#allocation78_spill] sm:$0xff] }
 0xb6e   :  { %v4226_v54 = vsub.f32 %v11428_v25, %v11427_v42 }
 0xb6f   :  { %v7368_v15 = vpop.eup %7367  ;;  %v6501_v6 = vpack.c.bf16 %v6898_v14, %v6897_v10 }
 0xb70   :  { %4301 = vadd.xlane.f32.xlu0 %v10423_v36  ;;  %v10435_v59 = vmul.f32 %v7368_v15, %v11217_v53  ;;  %v4257_v53 = vmul.f32 1.442695, %v4226_v54  ;;  %v4750_v15 = vsub.f32 %v11436_v32, %v10282_v4 }
 0xb72   :  { %7369 = vpow2.f32 %v4257_v53  ;;  %v4772_v60 = vmul.f32 1.442695, %v4750_v15 }
 0xb7c   :  { %v7370_v16 = vpop.eup %7369 }
 0xb7d   :  { %v10451_v52 = vmul.f32 %v7370_v16, %v11432_v43 }
 0xb82   :  { %4808 = vadd.xlane.f32.xlu1 %v10429_v50 }
 0xb86   :  { %4812 = vadd.xlane.f32.xlu1 %v10435_v59  ;;  %6910 = vrot.lane.b32.xlu0 %v11371_v11, %s7472_s7  ;;  %v4762_v11 = vmul.f32 1.442695, %v4745_v22 }
 0xb88   :  { %7371 = vpow2.f32 %v4762_v11  ;;  %v11439_v11 = vld [vmem:[#allocation86_spill] sm:$0xff] }
 0xb89   :  { %7373 = vpow2.f32 %v4768_v29 }
 0xb8a   :  { %7375 = vpow2.f32 %v4772_v60 }
 0xb8b   :  { %v10442_v35 = vpop.xlane.xlu0 %4283  ;;  %7377 = vrcp.f32 %v10393_v61  ;;  %v11442_v61 = vld [vmem:[#allocation17_spill] sm:$0xff] }
 0xb8c   :  { %7379 = vrcp.f32 %v10402_v21  ;;  %vm4311_vm12 = vcmp.gt.f32.partialorder %v10442_v35, 0.0 }
 0xb8d   :  { %7381 = vrcp.f32 %v10407_v44 }
 0xb8e   :  { %7383 = vrcp.f32 %v10442_v35 }
 0xb8f   :  { %v6891_v17 = vpop.permute.xlu0 %6890  ;;  %7385 = vrcp.f32 %v10431_v18 }
 0xb90   :  { %v6893_v9 = vunpack.i.h.bf16 %v6891_v17  ;;  %v6892_v34 = vunpack.i.l.bf16 %v6891_v17  ;;  %7387 = vrcp.f32 %v10440_v13 }
 0xb92   :  { %v6497_v19 = vpack.c.bf16 %v6893_v9, %v6892_v34  ;;  %v7372_v31 = vpop.eup %7371  ;;  %v11437_v9 = vld [vmem:[#allocation9_spill] sm:$0xff] }
 0xb93   :  { %v10457_v26 = vmul.f32 %v7372_v31, %v11435_v55  ;;  %v7374_v42 = vpop.eup %7373  ;;  %v11438_v34 = vld [vmem:[#allocation33_spill] sm:$0xff] }
 0xb94   :  { %6498 = vmatprep.subr.bf16.mxu1 %v6497_v19  ;;  %v10463_v25 = vmul.f32 %v7374_v42, %v7929_v47  ;;  %v7376_v54 = vpop.eup %7375  ;;  %v4747_v53 = vsub.f32 %v11438_v34, %v11437_v9  ;;  %v11441_v42 = vld [vmem:[#allocation37_spill] sm:$0xff] }
 0xb95   :  { %6500 = vmatpush3.bf16.msra.mxu1 %v6497_v19  ;;  %v10469_v14 = vmul.f32 %v7376_v54, %v7931_v39  ;;  %v7378_v30 = vpop.eup %7377 }
 0xb96   :  { %6502 = vmatprep.subr.bf16.mxu1 %v6501_v6  ;;  %v7380_v49 = vpop.eup %7379  ;;  %v4340_v29 = vsel %vm4308_vm9, %v7378_v30, 0.0 }
 0xb97   :  { %6925 = vrot.lane.b32.xlu1 %v11431_v33, %s7472_s7  ;;  %v11440_v33 = vld [vmem:[#allocation7_spill] sm:$0xff]  ;;  %v7382_v32 = vpop.eup %7381  ;;  %v4341_v15 = vsel %vm4309_vm10, %v7380_v49, 0.0  ;;  %v4356_v54 = vmul.f32 %v4340_v29, %v11441_v42  ;;  %v11447_v29 = vld [vmem:[#allocation92_spill] sm:$0xff] }
 0xb98   :  { %v4749_v16 = vsub.f32 %v11440_v33, %v11439_v11  ;;  %v7384_v60 = vpop.eup %7383  ;;  %v4357_v9 = vmul.f32 %v4341_v15, %v11442_v61  ;;  %v4342_v34 = vsel %vm4310_vm11, %v7382_v32, 0.0 }
 0xb99   :  { %6504 = vmatpush3.bf16.msra.mxu1 %v6501_v6  ;;  %v4766_v6 = vmul.f32 1.442695, %v4747_v53  ;;  %v7386_v21 = vpop.eup %7385 }
 0xb9a   :  { %v4770_v55 = vmul.f32 1.442695, %v4749_v16  ;;  %v7388_v53 = vpop.eup %7387  ;;  %v4344_v44 = vsel %vm4312_vm13, %v7386_v21, 0.0  ;;  %v11444_v16 = vld [vmem:[#allocation23_spill] sm:$0xff]  ;;  %v11451_v21 = vld [vmem:[#allocation53_spill] sm:$0xff] }
 0xb9b   :  { %7389 = vpow2.f32 %v4766_v6  ;;  %v4360_v6 = vmul.f32 %v4344_v44, %v10273_v24 }
 0xb9d   :  { %v10465_v17 = vpop.xlane.xlu1 %4291 }
 0xb9e   :  { %vm4315_vm5 = vcmp.gt.f32.partialorder %v10465_v17, 0.0 }
 0xba1   :  { %v10474_v4 = vpop.xlane.xlu1 %4295 }
 0xba2   :  { %vm4317_vm2 = vcmp.gt.f32.partialorder %v10474_v4, 0.0 }
 0xba5   :  { %4305 = vadd.xlane.f32.xlu0 %v10451_v52  ;;  %v6906_v39 = vpop.permute.xlu1 %6905 }
 0xba6   :  { %v6907_v2 = vunpack.i.l.bf16 %v6906_v39 }
 0xba9   :  { %4810 = vadd.xlane.f32.xlu0 %v10457_v26 }
 0xbbb   :  { %4816 = vadd.xlane.f32.xlu1 %v10463_v25 }
 0xbbf   :  { %4820 = vadd.xlane.f32.xlu1 %v10469_v14  ;;  %6920 = vrot.lane.b32.xlu0 %v11397_v8, %s7472_s7  ;;  %v6908_v8 = vunpack.i.h.bf16 %v6906_v39  ;;  %v11443_v39 = vld [vmem:[#allocation46_spill] sm:$0xff] }
 0xbc0   :  { %v10476_v10 = vpop.xlane.xlu0 %4289 }
 0xbc1   :  { %v6509_v46 = vpack.c.bf16 %v6908_v8, %v6907_v2  ;;  %7391 = vrcp.f32 %v10476_v10  ;;  %v7390_v8 = vpop.eup %7389  ;;  %vm4314_vm1 = vcmp.gt.f32.partialorder %v10476_v10, 0.0 }
 0xbc2   :  { %7393 = vrcp.f32 %v10465_v17 }
 0xbc3   :  { %7395 = vpow2.f32 %v4770_v55 }
 0xbc4   :  { %v10480_v47 = vpop.xlane.xlu0 %4293 }
 0xbc5   :  { %7397 = vrcp.f32 %v10480_v47  ;;  %vm4316_vm15 = vcmp.gt.f32.partialorder %v10480_v47, 0.0 }
 0xbc6   :  { %7399 = vrcp.f32 %v10474_v4 }
 0xbc8   :  { %v6901_v63 = vpop.permute.xlu0 %6900 }
 0xbc9   :  { %v6903_v22 = vunpack.i.h.bf16 %v6901_v63  ;;  %v6902_v19 = vunpack.i.l.bf16 %v6901_v63  ;;  %v4358_v63 = vmul.f32 %v4342_v34, %v11443_v39 }
 0xbcb   :  { %v6505_v31 = vpack.c.bf16 %v6903_v22, %v6902_v19  ;;  %v7392_v22 = vpop.eup %7391  ;;  %v4345_v19 = vsel %vm4313_vm14, %v7388_v53, 0.0 }
 0xbcc   :  { %v7394_v35 = vpop.eup %7393  ;;  %v4361_v33 = vmul.f32 %v4345_v19, %v10279_v5  ;;  %v4346_v18 = vsel %vm4314_vm1, %v7392_v22, 0.0 }
 0xbcd   :  { %6506 = vmatprep.subr.bf16.mxu1 %v6505_v31  ;;  %v7396_v11 = vpop.eup %7395  ;;  %v4362_v24 = vmul.f32 %v4346_v18, %v10381_v56 }
 0xbce   :  { %6508 = vmatpush3.bf16.msra.mxu1 %v6505_v31  ;;  %v10511_v31 = vmul.f32 %v7390_v8, %v11444_v16  ;;  %v10521_v10 = vmul.f32 %v7396_v11, %v7934_v48  ;;  %v11453_v11 = vld [vmem:[#allocation91_spill] sm:$0xff] }
 0xbcf   :  { %6510 = vmatprep.subr.bf16.mxu1 %v6509_v46  ;;  %v7398_v13 = vpop.eup %7397 }
 0xbd0   :  { %6935 = vrot.lane.b32.xlu1 %v11401_v37, %s7472_s7  ;;  %v4343_v37 = vsel %vm4311_vm12, %v7384_v60, 0.0  ;;  %v7400_v49 = vpop.eup %7399  ;;  %v4348_v17 = vsel %vm4316_vm15, %v7398_v13, 0.0 }
 0xbd1   :  { %v4359_v2 = vmul.f32 %v4343_v37, %v10306_v41  ;;  %v11445_v41 = vld [vmem:[#allocation38_spill] sm:$0xff]  ;;  %v4349_v15 = vsel %vm4317_vm2, %v7400_v49, 0.0  ;;  %v4364_v56 = vmul.f32 %v4348_v17, %v10388_v45 }
 0xbd2   :  { %6512 = vmatpush3.bf16.msra.mxu1 %v6509_v46  ;;  %v4752_v30 = vsub.f32 %v11445_v41, %v10286_v38  ;;  %v4347_v46 = vsel %vm4315_vm5, %v7394_v35, 0.0  ;;  %v11446_v38 = vld [vmem:[#allocation76_spill] sm:$0xff]  ;;  %v4365_v47 = vmul.f32 %v4349_v15, %v10340_v1  ;;  %v11449_v1 = vld [vmem:[#allocation90_spill] sm:$0xff] }
 0xbd3   :  { %v4363_v5 = vmul.f32 %v4347_v46, %v10329_v23  ;;  %v4754_v32 = vsub.f32 %v11447_v29, %v11446_v38  ;;  %v11454_v15 = vld [vmem:[#allocation8_spill] sm:$0xff] }
 0xbd4   :  { %v4776_v55 = vmul.f32 1.442695, %v4752_v30 }
 0xbd5   :  { %6138 = vmatmul.mubr.f32.vlgmr.msra.gmra.mrb[34].mxu1 %v4356_v54  ;;  %v4780_v23 = vmul.f32 1.442695, %v4754_v32  ;;  %v11448_v54 = vld [vmem:[#allocation42_spill] sm:$0xff] }
 0xbd6   :  { %6140 = vmatprep.mubr.f32.mxu1 %v4357_v9  ;;  %7401 = vpow2.f32 %v4776_v55  ;;  %v4300_v4 = vpop.xlane.xlu1 %4299 }
 0xbd7   :  { %7403 = vpow2.f32 %v4780_v23  ;;  %vm4319_vm0 = vcmp.gt.f32.partialorder %v4300_v4, 0.0 }
 0xbd8   :  { %7405 = vrcp.f32 %v4300_v4 }
 0xbd9   :  { %6141 = vmatmul.mubr.f32.gmra.mrb[36].mxu1 %v4358_v63 }
 0xbda   :  { %6143 = vmatprep.mubr.f32.mxu1 %v4359_v2  ;;  %v4304_v45 = vpop.xlane.xlu1 %4303 }
 0xbdb   :  { %vm4321_vm4 = vcmp.gt.f32.partialorder %v4304_v45, 0.0 }
 0xbdd   :  { %6144 = vmatmul.mubr.f32.gmra.mrb[38].mxu1 %v4360_v6  ;;  %v11452_v6 = vld [vmem:[#allocation40_spill] sm:$0xff] }
 0xbde   :  { %4814 = vadd.xlane.f32.xlu0 %v10511_v31  ;;  %6146 = vmatprep.mubr.f32.mxu1 %v4361_v33  ;;  %v6916_v53 = vpop.permute.xlu1 %6915  ;;  %v4753_v33 = vsub.f32 %v11453_v11, %v11452_v6 }
 0xbdf   :  { %v6918_v8 = vunpack.i.h.bf16 %v6916_v53  ;;  %v6917_v44 = vunpack.i.l.bf16 %v6916_v53 }
 0xbe0   :  { %v7402_v48 = vpop.eup %7401 }
 0xbe1   :  { %6147 = vmatmul.mubr.f32.gmra.mrb[40].mxu1 %v4362_v24  ;;  %v10529_v60 = vmul.f32 %v7402_v48, %v7994_v27  ;;  %v7404_v42 = vpop.eup %7403  ;;  %v11450_v27 = vld [vmem:[#allocation64_spill] sm:$0xff]  ;;  %v6517_v30 = vpack.c.bf16 %v6918_v8, %v6917_v44 }
 0xbe2   :  { %4818 = vadd.xlane.f32.xlu0 %v10521_v10  ;;  %6149 = vmatprep.mubr.f32.mxu1 %v4363_v5  ;;  %v10533_v61 = vmul.f32 %v7404_v42, %v11448_v54  ;;  %v4751_v37 = vsub.f32 %v11451_v21, %v11450_v27  ;;  %v7406_v39 = vpop.eup %7405  ;;  %v4778_v5 = vmul.f32 1.442695, %v4753_v33  ;;  %v11456_v42 = vld [vmem:[#allocation54_spill] sm:$0xff]  ;;  %v11457_v54 = vld [vmem:[#allocation11_spill] sm:$0xff]  ;;  %v11460_v33 = vld [vmem:[#allocation89_spill] sm:$0xff] }
 0xbe3   :  { %v4351_v18 = vsel %vm4319_vm0, %v7406_v39, 0.0 }
 0xbe4   :  { %v4774_v19 = vmul.f32 1.442695, %v4751_v37  ;;  %v4367_v49 = vmul.f32 %v4351_v18, %v10396_v40  ;;  %v11461_v18 = vld [vmem:[#allocation79_spill] sm:$0xff] }
 0xbe5   :  { %6150 = vmatmul.mubr.f32.gmra.mrb[42].mxu1 %v4364_v56  ;;  %v11455_v56 = vld [vmem:[#allocation6_spill] sm:$0xff] }
 0xbe6   :  { %6152 = vmatprep.mubr.f32.mxu1 %v4365_v47  ;;  %v4756_v47 = vsub.f32 %v11455_v56, %v11454_v15 }
 0xbf4   :  { %4824 = vadd.xlane.f32.xlu1 %v10529_v60 }
 0xbf8   :  { %4828 = vadd.xlane.f32.xlu1 %v10533_v61  ;;  %6930 = vrot.lane.b32.xlu0 %v11449_v1, %s7472_s7 }
 0xbf9   :  { %v4298_v9 = vpop.xlane.xlu0 %4297 }
 0xbfa   :  { %7407 = vrcp.f32 %v4298_v9  ;;  %vm4318_vm3 = vcmp.gt.f32.partialorder %v4298_v9, 0.0 }
 0xbfb   :  { %7409 = vrcp.f32 %v4304_v45  ;;  %v4755_v45 = vsub.f32 %v11457_v54, %v11456_v42 }
 0xbfd   :  { %v4302_v34 = vpop.xlane.xlu0 %4301  ;;  %v4782_v53 = vmul.f32 1.442695, %v4755_v45 }
 0xbfe   :  { %7411 = vrcp.f32 %v4302_v34  ;;  %vm4320_vm6 = vcmp.gt.f32.partialorder %v4302_v34, 0.0 }
 0xbff   :  { %7413 = vpow2.f32 %v4774_v19 }
 0xc00   :  { %7415 = vpow2.f32 %v4778_v5 }
 0xc01   :  { %v6911_v63 = vpop.permute.xlu0 %6910 }
 0xc02   :  { %v6913_v2 = vunpack.i.h.bf16 %v6911_v63  ;;  %v6912_v22 = vunpack.i.l.bf16 %v6911_v63  ;;  %v11459_v63 = vld [vmem:[#allocation62_spill] sm:$0xff] }
 0xc04   :  { %v7408_v35 = vpop.eup %7407  ;;  %v6513_v16 = vpack.c.bf16 %v6913_v2, %v6912_v22 }
 0xc05   :  { %v7410_v13 = vpop.eup %7409  ;;  %v4350_v41 = vsel %vm4318_vm3, %v7408_v35, 0.0 }
 0xc06   :  { %v4366_v46 = vmul.f32 %v4350_v41, %v10417_v3  ;;  %6514 = vmatprep.subr.bf16.mxu1 %v6513_v16  ;;  %v4353_v17 = vsel %vm4321_vm4, %v7410_v13, 0.0  ;;  %v11462_v41 = vld [vmem:[#allocation18_spill] sm:$0xff] }
 0xc07   :  { %6516 = vmatpush3.bf16.msra.mxu1 %v6513_v16  ;;  %v4369_v3 = vmul.f32 %v4353_v17, %v10400_v0  ;;  %v4758_v16 = vsub.f32 %v11461_v18, %v11460_v33 }
 0xc08   :  { %v7412_v24 = vpop.eup %7411  ;;  %6153 = vmatmul.mubr.f32.gmra.mrb[44].mxu1 %v4366_v46  ;;  %6518 = vmatprep.subr.bf16.mxu1 %v6517_v30 }
 0xc09   :  { %v4352_v55 = vsel %vm4320_vm6, %v7412_v24, 0.0  ;;  %6945 = vrot.lane.b32.xlu1 %v11417_v58, %s7472_s7  ;;  %6155 = vmatprep.mubr.f32.mxu1 %v4367_v49  ;;  %v7414_v40 = vpop.eup %7413  ;;  %v4788_v13 = vmul.f32 1.442695, %v4758_v16 }
 0xc0a   :  { %v4368_v38 = vmul.f32 %v4352_v55, %v10423_v36  ;;  %v10549_v29 = vmul.f32 %v7414_v40, %v11185_v57  ;;  %v7416_v32 = vpop.eup %7415  ;;  %v4784_v36 = vmul.f32 1.442695, %v4756_v47 }
 0xc0b   :  { %6520 = vmatpush3.bf16.msra.mxu1 %v6517_v30  ;;  %v10555_v58 = vmul.f32 %v7416_v32, %v8012_v62  ;;  %v11463_v30 = vld [vmem:[#allocation66_spill] sm:$0xff] }
 0xc0c   :  { %6156 = vmatmul.mubr.f32.gmra.mrb[46].mxu1 %v4368_v38  ;;  %7417 = vpow2.f32 %v4784_v36  ;;  %v4759_v46 = vsub.f32 %v11463_v30, %v11462_v41 }
 0xc0d   :  { %6158 = vmatprep.mubr.f32.mxu1 %v4369_v3 }
 0xc0f   :  { %v4809_v48 = vpop.xlane.xlu1 %4808 }
 0xc10   :  { %7419 = vrcp.f32 %v4809_v48  ;;  %vm4840_vm7 = vcmp.gt.f32.partialorder %v4809_v48, 0.0 }
 0xc13   :  { %v10564_v57 = vpop.xlane.xlu1 %4812 }
 0xc14   :  { %vm4842_vm10 = vcmp.gt.f32.partialorder %v10564_v57, 0.0 }
 0xc16   :  { %v7418_v0 = vpop.eup %7417 }
 0xc17   :  { %4822 = vadd.xlane.f32.xlu0 %v10549_v29  ;;  %v10559_v23 = vmul.f32 %v7418_v0, %v11183_v7  ;;  %v6926_v1 = vpop.permute.xlu1 %6925 }
 0xc18   :  { %v6928_v34 = vunpack.i.h.bf16 %v6926_v1  ;;  %v6927_v27 = vunpack.i.l.bf16 %v6926_v1 }
 0xc1a   :  { %v7420_v9 = vpop.eup %7419  ;;  %v6525_v19 = vpack.c.bf16 %v6928_v34, %v6927_v27 }
 0xc1b   :  { %4826 = vadd.xlane.f32.xlu0 %v10555_v58  ;;  %v4872_v44 = vsel %vm4840_vm7, %v7420_v9, 0.0 }
 0xc1c   :  { %v4888_v6 = vmul.f32 %v4872_v44, %v10429_v50 }
 0xc2d   :  { %4832 = vadd.xlane.f32.xlu1 %v10559_v23 }
 0xc31   :  { %6940 = vrot.lane.b32.xlu0 %v11323_v51, %s7472_s7  ;;  %v11458_v51 = vld [vmem:[#allocation22_spill] sm:$0xff] }
 0xc32   :  { %v4306_v4 = vpop.xlane.xlu0 %4305  ;;  %v4757_v8 = vsub.f32 %v11459_v63, %v11458_v51 }
 0xc33   :  { %7421 = vrcp.f32 %v4306_v4  ;;  %vm4322_vm8 = vcmp.gt.f32.partialorder %v4306_v4, 0.0 }
 0xc34   :  { %7423 = vpow2.f32 %v4782_v53  ;;  %v4786_v11 = vmul.f32 1.442695, %v4757_v8 }
 0xc36   :  { %v10566_v62 = vpop.xlane.xlu0 %4810  ;;  %7425 = vpow2.f32 %v4786_v11 }
 0xc37   :  { %7427 = vpow2.f32 %v4788_v13  ;;  %vm4841_vm9 = vcmp.gt.f32.partialorder %v10566_v62, 0.0 }
 0xc3a   :  { %v6921_v7 = vpop.permute.xlu0 %6920 }
 0xc3b   :  { %v6923_v21 = vunpack.i.h.bf16 %v6921_v7  ;;  %v6922_v37 = vunpack.i.l.bf16 %v6921_v7 }
 0xc3d   :  { %v7422_v39 = vpop.eup %7421  ;;  %v6521_v2 = vpack.c.bf16 %v6923_v21, %v6922_v37 }
 0xc3e   :  { %v4354_v22 = vsel %vm4322_vm8, %v7422_v39, 0.0  ;;  %v7424_v49 = vpop.eup %7423  ;;  %vm11464_vm8 = vcmask 130048  }
 0xc3f   :  { %v4370_v35 = vmul.f32 %v4354_v22, %v10451_v52  ;;  %6522 = vmatprep.subr.bf16.mxu1 %v6521_v2  ;;  %v4790_v52 = vmul.f32 1.442695, %v4759_v46  ;;  %v10579_v50 = vmul.f32 %v7424_v49, %v11151_v28 }
 0xc40   :  { %6524 = vmatpush3.bf16.msra.mxu1 %v6521_v2  ;;  %v7426_v24 = vpop.eup %7425 }
 0xc41   :  { %6159 = vmatmul.mubr.f32.gmra.mrb[48].mxu1 %v4370_v35  ;;  %6526 = vmatprep.subr.bf16.mxu1 %v6525_v19  ;;  %7429 = vpow2.f32 %v4790_v52  ;;  %v10583_v5 = vmul.f32 %v7426_v24, %v11186_v12  ;;  %v7428_v17 = vpop.eup %7427 }
 0xc42   :  { %6193 = vmatprep.mubr.f32.mxu1 %v4888_v6  ;;  %v10587_v55 = vmul.f32 %v7428_v17, %v11184_v20  ;;  %7431 = vrcp.f32 %v10566_v62 }
 0xc43   :  { %7433 = vrcp.f32 %v10564_v57 }
 0xc44   :  { %6528 = vmatpush3.bf16.msra.mxu1 %v6525_v19 }
 0xc48   :  { %v4817_v28 = vpop.xlane.xlu1 %4816 }
 0xc49   :  { %vm4844_vm12 = vcmp.gt.f32.partialorder %v4817_v28, 0.0 }
 0xc4b   :  { %v7430_v38 = vpop.eup %7429 }
 0xc4c   :  { %v10591_v3 = vmul.f32 %v7430_v38, %v11432_v43  ;;  %v10594_v40 = vpop.xlane.xlu1 %4820  ;;  %v7432_v53 = vpop.eup %7431 }
 0xc4d   :  { %v7434_v51 = vpop.eup %7433  ;;  %v4873_v63 = vsel %vm4841_vm9, %v7432_v53, 0.0  ;;  %vm4846_vm14 = vcmp.gt.f32.partialorder %v10594_v40, 0.0  ;;  %vm11465_vm9 = vmmov %vm11464_vm8 }
 0xc4e   :  { %v4874_v44 = vsel %vm4842_vm10, %v7434_v51, 0.0  ;;  %v4889_v22 = vmul.f32 %v4873_v63, %v10457_v26  ;;  %vm11466_vm10 = vmmov %vm11464_vm8 }
 0xc4f   :  { %v4890_v19 = vmul.f32 %v4874_v44, %v10435_v59 }
 0xc50   :  { %4830 = vadd.xlane.f32.xlu0 %v10579_v50  ;;  %v6936_v15 = vpop.permute.xlu1 %6935 }
 0xc51   :  { %v6938_v47 = vunpack.i.h.bf16 %v6936_v15  ;;  %v6937_v36 = vunpack.i.l.bf16 %v6936_v15 }
 0xc53   :  { %v6533_v4 = vpack.c.bf16 %v6938_v47, %v6937_v36 }
 0xc54   :  { %4834 = vadd.xlane.f32.xlu0 %v10583_v5 }
 0xc58   :  { %4836 = vadd.xlane.f32.xlu0 %v10587_v55 }
 0xc5c   :  { %4838 = vadd.xlane.f32.xlu0 %v10591_v3 }
 0xc6b   :  { %v4815_v32 = vpop.xlane.xlu0 %4814 }
 0xc6c   :  { %7435 = vrcp.f32 %v4815_v32  ;;  %vm4843_vm11 = vcmp.gt.f32.partialorder %v4815_v32, 0.0 }
 0xc6d   :  { %7437 = vrcp.f32 %v4817_v28 }
 0xc6f   :  { %v4819_v12 = vpop.xlane.xlu0 %4818 }
 0xc70   :  { %7439 = vrcp.f32 %v4819_v12  ;;  %vm4845_vm13 = vcmp.gt.f32.partialorder %v4819_v12, 0.0 }
 0xc71   :  { %7441 = vrcp.f32 %v10594_v40 }
 0xc73   :  { %v6931_v56 = vpop.permute.xlu0 %6930 }
 0xc74   :  { %v6933_v0 = vunpack.i.h.bf16 %v6931_v56  ;;  %v6932_v20 = vunpack.i.l.bf16 %v6931_v56 }
 0xc76   :  { %v6529_v48 = vpack.c.bf16 %v6933_v0, %v6932_v20  ;;  %v7436_v8 = vpop.eup %7435 }
 0xc77   :  { %v7438_v2 = vpop.eup %7437  ;;  %v4875_v35 = vsel %vm4843_vm11, %v7436_v8, 0.0  ;;  %vm11467_vm11 = vmmov %vm11464_vm8 }
 0xc78   :  { %6530 = vmatprep.subr.bf16.mxu1 %v6529_v48  ;;  %v4876_v6 = vsel %vm4844_vm12, %v7438_v2, 0.0  ;;  %v4891_v11 = vmul.f32 %v4875_v35, %v10511_v31  ;;  %vm11468_vm12 = vmmov %vm11464_vm8 }
 0xc79   :  { %6532 = vmatpush3.bf16.msra.mxu1 %v6529_v48  ;;  %v4892_v33 = vmul.f32 %v4876_v6, %v10463_v25 }
 0xc7a   :  { %6534 = vmatprep.subr.bf16.mxu1 %v6533_v4  ;;  %v7440_v62 = vpop.eup %7439 }
 0xc7b   :  { %v7442_v57 = vpop.eup %7441  ;;  %v4877_v26 = vsel %vm4845_vm13, %v7440_v62, 0.0  ;;  %vm11469_vm13 = vmmov %vm11464_vm8 }
 0xc7c   :  { %v4878_v16 = vsel %vm4846_vm14, %v7442_v57, 0.0  ;;  %v4893_v13 = vmul.f32 %v4877_v26, %v10521_v10  ;;  %vm11470_vm14 = vmmov %vm11464_vm8 }
 0xc7d   :  { %6536 = vmatpush3.bf16.msra.mxu1 %v6533_v4  ;;  %v4894_v41 = vmul.f32 %v4878_v16, %v10469_v14 }
 0xc81   :  { %v4825_v43 = vpop.xlane.xlu1 %4824 }
 0xc82   :  { %vm4848_vm5 = vcmp.gt.f32.partialorder %v4825_v43, 0.0 }
 0xc85   :  { %v10596_v42 = vpop.xlane.xlu1 %4828 }
 0xc86   :  { %vm4850_vm2 = vcmp.gt.f32.partialorder %v10596_v42, 0.0 }
 0xc89   :  { %v6946_v1 = vpop.permute.xlu1 %6945 }
 0xc8a   :  { %v6948_v7 = vunpack.i.h.bf16 %v6946_v1  ;;  %v6947_v34 = vunpack.i.l.bf16 %v6946_v1 }
 0xc8c   :  { %v6541_v39 = vpack.c.bf16 %v6948_v7, %v6947_v34 }
 0xca4   :  { %v4823_v54 = vpop.xlane.xlu0 %4822 }
 0xca5   :  { %7443 = vrcp.f32 %v4823_v54  ;;  %vm4847_vm1 = vcmp.gt.f32.partialorder %v4823_v54, 0.0 }
 0xca6   :  { %7445 = vrcp.f32 %v4825_v43 }
 0xca8   :  { %v10600_v45 = vpop.xlane.xlu0 %4826 }
 0xca9   :  { %7447 = vrcp.f32 %v10600_v45  ;;  %vm4849_vm15 = vcmp.gt.f32.partialorder %v10600_v45, 0.0 }
 0xcaa   :  { %7449 = vrcp.f32 %v10596_v42 }
 0xcac   :  { %v6941_v9 = vpop.permute.xlu0 %6940 }
 0xcad   :  { %v6943_v27 = vunpack.i.h.bf16 %v6941_v9  ;;  %v6942_v21 = vunpack.i.l.bf16 %v6941_v9 }
 0xcaf   :  { %v6537_v37 = vpack.c.bf16 %v6943_v27, %v6942_v21  ;;  %v7444_v18 = vpop.eup %7443 }
 0xcb0   :  { %v7446_v59 = vpop.eup %7445  ;;  %v4879_v30 = vsel %vm4847_vm1, %v7444_v18, 0.0  ;;  %vm11471_vm1 = vmmov %vm11464_vm8 }
 0xcb1   :  { %6538 = vmatprep.subr.bf16.mxu1 %v6537_v37  ;;  %v4880_v31 = vsel %vm4848_vm5, %v7446_v59, 0.0  ;;  %v4895_v25 = vmul.f32 %v4879_v30, %v10549_v29  ;;  %vm11472_vm5 = vmmov %vm11471_vm1 }
 0xcb2   :  { %6540 = vmatpush3.bf16.msra.mxu1 %v6537_v37  ;;  %v4896_v49 = vmul.f32 %v4880_v31, %v10529_v60 }
 0xcb3   :  { %6542 = vmatprep.subr.bf16.mxu1 %v6541_v39  ;;  %v7448_v46 = vpop.eup %7447 }
 0xcb4   :  { %v7450_v52 = vpop.eup %7449  ;;  %v4881_v24 = vsel %vm4849_vm15, %v7448_v46, 0.0  ;;  %vm11473_vm15 = vmmov %vm11471_vm1 }
 0xcb5   :  { %v4882_v10 = vsel %vm4850_vm2, %v7450_v52, 0.0  ;;  %v4897_v14 = vmul.f32 %v4881_v24, %v10555_v58  ;;  %vm11474_vm2 = vmmov %vm11471_vm1 }
 0xcb6   :  { %6544 = vmatpush3.bf16.msra.mxu1 %v6541_v39  ;;  %v4898_v17 = vmul.f32 %v4882_v10, %v10533_v61 }
 0xcb9   :  { %6194 = vmatmul.mubr.f32.vlgmr.msra.gmra.mrb[34].mxu1 %v4889_v22 }
 0xcba   :  { %6196 = vmatprep.mubr.f32.mxu1 %v4890_v19  ;;  %v4833_v38 = vpop.xlane.xlu1 %4832 }
 0xcbb   :  { %7451 = vrcp.f32 %v4833_v38  ;;  %vm4852_vm0 = vcmp.gt.f32.partialorder %v4833_v38, 0.0 }
 0xcbd   :  { %6197 = vmatmul.mubr.f32.gmra.mrb[36].mxu1 %v4891_v11 }
 0xcbe   :  { %6199 = vmatprep.mubr.f32.mxu1 %v4892_v33 }
 0xcc1   :  { %6200 = vmatmul.mubr.f32.gmra.mrb[38].mxu1 %v4893_v13 }
 0xcc2   :  { %6202 = vmatprep.mubr.f32.mxu1 %v4894_v41 }
 0xcc5   :  { %6203 = vmatmul.mubr.f32.gmra.mrb[40].mxu1 %v4895_v25  ;;  %v7452_v40 = vpop.eup %7451 }
 0xcc6   :  { %6205 = vmatprep.mubr.f32.mxu1 %v4896_v49  ;;  %v4884_v12 = vsel %vm4852_vm0, %v7452_v40, 0.0  ;;  %vm11475_vm0 = vmmov %vm11471_vm1 }
 0xcc7   :  { %v4900_v61 = vmul.f32 %v4884_v12, %v10559_v23 }
 0xcc9   :  { %6206 = vmatmul.mubr.f32.gmra.mrb[42].mxu1 %v4897_v14 }
 0xcca   :  { %6208 = vmatprep.mubr.f32.mxu1 %v4898_v17 }
 0xcdd   :  { %v4831_v28 = vpop.xlane.xlu0 %4830 }
 0xcde   :  { %7453 = vrcp.f32 %v4831_v28  ;;  %vm4851_vm3 = vcmp.gt.f32.partialorder %v4831_v28, 0.0 }
 0xce1   :  { %v4835_v29 = vpop.xlane.xlu0 %4834 }
 0xce2   :  { %7455 = vrcp.f32 %v4835_v29  ;;  %vm4853_vm4 = vcmp.gt.f32.partialorder %v4835_v29, 0.0 }
 0xce5   :  { %v4837_v60 = vpop.xlane.xlu0 %4836 }
 0xce6   :  { %7457 = vrcp.f32 %v4837_v60  ;;  %vm4854_vm6 = vcmp.gt.f32.partialorder %v4837_v60, 0.0 }
 0xce8   :  { %v7454_v32 = vpop.eup %7453 }
 0xce9   :  { %v4883_v15 = vsel %vm4851_vm3, %v7454_v32, 0.0  ;;  %v4839_v56 = vpop.xlane.xlu0 %4838  ;;  %vm11476_vm3 = vmmov %vm11475_vm0 }
 0xcea   :  { %v4899_v58 = vmul.f32 %v4883_v15, %v10579_v50  ;;  %7459 = vrcp.f32 %v4839_v56  ;;  %vm4855_vm7 = vcmp.gt.f32.partialorder %v4839_v56, 0.0 }
 0xcec   :  { %v7456_v47 = vpop.eup %7455  ;;  %6209 = vmatmul.mubr.f32.gmra.mrb[44].mxu1 %v4899_v58 }
 0xced   :  { %v4885_v36 = vsel %vm4853_vm4, %v7456_v47, 0.0  ;;  %6211 = vmatprep.mubr.f32.mxu1 %v4900_v61  ;;  %vm11477_vm4 = vmmov %vm11475_vm0 }
 0xcee   :  { %v4901_v0 = vmul.f32 %v4885_v36, %v10583_v5 }
 0xcf0   :  { %v7458_v20 = vpop.eup %7457  ;;  %6212 = vmatmul.mubr.f32.gmra.mrb[46].mxu1 %v4901_v0 }
 0xcf1   :  { %v4886_v48 = vsel %vm4854_vm6, %v7458_v20, 0.0  ;;  %vm11478_vm6 = vmmov %vm11475_vm0 }
 0xcf2   :  { %v4902_v4 = vmul.f32 %v4886_v48, %v10587_v55 }
 0xcf4   :  { %v7460_v43 = vpop.eup %7459  ;;  %6214 = vmatprep.mubr.f32.mxu1 %v4902_v4 }
 0xcf5   :  { %v4887_v50 = vsel %vm4855_vm7, %v7460_v43, 0.0  ;;  %vm11479_vm7 = vmmov %vm11475_vm0 }
 0xcf6   :  { %v4903_v42 = vmul.f32 %v4887_v50, %v10591_v3 }
 0xcf8   :  { %6215 = vmatmul.mubr.f32.gmra.mrb[48].mxu1 %v4903_v42 }
 0xd8c   :  { %v6195_v23 = vpop.f32.mrb[34].mxu1 }
 0xd8d   :  { %5114 = vst.msk [vmem:[%s10697_s8 + $0x8] sm:$0xff] %vm11464_vm8, %v6195_v23  ;;  %v5018_v5 = vpop.f32.mrb[35].mxu1 }
 0xd8e   :  { %5113 = vst.msk [vmem:[%s10697_s8] sm:$0xff] %vm11465_vm9, %v5018_v5 }
 0xd90   :  { %v6198_v55 = vpop.f32.mrb[36].mxu1 }
 0xd91   :  { %5116 = vst.msk [vmem:[%s10697_s8 + $0x18] sm:$0xff] %vm11466_vm10, %v6198_v55  ;;  %v5028_v3 = vpop.f32.mrb[37].mxu1 }
 0xd92   :  { %5115 = vst.msk [vmem:[%s10697_s8 + $0x10] sm:$0xff] %vm11467_vm11, %v5028_v3 }
 0xd94   :  { %v6201_v54 = vpop.f32.mrb[38].mxu1 }
 0xd95   :  { %5118 = vst.msk [vmem:[%s10697_s8 + $0x28] sm:$0xff] %vm11468_vm12, %v6201_v54  ;;  %v5038_v45 = vpop.f32.mrb[39].mxu1 }
 0xd96   :  { %5117 = vst.msk [vmem:[%s10697_s8 + $0x20] sm:$0xff] %vm11469_vm13, %v5038_v45 }
 0xd98   :  { %v6204_v1 = vpop.f32.mrb[40].mxu1 }
 0xd99   :  { %5120 = vst.msk [vmem:[%s10697_s8 + $0x38] sm:$0xff] %vm11470_vm14, %v6204_v1  ;;  %v5048_v9 = vpop.f32.mrb[41].mxu1 }
 0xd9a   :  { %5119 = vst.msk [vmem:[%s10697_s8 + $0x30] sm:$0xff] %vm11471_vm1, %v5048_v9 }
 0xd9c   :  { %v6207_v7 = vpop.f32.mrb[42].mxu1 }
 0xd9d   :  { %5122 = vst.msk [vmem:[%s10697_s8 + $0x48] sm:$0xff] %vm11472_vm5, %v6207_v7  ;;  %v5058_v34 = vpop.f32.mrb[43].mxu1 }
 0xd9e   :  { %5121 = vst.msk [vmem:[%s10697_s8 + $0x40] sm:$0xff] %vm11473_vm15, %v5058_v34 }
 0xdbf   :  { %v6210_v27 = vpop.f32.mrb[44].mxu1 }
 0xdc0   :  { %5124 = vst.msk [vmem:[%s10697_s8 + $0x58] sm:$0xff] %vm11474_vm2, %v6210_v27  ;;  %v5068_v21 = vpop.f32.mrb[45].mxu1 }
 0xdc1   :  { %5123 = vst.msk [vmem:[%s10697_s8 + $0x50] sm:$0xff] %vm11475_vm0, %v5068_v21 }
 0xdc3   :  { %v6213_v37 = vpop.f32.mrb[46].mxu1 }
 0xdc4   :  { %5126 = vst.msk [vmem:[%s10697_s8 + $0x68] sm:$0xff] %vm11476_vm3, %v6213_v37  ;;  %v5078_v53 = vpop.f32.mrb[47].mxu1 }
 0xdc5   :  { %5125 = vst.msk [vmem:[%s10697_s8 + $0x60] sm:$0xff] %vm11477_vm4, %v5078_v53 }
 0xdcb   :  { %v6216_v39 = vpop.f32.mrb[48].mxu1 }
 0xdcc   :  { %5128 = vst.msk [vmem:[%s10697_s8 + $0x78] sm:$0xff] %vm11478_vm6, %v6216_v39  ;;  %v5088_v51 = vpop.f32.mrb[49].mxu1 }
 0xdcd   :  { %5127 = vst.msk [vmem:[%s10697_s8 + $0x70] sm:$0xff] %vm11479_vm7, %v5088_v51 }

</bundles_post_ra>
